<compile_context>
chip_gen: v6e
topology: v6e:2x2x1
jax: 0.10.0
libtpu: 0.0.40
codegen_flags: <defaults>
</compile_context>

<pallas_src>
import functools

import numpy as np
import jax
import jax.numpy as jnp
from jax.experimental import pallas as pl
from jax.experimental.pallas import tpu as pltpu

LEAKY_SLOPE = 0.1
MAX_DISP = 2                       # cost-volume max displacement (surrogate PWC correlation)
D_CORR = (2 * MAX_DISP + 1) ** 2   # 25 displacements
D_PAD = 32                         # cost-volume channels padded to 32 lanes
FLOW_PAD = 128                     # flow-head output padded to a lane-dense 128 (bf16)


def _vmem_limit_bytes():
    # Per-generation scoped-VMEM budget: ~3/4 of physical, capped at 100 MiB.
    # (v5e/v6e: 128 MiB physical -> 96 MiB; v7x: 64 MiB physical -> 48 MiB.)
    try:
        cap = int(getattr(pltpu.get_tpu_info(), "vmem_capacity_bytes",
                          128 * 1024 * 1024))
    except Exception:
        cap = 128 * 1024 * 1024
    return max(32 * 1024 * 1024, min(3 * cap // 4, 100 * 1024 * 1024))


_VMEM_LIMIT = _vmem_limit_bytes()


def _cparams(sem):
    return pltpu.CompilerParams(dimension_semantics=sem,
                                vmem_limit_bytes=_VMEM_LIMIT)


# ----------------------------- conv kernel ----------------------------------

def _conv3x3_kernel(x_ref, w_ref, b_ref, o_ref, *, taps, Ho, Wo, R, halo, leaky):
    """Fused im2col 3x3 conv for one batch element, one fat MXU dot per row block.

    x_ref: (P, Hs, Ws, Cin) bf16   — P phases (1 for stride-1, 4 for stride-2 s2d)
    w_ref: (9*Cin, Cout)    bf16   — taps stacked along K (tap-major, channel inner)
    b_ref: (1, Cout)        f32
    o_ref: (Ho*Wo, Cout)           — lane-dense 2D output (reshaped in the wrapper)
    """
    P = x_ref.shape[0]
    cout = o_ref.shape[-1]
    w = w_ref[...]                                              # (9*Cin, Cout) bf16
    bias = jnp.broadcast_to(b_ref[...], (R * Wo, cout))         # hoisted out of the loop

    for oy in range(0, Ho, R):                                  # static row blocks
        # Load each phase band exactly once per block; every tap slices registers.
        bands = [x_ref[p, pl.ds(oy, R + halo), :, :] for p in range(P)]  # (R+halo, Ws, Cin)
        rows = []
        for r in range(R):
            taps_r = [bands[pi][r + a, bc:bc + Wo, :] for (pi, a, bc) in taps]
            rows.append(jnp.concatenate(taps_r, axis=-1))        # (Wo, 9*Cin)
        patch = jnp.concatenate(rows, axis=0).astype(jnp.bfloat16)   # (R*Wo, 9*Cin)
        acc = jnp.dot(patch, w, preferred_element_type=jnp.float32) + bias
        if leaky:
            acc = jnp.where(acc >= 0, acc, LEAKY_SLOPE * acc)
        o_ref[pl.ds(oy * Wo, R * Wo), :] = acc.astype(o_ref.dtype)


def _space_to_depth_pad1(x):
    """(B,H,W,C) -> (B, 4, (H+2)//2, (W+2)//2, C) bf16 ; phase p*2+q holds xp[2i+p, 2j+q]."""
    B, H, W, C = x.shape
    xp = jnp.pad(x, ((0, 0), (1, 1), (1, 1), (0, 0)))
    Hh, Wh = (H + 2) // 2, (W + 2) // 2
    xr = xp.reshape(B, Hh, 2, Wh, 2, C)
    xr = jnp.transpose(xr, (0, 2, 4, 1, 3, 5))          # (B, 2, 2, Hh, Wh, C)
    return xr.reshape(B, 4, Hh, Wh, C).astype(jnp.bfloat16)


def conv3x3(x, wk, bias, *, stride, leaky, out_dtype):
    """'same' 3x3 conv.  x: (B,H,W,Cin) ; wk: (9*Cin,Cout) bf16 ; bias: (1,Cout) f32."""
    B, H, W, Cin = x.shape
    Cout = wk.shape[-1]
    assert wk.shape[0] == 9 * Cin
    if stride == 2:
        assert H % 2 == 0 and W % 2 == 0
        xs = _space_to_depth_pad1(x)                    # (B, 4, H//2+1, W//2+1, Cin)
        Ho, Wo = H // 2, W // 2
        taps = tuple(((ky % 2) * 2 + (kx % 2), ky // 2, kx // 2)
                     for ky in range(3) for kx in range(3))
        halo = 1
    else:
        xp = jnp.pad(x.astype(jnp.bfloat16), ((0, 0), (1, 1), (1, 1), (0, 0)))
        xs = xp[:, None]                                # (B, 1, H+2, W+2, Cin)
        Ho, Wo = H, W
        taps = tuple((0, ky, kx) for ky in range(3) for kx in range(3))
        halo = 2

    R = 8 if Ho % 8 == 0 else Ho                        # row-block size
    # TODO(synk): at large resolutions, tile rows on the grid with halo DMA instead of
    # whole-image blocks (v7x 64 MiB VMEM), and tile Wo for the f32 accumulator.
    P, Hs, Ws = xs.shape[1], xs.shape[2], xs.shape[3]
    kern = functools.partial(_conv3x3_kernel, taps=taps, Ho=Ho, Wo=Wo, R=R,
                             halo=halo, leaky=leaky)
    out = pl.pallas_call(
        kern,
        out_shape=jax.ShapeDtypeStruct((B, Ho * Wo, Cout), out_dtype),
        grid=(B,),
        in_specs=[
            pl.BlockSpec((None, P, Hs, Ws, Cin), lambda b: (b, 0, 0, 0, 0)),
            pl.BlockSpec((9 * Cin, Cout), lambda b: (0, 0)),
            pl.BlockSpec((1, Cout), lambda b: (0, 0)),
        ],
        out_specs=pl.BlockSpec((None, Ho * Wo, Cout), lambda b: (b, 0, 0)),
        compiler_params=_cparams(("parallel",)),
    )(xs, wk, bias)
    return out.reshape(B, Ho, Wo, Cout)


# --------------------------- correlation kernel ------------------------------

def _corr_kernel(f1_ref, f2p_ref, sel_ref, o_ref, *, H, W, md, R):
    """Cost volume: one MXU dot per row block against a block-diagonal selector.

    f1_ref: (H, W, C) bf16 ; f2p_ref: (H+2md, W+2md, C) bf16
    sel_ref: (25*C, D_PAD) bf16 (block-diagonal, entries 1/C) ; o_ref: (H*W, D_PAD)
    """
    nd = 2 * md + 1
    sel = sel_ref[...]
    for oy in range(0, H, R):
        f1blk = f1_ref[pl.ds(oy, R), :, :]                   # (R, W, C)
        f2blk = f2p_ref[pl.ds(oy, R + 2 * md), :, :]         # (R+2md, W+2md, C)
        rows = []
        for r in range(R):
            f1row = f1blk[r]                                 # (W, C)
            prods = []
            for dy in range(nd):
                band = f2blk[r + dy]                         # (W+2md, C)
                for dx in range(nd):
                    prods.append(f1row * band[dx:dx + W, :])  # (W, C)
            rows.append(jnp.concatenate(prods, axis=-1))      # (W, 25*C)
        pcat = jnp.concatenate(rows, axis=0).astype(jnp.bfloat16)   # (R*W, 25*C)
        acc = jnp.dot(pcat, sel, preferred_element_type=jnp.float32)  # (R*W, D_PAD)
        acc = jnp.where(acc >= 0, acc, LEAKY_SLOPE * acc)     # leaky ReLU
        o_ref[pl.ds(oy * W, R * W), :] = acc.astype(o_ref.dtype)


def correlation(f1, f2, md):
    """f1, f2: (B,H,W,C) bf16  ->  (B,H,W,D_PAD) bf16 cost volume (channels >=25 are 0)."""
    B, H, W, C = f1.shape
    nd = 2 * md + 1
    f2p = jnp.pad(f2, ((0, 0), (md, md), (md, md), (0, 0)))
    # Block-diagonal selector: rows [d*C, (d+1)*C) sum channel block d (scaled 1/C) into
    # lane column d.  1/C exact in bf16 for C=32.
    sel = np.zeros((nd * nd * C, D_PAD), np.float32)
    for d in range(nd * nd):
        sel[d * C:(d + 1) * C, d] = 1.0 / C
    sel = jnp.asarray(sel, jnp.bfloat16)

    R = 8 if H % 8 == 0 else H
    out = pl.pallas_call(
        functools.partial(_corr_kernel, H=H, W=W, md=md, R=R),
        out_shape=jax.ShapeDtypeStruct((B, H * W, D_PAD), jnp.bfloat16),
        grid=(B,),
        in_specs=[
            pl.BlockSpec((None, H, W, C), lambda b: (b, 0, 0, 0)),
            pl.BlockSpec((None, H + 2 * md, W + 2 * md, C), lambda b: (b, 0, 0, 0)),
            pl.BlockSpec((nd * nd * C, D_PAD), lambda b: (0, 0)),
        ],
        out_specs=pl.BlockSpec((None, H * W, D_PAD), lambda b: (b, 0, 0)),
        compiler_params=_cparams(("parallel",)),
    )(f1, f2p, sel)
    return out.reshape(B, H, W, D_PAD)


# --------------------------- bilinear x4 upsample ----------------------------

def _upsample_kernel(wy_ref, x_ref, wxt_ref, o_ref, *, scale, C):
    """out[c] = (Wy @ x[c] @ Wx^T) * scale — both channels fused in one grid cell."""
    wy = wy_ref[...]
    wxt = wxt_ref[...]
    for c in range(C):
        t = jnp.dot(wy, x_ref[c], preferred_element_type=jnp.float32)
        o = jnp.dot(t.astype(jnp.bfloat16), wxt, preferred_element_type=jnp.float32)
        o_ref[c] = (o * scale).astype(o_ref.dtype)


def _bilinear_matrix(n_in, scale_factor):
    # PyTorch nn.Upsample(mode='bilinear', align_corners=False) source-index rule.
    n_out = n_in * scale_factor
    dst = np.arange(n_out, dtype=np.float64)
    src = np.maximum((dst + 0.5) / scale_factor - 0.5, 0.0)
    i0 = np.minimum(np.floor(src).astype(np.int64), n_in - 1)
    i1 = np.minimum(i0 + 1, n_in - 1)
    lam = src - i0
    W = np.zeros((n_out, n_in), dtype=np.float32)
    W[np.arange(n_out), i0] += (1.0 - lam)
    W[np.arange(n_out), i1] += lam
    return W        # weights are small dyadic fractions -> exact in bf16 for scale 4


def upsample4(x_nchw, scale):
    B, C, Hi, Wi = x_nchw.shape
    Ho, Wo = 4 * Hi, 4 * Wi
    wy = jnp.asarray(_bilinear_matrix(Hi, 4), jnp.bfloat16)
    wxt = jnp.asarray(_bilinear_matrix(Wi, 4).T, jnp.bfloat16)
    return pl.pallas_call(
        functools.partial(_upsample_kernel, scale=float(scale), C=C),
        out_shape=jax.ShapeDtypeStruct((B, C, Ho, Wo), jnp.float32),
        grid=(B,),
        in_specs=[
            pl.BlockSpec((Ho, Hi), lambda b: (0, 0)),
            pl.BlockSpec((None, C, Hi, Wi), lambda b: (b, 0, 0, 0)),
            pl.BlockSpec((Wi, Wo), lambda b: (0, 0)),
        ],
        out_specs=pl.BlockSpec((None, C, Ho, Wo), lambda b: (b, 0, 0, 0)),
        compiler_params=_cparams(("parallel",)),
    )(wy, x_nchw.astype(jnp.bfloat16), wxt)


# ------------------------------ network --------------------------------------

def init_pwc_params(key):
    ks = jax.random.split(key, 4)

    def w(k, shape):
        fan_in = shape[0] * shape[1] * shape[2]
        return jax.random.normal(k, shape, jnp.float32) / np.sqrt(fan_in)

    return {
        "c1_w": w(ks[0], (3, 3, 3, 16)), "c1_b": jnp.zeros((16,), jnp.float32),
        "c2_w": w(ks[1], (3, 3, 16, 32)), "c2_b": jnp.zeros((32,), jnp.float32),
        "f1_w": w(ks[2], (3, 3, D_CORR + 32, 32)), "f1_b": jnp.zeros((32,), jnp.float32),
        "f2_w": w(ks[3], (3, 3, 32, 2)), "f2_b": jnp.zeros((2,), jnp.float32),
    }


def _prep_weights(params):
    """Logical (3,3,Cin,Cout) params -> kernel layout (9*Cin, Cout) bf16 + (1,Cout) f32."""
    def wk(w):
        return w.reshape(-1, w.shape[-1]).astype(jnp.bfloat16)   # tap-major, channel inner

    def b2(b):
        return b.reshape(1, -1).astype(jnp.float32)

    # f1 conv consumes [cv(32 lanes, 25 real) | feat(32)] -> insert zero rows for the 7
    # cost-volume padding channels so K per tap becomes a lane-friendly 64.
    w = params["f1_w"].reshape(9, D_CORR + 32, 32)
    f1 = jnp.zeros((9, D_PAD + 32, 32), params["f1_w"].dtype)
    f1 = f1.at[:, :D_CORR, :].set(w[:, :D_CORR, :])
    f1 = f1.at[:, D_PAD:, :].set(w[:, D_CORR:, :])
    f1 = f1.reshape(9 * (D_PAD + 32), 32).astype(jnp.bfloat16)

    # flow head: pad Cout 2 -> 128 for lane-dense stores (kept bf16, sliced in wrapper).
    w2 = params["f2_w"].reshape(9 * 32, 2)
    f2 = jnp.pad(w2, ((0, 0), (0, FLOW_PAD - 2))).astype(jnp.bfloat16)
    f2_b = jnp.pad(params["f2_b"], (0, FLOW_PAD - 2))

    return {
        "c1_w": wk(params["c1_w"]), "c1_b": b2(params["c1_b"]),
        "c2_w": wk(params["c2_w"]), "c2_b": b2(params["c2_b"]),
        "f1_w": f1, "f1_b": b2(params["f1_b"]),
        "f2_w": f2, "f2_b": b2(f2_b),
    }


def extract_features(kw, im_nhwc):
    """Siamese feature extractor (two stride-2 convs) -> (B, H/4, W/4, 32) bf16."""
    h = conv3x3(im_nhwc, kw["c1_w"], kw["c1_b"], stride=2, leaky=True,
                out_dtype=jnp.bfloat16)
    return conv3x3(h, kw["c2_w"], kw["c2_b"], stride=2, leaky=True,
                   out_dtype=jnp.bfloat16)


def flow_head(kw, f_ref, f_other):
    """Correlation + 2 convs -> (B, 2, H/4, W/4) bf16 flow."""
    cv = correlation(f_ref, f_other, MAX_DISP)          # (B, H/4, W/4, 32) bf16
    h = jnp.concatenate([cv, f_ref], axis=-1)           # K = 64 (25 real + 7 pad + 32)
    h = conv3x3(h, kw["f1_w"], kw["f1_b"], stride=1, leaky=True,
                out_dtype=jnp.bfloat16)
    flow = conv3x3(h, kw["f2_w"], kw["f2_b"], stride=1, leaky=False,
                   out_dtype=jnp.bfloat16)               # (B, H/4, W/4, 128) lane-dense
    return jnp.transpose(flow[..., :2], (0, 3, 1, 2))    # NCHW (B, 2, H/4, W/4)


@functools.partial(jax.jit, static_argnames=("timestep",))
def run_pwcnet_forward(params, startf, endf, timestep=0.5):
    # TODO(synk): the full pwc_dc_net (6-level pyramid, warping, DenseNet flow estimators,
    # context net, pretrained .pth.tar weights) is replaced by a single-level siamese
    # feature + cost-volume + flow-head surrogate with deterministic weights; the
    # interface (6-ch input -> 2-ch flow at 1/4 resolution, x4 bilinear upsample, x20
    # scale, forward + reversed pass) is kept.
    num_frames = int(1.0 / timestep) - 1
    time_offsets = [timestep * ind for ind in range(1, 1 + num_frames)]

    kw = _prep_weights(params)
    s = jnp.transpose(startf.astype(jnp.float32), (0, 2, 3, 1))   # NHWC
    e = jnp.transpose(endf.astype(jnp.float32), (0, 2, 3, 1))

    # Features are shared between the forward ([start|end]) and reversed ([end|start])
    # passes — identical to running the surrogate twice, at half the conv cost.
    fs = extract_features(kw, s)
    fe = extract_features(kw, e)

    flow_fwd = flow_head(kw, fs, fe)                    # cur  = cat(start, end)
    flow_bwd = flow_head(kw, fe, fs)                    # rev  = cat(end, start)

    # Upsample hoisted out of the per-offset loop (bilinear upsample is linear, so
    # 20*off*upsample(flow) == upsample(20*flow)*off); per-offset scale is a cheap VPU op.
    up_fwd = upsample4(flow_fwd, 20.0)                  # (B, 2, H, W) f32
    up_bwd = upsample4(flow_bwd, 20.0)

    return [[up_fwd * off for off in time_offsets],
            [up_bwd * off for off in time_offsets[::-1]]]


# --------------------------------- main ---------------------------------------

if __name__ == "__main__":
    key = jax.random.PRNGKey(0)
    k_p, k_s, k_e = jax.random.split(key, 3)
    params = init_pwc_params(k_p)

    B, H, W = 2, 32, 32
    startf = jax.random.normal(k_s, (B, 3, H, W), jnp.float32)
    endf = jax.random.normal(k_e, (B, 3, H, W), jnp.float32)

    out = run_pwcnet_forward(params, startf, endf, timestep=0.5)
    for leaf in jax.tree_util.tree_leaves(out):
        jax.block_until_ready(leaf)

    assert out[0][0].shape == (B, 2, H, W)
    assert out[1][0].shape == (B, 2, H, W)
    assert bool(jnp.all(jnp.isfinite(out[0][0]))) and bool(jnp.all(jnp.isfinite(out[1][0])))
    print("KERNEL_OK")
</pallas_src>

<mosaic_0001>
module attributes {stable_mosaic.version = 11 : i64} {
  func.func @_conv3x3_kernel(%arg0: i32, %arg1: memref<1x4x17x17x3xbf16, #tpu.memory_space<vmem>>, %arg2: memref<27x16xbf16, #tpu.memory_space<vmem>>, %arg3: memref<1x16xf32, #tpu.memory_space<vmem>>, %arg4: memref<1x256x16xbf16, #tpu.memory_space<vmem>>) attributes {dimension_semantics = [#tpu.dimension_semantics<parallel>], iteration_bounds = array<i64: 2>, scalar_prefetch = 0 : i64, scratch_operands = 0 : i64, tpu.core_type = #tpu.core_type<tc>, window_params = [{transform_indices = @transform_0, window_bounds = array<i64: 1, 4, 17, 17, 3>}, {pipeline_mode = #tpu.pipeline_mode<synchronous>, transform_indices = @transform_1, window_bounds = array<i64: 27, 16>}, {pipeline_mode = #tpu.pipeline_mode<synchronous>, transform_indices = @transform_2, window_bounds = array<i64: 1, 16>}, {transform_indices = @transform_3, window_bounds = array<i64: 1, 256, 16>}]} {
    %c0 = arith.constant 0 : index
    %c0_0 = arith.constant 0 : index
    %0 = vector.load %arg2[%c0, %c0_0] : memref<27x16xbf16, #tpu.memory_space<vmem>>, vector<27x16xbf16>
    %c0_1 = arith.constant 0 : index
    %c0_2 = arith.constant 0 : index
    %1 = vector.load %arg3[%c0_1, %c0_2] : memref<1x16xf32, #tpu.memory_space<vmem>>, vector<1x16xf32>
    %2 = vector.shape_cast %1 : vector<1x16xf32> to vector<1x16xf32>
    %3 = vector.broadcast %2 : vector<1x16xf32> to vector<128x16xf32>
    %c0_3 = arith.constant 0 : index
    %c0_4 = arith.constant 0 : index
    %c0_5 = arith.constant 0 : index
    %c0_6 = arith.constant 0 : index
    %c0_7 = arith.constant 0 : index
    %4 = vector.load %arg1[%c0_3, %c0_4, %c0_5, %c0_6, %c0_7] : memref<1x4x17x17x3xbf16, #tpu.memory_space<vmem>>, vector<1x1x9x17x3xbf16>
    %5 = vector.shape_cast %4 : vector<1x1x9x17x3xbf16> to vector<9x17x3xbf16>
    %c0_8 = arith.constant 0 : index
    %c1 = arith.constant 1 : index
    %c0_9 = arith.constant 0 : index
    %c0_10 = arith.constant 0 : index
    %c0_11 = arith.constant 0 : index
    %6 = vector.load %arg1[%c0_8, %c1, %c0_9, %c0_10, %c0_11] : memref<1x4x17x17x3xbf16, #tpu.memory_space<vmem>>, vector<1x1x9x17x3xbf16>
    %7 = vector.shape_cast %6 : vector<1x1x9x17x3xbf16> to vector<9x17x3xbf16>
    %c0_12 = arith.constant 0 : index
    %c2 = arith.constant 2 : index
    %c0_13 = arith.constant 0 : index
    %c0_14 = arith.constant 0 : index
    %c0_15 = arith.constant 0 : index
    %8 = vector.load %arg1[%c0_12, %c2, %c0_13, %c0_14, %c0_15] : memref<1x4x17x17x3xbf16, #tpu.memory_space<vmem>>, vector<1x1x9x17x3xbf16>
    %9 = vector.shape_cast %8 : vector<1x1x9x17x3xbf16> to vector<9x17x3xbf16>
    %c0_16 = arith.constant 0 : index
    %c3 = arith.constant 3 : index
    %c0_17 = arith.constant 0 : index
    %c0_18 = arith.constant 0 : index
    %c0_19 = arith.constant 0 : index
    %10 = vector.load %arg1[%c0_16, %c3, %c0_17, %c0_18, %c0_19] : memref<1x4x17x17x3xbf16, #tpu.memory_space<vmem>>, vector<1x1x9x17x3xbf16>
    %11 = vector.shape_cast %10 : vector<1x1x9x17x3xbf16> to vector<9x17x3xbf16>
    %12 = vector.extract_strided_slice %5 {offsets = [0, 0, 0], sizes = [1, 16, 3], strides = [1, 1, 1]} : vector<9x17x3xbf16> to vector<1x16x3xbf16>
    %13 = vector.shape_cast %12 : vector<1x16x3xbf16> to vector<16x3xbf16>
    %14 = vector.extract_strided_slice %7 {offsets = [0, 0, 0], sizes = [1, 16, 3], strides = [1, 1, 1]} : vector<9x17x3xbf16> to vector<1x16x3xbf16>
    %15 = vector.shape_cast %14 : vector<1x16x3xbf16> to vector<16x3xbf16>
    %16 = vector.extract_strided_slice %5 {offsets = [0, 1, 0], sizes = [1, 16, 3], strides = [1, 1, 1]} : vector<9x17x3xbf16> to vector<1x16x3xbf16>
    %17 = vector.shape_cast %16 : vector<1x16x3xbf16> to vector<16x3xbf16>
    %18 = vector.extract_strided_slice %9 {offsets = [0, 0, 0], sizes = [1, 16, 3], strides = [1, 1, 1]} : vector<9x17x3xbf16> to vector<1x16x3xbf16>
    %19 = vector.shape_cast %18 : vector<1x16x3xbf16> to vector<16x3xbf16>
    %20 = vector.extract_strided_slice %11 {offsets = [0, 0, 0], sizes = [1, 16, 3], strides = [1, 1, 1]} : vector<9x17x3xbf16> to vector<1x16x3xbf16>
    %21 = vector.shape_cast %20 : vector<1x16x3xbf16> to vector<16x3xbf16>
    %22 = vector.extract_strided_slice %9 {offsets = [0, 1, 0], sizes = [1, 16, 3], strides = [1, 1, 1]} : vector<9x17x3xbf16> to vector<1x16x3xbf16>
    %23 = vector.shape_cast %22 : vector<1x16x3xbf16> to vector<16x3xbf16>
    %24 = vector.extract_strided_slice %5 {offsets = [1, 0, 0], sizes = [1, 16, 3], strides = [1, 1, 1]} : vector<9x17x3xbf16> to vector<1x16x3xbf16>
    %25 = vector.shape_cast %24 : vector<1x16x3xbf16> to vector<16x3xbf16>
    %26 = vector.extract_strided_slice %7 {offsets = [1, 0, 0], sizes = [1, 16, 3], strides = [1, 1, 1]} : vector<9x17x3xbf16> to vector<1x16x3xbf16>
    %27 = vector.shape_cast %26 : vector<1x16x3xbf16> to vector<16x3xbf16>
    %28 = vector.extract_strided_slice %5 {offsets = [1, 1, 0], sizes = [1, 16, 3], strides = [1, 1, 1]} : vector<9x17x3xbf16> to vector<1x16x3xbf16>
    %29 = vector.shape_cast %28 : vector<1x16x3xbf16> to vector<16x3xbf16>
    %30 = tpu.concatenate %13, %15, %17, %19, %21, %23, %25, %27, %29 in 1 : vector<16x3xbf16>, vector<16x3xbf16>, vector<16x3xbf16>, vector<16x3xbf16>, vector<16x3xbf16>, vector<16x3xbf16>, vector<16x3xbf16>, vector<16x3xbf16>, vector<16x3xbf16> -> vector<16x27xbf16>
    %31 = vector.extract_strided_slice %5 {offsets = [1, 0, 0], sizes = [1, 16, 3], strides = [1, 1, 1]} : vector<9x17x3xbf16> to vector<1x16x3xbf16>
    %32 = vector.shape_cast %31 : vector<1x16x3xbf16> to vector<16x3xbf16>
    %33 = vector.extract_strided_slice %7 {offsets = [1, 0, 0], sizes = [1, 16, 3], strides = [1, 1, 1]} : vector<9x17x3xbf16> to vector<1x16x3xbf16>
    %34 = vector.shape_cast %33 : vector<1x16x3xbf16> to vector<16x3xbf16>
    %35 = vector.extract_strided_slice %5 {offsets = [1, 1, 0], sizes = [1, 16, 3], strides = [1, 1, 1]} : vector<9x17x3xbf16> to vector<1x16x3xbf16>
    %36 = vector.shape_cast %35 : vector<1x16x3xbf16> to vector<16x3xbf16>
    %37 = vector.extract_strided_slice %9 {offsets = [1, 0, 0], sizes = [1, 16, 3], strides = [1, 1, 1]} : vector<9x17x3xbf16> to vector<1x16x3xbf16>
    %38 = vector.shape_cast %37 : vector<1x16x3xbf16> to vector<16x3xbf16>
    %39 = vector.extract_strided_slice %11 {offsets = [1, 0, 0], sizes = [1, 16, 3], strides = [1, 1, 1]} : vector<9x17x3xbf16> to vector<1x16x3xbf16>
    %40 = vector.shape_cast %39 : vector<1x16x3xbf16> to vector<16x3xbf16>
    %41 = vector.extract_strided_slice %9 {offsets = [1, 1, 0], sizes = [1, 16, 3], strides = [1, 1, 1]} : vector<9x17x3xbf16> to vector<1x16x3xbf16>
    %42 = vector.shape_cast %41 : vector<1x16x3xbf16> to vector<16x3xbf16>
    %43 = vector.extract_strided_slice %5 {offsets = [2, 0, 0], sizes = [1, 16, 3], strides = [1, 1, 1]} : vector<9x17x3xbf16> to vector<1x16x3xbf16>
    %44 = vector.shape_cast %43 : vector<1x16x3xbf16> to vector<16x3xbf16>
    %45 = vector.extract_strided_slice %7 {offsets = [2, 0, 0], sizes = [1, 16, 3], strides = [1, 1, 1]} : vector<9x17x3xbf16> to vector<1x16x3xbf16>
    %46 = vector.shape_cast %45 : vector<1x16x3xbf16> to vector<16x3xbf16>
    %47 = vector.extract_strided_slice %5 {offsets = [2, 1, 0], sizes = [1, 16, 3], strides = [1, 1, 1]} : vector<9x17x3xbf16> to vector<1x16x3xbf16>
    %48 = vector.shape_cast %47 : vector<1x16x3xbf16> to vector<16x3xbf16>
    %49 = tpu.concatenate %32, %34, %36, %38, %40, %42, %44, %46, %48 in 1 : vector<16x3xbf16>, vector<16x3xbf16>, vector<16x3xbf16>, vector<16x3xbf16>, vector<16x3xbf16>, vector<16x3xbf16>, vector<16x3xbf16>, vector<16x3xbf16>, vector<16x3xbf16> -> vector<16x27xbf16>
    %50 = vector.extract_strided_slice %5 {offsets = [2, 0, 0], sizes = [1, 16, 3], strides = [1, 1, 1]} : vector<9x17x3xbf16> to vector<1x16x3xbf16>
    %51 = vector.shape_cast %50 : vector<1x16x3xbf16> to vector<16x3xbf16>
    %52 = vector.extract_strided_slice %7 {offsets = [2, 0, 0], sizes = [1, 16, 3], strides = [1, 1, 1]} : vector<9x17x3xbf16> to vector<1x16x3xbf16>
    %53 = vector.shape_cast %52 : vector<1x16x3xbf16> to vector<16x3xbf16>
    %54 = vector.extract_strided_slice %5 {offsets = [2, 1, 0], sizes = [1, 16, 3], strides = [1, 1, 1]} : vector<9x17x3xbf16> to vector<1x16x3xbf16>
    %55 = vector.shape_cast %54 : vector<1x16x3xbf16> to vector<16x3xbf16>
    %56 = vector.extract_strided_slice %9 {offsets = [2, 0, 0], sizes = [1, 16, 3], strides = [1, 1, 1]} : vector<9x17x3xbf16> to vector<1x16x3xbf16>
    %57 = vector.shape_cast %56 : vector<1x16x3xbf16> to vector<16x3xbf16>
    %58 = vector.extract_strided_slice %11 {offsets = [2, 0, 0], sizes = [1, 16, 3], strides = [1, 1, 1]} : vector<9x17x3xbf16> to vector<1x16x3xbf16>
    %59 = vector.shape_cast %58 : vector<1x16x3xbf16> to vector<16x3xbf16>
    %60 = vector.extract_strided_slice %9 {offsets = [2, 1, 0], sizes = [1, 16, 3], strides = [1, 1, 1]} : vector<9x17x3xbf16> to vector<1x16x3xbf16>
    %61 = vector.shape_cast %60 : vector<1x16x3xbf16> to vector<16x3xbf16>
    %62 = vector.extract_strided_slice %5 {offsets = [3, 0, 0], sizes = [1, 16, 3], strides = [1, 1, 1]} : vector<9x17x3xbf16> to vector<1x16x3xbf16>
    %63 = vector.shape_cast %62 : vector<1x16x3xbf16> to vector<16x3xbf16>
    %64 = vector.extract_strided_slice %7 {offsets = [3, 0, 0], sizes = [1, 16, 3], strides = [1, 1, 1]} : vector<9x17x3xbf16> to vector<1x16x3xbf16>
    %65 = vector.shape_cast %64 : vector<1x16x3xbf16> to vector<16x3xbf16>
    %66 = vector.extract_strided_slice %5 {offsets = [3, 1, 0], sizes = [1, 16, 3], strides = [1, 1, 1]} : vector<9x17x3xbf16> to vector<1x16x3xbf16>
    %67 = vector.shape_cast %66 : vector<1x16x3xbf16> to vector<16x3xbf16>
    %68 = tpu.concatenate %51, %53, %55, %57, %59, %61, %63, %65, %67 in 1 : vector<16x3xbf16>, vector<16x3xbf16>, vector<16x3xbf16>, vector<16x3xbf16>, vector<16x3xbf16>, vector<16x3xbf16>, vector<16x3xbf16>, vector<16x3xbf16>, vector<16x3xbf16> -> vector<16x27xbf16>
    %69 = vector.extract_strided_slice %5 {offsets = [3, 0, 0], sizes = [1, 16, 3], strides = [1, 1, 1]} : vector<9x17x3xbf16> to vector<1x16x3xbf16>
    %70 = vector.shape_cast %69 : vector<1x16x3xbf16> to vector<16x3xbf16>
    %71 = vector.extract_strided_slice %7 {offsets = [3, 0, 0], sizes = [1, 16, 3], strides = [1, 1, 1]} : vector<9x17x3xbf16> to vector<1x16x3xbf16>
    %72 = vector.shape_cast %71 : vector<1x16x3xbf16> to vector<16x3xbf16>
    %73 = vector.extract_strided_slice %5 {offsets = [3, 1, 0], sizes = [1, 16, 3], strides = [1, 1, 1]} : vector<9x17x3xbf16> to vector<1x16x3xbf16>
    %74 = vector.shape_cast %73 : vector<1x16x3xbf16> to vector<16x3xbf16>
    %75 = vector.extract_strided_slice %9 {offsets = [3, 0, 0], sizes = [1, 16, 3], strides = [1, 1, 1]} : vector<9x17x3xbf16> to vector<1x16x3xbf16>
    %76 = vector.shape_cast %75 : vector<1x16x3xbf16> to vector<16x3xbf16>
    %77 = vector.extract_strided_slice %11 {offsets = [3, 0, 0], sizes = [1, 16, 3], strides = [1, 1, 1]} : vector<9x17x3xbf16> to vector<1x16x3xbf16>
    %78 = vector.shape_cast %77 : vector<1x16x3xbf16> to vector<16x3xbf16>
    %79 = vector.extract_strided_slice %9 {offsets = [3, 1, 0], sizes = [1, 16, 3], strides = [1, 1, 1]} : vector<9x17x3xbf16> to vector<1x16x3xbf16>
    %80 = vector.shape_cast %79 : vector<1x16x3xbf16> to vector<16x3xbf16>
    %81 = vector.extract_strided_slice %5 {offsets = [4, 0, 0], sizes = [1, 16, 3], strides = [1, 1, 1]} : vector<9x17x3xbf16> to vector<1x16x3xbf16>
    %82 = vector.shape_cast %81 : vector<1x16x3xbf16> to vector<16x3xbf16>
    %83 = vector.extract_strided_slice %7 {offsets = [4, 0, 0], sizes = [1, 16, 3], strides = [1, 1, 1]} : vector<9x17x3xbf16> to vector<1x16x3xbf16>
    %84 = vector.shape_cast %83 : vector<1x16x3xbf16> to vector<16x3xbf16>
    %85 = vector.extract_strided_slice %5 {offsets = [4, 1, 0], sizes = [1, 16, 3], strides = [1, 1, 1]} : vector<9x17x3xbf16> to vector<1x16x3xbf16>
    %86 = vector.shape_cast %85 : vector<1x16x3xbf16> to vector<16x3xbf16>
    %87 = tpu.concatenate %70, %72, %74, %76, %78, %80, %82, %84, %86 in 1 : vector<16x3xbf16>, vector<16x3xbf16>, vector<16x3xbf16>, vector<16x3xbf16>, vector<16x3xbf16>, vector<16x3xbf16>, vector<16x3xbf16>, vector<16x3xbf16>, vector<16x3xbf16> -> vector<16x27xbf16>
    %88 = vector.extract_strided_slice %5 {offsets = [4, 0, 0], sizes = [1, 16, 3], strides = [1, 1, 1]} : vector<9x17x3xbf16> to vector<1x16x3xbf16>
    %89 = vector.shape_cast %88 : vector<1x16x3xbf16> to vector<16x3xbf16>
    %90 = vector.extract_strided_slice %7 {offsets = [4, 0, 0], sizes = [1, 16, 3], strides = [1, 1, 1]} : vector<9x17x3xbf16> to vector<1x16x3xbf16>
    %91 = vector.shape_cast %90 : vector<1x16x3xbf16> to vector<16x3xbf16>
    %92 = vector.extract_strided_slice %5 {offsets = [4, 1, 0], sizes = [1, 16, 3], strides = [1, 1, 1]} : vector<9x17x3xbf16> to vector<1x16x3xbf16>
    %93 = vector.shape_cast %92 : vector<1x16x3xbf16> to vector<16x3xbf16>
    %94 = vector.extract_strided_slice %9 {offsets = [4, 0, 0], sizes = [1, 16, 3], strides = [1, 1, 1]} : vector<9x17x3xbf16> to vector<1x16x3xbf16>
    %95 = vector.shape_cast %94 : vector<1x16x3xbf16> to vector<16x3xbf16>
    %96 = vector.extract_strided_slice %11 {offsets = [4, 0, 0], sizes = [1, 16, 3], strides = [1, 1, 1]} : vector<9x17x3xbf16> to vector<1x16x3xbf16>
    %97 = vector.shape_cast %96 : vector<1x16x3xbf16> to vector<16x3xbf16>
    %98 = vector.extract_strided_slice %9 {offsets = [4, 1, 0], sizes = [1, 16, 3], strides = [1, 1, 1]} : vector<9x17x3xbf16> to vector<1x16x3xbf16>
    %99 = vector.shape_cast %98 : vector<1x16x3xbf16> to vector<16x3xbf16>
    %100 = vector.extract_strided_slice %5 {offsets = [5, 0, 0], sizes = [1, 16, 3], strides = [1, 1, 1]} : vector<9x17x3xbf16> to vector<1x16x3xbf16>
    %101 = vector.shape_cast %100 : vector<1x16x3xbf16> to vector<16x3xbf16>
    %102 = vector.extract_strided_slice %7 {offsets = [5, 0, 0], sizes = [1, 16, 3], strides = [1, 1, 1]} : vector<9x17x3xbf16> to vector<1x16x3xbf16>
    %103 = vector.shape_cast %102 : vector<1x16x3xbf16> to vector<16x3xbf16>
    %104 = vector.extract_strided_slice %5 {offsets = [5, 1, 0], sizes = [1, 16, 3], strides = [1, 1, 1]} : vector<9x17x3xbf16> to vector<1x16x3xbf16>
    %105 = vector.shape_cast %104 : vector<1x16x3xbf16> to vector<16x3xbf16>
    %106 = tpu.concatenate %89, %91, %93, %95, %97, %99, %101, %103, %105 in 1 : vector<16x3xbf16>, vector<16x3xbf16>, vector<16x3xbf16>, vector<16x3xbf16>, vector<16x3xbf16>, vector<16x3xbf16>, vector<16x3xbf16>, vector<16x3xbf16>, vector<16x3xbf16> -> vector<16x27xbf16>
    %107 = vector.extract_strided_slice %5 {offsets = [5, 0, 0], sizes = [1, 16, 3], strides = [1, 1, 1]} : vector<9x17x3xbf16> to vector<1x16x3xbf16>
    %108 = vector.shape_cast %107 : vector<1x16x3xbf16> to vector<16x3xbf16>
    %109 = vector.extract_strided_slice %7 {offsets = [5, 0, 0], sizes = [1, 16, 3], strides = [1, 1, 1]} : vector<9x17x3xbf16> to vector<1x16x3xbf16>
    %110 = vector.shape_cast %109 : vector<1x16x3xbf16> to vector<16x3xbf16>
    %111 = vector.extract_strided_slice %5 {offsets = [5, 1, 0], sizes = [1, 16, 3], strides = [1, 1, 1]} : vector<9x17x3xbf16> to vector<1x16x3xbf16>
    %112 = vector.shape_cast %111 : vector<1x16x3xbf16> to vector<16x3xbf16>
    %113 = vector.extract_strided_slice %9 {offsets = [5, 0, 0], sizes = [1, 16, 3], strides = [1, 1, 1]} : vector<9x17x3xbf16> to vector<1x16x3xbf16>
    %114 = vector.shape_cast %113 : vector<1x16x3xbf16> to vector<16x3xbf16>
    %115 = vector.extract_strided_slice %11 {offsets = [5, 0, 0], sizes = [1, 16, 3], strides = [1, 1, 1]} : vector<9x17x3xbf16> to vector<1x16x3xbf16>
    %116 = vector.shape_cast %115 : vector<1x16x3xbf16> to vector<16x3xbf16>
    %117 = vector.extract_strided_slice %9 {offsets = [5, 1, 0], sizes = [1, 16, 3], strides = [1, 1, 1]} : vector<9x17x3xbf16> to vector<1x16x3xbf16>
    %118 = vector.shape_cast %117 : vector<1x16x3xbf16> to vector<16x3xbf16>
    %119 = vector.extract_strided_slice %5 {offsets = [6, 0, 0], sizes = [1, 16, 3], strides = [1, 1, 1]} : vector<9x17x3xbf16> to vector<1x16x3xbf16>
    %120 = vector.shape_cast %119 : vector<1x16x3xbf16> to vector<16x3xbf16>
    %121 = vector.extract_strided_slice %7 {offsets = [6, 0, 0], sizes = [1, 16, 3], strides = [1, 1, 1]} : vector<9x17x3xbf16> to vector<1x16x3xbf16>
    %122 = vector.shape_cast %121 : vector<1x16x3xbf16> to vector<16x3xbf16>
    %123 = vector.extract_strided_slice %5 {offsets = [6, 1, 0], sizes = [1, 16, 3], strides = [1, 1, 1]} : vector<9x17x3xbf16> to vector<1x16x3xbf16>
    %124 = vector.shape_cast %123 : vector<1x16x3xbf16> to vector<16x3xbf16>
    %125 = tpu.concatenate %108, %110, %112, %114, %116, %118, %120, %122, %124 in 1 : vector<16x3xbf16>, vector<16x3xbf16>, vector<16x3xbf16>, vector<16x3xbf16>, vector<16x3xbf16>, vector<16x3xbf16>, vector<16x3xbf16>, vector<16x3xbf16>, vector<16x3xbf16> -> vector<16x27xbf16>
    %126 = vector.extract_strided_slice %5 {offsets = [6, 0, 0], sizes = [1, 16, 3], strides = [1, 1, 1]} : vector<9x17x3xbf16> to vector<1x16x3xbf16>
    %127 = vector.shape_cast %126 : vector<1x16x3xbf16> to vector<16x3xbf16>
    %128 = vector.extract_strided_slice %7 {offsets = [6, 0, 0], sizes = [1, 16, 3], strides = [1, 1, 1]} : vector<9x17x3xbf16> to vector<1x16x3xbf16>
    %129 = vector.shape_cast %128 : vector<1x16x3xbf16> to vector<16x3xbf16>
    %130 = vector.extract_strided_slice %5 {offsets = [6, 1, 0], sizes = [1, 16, 3], strides = [1, 1, 1]} : vector<9x17x3xbf16> to vector<1x16x3xbf16>
    %131 = vector.shape_cast %130 : vector<1x16x3xbf16> to vector<16x3xbf16>
    %132 = vector.extract_strided_slice %9 {offsets = [6, 0, 0], sizes = [1, 16, 3], strides = [1, 1, 1]} : vector<9x17x3xbf16> to vector<1x16x3xbf16>
    %133 = vector.shape_cast %132 : vector<1x16x3xbf16> to vector<16x3xbf16>
    %134 = vector.extract_strided_slice %11 {offsets = [6, 0, 0], sizes = [1, 16, 3], strides = [1, 1, 1]} : vector<9x17x3xbf16> to vector<1x16x3xbf16>
    %135 = vector.shape_cast %134 : vector<1x16x3xbf16> to vector<16x3xbf16>
    %136 = vector.extract_strided_slice %9 {offsets = [6, 1, 0], sizes = [1, 16, 3], strides = [1, 1, 1]} : vector<9x17x3xbf16> to vector<1x16x3xbf16>
    %137 = vector.shape_cast %136 : vector<1x16x3xbf16> to vector<16x3xbf16>
    %138 = vector.extract_strided_slice %5 {offsets = [7, 0, 0], sizes = [1, 16, 3], strides = [1, 1, 1]} : vector<9x17x3xbf16> to vector<1x16x3xbf16>
    %139 = vector.shape_cast %138 : vector<1x16x3xbf16> to vector<16x3xbf16>
    %140 = vector.extract_strided_slice %7 {offsets = [7, 0, 0], sizes = [1, 16, 3], strides = [1, 1, 1]} : vector<9x17x3xbf16> to vector<1x16x3xbf16>
    %141 = vector.shape_cast %140 : vector<1x16x3xbf16> to vector<16x3xbf16>
    %142 = vector.extract_strided_slice %5 {offsets = [7, 1, 0], sizes = [1, 16, 3], strides = [1, 1, 1]} : vector<9x17x3xbf16> to vector<1x16x3xbf16>
    %143 = vector.shape_cast %142 : vector<1x16x3xbf16> to vector<16x3xbf16>
    %144 = tpu.concatenate %127, %129, %131, %133, %135, %137, %139, %141, %143 in 1 : vector<16x3xbf16>, vector<16x3xbf16>, vector<16x3xbf16>, vector<16x3xbf16>, vector<16x3xbf16>, vector<16x3xbf16>, vector<16x3xbf16>, vector<16x3xbf16>, vector<16x3xbf16> -> vector<16x27xbf16>
    %145 = vector.extract_strided_slice %5 {offsets = [7, 0, 0], sizes = [1, 16, 3], strides = [1, 1, 1]} : vector<9x17x3xbf16> to vector<1x16x3xbf16>
    %146 = vector.shape_cast %145 : vector<1x16x3xbf16> to vector<16x3xbf16>
    %147 = vector.extract_strided_slice %7 {offsets = [7, 0, 0], sizes = [1, 16, 3], strides = [1, 1, 1]} : vector<9x17x3xbf16> to vector<1x16x3xbf16>
    %148 = vector.shape_cast %147 : vector<1x16x3xbf16> to vector<16x3xbf16>
    %149 = vector.extract_strided_slice %5 {offsets = [7, 1, 0], sizes = [1, 16, 3], strides = [1, 1, 1]} : vector<9x17x3xbf16> to vector<1x16x3xbf16>
    %150 = vector.shape_cast %149 : vector<1x16x3xbf16> to vector<16x3xbf16>
    %151 = vector.extract_strided_slice %9 {offsets = [7, 0, 0], sizes = [1, 16, 3], strides = [1, 1, 1]} : vector<9x17x3xbf16> to vector<1x16x3xbf16>
    %152 = vector.shape_cast %151 : vector<1x16x3xbf16> to vector<16x3xbf16>
    %153 = vector.extract_strided_slice %11 {offsets = [7, 0, 0], sizes = [1, 16, 3], strides = [1, 1, 1]} : vector<9x17x3xbf16> to vector<1x16x3xbf16>
    %154 = vector.shape_cast %153 : vector<1x16x3xbf16> to vector<16x3xbf16>
    %155 = vector.extract_strided_slice %9 {offsets = [7, 1, 0], sizes = [1, 16, 3], strides = [1, 1, 1]} : vector<9x17x3xbf16> to vector<1x16x3xbf16>
    %156 = vector.shape_cast %155 : vector<1x16x3xbf16> to vector<16x3xbf16>
    %157 = vector.extract_strided_slice %5 {offsets = [8, 0, 0], sizes = [1, 16, 3], strides = [1, 1, 1]} : vector<9x17x3xbf16> to vector<1x16x3xbf16>
    %158 = vector.shape_cast %157 : vector<1x16x3xbf16> to vector<16x3xbf16>
    %159 = vector.extract_strided_slice %7 {offsets = [8, 0, 0], sizes = [1, 16, 3], strides = [1, 1, 1]} : vector<9x17x3xbf16> to vector<1x16x3xbf16>
    %160 = vector.shape_cast %159 : vector<1x16x3xbf16> to vector<16x3xbf16>
    %161 = vector.extract_strided_slice %5 {offsets = [8, 1, 0], sizes = [1, 16, 3], strides = [1, 1, 1]} : vector<9x17x3xbf16> to vector<1x16x3xbf16>
    %162 = vector.shape_cast %161 : vector<1x16x3xbf16> to vector<16x3xbf16>
    %163 = tpu.concatenate %146, %148, %150, %152, %154, %156, %158, %160, %162 in 1 : vector<16x3xbf16>, vector<16x3xbf16>, vector<16x3xbf16>, vector<16x3xbf16>, vector<16x3xbf16>, vector<16x3xbf16>, vector<16x3xbf16>, vector<16x3xbf16>, vector<16x3xbf16> -> vector<16x27xbf16>
    %164 = tpu.concatenate %30, %49, %68, %87, %106, %125, %144, %163 in 0 : vector<16x27xbf16>, vector<16x27xbf16>, vector<16x27xbf16>, vector<16x27xbf16>, vector<16x27xbf16>, vector<16x27xbf16>, vector<16x27xbf16>, vector<16x27xbf16> -> vector<128x27xbf16>
    %cst = arith.constant dense<0.000000e+00> : vector<128x16xf32>
    %165 = tpu.matmul %164, %0, %cst {dimension_numbers = #tpu.dot_dimension_numbers<[1], [0], [0], [1], [0, 0, 1, 1], [], []>} : vector<128x27xbf16>, vector<27x16xbf16>, vector<128x16xf32> -> vector<128x16xf32>
    %166 = arith.addf %165, %3 : vector<128x16xf32>
    %cst_20 = arith.constant 0.000000e+00 : f32
    %167 = vector.broadcast %cst_20 : f32 to vector<128x16xf32>
    %168 = arith.cmpf oge, %166, %167 : vector<128x16xf32>
    %cst_21 = arith.constant 1.000000e-01 : f32
    %169 = vector.broadcast %cst_21 : f32 to vector<128x16xf32>
    %170 = arith.mulf %169, %166 : vector<128x16xf32>
    %171 = arith.select %168, %166, %170 : vector<128x16xi1>, vector<128x16xf32>
    %172 = arith.truncf %171 : vector<128x16xf32> to vector<128x16xbf16>
    %c0_22 = arith.constant 0 : index
    %c0_23 = arith.constant 0 : index
    %c0_24 = arith.constant 0 : index
    %173 = vector.load %arg4[%c0_22, %c0_23, %c0_24] : memref<1x256x16xbf16, #tpu.memory_space<vmem>>, vector<1x128x16xbf16>
    %174 = vector.shape_cast %173 : vector<1x128x16xbf16> to vector<128x16xbf16>
    %175 = vector.shape_cast %172 : vector<128x16xbf16> to vector<1x128x16xbf16>
    tpu.vector_store %arg4[%c0_22, %c0_23, %c0_24], %175 {strides = array<i32>} : memref<1x256x16xbf16, #tpu.memory_space<vmem>>, vector<1x128x16xbf16>,
    %c0_25 = arith.constant 0 : index
    %c0_26 = arith.constant 0 : index
    %c8 = arith.constant 8 : index
    %c0_27 = arith.constant 0 : index
    %c0_28 = arith.constant 0 : index
    %176 = vector.load %arg1[%c0_25, %c0_26, %c8, %c0_27, %c0_28] : memref<1x4x17x17x3xbf16, #tpu.memory_space<vmem>>, vector<1x1x9x17x3xbf16>
    %177 = vector.shape_cast %176 : vector<1x1x9x17x3xbf16> to vector<9x17x3xbf16>
    %c0_29 = arith.constant 0 : index
    %c1_30 = arith.constant 1 : index
    %c8_31 = arith.constant 8 : index
    %c0_32 = arith.constant 0 : index
    %c0_33 = arith.constant 0 : index
    %178 = vector.load %arg1[%c0_29, %c1_30, %c8_31, %c0_32, %c0_33] : memref<1x4x17x17x3xbf16, #tpu.memory_space<vmem>>, vector<1x1x9x17x3xbf16>
    %179 = vector.shape_cast %178 : vector<1x1x9x17x3xbf16> to vector<9x17x3xbf16>
    %c0_34 = arith.constant 0 : index
    %c2_35 = arith.constant 2 : index
    %c8_36 = arith.constant 8 : index
    %c0_37 = arith.constant 0 : index
    %c0_38 = arith.constant 0 : index
    %180 = vector.load %arg1[%c0_34, %c2_35, %c8_36, %c0_37, %c0_38] : memref<1x4x17x17x3xbf16, #tpu.memory_space<vmem>>, vector<1x1x9x17x3xbf16>
    %181 = vector.shape_cast %180 : vector<1x1x9x17x3xbf16> to vector<9x17x3xbf16>
    %c0_39 = arith.constant 0 : index
    %c3_40 = arith.constant 3 : index
    %c8_41 = arith.constant 8 : index
    %c0_42 = arith.constant 0 : index
    %c0_43 = arith.constant 0 : index
    %182 = vector.load %arg1[%c0_39, %c3_40, %c8_41, %c0_42, %c0_43] : memref<1x4x17x17x3xbf16, #tpu.memory_space<vmem>>, vector<1x1x9x17x3xbf16>
    %183 = vector.shape_cast %182 : vector<1x1x9x17x3xbf16> to vector<9x17x3xbf16>
    %184 = vector.extract_strided_slice %177 {offsets = [0, 0, 0], sizes = [1, 16, 3], strides = [1, 1, 1]} : vector<9x17x3xbf16> to vector<1x16x3xbf16>
    %185 = vector.shape_cast %184 : vector<1x16x3xbf16> to vector<16x3xbf16>
    %186 = vector.extract_strided_slice %179 {offsets = [0, 0, 0], sizes = [1, 16, 3], strides = [1, 1, 1]} : vector<9x17x3xbf16> to vector<1x16x3xbf16>
    %187 = vector.shape_cast %186 : vector<1x16x3xbf16> to vector<16x3xbf16>
    %188 = vector.extract_strided_slice %177 {offsets = [0, 1, 0], sizes = [1, 16, 3], strides = [1, 1, 1]} : vector<9x17x3xbf16> to vector<1x16x3xbf16>
    %189 = vector.shape_cast %188 : vector<1x16x3xbf16> to vector<16x3xbf16>
    %190 = vector.extract_strided_slice %181 {offsets = [0, 0, 0], sizes = [1, 16, 3], strides = [1, 1, 1]} : vector<9x17x3xbf16> to vector<1x16x3xbf16>
    %191 = vector.shape_cast %190 : vector<1x16x3xbf16> to vector<16x3xbf16>
    %192 = vector.extract_strided_slice %183 {offsets = [0, 0, 0], sizes = [1, 16, 3], strides = [1, 1, 1]} : vector<9x17x3xbf16> to vector<1x16x3xbf16>
    %193 = vector.shape_cast %192 : vector<1x16x3xbf16> to vector<16x3xbf16>
    %194 = vector.extract_strided_slice %181 {offsets = [0, 1, 0], sizes = [1, 16, 3], strides = [1, 1, 1]} : vector<9x17x3xbf16> to vector<1x16x3xbf16>
    %195 = vector.shape_cast %194 : vector<1x16x3xbf16> to vector<16x3xbf16>
    %196 = vector.extract_strided_slice %177 {offsets = [1, 0, 0], sizes = [1, 16, 3], strides = [1, 1, 1]} : vector<9x17x3xbf16> to vector<1x16x3xbf16>
    %197 = vector.shape_cast %196 : vector<1x16x3xbf16> to vector<16x3xbf16>
    %198 = vector.extract_strided_slice %179 {offsets = [1, 0, 0], sizes = [1, 16, 3], strides = [1, 1, 1]} : vector<9x17x3xbf16> to vector<1x16x3xbf16>
    %199 = vector.shape_cast %198 : vector<1x16x3xbf16> to vector<16x3xbf16>
    %200 = vector.extract_strided_slice %177 {offsets = [1, 1, 0], sizes = [1, 16, 3], strides = [1, 1, 1]} : vector<9x17x3xbf16> to vector<1x16x3xbf16>
    %201 = vector.shape_cast %200 : vector<1x16x3xbf16> to vector<16x3xbf16>
    %202 = tpu.concatenate %185, %187, %189, %191, %193, %195, %197, %199, %201 in 1 : vector<16x3xbf16>, vector<16x3xbf16>, vector<16x3xbf16>, vector<16x3xbf16>, vector<16x3xbf16>, vector<16x3xbf16>, vector<16x3xbf16>, vector<16x3xbf16>, vector<16x3xbf16> -> vector<16x27xbf16>
    %203 = vector.extract_strided_slice %177 {offsets = [1, 0, 0], sizes = [1, 16, 3], strides = [1, 1, 1]} : vector<9x17x3xbf16> to vector<1x16x3xbf16>
    %204 = vector.shape_cast %203 : vector<1x16x3xbf16> to vector<16x3xbf16>
    %205 = vector.extract_strided_slice %179 {offsets = [1, 0, 0], sizes = [1, 16, 3], strides = [1, 1, 1]} : vector<9x17x3xbf16> to vector<1x16x3xbf16>
    %206 = vector.shape_cast %205 : vector<1x16x3xbf16> to vector<16x3xbf16>
    %207 = vector.extract_strided_slice %177 {offsets = [1, 1, 0], sizes = [1, 16, 3], strides = [1, 1, 1]} : vector<9x17x3xbf16> to vector<1x16x3xbf16>
    %208 = vector.shape_cast %207 : vector<1x16x3xbf16> to vector<16x3xbf16>
    %209 = vector.extract_strided_slice %181 {offsets = [1, 0, 0], sizes = [1, 16, 3], strides = [1, 1, 1]} : vector<9x17x3xbf16> to vector<1x16x3xbf16>
    %210 = vector.shape_cast %209 : vector<1x16x3xbf16> to vector<16x3xbf16>
    %211 = vector.extract_strided_slice %183 {offsets = [1, 0, 0], sizes = [1, 16, 3], strides = [1, 1, 1]} : vector<9x17x3xbf16> to vector<1x16x3xbf16>
    %212 = vector.shape_cast %211 : vector<1x16x3xbf16> to vector<16x3xbf16>
    %213 = vector.extract_strided_slice %181 {offsets = [1, 1, 0], sizes = [1, 16, 3], strides = [1, 1, 1]} : vector<9x17x3xbf16> to vector<1x16x3xbf16>
    %214 = vector.shape_cast %213 : vector<1x16x3xbf16> to vector<16x3xbf16>
    %215 = vector.extract_strided_slice %177 {offsets = [2, 0, 0], sizes = [1, 16, 3], strides = [1, 1, 1]} : vector<9x17x3xbf16> to vector<1x16x3xbf16>
    %216 = vector.shape_cast %215 : vector<1x16x3xbf16> to vector<16x3xbf16>
    %217 = vector.extract_strided_slice %179 {offsets = [2, 0, 0], sizes = [1, 16, 3], strides = [1, 1, 1]} : vector<9x17x3xbf16> to vector<1x16x3xbf16>
    %218 = vector.shape_cast %217 : vector<1x16x3xbf16> to vector<16x3xbf16>
    %219 = vector.extract_strided_slice %177 {offsets = [2, 1, 0], sizes = [1, 16, 3], strides = [1, 1, 1]} : vector<9x17x3xbf16> to vector<1x16x3xbf16>
    %220 = vector.shape_cast %219 : vector<1x16x3xbf16> to vector<16x3xbf16>
    %221 = tpu.concatenate %204, %206, %208, %210, %212, %214, %216, %218, %220 in 1 : vector<16x3xbf16>, vector<16x3xbf16>, vector<16x3xbf16>, vector<16x3xbf16>, vector<16x3xbf16>, vector<16x3xbf16>, vector<16x3xbf16>, vector<16x3xbf16>, vector<16x3xbf16> -> vector<16x27xbf16>
    %222 = vector.extract_strided_slice %177 {offsets = [2, 0, 0], sizes = [1, 16, 3], strides = [1, 1, 1]} : vector<9x17x3xbf16> to vector<1x16x3xbf16>
    %223 = vector.shape_cast %222 : vector<1x16x3xbf16> to vector<16x3xbf16>
    %224 = vector.extract_strided_slice %179 {offsets = [2, 0, 0], sizes = [1, 16, 3], strides = [1, 1, 1]} : vector<9x17x3xbf16> to vector<1x16x3xbf16>
    %225 = vector.shape_cast %224 : vector<1x16x3xbf16> to vector<16x3xbf16>
    %226 = vector.extract_strided_slice %177 {offsets = [2, 1, 0], sizes = [1, 16, 3], strides = [1, 1, 1]} : vector<9x17x3xbf16> to vector<1x16x3xbf16>
    %227 = vector.shape_cast %226 : vector<1x16x3xbf16> to vector<16x3xbf16>
    %228 = vector.extract_strided_slice %181 {offsets = [2, 0, 0], sizes = [1, 16, 3], strides = [1, 1, 1]} : vector<9x17x3xbf16> to vector<1x16x3xbf16>
    %229 = vector.shape_cast %228 : vector<1x16x3xbf16> to vector<16x3xbf16>
    %230 = vector.extract_strided_slice %183 {offsets = [2, 0, 0], sizes = [1, 16, 3], strides = [1, 1, 1]} : vector<9x17x3xbf16> to vector<1x16x3xbf16>
    %231 = vector.shape_cast %230 : vector<1x16x3xbf16> to vector<16x3xbf16>
    %232 = vector.extract_strided_slice %181 {offsets = [2, 1, 0], sizes = [1, 16, 3], strides = [1, 1, 1]} : vector<9x17x3xbf16> to vector<1x16x3xbf16>
    %233 = vector.shape_cast %232 : vector<1x16x3xbf16> to vector<16x3xbf16>
    %234 = vector.extract_strided_slice %177 {offsets = [3, 0, 0], sizes = [1, 16, 3], strides = [1, 1, 1]} : vector<9x17x3xbf16> to vector<1x16x3xbf16>
    %235 = vector.shape_cast %234 : vector<1x16x3xbf16> to vector<16x3xbf16>
    %236 = vector.extract_strided_slice %179 {offsets = [3, 0, 0], sizes = [1, 16, 3], strides = [1, 1, 1]} : vector<9x17x3xbf16> to vector<1x16x3xbf16>
    %237 = vector.shape_cast %236 : vector<1x16x3xbf16> to vector<16x3xbf16>
    %238 = vector.extract_strided_slice %177 {offsets = [3, 1, 0], sizes = [1, 16, 3], strides = [1, 1, 1]} : vector<9x17x3xbf16> to vector<1x16x3xbf16>
    %239 = vector.shape_cast %238 : vector<1x16x3xbf16> to vector<16x3xbf16>
    %240 = tpu.concatenate %223, %225, %227, %229, %231, %233, %235, %237, %239 in 1 : vector<16x3xbf16>, vector<16x3xbf16>, vector<16x3xbf16>, vector<16x3xbf16>, vector<16x3xbf16>, vector<16x3xbf16>, vector<16x3xbf16>, vector<16x3xbf16>, vector<16x3xbf16> -> vector<16x27xbf16>
    %241 = vector.extract_strided_slice %177 {offsets = [3, 0, 0], sizes = [1, 16, 3], strides = [1, 1, 1]} : vector<9x17x3xbf16> to vector<1x16x3xbf16>
    %242 = vector.shape_cast %241 : vector<1x16x3xbf16> to vector<16x3xbf16>
    %243 = vector.extract_strided_slice %179 {offsets = [3, 0, 0], sizes = [1, 16, 3], strides = [1, 1, 1]} : vector<9x17x3xbf16> to vector<1x16x3xbf16>
    %244 = vector.shape_cast %243 : vector<1x16x3xbf16> to vector<16x3xbf16>
    %245 = vector.extract_strided_slice %177 {offsets = [3, 1, 0], sizes = [1, 16, 3], strides = [1, 1, 1]} : vector<9x17x3xbf16> to vector<1x16x3xbf16>
    %246 = vector.shape_cast %245 : vector<1x16x3xbf16> to vector<16x3xbf16>
    %247 = vector.extract_strided_slice %181 {offsets = [3, 0, 0], sizes = [1, 16, 3], strides = [1, 1, 1]} : vector<9x17x3xbf16> to vector<1x16x3xbf16>
    %248 = vector.shape_cast %247 : vector<1x16x3xbf16> to vector<16x3xbf16>
    %249 = vector.extract_strided_slice %183 {offsets = [3, 0, 0], sizes = [1, 16, 3], strides = [1, 1, 1]} : vector<9x17x3xbf16> to vector<1x16x3xbf16>
    %250 = vector.shape_cast %249 : vector<1x16x3xbf16> to vector<16x3xbf16>
    %251 = vector.extract_strided_slice %181 {offsets = [3, 1, 0], sizes = [1, 16, 3], strides = [1, 1, 1]} : vector<9x17x3xbf16> to vector<1x16x3xbf16>
    %252 = vector.shape_cast %251 : vector<1x16x3xbf16> to vector<16x3xbf16>
    %253 = vector.extract_strided_slice %177 {offsets = [4, 0, 0], sizes = [1, 16, 3], strides = [1, 1, 1]} : vector<9x17x3xbf16> to vector<1x16x3xbf16>
    %254 = vector.shape_cast %253 : vector<1x16x3xbf16> to vector<16x3xbf16>
    %255 = vector.extract_strided_slice %179 {offsets = [4, 0, 0], sizes = [1, 16, 3], strides = [1, 1, 1]} : vector<9x17x3xbf16> to vector<1x16x3xbf16>
    %256 = vector.shape_cast %255 : vector<1x16x3xbf16> to vector<16x3xbf16>
    %257 = vector.extract_strided_slice %177 {offsets = [4, 1, 0], sizes = [1, 16, 3], strides = [1, 1, 1]} : vector<9x17x3xbf16> to vector<1x16x3xbf16>
    %258 = vector.shape_cast %257 : vector<1x16x3xbf16> to vector<16x3xbf16>
    %259 = tpu.concatenate %242, %244, %246, %248, %250, %252, %254, %256, %258 in 1 : vector<16x3xbf16>, vector<16x3xbf16>, vector<16x3xbf16>, vector<16x3xbf16>, vector<16x3xbf16>, vector<16x3xbf16>, vector<16x3xbf16>, vector<16x3xbf16>, vector<16x3xbf16> -> vector<16x27xbf16>
    %260 = vector.extract_strided_slice %177 {offsets = [4, 0, 0], sizes = [1, 16, 3], strides = [1, 1, 1]} : vector<9x17x3xbf16> to vector<1x16x3xbf16>
    %261 = vector.shape_cast %260 : vector<1x16x3xbf16> to vector<16x3xbf16>
    %262 = vector.extract_strided_slice %179 {offsets = [4, 0, 0], sizes = [1, 16, 3], strides = [1, 1, 1]} : vector<9x17x3xbf16> to vector<1x16x3xbf16>
    %263 = vector.shape_cast %262 : vector<1x16x3xbf16> to vector<16x3xbf16>
    %264 = vector.extract_strided_slice %177 {offsets = [4, 1, 0], sizes = [1, 16, 3], strides = [1, 1, 1]} : vector<9x17x3xbf16> to vector<1x16x3xbf16>
    %265 = vector.shape_cast %264 : vector<1x16x3xbf16> to vector<16x3xbf16>
    %266 = vector.extract_strided_slice %181 {offsets = [4, 0, 0], sizes = [1, 16, 3], strides = [1, 1, 1]} : vector<9x17x3xbf16> to vector<1x16x3xbf16>
    %267 = vector.shape_cast %266 : vector<1x16x3xbf16> to vector<16x3xbf16>
    %268 = vector.extract_strided_slice %183 {offsets = [4, 0, 0], sizes = [1, 16, 3], strides = [1, 1, 1]} : vector<9x17x3xbf16> to vector<1x16x3xbf16>
    %269 = vector.shape_cast %268 : vector<1x16x3xbf16> to vector<16x3xbf16>
    %270 = vector.extract_strided_slice %181 {offsets = [4, 1, 0], sizes = [1, 16, 3], strides = [1, 1, 1]} : vector<9x17x3xbf16> to vector<1x16x3xbf16>
    %271 = vector.shape_cast %270 : vector<1x16x3xbf16> to vector<16x3xbf16>
    %272 = vector.extract_strided_slice %177 {offsets = [5, 0, 0], sizes = [1, 16, 3], strides = [1, 1, 1]} : vector<9x17x3xbf16> to vector<1x16x3xbf16>
    %273 = vector.shape_cast %272 : vector<1x16x3xbf16> to vector<16x3xbf16>
    %274 = vector.extract_strided_slice %179 {offsets = [5, 0, 0], sizes = [1, 16, 3], strides = [1, 1, 1]} : vector<9x17x3xbf16> to vector<1x16x3xbf16>
    %275 = vector.shape_cast %274 : vector<1x16x3xbf16> to vector<16x3xbf16>
    %276 = vector.extract_strided_slice %177 {offsets = [5, 1, 0], sizes = [1, 16, 3], strides = [1, 1, 1]} : vector<9x17x3xbf16> to vector<1x16x3xbf16>
    %277 = vector.shape_cast %276 : vector<1x16x3xbf16> to vector<16x3xbf16>
    %278 = tpu.concatenate %261, %263, %265, %267, %269, %271, %273, %275, %277 in 1 : vector<16x3xbf16>, vector<16x3xbf16>, vector<16x3xbf16>, vector<16x3xbf16>, vector<16x3xbf16>, vector<16x3xbf16>, vector<16x3xbf16>, vector<16x3xbf16>, vector<16x3xbf16> -> vector<16x27xbf16>
    %279 = vector.extract_strided_slice %177 {offsets = [5, 0, 0], sizes = [1, 16, 3], strides = [1, 1, 1]} : vector<9x17x3xbf16> to vector<1x16x3xbf16>
    %280 = vector.shape_cast %279 : vector<1x16x3xbf16> to vector<16x3xbf16>
    %281 = vector.extract_strided_slice %179 {offsets = [5, 0, 0], sizes = [1, 16, 3], strides = [1, 1, 1]} : vector<9x17x3xbf16> to vector<1x16x3xbf16>
    %282 = vector.shape_cast %281 : vector<1x16x3xbf16> to vector<16x3xbf16>
    %283 = vector.extract_strided_slice %177 {offsets = [5, 1, 0], sizes = [1, 16, 3], strides = [1, 1, 1]} : vector<9x17x3xbf16> to vector<1x16x3xbf16>
    %284 = vector.shape_cast %283 : vector<1x16x3xbf16> to vector<16x3xbf16>
    %285 = vector.extract_strided_slice %181 {offsets = [5, 0, 0], sizes = [1, 16, 3], strides = [1, 1, 1]} : vector<9x17x3xbf16> to vector<1x16x3xbf16>
    %286 = vector.shape_cast %285 : vector<1x16x3xbf16> to vector<16x3xbf16>
    %287 = vector.extract_strided_slice %183 {offsets = [5, 0, 0], sizes = [1, 16, 3], strides = [1, 1, 1]} : vector<9x17x3xbf16> to vector<1x16x3xbf16>
    %288 = vector.shape_cast %287 : vector<1x16x3xbf16> to vector<16x3xbf16>
    %289 = vector.extract_strided_slice %181 {offsets = [5, 1, 0], sizes = [1, 16, 3], strides = [1, 1, 1]} : vector<9x17x3xbf16> to vector<1x16x3xbf16>
    %290 = vector.shape_cast %289 : vector<1x16x3xbf16> to vector<16x3xbf16>
    %291 = vector.extract_strided_slice %177 {offsets = [6, 0, 0], sizes = [1, 16, 3], strides = [1, 1, 1]} : vector<9x17x3xbf16> to vector<1x16x3xbf16>
    %292 = vector.shape_cast %291 : vector<1x16x3xbf16> to vector<16x3xbf16>
    %293 = vector.extract_strided_slice %179 {offsets = [6, 0, 0], sizes = [1, 16, 3], strides = [1, 1, 1]} : vector<9x17x3xbf16> to vector<1x16x3xbf16>
    %294 = vector.shape_cast %293 : vector<1x16x3xbf16> to vector<16x3xbf16>
    %295 = vector.extract_strided_slice %177 {offsets = [6, 1, 0], sizes = [1, 16, 3], strides = [1, 1, 1]} : vector<9x17x3xbf16> to vector<1x16x3xbf16>
    %296 = vector.shape_cast %295 : vector<1x16x3xbf16> to vector<16x3xbf16>
    %297 = tpu.concatenate %280, %282, %284, %286, %288, %290, %292, %294, %296 in 1 : vector<16x3xbf16>, vector<16x3xbf16>, vector<16x3xbf16>, vector<16x3xbf16>, vector<16x3xbf16>, vector<16x3xbf16>, vector<16x3xbf16>, vector<16x3xbf16>, vector<16x3xbf16> -> vector<16x27xbf16>
    %298 = vector.extract_strided_slice %177 {offsets = [6, 0, 0], sizes = [1, 16, 3], strides = [1, 1, 1]} : vector<9x17x3xbf16> to vector<1x16x3xbf16>
    %299 = vector.shape_cast %298 : vector<1x16x3xbf16> to vector<16x3xbf16>
    %300 = vector.extract_strided_slice %179 {offsets = [6, 0, 0], sizes = [1, 16, 3], strides = [1, 1, 1]} : vector<9x17x3xbf16> to vector<1x16x3xbf16>
    %301 = vector.shape_cast %300 : vector<1x16x3xbf16> to vector<16x3xbf16>
    %302 = vector.extract_strided_slice %177 {offsets = [6, 1, 0], sizes = [1, 16, 3], strides = [1, 1, 1]} : vector<9x17x3xbf16> to vector<1x16x3xbf16>
    %303 = vector.shape_cast %302 : vector<1x16x3xbf16> to vector<16x3xbf16>
    %304 = vector.extract_strided_slice %181 {offsets = [6, 0, 0], sizes = [1, 16, 3], strides = [1, 1, 1]} : vector<9x17x3xbf16> to vector<1x16x3xbf16>
    %305 = vector.shape_cast %304 : vector<1x16x3xbf16> to vector<16x3xbf16>
    %306 = vector.extract_strided_slice %183 {offsets = [6, 0, 0], sizes = [1, 16, 3], strides = [1, 1, 1]} : vector<9x17x3xbf16> to vector<1x16x3xbf16>
    %307 = vector.shape_cast %306 : vector<1x16x3xbf16> to vector<16x3xbf16>
    %308 = vector.extract_strided_slice %181 {offsets = [6, 1, 0], sizes = [1, 16, 3], strides = [1, 1, 1]} : vector<9x17x3xbf16> to vector<1x16x3xbf16>
    %309 = vector.shape_cast %308 : vector<1x16x3xbf16> to vector<16x3xbf16>
    %310 = vector.extract_strided_slice %177 {offsets = [7, 0, 0], sizes = [1, 16, 3], strides = [1, 1, 1]} : vector<9x17x3xbf16> to vector<1x16x3xbf16>
    %311 = vector.shape_cast %310 : vector<1x16x3xbf16> to vector<16x3xbf16>
    %312 = vector.extract_strided_slice %179 {offsets = [7, 0, 0], sizes = [1, 16, 3], strides = [1, 1, 1]} : vector<9x17x3xbf16> to vector<1x16x3xbf16>
    %313 = vector.shape_cast %312 : vector<1x16x3xbf16> to vector<16x3xbf16>
    %314 = vector.extract_strided_slice %177 {offsets = [7, 1, 0], sizes = [1, 16, 3], strides = [1, 1, 1]} : vector<9x17x3xbf16> to vector<1x16x3xbf16>
    %315 = vector.shape_cast %314 : vector<1x16x3xbf16> to vector<16x3xbf16>
    %316 = tpu.concatenate %299, %301, %303, %305, %307, %309, %311, %313, %315 in 1 : vector<16x3xbf16>, vector<16x3xbf16>, vector<16x3xbf16>, vector<16x3xbf16>, vector<16x3xbf16>, vector<16x3xbf16>, vector<16x3xbf16>, vector<16x3xbf16>, vector<16x3xbf16> -> vector<16x27xbf16>
    %317 = vector.extract_strided_slice %177 {offsets = [7, 0, 0], sizes = [1, 16, 3], strides = [1, 1, 1]} : vector<9x17x3xbf16> to vector<1x16x3xbf16>
    %318 = vector.shape_cast %317 : vector<1x16x3xbf16> to vector<16x3xbf16>
    %319 = vector.extract_strided_slice %179 {offsets = [7, 0, 0], sizes = [1, 16, 3], strides = [1, 1, 1]} : vector<9x17x3xbf16> to vector<1x16x3xbf16>
    %320 = vector.shape_cast %319 : vector<1x16x3xbf16> to vector<16x3xbf16>
    %321 = vector.extract_strided_slice %177 {offsets = [7, 1, 0], sizes = [1, 16, 3], strides = [1, 1, 1]} : vector<9x17x3xbf16> to vector<1x16x3xbf16>
    %322 = vector.shape_cast %321 : vector<1x16x3xbf16> to vector<16x3xbf16>
    %323 = vector.extract_strided_slice %181 {offsets = [7, 0, 0], sizes = [1, 16, 3], strides = [1, 1, 1]} : vector<9x17x3xbf16> to vector<1x16x3xbf16>
    %324 = vector.shape_cast %323 : vector<1x16x3xbf16> to vector<16x3xbf16>
    %325 = vector.extract_strided_slice %183 {offsets = [7, 0, 0], sizes = [1, 16, 3], strides = [1, 1, 1]} : vector<9x17x3xbf16> to vector<1x16x3xbf16>
    %326 = vector.shape_cast %325 : vector<1x16x3xbf16> to vector<16x3xbf16>
    %327 = vector.extract_strided_slice %181 {offsets = [7, 1, 0], sizes = [1, 16, 3], strides = [1, 1, 1]} : vector<9x17x3xbf16> to vector<1x16x3xbf16>
    %328 = vector.shape_cast %327 : vector<1x16x3xbf16> to vector<16x3xbf16>
    %329 = vector.extract_strided_slice %177 {offsets = [8, 0, 0], sizes = [1, 16, 3], strides = [1, 1, 1]} : vector<9x17x3xbf16> to vector<1x16x3xbf16>
    %330 = vector.shape_cast %329 : vector<1x16x3xbf16> to vector<16x3xbf16>
    %331 = vector.extract_strided_slice %179 {offsets = [8, 0, 0], sizes = [1, 16, 3], strides = [1, 1, 1]} : vector<9x17x3xbf16> to vector<1x16x3xbf16>
    %332 = vector.shape_cast %331 : vector<1x16x3xbf16> to vector<16x3xbf16>
    %333 = vector.extract_strided_slice %177 {offsets = [8, 1, 0], sizes = [1, 16, 3], strides = [1, 1, 1]} : vector<9x17x3xbf16> to vector<1x16x3xbf16>
    %334 = vector.shape_cast %333 : vector<1x16x3xbf16> to vector<16x3xbf16>
    %335 = tpu.concatenate %318, %320, %322, %324, %326, %328, %330, %332, %334 in 1 : vector<16x3xbf16>, vector<16x3xbf16>, vector<16x3xbf16>, vector<16x3xbf16>, vector<16x3xbf16>, vector<16x3xbf16>, vector<16x3xbf16>, vector<16x3xbf16>, vector<16x3xbf16> -> vector<16x27xbf16>
    %336 = tpu.concatenate %202, %221, %240, %259, %278, %297, %316, %335 in 0 : vector<16x27xbf16>, vector<16x27xbf16>, vector<16x27xbf16>, vector<16x27xbf16>, vector<16x27xbf16>, vector<16x27xbf16>, vector<16x27xbf16>, vector<16x27xbf16> -> vector<128x27xbf16>
    %cst_44 = arith.constant dense<0.000000e+00> : vector<128x16xf32>
    %337 = tpu.matmul %336, %0, %cst_44 {dimension_numbers = #tpu.dot_dimension_numbers<[1], [0], [0], [1], [0, 0, 1, 1], [], []>} : vector<128x27xbf16>, vector<27x16xbf16>, vector<128x16xf32> -> vector<128x16xf32>
    %338 = arith.addf %337, %3 : vector<128x16xf32>
    %cst_45 = arith.constant 0.000000e+00 : f32
    %339 = vector.broadcast %cst_45 : f32 to vector<128x16xf32>
    %340 = arith.cmpf oge, %338, %339 : vector<128x16xf32>
    %cst_46 = arith.constant 1.000000e-01 : f32
    %341 = vector.broadcast %cst_46 : f32 to vector<128x16xf32>
    %342 = arith.mulf %341, %338 : vector<128x16xf32>
    %343 = arith.select %340, %338, %342 : vector<128x16xi1>, vector<128x16xf32>
    %344 = arith.truncf %343 : vector<128x16xf32> to vector<128x16xbf16>
    %c0_47 = arith.constant 0 : index
    %c128 = arith.constant 128 : index
    %c0_48 = arith.constant 0 : index
    %345 = vector.load %arg4[%c0_47, %c128, %c0_48] : memref<1x256x16xbf16, #tpu.memory_space<vmem>>, vector<1x128x16xbf16>
    %346 = vector.shape_cast %345 : vector<1x128x16xbf16> to vector<128x16xbf16>
    %347 = vector.shape_cast %344 : vector<128x16xbf16> to vector<1x128x16xbf16>
    tpu.vector_store %arg4[%c0_47, %c128, %c0_48], %347 {strides = array<i32>} : memref<1x256x16xbf16, #tpu.memory_space<vmem>>, vector<1x128x16xbf16>,
    return
  }
  func.func @transform_0(%arg0: i32) -> (i32, i32, i32, i32, i32) {
    %c0_i32 = arith.constant 0 : i32
    %c0_i32_0 = arith.constant 0 : i32
    %c0_i32_1 = arith.constant 0 : i32
    %c0_i32_2 = arith.constant 0 : i32
    %c0_i32_3 = arith.constant 0 : i32
    return %arg0, %c0_i32, %c0_i32_0, %c0_i32_1, %c0_i32_2 : i32, i32, i32, i32, i32
  }
  func.func @transform_1(%arg0: i32) -> (i32, i32) {
    %c0_i32 = arith.constant 0 : i32
    %c0_i32_0 = arith.constant 0 : i32
    %c0_i32_1 = arith.constant 0 : i32
    return %c0_i32, %c0_i32_0 : i32, i32
  }
  func.func @transform_2(%arg0: i32) -> (i32, i32) {
    %c0_i32 = arith.constant 0 : i32
    %c0_i32_0 = arith.constant 0 : i32
    %c0_i32_1 = arith.constant 0 : i32
    return %c0_i32, %c0_i32_0 : i32, i32
  }
  func.func @transform_3(%arg0: i32) -> (i32, i32, i32) {
    %c0_i32 = arith.constant 0 : i32
    %c0_i32_0 = arith.constant 0 : i32
    %c0_i32_1 = arith.constant 0 : i32
    return %arg0, %c0_i32, %c0_i32_0 : i32, i32, i32
  }
}

module attributes {stable_mosaic.version = 11 : i64} {
  func.func @_conv3x3_kernel(%arg0: i32, %arg1: memref<1x4x9x9x16xbf16, #tpu.memory_space<vmem>>, %arg2: memref<144x32xbf16, #tpu.memory_space<vmem>>, %arg3: memref<1x32xf32, #tpu.memory_space<vmem>>, %arg4: memref<1x64x32xbf16, #tpu.memory_space<vmem>>) attributes {dimension_semantics = [#tpu.dimension_semantics<parallel>], iteration_bounds = array<i64: 2>, scalar_prefetch = 0 : i64, scratch_operands = 0 : i64, tpu.core_type = #tpu.core_type<tc>, window_params = [{transform_indices = @transform_0, window_bounds = array<i64: 1, 4, 9, 9, 16>}, {pipeline_mode = #tpu.pipeline_mode<synchronous>, transform_indices = @transform_1, window_bounds = array<i64: 144, 32>}, {pipeline_mode = #tpu.pipeline_mode<synchronous>, transform_indices = @transform_2, window_bounds = array<i64: 1, 32>}, {transform_indices = @transform_3, window_bounds = array<i64: 1, 64, 32>}]} {
    %c0 = arith.constant 0 : index
    %c0_0 = arith.constant 0 : index
    %0 = vector.load %arg2[%c0, %c0_0] : memref<144x32xbf16, #tpu.memory_space<vmem>>, vector<144x32xbf16>
    %c0_1 = arith.constant 0 : index
    %c0_2 = arith.constant 0 : index
    %1 = vector.load %arg3[%c0_1, %c0_2] : memref<1x32xf32, #tpu.memory_space<vmem>>, vector<1x32xf32>
    %2 = vector.shape_cast %1 : vector<1x32xf32> to vector<1x32xf32>
    %3 = vector.broadcast %2 : vector<1x32xf32> to vector<64x32xf32>
    %c0_3 = arith.constant 0 : index
    %c0_4 = arith.constant 0 : index
    %c0_5 = arith.constant 0 : index
    %c0_6 = arith.constant 0 : index
    %c0_7 = arith.constant 0 : index
    %4 = vector.load %arg1[%c0_3, %c0_4, %c0_5, %c0_6, %c0_7] : memref<1x4x9x9x16xbf16, #tpu.memory_space<vmem>>, vector<1x1x9x9x16xbf16>
    %5 = vector.shape_cast %4 : vector<1x1x9x9x16xbf16> to vector<9x9x16xbf16>
    %c0_8 = arith.constant 0 : index
    %c1 = arith.constant 1 : index
    %c0_9 = arith.constant 0 : index
    %c0_10 = arith.constant 0 : index
    %c0_11 = arith.constant 0 : index
    %6 = vector.load %arg1[%c0_8, %c1, %c0_9, %c0_10, %c0_11] : memref<1x4x9x9x16xbf16, #tpu.memory_space<vmem>>, vector<1x1x9x9x16xbf16>
    %7 = vector.shape_cast %6 : vector<1x1x9x9x16xbf16> to vector<9x9x16xbf16>
    %c0_12 = arith.constant 0 : index
    %c2 = arith.constant 2 : index
    %c0_13 = arith.constant 0 : index
    %c0_14 = arith.constant 0 : index
    %c0_15 = arith.constant 0 : index
    %8 = vector.load %arg1[%c0_12, %c2, %c0_13, %c0_14, %c0_15] : memref<1x4x9x9x16xbf16, #tpu.memory_space<vmem>>, vector<1x1x9x9x16xbf16>
    %9 = vector.shape_cast %8 : vector<1x1x9x9x16xbf16> to vector<9x9x16xbf16>
    %c0_16 = arith.constant 0 : index
    %c3 = arith.constant 3 : index
    %c0_17 = arith.constant 0 : index
    %c0_18 = arith.constant 0 : index
    %c0_19 = arith.constant 0 : index
    %10 = vector.load %arg1[%c0_16, %c3, %c0_17, %c0_18, %c0_19] : memref<1x4x9x9x16xbf16, #tpu.memory_space<vmem>>, vector<1x1x9x9x16xbf16>
    %11 = vector.shape_cast %10 : vector<1x1x9x9x16xbf16> to vector<9x9x16xbf16>
    %12 = vector.extract_strided_slice %5 {offsets = [0, 0, 0], sizes = [1, 8, 16], strides = [1, 1, 1]} : vector<9x9x16xbf16> to vector<1x8x16xbf16>
    %13 = vector.shape_cast %12 : vector<1x8x16xbf16> to vector<8x16xbf16>
    %14 = vector.extract_strided_slice %7 {offsets = [0, 0, 0], sizes = [1, 8, 16], strides = [1, 1, 1]} : vector<9x9x16xbf16> to vector<1x8x16xbf16>
    %15 = vector.shape_cast %14 : vector<1x8x16xbf16> to vector<8x16xbf16>
    %16 = vector.extract_strided_slice %5 {offsets = [0, 1, 0], sizes = [1, 8, 16], strides = [1, 1, 1]} : vector<9x9x16xbf16> to vector<1x8x16xbf16>
    %17 = vector.shape_cast %16 : vector<1x8x16xbf16> to vector<8x16xbf16>
    %18 = vector.extract_strided_slice %9 {offsets = [0, 0, 0], sizes = [1, 8, 16], strides = [1, 1, 1]} : vector<9x9x16xbf16> to vector<1x8x16xbf16>
    %19 = vector.shape_cast %18 : vector<1x8x16xbf16> to vector<8x16xbf16>
    %20 = vector.extract_strided_slice %11 {offsets = [0, 0, 0], sizes = [1, 8, 16], strides = [1, 1, 1]} : vector<9x9x16xbf16> to vector<1x8x16xbf16>
    %21 = vector.shape_cast %20 : vector<1x8x16xbf16> to vector<8x16xbf16>
    %22 = vector.extract_strided_slice %9 {offsets = [0, 1, 0], sizes = [1, 8, 16], strides = [1, 1, 1]} : vector<9x9x16xbf16> to vector<1x8x16xbf16>
    %23 = vector.shape_cast %22 : vector<1x8x16xbf16> to vector<8x16xbf16>
    %24 = vector.extract_strided_slice %5 {offsets = [1, 0, 0], sizes = [1, 8, 16], strides = [1, 1, 1]} : vector<9x9x16xbf16> to vector<1x8x16xbf16>
    %25 = vector.shape_cast %24 : vector<1x8x16xbf16> to vector<8x16xbf16>
    %26 = vector.extract_strided_slice %7 {offsets = [1, 0, 0], sizes = [1, 8, 16], strides = [1, 1, 1]} : vector<9x9x16xbf16> to vector<1x8x16xbf16>
    %27 = vector.shape_cast %26 : vector<1x8x16xbf16> to vector<8x16xbf16>
    %28 = vector.extract_strided_slice %5 {offsets = [1, 1, 0], sizes = [1, 8, 16], strides = [1, 1, 1]} : vector<9x9x16xbf16> to vector<1x8x16xbf16>
    %29 = vector.shape_cast %28 : vector<1x8x16xbf16> to vector<8x16xbf16>
    %30 = tpu.concatenate %13, %15, %17, %19, %21, %23, %25, %27, %29 in 1 : vector<8x16xbf16>, vector<8x16xbf16>, vector<8x16xbf16>, vector<8x16xbf16>, vector<8x16xbf16>, vector<8x16xbf16>, vector<8x16xbf16>, vector<8x16xbf16>, vector<8x16xbf16> -> vector<8x144xbf16>
    %31 = vector.extract_strided_slice %5 {offsets = [1, 0, 0], sizes = [1, 8, 16], strides = [1, 1, 1]} : vector<9x9x16xbf16> to vector<1x8x16xbf16>
    %32 = vector.shape_cast %31 : vector<1x8x16xbf16> to vector<8x16xbf16>
    %33 = vector.extract_strided_slice %7 {offsets = [1, 0, 0], sizes = [1, 8, 16], strides = [1, 1, 1]} : vector<9x9x16xbf16> to vector<1x8x16xbf16>
    %34 = vector.shape_cast %33 : vector<1x8x16xbf16> to vector<8x16xbf16>
    %35 = vector.extract_strided_slice %5 {offsets = [1, 1, 0], sizes = [1, 8, 16], strides = [1, 1, 1]} : vector<9x9x16xbf16> to vector<1x8x16xbf16>
    %36 = vector.shape_cast %35 : vector<1x8x16xbf16> to vector<8x16xbf16>
    %37 = vector.extract_strided_slice %9 {offsets = [1, 0, 0], sizes = [1, 8, 16], strides = [1, 1, 1]} : vector<9x9x16xbf16> to vector<1x8x16xbf16>
    %38 = vector.shape_cast %37 : vector<1x8x16xbf16> to vector<8x16xbf16>
    %39 = vector.extract_strided_slice %11 {offsets = [1, 0, 0], sizes = [1, 8, 16], strides = [1, 1, 1]} : vector<9x9x16xbf16> to vector<1x8x16xbf16>
    %40 = vector.shape_cast %39 : vector<1x8x16xbf16> to vector<8x16xbf16>
    %41 = vector.extract_strided_slice %9 {offsets = [1, 1, 0], sizes = [1, 8, 16], strides = [1, 1, 1]} : vector<9x9x16xbf16> to vector<1x8x16xbf16>
    %42 = vector.shape_cast %41 : vector<1x8x16xbf16> to vector<8x16xbf16>
    %43 = vector.extract_strided_slice %5 {offsets = [2, 0, 0], sizes = [1, 8, 16], strides = [1, 1, 1]} : vector<9x9x16xbf16> to vector<1x8x16xbf16>
    %44 = vector.shape_cast %43 : vector<1x8x16xbf16> to vector<8x16xbf16>
    %45 = vector.extract_strided_slice %7 {offsets = [2, 0, 0], sizes = [1, 8, 16], strides = [1, 1, 1]} : vector<9x9x16xbf16> to vector<1x8x16xbf16>
    %46 = vector.shape_cast %45 : vector<1x8x16xbf16> to vector<8x16xbf16>
    %47 = vector.extract_strided_slice %5 {offsets = [2, 1, 0], sizes = [1, 8, 16], strides = [1, 1, 1]} : vector<9x9x16xbf16> to vector<1x8x16xbf16>
    %48 = vector.shape_cast %47 : vector<1x8x16xbf16> to vector<8x16xbf16>
    %49 = tpu.concatenate %32, %34, %36, %38, %40, %42, %44, %46, %48 in 1 : vector<8x16xbf16>, vector<8x16xbf16>, vector<8x16xbf16>, vector<8x16xbf16>, vector<8x16xbf16>, vector<8x16xbf16>, vector<8x16xbf16>, vector<8x16xbf16>, vector<8x16xbf16> -> vector<8x144xbf16>
    %50 = vector.extract_strided_slice %5 {offsets = [2, 0, 0], sizes = [1, 8, 16], strides = [1, 1, 1]} : vector<9x9x16xbf16> to vector<1x8x16xbf16>
    %51 = vector.shape_cast %50 : vector<1x8x16xbf16> to vector<8x16xbf16>
    %52 = vector.extract_strided_slice %7 {offsets = [2, 0, 0], sizes = [1, 8, 16], strides = [1, 1, 1]} : vector<9x9x16xbf16> to vector<1x8x16xbf16>
    %53 = vector.shape_cast %52 : vector<1x8x16xbf16> to vector<8x16xbf16>
    %54 = vector.extract_strided_slice %5 {offsets = [2, 1, 0], sizes = [1, 8, 16], strides = [1, 1, 1]} : vector<9x9x16xbf16> to vector<1x8x16xbf16>
    %55 = vector.shape_cast %54 : vector<1x8x16xbf16> to vector<8x16xbf16>
    %56 = vector.extract_strided_slice %9 {offsets = [2, 0, 0], sizes = [1, 8, 16], strides = [1, 1, 1]} : vector<9x9x16xbf16> to vector<1x8x16xbf16>
    %57 = vector.shape_cast %56 : vector<1x8x16xbf16> to vector<8x16xbf16>
    %58 = vector.extract_strided_slice %11 {offsets = [2, 0, 0], sizes = [1, 8, 16], strides = [1, 1, 1]} : vector<9x9x16xbf16> to vector<1x8x16xbf16>
    %59 = vector.shape_cast %58 : vector<1x8x16xbf16> to vector<8x16xbf16>
    %60 = vector.extract_strided_slice %9 {offsets = [2, 1, 0], sizes = [1, 8, 16], strides = [1, 1, 1]} : vector<9x9x16xbf16> to vector<1x8x16xbf16>
    %61 = vector.shape_cast %60 : vector<1x8x16xbf16> to vector<8x16xbf16>
    %62 = vector.extract_strided_slice %5 {offsets = [3, 0, 0], sizes = [1, 8, 16], strides = [1, 1, 1]} : vector<9x9x16xbf16> to vector<1x8x16xbf16>
    %63 = vector.shape_cast %62 : vector<1x8x16xbf16> to vector<8x16xbf16>
    %64 = vector.extract_strided_slice %7 {offsets = [3, 0, 0], sizes = [1, 8, 16], strides = [1, 1, 1]} : vector<9x9x16xbf16> to vector<1x8x16xbf16>
    %65 = vector.shape_cast %64 : vector<1x8x16xbf16> to vector<8x16xbf16>
    %66 = vector.extract_strided_slice %5 {offsets = [3, 1, 0], sizes = [1, 8, 16], strides = [1, 1, 1]} : vector<9x9x16xbf16> to vector<1x8x16xbf16>
    %67 = vector.shape_cast %66 : vector<1x8x16xbf16> to vector<8x16xbf16>
    %68 = tpu.concatenate %51, %53, %55, %57, %59, %61, %63, %65, %67 in 1 : vector<8x16xbf16>, vector<8x16xbf16>, vector<8x16xbf16>, vector<8x16xbf16>, vector<8x16xbf16>, vector<8x16xbf16>, vector<8x16xbf16>, vector<8x16xbf16>, vector<8x16xbf16> -> vector<8x144xbf16>
    %69 = vector.extract_strided_slice %5 {offsets = [3, 0, 0], sizes = [1, 8, 16], strides = [1, 1, 1]} : vector<9x9x16xbf16> to vector<1x8x16xbf16>
    %70 = vector.shape_cast %69 : vector<1x8x16xbf16> to vector<8x16xbf16>
    %71 = vector.extract_strided_slice %7 {offsets = [3, 0, 0], sizes = [1, 8, 16], strides = [1, 1, 1]} : vector<9x9x16xbf16> to vector<1x8x16xbf16>
    %72 = vector.shape_cast %71 : vector<1x8x16xbf16> to vector<8x16xbf16>
    %73 = vector.extract_strided_slice %5 {offsets = [3, 1, 0], sizes = [1, 8, 16], strides = [1, 1, 1]} : vector<9x9x16xbf16> to vector<1x8x16xbf16>
    %74 = vector.shape_cast %73 : vector<1x8x16xbf16> to vector<8x16xbf16>
    %75 = vector.extract_strided_slice %9 {offsets = [3, 0, 0], sizes = [1, 8, 16], strides = [1, 1, 1]} : vector<9x9x16xbf16> to vector<1x8x16xbf16>
    %76 = vector.shape_cast %75 : vector<1x8x16xbf16> to vector<8x16xbf16>
    %77 = vector.extract_strided_slice %11 {offsets = [3, 0, 0], sizes = [1, 8, 16], strides = [1, 1, 1]} : vector<9x9x16xbf16> to vector<1x8x16xbf16>
    %78 = vector.shape_cast %77 : vector<1x8x16xbf16> to vector<8x16xbf16>
    %79 = vector.extract_strided_slice %9 {offsets = [3, 1, 0], sizes = [1, 8, 16], strides = [1, 1, 1]} : vector<9x9x16xbf16> to vector<1x8x16xbf16>
    %80 = vector.shape_cast %79 : vector<1x8x16xbf16> to vector<8x16xbf16>
    %81 = vector.extract_strided_slice %5 {offsets = [4, 0, 0], sizes = [1, 8, 16], strides = [1, 1, 1]} : vector<9x9x16xbf16> to vector<1x8x16xbf16>
    %82 = vector.shape_cast %81 : vector<1x8x16xbf16> to vector<8x16xbf16>
    %83 = vector.extract_strided_slice %7 {offsets = [4, 0, 0], sizes = [1, 8, 16], strides = [1, 1, 1]} : vector<9x9x16xbf16> to vector<1x8x16xbf16>
    %84 = vector.shape_cast %83 : vector<1x8x16xbf16> to vector<8x16xbf16>
    %85 = vector.extract_strided_slice %5 {offsets = [4, 1, 0], sizes = [1, 8, 16], strides = [1, 1, 1]} : vector<9x9x16xbf16> to vector<1x8x16xbf16>
    %86 = vector.shape_cast %85 : vector<1x8x16xbf16> to vector<8x16xbf16>
    %87 = tpu.concatenate %70, %72, %74, %76, %78, %80, %82, %84, %86 in 1 : vector<8x16xbf16>, vector<8x16xbf16>, vector<8x16xbf16>, vector<8x16xbf16>, vector<8x16xbf16>, vector<8x16xbf16>, vector<8x16xbf16>, vector<8x16xbf16>, vector<8x16xbf16> -> vector<8x144xbf16>
    %88 = vector.extract_strided_slice %5 {offsets = [4, 0, 0], sizes = [1, 8, 16], strides = [1, 1, 1]} : vector<9x9x16xbf16> to vector<1x8x16xbf16>
    %89 = vector.shape_cast %88 : vector<1x8x16xbf16> to vector<8x16xbf16>
    %90 = vector.extract_strided_slice %7 {offsets = [4, 0, 0], sizes = [1, 8, 16], strides = [1, 1, 1]} : vector<9x9x16xbf16> to vector<1x8x16xbf16>
    %91 = vector.shape_cast %90 : vector<1x8x16xbf16> to vector<8x16xbf16>
    %92 = vector.extract_strided_slice %5 {offsets = [4, 1, 0], sizes = [1, 8, 16], strides = [1, 1, 1]} : vector<9x9x16xbf16> to vector<1x8x16xbf16>
    %93 = vector.shape_cast %92 : vector<1x8x16xbf16> to vector<8x16xbf16>
    %94 = vector.extract_strided_slice %9 {offsets = [4, 0, 0], sizes = [1, 8, 16], strides = [1, 1, 1]} : vector<9x9x16xbf16> to vector<1x8x16xbf16>
    %95 = vector.shape_cast %94 : vector<1x8x16xbf16> to vector<8x16xbf16>
    %96 = vector.extract_strided_slice %11 {offsets = [4, 0, 0], sizes = [1, 8, 16], strides = [1, 1, 1]} : vector<9x9x16xbf16> to vector<1x8x16xbf16>
    %97 = vector.shape_cast %96 : vector<1x8x16xbf16> to vector<8x16xbf16>
    %98 = vector.extract_strided_slice %9 {offsets = [4, 1, 0], sizes = [1, 8, 16], strides = [1, 1, 1]} : vector<9x9x16xbf16> to vector<1x8x16xbf16>
    %99 = vector.shape_cast %98 : vector<1x8x16xbf16> to vector<8x16xbf16>
    %100 = vector.extract_strided_slice %5 {offsets = [5, 0, 0], sizes = [1, 8, 16], strides = [1, 1, 1]} : vector<9x9x16xbf16> to vector<1x8x16xbf16>
    %101 = vector.shape_cast %100 : vector<1x8x16xbf16> to vector<8x16xbf16>
    %102 = vector.extract_strided_slice %7 {offsets = [5, 0, 0], sizes = [1, 8, 16], strides = [1, 1, 1]} : vector<9x9x16xbf16> to vector<1x8x16xbf16>
    %103 = vector.shape_cast %102 : vector<1x8x16xbf16> to vector<8x16xbf16>
    %104 = vector.extract_strided_slice %5 {offsets = [5, 1, 0], sizes = [1, 8, 16], strides = [1, 1, 1]} : vector<9x9x16xbf16> to vector<1x8x16xbf16>
    %105 = vector.shape_cast %104 : vector<1x8x16xbf16> to vector<8x16xbf16>
    %106 = tpu.concatenate %89, %91, %93, %95, %97, %99, %101, %103, %105 in 1 : vector<8x16xbf16>, vector<8x16xbf16>, vector<8x16xbf16>, vector<8x16xbf16>, vector<8x16xbf16>, vector<8x16xbf16>, vector<8x16xbf16>, vector<8x16xbf16>, vector<8x16xbf16> -> vector<8x144xbf16>
    %107 = vector.extract_strided_slice %5 {offsets = [5, 0, 0], sizes = [1, 8, 16], strides = [1, 1, 1]} : vector<9x9x16xbf16> to vector<1x8x16xbf16>
    %108 = vector.shape_cast %107 : vector<1x8x16xbf16> to vector<8x16xbf16>
    %109 = vector.extract_strided_slice %7 {offsets = [5, 0, 0], sizes = [1, 8, 16], strides = [1, 1, 1]} : vector<9x9x16xbf16> to vector<1x8x16xbf16>
    %110 = vector.shape_cast %109 : vector<1x8x16xbf16> to vector<8x16xbf16>
    %111 = vector.extract_strided_slice %5 {offsets = [5, 1, 0], sizes = [1, 8, 16], strides = [1, 1, 1]} : vector<9x9x16xbf16> to vector<1x8x16xbf16>
    %112 = vector.shape_cast %111 : vector<1x8x16xbf16> to vector<8x16xbf16>
    %113 = vector.extract_strided_slice %9 {offsets = [5, 0, 0], sizes = [1, 8, 16], strides = [1, 1, 1]} : vector<9x9x16xbf16> to vector<1x8x16xbf16>
    %114 = vector.shape_cast %113 : vector<1x8x16xbf16> to vector<8x16xbf16>
    %115 = vector.extract_strided_slice %11 {offsets = [5, 0, 0], sizes = [1, 8, 16], strides = [1, 1, 1]} : vector<9x9x16xbf16> to vector<1x8x16xbf16>
    %116 = vector.shape_cast %115 : vector<1x8x16xbf16> to vector<8x16xbf16>
    %117 = vector.extract_strided_slice %9 {offsets = [5, 1, 0], sizes = [1, 8, 16], strides = [1, 1, 1]} : vector<9x9x16xbf16> to vector<1x8x16xbf16>
    %118 = vector.shape_cast %117 : vector<1x8x16xbf16> to vector<8x16xbf16>
    %119 = vector.extract_strided_slice %5 {offsets = [6, 0, 0], sizes = [1, 8, 16], strides = [1, 1, 1]} : vector<9x9x16xbf16> to vector<1x8x16xbf16>
    %120 = vector.shape_cast %119 : vector<1x8x16xbf16> to vector<8x16xbf16>
    %121 = vector.extract_strided_slice %7 {offsets = [6, 0, 0], sizes = [1, 8, 16], strides = [1, 1, 1]} : vector<9x9x16xbf16> to vector<1x8x16xbf16>
    %122 = vector.shape_cast %121 : vector<1x8x16xbf16> to vector<8x16xbf16>
    %123 = vector.extract_strided_slice %5 {offsets = [6, 1, 0], sizes = [1, 8, 16], strides = [1, 1, 1]} : vector<9x9x16xbf16> to vector<1x8x16xbf16>
    %124 = vector.shape_cast %123 : vector<1x8x16xbf16> to vector<8x16xbf16>
    %125 = tpu.concatenate %108, %110, %112, %114, %116, %118, %120, %122, %124 in 1 : vector<8x16xbf16>, vector<8x16xbf16>, vector<8x16xbf16>, vector<8x16xbf16>, vector<8x16xbf16>, vector<8x16xbf16>, vector<8x16xbf16>, vector<8x16xbf16>, vector<8x16xbf16> -> vector<8x144xbf16>
    %126 = vector.extract_strided_slice %5 {offsets = [6, 0, 0], sizes = [1, 8, 16], strides = [1, 1, 1]} : vector<9x9x16xbf16> to vector<1x8x16xbf16>
    %127 = vector.shape_cast %126 : vector<1x8x16xbf16> to vector<8x16xbf16>
    %128 = vector.extract_strided_slice %7 {offsets = [6, 0, 0], sizes = [1, 8, 16], strides = [1, 1, 1]} : vector<9x9x16xbf16> to vector<1x8x16xbf16>
    %129 = vector.shape_cast %128 : vector<1x8x16xbf16> to vector<8x16xbf16>
    %130 = vector.extract_strided_slice %5 {offsets = [6, 1, 0], sizes = [1, 8, 16], strides = [1, 1, 1]} : vector<9x9x16xbf16> to vector<1x8x16xbf16>
    %131 = vector.shape_cast %130 : vector<1x8x16xbf16> to vector<8x16xbf16>
    %132 = vector.extract_strided_slice %9 {offsets = [6, 0, 0], sizes = [1, 8, 16], strides = [1, 1, 1]} : vector<9x9x16xbf16> to vector<1x8x16xbf16>
    %133 = vector.shape_cast %132 : vector<1x8x16xbf16> to vector<8x16xbf16>
    %134 = vector.extract_strided_slice %11 {offsets = [6, 0, 0], sizes = [1, 8, 16], strides = [1, 1, 1]} : vector<9x9x16xbf16> to vector<1x8x16xbf16>
    %135 = vector.shape_cast %134 : vector<1x8x16xbf16> to vector<8x16xbf16>
    %136 = vector.extract_strided_slice %9 {offsets = [6, 1, 0], sizes = [1, 8, 16], strides = [1, 1, 1]} : vector<9x9x16xbf16> to vector<1x8x16xbf16>
    %137 = vector.shape_cast %136 : vector<1x8x16xbf16> to vector<8x16xbf16>
    %138 = vector.extract_strided_slice %5 {offsets = [7, 0, 0], sizes = [1, 8, 16], strides = [1, 1, 1]} : vector<9x9x16xbf16> to vector<1x8x16xbf16>
    %139 = vector.shape_cast %138 : vector<1x8x16xbf16> to vector<8x16xbf16>
    %140 = vector.extract_strided_slice %7 {offsets = [7, 0, 0], sizes = [1, 8, 16], strides = [1, 1, 1]} : vector<9x9x16xbf16> to vector<1x8x16xbf16>
    %141 = vector.shape_cast %140 : vector<1x8x16xbf16> to vector<8x16xbf16>
    %142 = vector.extract_strided_slice %5 {offsets = [7, 1, 0], sizes = [1, 8, 16], strides = [1, 1, 1]} : vector<9x9x16xbf16> to vector<1x8x16xbf16>
    %143 = vector.shape_cast %142 : vector<1x8x16xbf16> to vector<8x16xbf16>
    %144 = tpu.concatenate %127, %129, %131, %133, %135, %137, %139, %141, %143 in 1 : vector<8x16xbf16>, vector<8x16xbf16>, vector<8x16xbf16>, vector<8x16xbf16>, vector<8x16xbf16>, vector<8x16xbf16>, vector<8x16xbf16>, vector<8x16xbf16>, vector<8x16xbf16> -> vector<8x144xbf16>
    %145 = vector.extract_strided_slice %5 {offsets = [7, 0, 0], sizes = [1, 8, 16], strides = [1, 1, 1]} : vector<9x9x16xbf16> to vector<1x8x16xbf16>
    %146 = vector.shape_cast %145 : vector<1x8x16xbf16> to vector<8x16xbf16>
    %147 = vector.extract_strided_slice %7 {offsets = [7, 0, 0], sizes = [1, 8, 16], strides = [1, 1, 1]} : vector<9x9x16xbf16> to vector<1x8x16xbf16>
    %148 = vector.shape_cast %147 : vector<1x8x16xbf16> to vector<8x16xbf16>
    %149 = vector.extract_strided_slice %5 {offsets = [7, 1, 0], sizes = [1, 8, 16], strides = [1, 1, 1]} : vector<9x9x16xbf16> to vector<1x8x16xbf16>
    %150 = vector.shape_cast %149 : vector<1x8x16xbf16> to vector<8x16xbf16>
    %151 = vector.extract_strided_slice %9 {offsets = [7, 0, 0], sizes = [1, 8, 16], strides = [1, 1, 1]} : vector<9x9x16xbf16> to vector<1x8x16xbf16>
    %152 = vector.shape_cast %151 : vector<1x8x16xbf16> to vector<8x16xbf16>
    %153 = vector.extract_strided_slice %11 {offsets = [7, 0, 0], sizes = [1, 8, 16], strides = [1, 1, 1]} : vector<9x9x16xbf16> to vector<1x8x16xbf16>
    %154 = vector.shape_cast %153 : vector<1x8x16xbf16> to vector<8x16xbf16>
    %155 = vector.extract_strided_slice %9 {offsets = [7, 1, 0], sizes = [1, 8, 16], strides = [1, 1, 1]} : vector<9x9x16xbf16> to vector<1x8x16xbf16>
    %156 = vector.shape_cast %155 : vector<1x8x16xbf16> to vector<8x16xbf16>
    %157 = vector.extract_strided_slice %5 {offsets = [8, 0, 0], sizes = [1, 8, 16], strides = [1, 1, 1]} : vector<9x9x16xbf16> to vector<1x8x16xbf16>
    %158 = vector.shape_cast %157 : vector<1x8x16xbf16> to vector<8x16xbf16>
    %159 = vector.extract_strided_slice %7 {offsets = [8, 0, 0], sizes = [1, 8, 16], strides = [1, 1, 1]} : vector<9x9x16xbf16> to vector<1x8x16xbf16>
    %160 = vector.shape_cast %159 : vector<1x8x16xbf16> to vector<8x16xbf16>
    %161 = vector.extract_strided_slice %5 {offsets = [8, 1, 0], sizes = [1, 8, 16], strides = [1, 1, 1]} : vector<9x9x16xbf16> to vector<1x8x16xbf16>
    %162 = vector.shape_cast %161 : vector<1x8x16xbf16> to vector<8x16xbf16>
    %163 = tpu.concatenate %146, %148, %150, %152, %154, %156, %158, %160, %162 in 1 : vector<8x16xbf16>, vector<8x16xbf16>, vector<8x16xbf16>, vector<8x16xbf16>, vector<8x16xbf16>, vector<8x16xbf16>, vector<8x16xbf16>, vector<8x16xbf16>, vector<8x16xbf16> -> vector<8x144xbf16>
    %164 = tpu.concatenate %30, %49, %68, %87, %106, %125, %144, %163 in 0 : vector<8x144xbf16>, vector<8x144xbf16>, vector<8x144xbf16>, vector<8x144xbf16>, vector<8x144xbf16>, vector<8x144xbf16>, vector<8x144xbf16>, vector<8x144xbf16> -> vector<64x144xbf16>
    %cst = arith.constant dense<0.000000e+00> : vector<64x32xf32>
    %165 = tpu.matmul %164, %0, %cst {dimension_numbers = #tpu.dot_dimension_numbers<[1], [0], [0], [1], [0, 0, 1, 1], [], []>} : vector<64x144xbf16>, vector<144x32xbf16>, vector<64x32xf32> -> vector<64x32xf32>
    %166 = arith.addf %165, %3 : vector<64x32xf32>
    %cst_20 = arith.constant 0.000000e+00 : f32
    %167 = vector.broadcast %cst_20 : f32 to vector<64x32xf32>
    %168 = arith.cmpf oge, %166, %167 : vector<64x32xf32>
    %cst_21 = arith.constant 1.000000e-01 : f32
    %169 = vector.broadcast %cst_21 : f32 to vector<64x32xf32>
    %170 = arith.mulf %169, %166 : vector<64x32xf32>
    %171 = arith.select %168, %166, %170 : vector<64x32xi1>, vector<64x32xf32>
    %172 = arith.truncf %171 : vector<64x32xf32> to vector<64x32xbf16>
    %c0_22 = arith.constant 0 : index
    %c0_23 = arith.constant 0 : index
    %c0_24 = arith.constant 0 : index
    %173 = vector.load %arg4[%c0_22, %c0_23, %c0_24] : memref<1x64x32xbf16, #tpu.memory_space<vmem>>, vector<1x64x32xbf16>
    %174 = vector.shape_cast %173 : vector<1x64x32xbf16> to vector<64x32xbf16>
    %175 = vector.shape_cast %172 : vector<64x32xbf16> to vector<1x64x32xbf16>
    tpu.vector_store %arg4[%c0_22, %c0_23, %c0_24], %175 {strides = array<i32>} : memref<1x64x32xbf16, #tpu.memory_space<vmem>>, vector<1x64x32xbf16>,
    return
  }
  func.func @transform_0(%arg0: i32) -> (i32, i32, i32, i32, i32) {
    %c0_i32 = arith.constant 0 : i32
    %c0_i32_0 = arith.constant 0 : i32
    %c0_i32_1 = arith.constant 0 : i32
    %c0_i32_2 = arith.constant 0 : i32
    %c0_i32_3 = arith.constant 0 : i32
    return %arg0, %c0_i32, %c0_i32_0, %c0_i32_1, %c0_i32_2 : i32, i32, i32, i32, i32
  }
  func.func @transform_1(%arg0: i32) -> (i32, i32) {
    %c0_i32 = arith.constant 0 : i32
    %c0_i32_0 = arith.constant 0 : i32
    %c0_i32_1 = arith.constant 0 : i32
    return %c0_i32, %c0_i32_0 : i32, i32
  }
  func.func @transform_2(%arg0: i32) -> (i32, i32) {
    %c0_i32 = arith.constant 0 : i32
    %c0_i32_0 = arith.constant 0 : i32
    %c0_i32_1 = arith.constant 0 : i32
    return %c0_i32, %c0_i32_0 : i32, i32
  }
  func.func @transform_3(%arg0: i32) -> (i32, i32, i32) {
    %c0_i32 = arith.constant 0 : i32
    %c0_i32_0 = arith.constant 0 : i32
    %c0_i32_1 = arith.constant 0 : i32
    return %arg0, %c0_i32, %c0_i32_0 : i32, i32, i32
  }
}

module attributes {stable_mosaic.version = 11 : i64} {
  func.func @_corr_kernel(%arg0: i32, %arg1: memref<1x8x8x32xbf16, #tpu.memory_space<vmem>>, %arg2: memref<1x12x12x32xbf16, #tpu.memory_space<vmem>>, %arg3: memref<800x32xbf16, #tpu.memory_space<vmem>>, %arg4: memref<1x64x32xbf16, #tpu.memory_space<vmem>>) attributes {dimension_semantics = [#tpu.dimension_semantics<parallel>], iteration_bounds = array<i64: 2>, scalar_prefetch = 0 : i64, scratch_operands = 0 : i64, tpu.core_type = #tpu.core_type<tc>, window_params = [{transform_indices = @transform_0, window_bounds = array<i64: 1, 8, 8, 32>}, {transform_indices = @transform_1, window_bounds = array<i64: 1, 12, 12, 32>}, {pipeline_mode = #tpu.pipeline_mode<synchronous>, transform_indices = @transform_2, window_bounds = array<i64: 800, 32>}, {transform_indices = @transform_3, window_bounds = array<i64: 1, 64, 32>}]} {
    %c0 = arith.constant 0 : index
    %c0_0 = arith.constant 0 : index
    %0 = vector.load %arg3[%c0, %c0_0] : memref<800x32xbf16, #tpu.memory_space<vmem>>, vector<800x32xbf16>
    %c0_1 = arith.constant 0 : index
    %c0_2 = arith.constant 0 : index
    %c0_3 = arith.constant 0 : index
    %c0_4 = arith.constant 0 : index
    %1 = vector.load %arg1[%c0_1, %c0_2, %c0_3, %c0_4] : memref<1x8x8x32xbf16, #tpu.memory_space<vmem>>, vector<1x8x8x32xbf16>
    %2 = vector.shape_cast %1 : vector<1x8x8x32xbf16> to vector<8x8x32xbf16>
    %c0_5 = arith.constant 0 : index
    %c0_6 = arith.constant 0 : index
    %c0_7 = arith.constant 0 : index
    %c0_8 = arith.constant 0 : index
    %3 = vector.load %arg2[%c0_5, %c0_6, %c0_7, %c0_8] : memref<1x12x12x32xbf16, #tpu.memory_space<vmem>>, vector<1x12x12x32xbf16>
    %4 = vector.shape_cast %3 : vector<1x12x12x32xbf16> to vector<12x12x32xbf16>
    %5 = vector.extract_strided_slice %2 {offsets = [0, 0, 0], sizes = [1, 8, 32], strides = [1, 1, 1]} : vector<8x8x32xbf16> to vector<1x8x32xbf16>
    %6 = vector.shape_cast %5 : vector<1x8x32xbf16> to vector<8x32xbf16>
    %7 = vector.extract_strided_slice %4 {offsets = [0, 0, 0], sizes = [1, 12, 32], strides = [1, 1, 1]} : vector<12x12x32xbf16> to vector<1x12x32xbf16>
    %8 = vector.shape_cast %7 : vector<1x12x32xbf16> to vector<12x32xbf16>
    %9 = vector.extract_strided_slice %8 {offsets = [0, 0], sizes = [8, 32], strides = [1, 1]} : vector<12x32xbf16> to vector<8x32xbf16>
    %10 = arith.mulf %6, %9 : vector<8x32xbf16>
    %11 = vector.extract_strided_slice %8 {offsets = [1, 0], sizes = [8, 32], strides = [1, 1]} : vector<12x32xbf16> to vector<8x32xbf16>
    %12 = arith.mulf %6, %11 : vector<8x32xbf16>
    %13 = vector.extract_strided_slice %8 {offsets = [2, 0], sizes = [8, 32], strides = [1, 1]} : vector<12x32xbf16> to vector<8x32xbf16>
    %14 = arith.mulf %6, %13 : vector<8x32xbf16>
    %15 = vector.extract_strided_slice %8 {offsets = [3, 0], sizes = [8, 32], strides = [1, 1]} : vector<12x32xbf16> to vector<8x32xbf16>
    %16 = arith.mulf %6, %15 : vector<8x32xbf16>
    %17 = vector.extract_strided_slice %8 {offsets = [4, 0], sizes = [8, 32], strides = [1, 1]} : vector<12x32xbf16> to vector<8x32xbf16>
    %18 = arith.mulf %6, %17 : vector<8x32xbf16>
    %19 = vector.extract_strided_slice %4 {offsets = [1, 0, 0], sizes = [1, 12, 32], strides = [1, 1, 1]} : vector<12x12x32xbf16> to vector<1x12x32xbf16>
    %20 = vector.shape_cast %19 : vector<1x12x32xbf16> to vector<12x32xbf16>
    %21 = vector.extract_strided_slice %20 {offsets = [0, 0], sizes = [8, 32], strides = [1, 1]} : vector<12x32xbf16> to vector<8x32xbf16>
    %22 = arith.mulf %6, %21 : vector<8x32xbf16>
    %23 = vector.extract_strided_slice %20 {offsets = [1, 0], sizes = [8, 32], strides = [1, 1]} : vector<12x32xbf16> to vector<8x32xbf16>
    %24 = arith.mulf %6, %23 : vector<8x32xbf16>
    %25 = vector.extract_strided_slice %20 {offsets = [2, 0], sizes = [8, 32], strides = [1, 1]} : vector<12x32xbf16> to vector<8x32xbf16>
    %26 = arith.mulf %6, %25 : vector<8x32xbf16>
    %27 = vector.extract_strided_slice %20 {offsets = [3, 0], sizes = [8, 32], strides = [1, 1]} : vector<12x32xbf16> to vector<8x32xbf16>
    %28 = arith.mulf %6, %27 : vector<8x32xbf16>
    %29 = vector.extract_strided_slice %20 {offsets = [4, 0], sizes = [8, 32], strides = [1, 1]} : vector<12x32xbf16> to vector<8x32xbf16>
    %30 = arith.mulf %6, %29 : vector<8x32xbf16>
    %31 = vector.extract_strided_slice %4 {offsets = [2, 0, 0], sizes = [1, 12, 32], strides = [1, 1, 1]} : vector<12x12x32xbf16> to vector<1x12x32xbf16>
    %32 = vector.shape_cast %31 : vector<1x12x32xbf16> to vector<12x32xbf16>
    %33 = vector.extract_strided_slice %32 {offsets = [0, 0], sizes = [8, 32], strides = [1, 1]} : vector<12x32xbf16> to vector<8x32xbf16>
    %34 = arith.mulf %6, %33 : vector<8x32xbf16>
    %35 = vector.extract_strided_slice %32 {offsets = [1, 0], sizes = [8, 32], strides = [1, 1]} : vector<12x32xbf16> to vector<8x32xbf16>
    %36 = arith.mulf %6, %35 : vector<8x32xbf16>
    %37 = vector.extract_strided_slice %32 {offsets = [2, 0], sizes = [8, 32], strides = [1, 1]} : vector<12x32xbf16> to vector<8x32xbf16>
    %38 = arith.mulf %6, %37 : vector<8x32xbf16>
    %39 = vector.extract_strided_slice %32 {offsets = [3, 0], sizes = [8, 32], strides = [1, 1]} : vector<12x32xbf16> to vector<8x32xbf16>
    %40 = arith.mulf %6, %39 : vector<8x32xbf16>
    %41 = vector.extract_strided_slice %32 {offsets = [4, 0], sizes = [8, 32], strides = [1, 1]} : vector<12x32xbf16> to vector<8x32xbf16>
    %42 = arith.mulf %6, %41 : vector<8x32xbf16>
    %43 = vector.extract_strided_slice %4 {offsets = [3, 0, 0], sizes = [1, 12, 32], strides = [1, 1, 1]} : vector<12x12x32xbf16> to vector<1x12x32xbf16>
    %44 = vector.shape_cast %43 : vector<1x12x32xbf16> to vector<12x32xbf16>
    %45 = vector.extract_strided_slice %44 {offsets = [0, 0], sizes = [8, 32], strides = [1, 1]} : vector<12x32xbf16> to vector<8x32xbf16>
    %46 = arith.mulf %6, %45 : vector<8x32xbf16>
    %47 = vector.extract_strided_slice %44 {offsets = [1, 0], sizes = [8, 32], strides = [1, 1]} : vector<12x32xbf16> to vector<8x32xbf16>
    %48 = arith.mulf %6, %47 : vector<8x32xbf16>
    %49 = vector.extract_strided_slice %44 {offsets = [2, 0], sizes = [8, 32], strides = [1, 1]} : vector<12x32xbf16> to vector<8x32xbf16>
    %50 = arith.mulf %6, %49 : vector<8x32xbf16>
    %51 = vector.extract_strided_slice %44 {offsets = [3, 0], sizes = [8, 32], strides = [1, 1]} : vector<12x32xbf16> to vector<8x32xbf16>
    %52 = arith.mulf %6, %51 : vector<8x32xbf16>
    %53 = vector.extract_strided_slice %44 {offsets = [4, 0], sizes = [8, 32], strides = [1, 1]} : vector<12x32xbf16> to vector<8x32xbf16>
    %54 = arith.mulf %6, %53 : vector<8x32xbf16>
    %55 = vector.extract_strided_slice %4 {offsets = [4, 0, 0], sizes = [1, 12, 32], strides = [1, 1, 1]} : vector<12x12x32xbf16> to vector<1x12x32xbf16>
    %56 = vector.shape_cast %55 : vector<1x12x32xbf16> to vector<12x32xbf16>
    %57 = vector.extract_strided_slice %56 {offsets = [0, 0], sizes = [8, 32], strides = [1, 1]} : vector<12x32xbf16> to vector<8x32xbf16>
    %58 = arith.mulf %6, %57 : vector<8x32xbf16>
    %59 = vector.extract_strided_slice %56 {offsets = [1, 0], sizes = [8, 32], strides = [1, 1]} : vector<12x32xbf16> to vector<8x32xbf16>
    %60 = arith.mulf %6, %59 : vector<8x32xbf16>
    %61 = vector.extract_strided_slice %56 {offsets = [2, 0], sizes = [8, 32], strides = [1, 1]} : vector<12x32xbf16> to vector<8x32xbf16>
    %62 = arith.mulf %6, %61 : vector<8x32xbf16>
    %63 = vector.extract_strided_slice %56 {offsets = [3, 0], sizes = [8, 32], strides = [1, 1]} : vector<12x32xbf16> to vector<8x32xbf16>
    %64 = arith.mulf %6, %63 : vector<8x32xbf16>
    %65 = vector.extract_strided_slice %56 {offsets = [4, 0], sizes = [8, 32], strides = [1, 1]} : vector<12x32xbf16> to vector<8x32xbf16>
    %66 = arith.mulf %6, %65 : vector<8x32xbf16>
    %67 = tpu.concatenate %10, %12, %14, %16, %18, %22, %24, %26, %28, %30, %34, %36, %38, %40, %42, %46 in 1 : vector<8x32xbf16>, vector<8x32xbf16>, vector<8x32xbf16>, vector<8x32xbf16>, vector<8x32xbf16>, vector<8x32xbf16>, vector<8x32xbf16>, vector<8x32xbf16>, vector<8x32xbf16>, vector<8x32xbf16>, vector<8x32xbf16>, vector<8x32xbf16>, vector<8x32xbf16>, vector<8x32xbf16>, vector<8x32xbf16>, vector<8x32xbf16> -> vector<8x512xbf16>
    %68 = tpu.concatenate %48, %50, %52, %54, %58, %60, %62, %64, %66 in 1 : vector<8x32xbf16>, vector<8x32xbf16>, vector<8x32xbf16>, vector<8x32xbf16>, vector<8x32xbf16>, vector<8x32xbf16>, vector<8x32xbf16>, vector<8x32xbf16>, vector<8x32xbf16> -> vector<8x288xbf16>
    %69 = tpu.concatenate %67, %68 in 1 : vector<8x512xbf16>, vector<8x288xbf16> -> vector<8x800xbf16>
    %70 = vector.extract_strided_slice %2 {offsets = [1, 0, 0], sizes = [1, 8, 32], strides = [1, 1, 1]} : vector<8x8x32xbf16> to vector<1x8x32xbf16>
    %71 = vector.shape_cast %70 : vector<1x8x32xbf16> to vector<8x32xbf16>
    %72 = vector.extract_strided_slice %4 {offsets = [1, 0, 0], sizes = [1, 12, 32], strides = [1, 1, 1]} : vector<12x12x32xbf16> to vector<1x12x32xbf16>
    %73 = vector.shape_cast %72 : vector<1x12x32xbf16> to vector<12x32xbf16>
    %74 = vector.extract_strided_slice %73 {offsets = [0, 0], sizes = [8, 32], strides = [1, 1]} : vector<12x32xbf16> to vector<8x32xbf16>
    %75 = arith.mulf %71, %74 : vector<8x32xbf16>
    %76 = vector.extract_strided_slice %73 {offsets = [1, 0], sizes = [8, 32], strides = [1, 1]} : vector<12x32xbf16> to vector<8x32xbf16>
    %77 = arith.mulf %71, %76 : vector<8x32xbf16>
    %78 = vector.extract_strided_slice %73 {offsets = [2, 0], sizes = [8, 32], strides = [1, 1]} : vector<12x32xbf16> to vector<8x32xbf16>
    %79 = arith.mulf %71, %78 : vector<8x32xbf16>
    %80 = vector.extract_strided_slice %73 {offsets = [3, 0], sizes = [8, 32], strides = [1, 1]} : vector<12x32xbf16> to vector<8x32xbf16>
    %81 = arith.mulf %71, %80 : vector<8x32xbf16>
    %82 = vector.extract_strided_slice %73 {offsets = [4, 0], sizes = [8, 32], strides = [1, 1]} : vector<12x32xbf16> to vector<8x32xbf16>
    %83 = arith.mulf %71, %82 : vector<8x32xbf16>
    %84 = vector.extract_strided_slice %4 {offsets = [2, 0, 0], sizes = [1, 12, 32], strides = [1, 1, 1]} : vector<12x12x32xbf16> to vector<1x12x32xbf16>
    %85 = vector.shape_cast %84 : vector<1x12x32xbf16> to vector<12x32xbf16>
    %86 = vector.extract_strided_slice %85 {offsets = [0, 0], sizes = [8, 32], strides = [1, 1]} : vector<12x32xbf16> to vector<8x32xbf16>
    %87 = arith.mulf %71, %86 : vector<8x32xbf16>
    %88 = vector.extract_strided_slice %85 {offsets = [1, 0], sizes = [8, 32], strides = [1, 1]} : vector<12x32xbf16> to vector<8x32xbf16>
    %89 = arith.mulf %71, %88 : vector<8x32xbf16>
    %90 = vector.extract_strided_slice %85 {offsets = [2, 0], sizes = [8, 32], strides = [1, 1]} : vector<12x32xbf16> to vector<8x32xbf16>
    %91 = arith.mulf %71, %90 : vector<8x32xbf16>
    %92 = vector.extract_strided_slice %85 {offsets = [3, 0], sizes = [8, 32], strides = [1, 1]} : vector<12x32xbf16> to vector<8x32xbf16>
    %93 = arith.mulf %71, %92 : vector<8x32xbf16>
    %94 = vector.extract_strided_slice %85 {offsets = [4, 0], sizes = [8, 32], strides = [1, 1]} : vector<12x32xbf16> to vector<8x32xbf16>
    %95 = arith.mulf %71, %94 : vector<8x32xbf16>
    %96 = vector.extract_strided_slice %4 {offsets = [3, 0, 0], sizes = [1, 12, 32], strides = [1, 1, 1]} : vector<12x12x32xbf16> to vector<1x12x32xbf16>
    %97 = vector.shape_cast %96 : vector<1x12x32xbf16> to vector<12x32xbf16>
    %98 = vector.extract_strided_slice %97 {offsets = [0, 0], sizes = [8, 32], strides = [1, 1]} : vector<12x32xbf16> to vector<8x32xbf16>
    %99 = arith.mulf %71, %98 : vector<8x32xbf16>
    %100 = vector.extract_strided_slice %97 {offsets = [1, 0], sizes = [8, 32], strides = [1, 1]} : vector<12x32xbf16> to vector<8x32xbf16>
    %101 = arith.mulf %71, %100 : vector<8x32xbf16>
    %102 = vector.extract_strided_slice %97 {offsets = [2, 0], sizes = [8, 32], strides = [1, 1]} : vector<12x32xbf16> to vector<8x32xbf16>
    %103 = arith.mulf %71, %102 : vector<8x32xbf16>
    %104 = vector.extract_strided_slice %97 {offsets = [3, 0], sizes = [8, 32], strides = [1, 1]} : vector<12x32xbf16> to vector<8x32xbf16>
    %105 = arith.mulf %71, %104 : vector<8x32xbf16>
    %106 = vector.extract_strided_slice %97 {offsets = [4, 0], sizes = [8, 32], strides = [1, 1]} : vector<12x32xbf16> to vector<8x32xbf16>
    %107 = arith.mulf %71, %106 : vector<8x32xbf16>
    %108 = vector.extract_strided_slice %4 {offsets = [4, 0, 0], sizes = [1, 12, 32], strides = [1, 1, 1]} : vector<12x12x32xbf16> to vector<1x12x32xbf16>
    %109 = vector.shape_cast %108 : vector<1x12x32xbf16> to vector<12x32xbf16>
    %110 = vector.extract_strided_slice %109 {offsets = [0, 0], sizes = [8, 32], strides = [1, 1]} : vector<12x32xbf16> to vector<8x32xbf16>
    %111 = arith.mulf %71, %110 : vector<8x32xbf16>
    %112 = vector.extract_strided_slice %109 {offsets = [1, 0], sizes = [8, 32], strides = [1, 1]} : vector<12x32xbf16> to vector<8x32xbf16>
    %113 = arith.mulf %71, %112 : vector<8x32xbf16>
    %114 = vector.extract_strided_slice %109 {offsets = [2, 0], sizes = [8, 32], strides = [1, 1]} : vector<12x32xbf16> to vector<8x32xbf16>
    %115 = arith.mulf %71, %114 : vector<8x32xbf16>
    %116 = vector.extract_strided_slice %109 {offsets = [3, 0], sizes = [8, 32], strides = [1, 1]} : vector<12x32xbf16> to vector<8x32xbf16>
    %117 = arith.mulf %71, %116 : vector<8x32xbf16>
    %118 = vector.extract_strided_slice %109 {offsets = [4, 0], sizes = [8, 32], strides = [1, 1]} : vector<12x32xbf16> to vector<8x32xbf16>
    %119 = arith.mulf %71, %118 : vector<8x32xbf16>
    %120 = vector.extract_strided_slice %4 {offsets = [5, 0, 0], sizes = [1, 12, 32], strides = [1, 1, 1]} : vector<12x12x32xbf16> to vector<1x12x32xbf16>
    %121 = vector.shape_cast %120 : vector<1x12x32xbf16> to vector<12x32xbf16>
    %122 = vector.extract_strided_slice %121 {offsets = [0, 0], sizes = [8, 32], strides = [1, 1]} : vector<12x32xbf16> to vector<8x32xbf16>
    %123 = arith.mulf %71, %122 : vector<8x32xbf16>
    %124 = vector.extract_strided_slice %121 {offsets = [1, 0], sizes = [8, 32], strides = [1, 1]} : vector<12x32xbf16> to vector<8x32xbf16>
    %125 = arith.mulf %71, %124 : vector<8x32xbf16>
    %126 = vector.extract_strided_slice %121 {offsets = [2, 0], sizes = [8, 32], strides = [1, 1]} : vector<12x32xbf16> to vector<8x32xbf16>
    %127 = arith.mulf %71, %126 : vector<8x32xbf16>
    %128 = vector.extract_strided_slice %121 {offsets = [3, 0], sizes = [8, 32], strides = [1, 1]} : vector<12x32xbf16> to vector<8x32xbf16>
    %129 = arith.mulf %71, %128 : vector<8x32xbf16>
    %130 = vector.extract_strided_slice %121 {offsets = [4, 0], sizes = [8, 32], strides = [1, 1]} : vector<12x32xbf16> to vector<8x32xbf16>
    %131 = arith.mulf %71, %130 : vector<8x32xbf16>
    %132 = tpu.concatenate %75, %77, %79, %81, %83, %87, %89, %91, %93, %95, %99, %101, %103, %105, %107, %111 in 1 : vector<8x32xbf16>, vector<8x32xbf16>, vector<8x32xbf16>, vector<8x32xbf16>, vector<8x32xbf16>, vector<8x32xbf16>, vector<8x32xbf16>, vector<8x32xbf16>, vector<8x32xbf16>, vector<8x32xbf16>, vector<8x32xbf16>, vector<8x32xbf16>, vector<8x32xbf16>, vector<8x32xbf16>, vector<8x32xbf16>, vector<8x32xbf16> -> vector<8x512xbf16>
    %133 = tpu.concatenate %113, %115, %117, %119, %123, %125, %127, %129, %131 in 1 : vector<8x32xbf16>, vector<8x32xbf16>, vector<8x32xbf16>, vector<8x32xbf16>, vector<8x32xbf16>, vector<8x32xbf16>, vector<8x32xbf16>, vector<8x32xbf16>, vector<8x32xbf16> -> vector<8x288xbf16>
    %134 = tpu.concatenate %132, %133 in 1 : vector<8x512xbf16>, vector<8x288xbf16> -> vector<8x800xbf16>
    %135 = vector.extract_strided_slice %2 {offsets = [2, 0, 0], sizes = [1, 8, 32], strides = [1, 1, 1]} : vector<8x8x32xbf16> to vector<1x8x32xbf16>
    %136 = vector.shape_cast %135 : vector<1x8x32xbf16> to vector<8x32xbf16>
    %137 = vector.extract_strided_slice %4 {offsets = [2, 0, 0], sizes = [1, 12, 32], strides = [1, 1, 1]} : vector<12x12x32xbf16> to vector<1x12x32xbf16>
    %138 = vector.shape_cast %137 : vector<1x12x32xbf16> to vector<12x32xbf16>
    %139 = vector.extract_strided_slice %138 {offsets = [0, 0], sizes = [8, 32], strides = [1, 1]} : vector<12x32xbf16> to vector<8x32xbf16>
    %140 = arith.mulf %136, %139 : vector<8x32xbf16>
    %141 = vector.extract_strided_slice %138 {offsets = [1, 0], sizes = [8, 32], strides = [1, 1]} : vector<12x32xbf16> to vector<8x32xbf16>
    %142 = arith.mulf %136, %141 : vector<8x32xbf16>
    %143 = vector.extract_strided_slice %138 {offsets = [2, 0], sizes = [8, 32], strides = [1, 1]} : vector<12x32xbf16> to vector<8x32xbf16>
    %144 = arith.mulf %136, %143 : vector<8x32xbf16>
    %145 = vector.extract_strided_slice %138 {offsets = [3, 0], sizes = [8, 32], strides = [1, 1]} : vector<12x32xbf16> to vector<8x32xbf16>
    %146 = arith.mulf %136, %145 : vector<8x32xbf16>
    %147 = vector.extract_strided_slice %138 {offsets = [4, 0], sizes = [8, 32], strides = [1, 1]} : vector<12x32xbf16> to vector<8x32xbf16>
    %148 = arith.mulf %136, %147 : vector<8x32xbf16>
    %149 = vector.extract_strided_slice %4 {offsets = [3, 0, 0], sizes = [1, 12, 32], strides = [1, 1, 1]} : vector<12x12x32xbf16> to vector<1x12x32xbf16>
    %150 = vector.shape_cast %149 : vector<1x12x32xbf16> to vector<12x32xbf16>
    %151 = vector.extract_strided_slice %150 {offsets = [0, 0], sizes = [8, 32], strides = [1, 1]} : vector<12x32xbf16> to vector<8x32xbf16>
    %152 = arith.mulf %136, %151 : vector<8x32xbf16>
    %153 = vector.extract_strided_slice %150 {offsets = [1, 0], sizes = [8, 32], strides = [1, 1]} : vector<12x32xbf16> to vector<8x32xbf16>
    %154 = arith.mulf %136, %153 : vector<8x32xbf16>
    %155 = vector.extract_strided_slice %150 {offsets = [2, 0], sizes = [8, 32], strides = [1, 1]} : vector<12x32xbf16> to vector<8x32xbf16>
    %156 = arith.mulf %136, %155 : vector<8x32xbf16>
    %157 = vector.extract_strided_slice %150 {offsets = [3, 0], sizes = [8, 32], strides = [1, 1]} : vector<12x32xbf16> to vector<8x32xbf16>
    %158 = arith.mulf %136, %157 : vector<8x32xbf16>
    %159 = vector.extract_strided_slice %150 {offsets = [4, 0], sizes = [8, 32], strides = [1, 1]} : vector<12x32xbf16> to vector<8x32xbf16>
    %160 = arith.mulf %136, %159 : vector<8x32xbf16>
    %161 = vector.extract_strided_slice %4 {offsets = [4, 0, 0], sizes = [1, 12, 32], strides = [1, 1, 1]} : vector<12x12x32xbf16> to vector<1x12x32xbf16>
    %162 = vector.shape_cast %161 : vector<1x12x32xbf16> to vector<12x32xbf16>
    %163 = vector.extract_strided_slice %162 {offsets = [0, 0], sizes = [8, 32], strides = [1, 1]} : vector<12x32xbf16> to vector<8x32xbf16>
    %164 = arith.mulf %136, %163 : vector<8x32xbf16>
    %165 = vector.extract_strided_slice %162 {offsets = [1, 0], sizes = [8, 32], strides = [1, 1]} : vector<12x32xbf16> to vector<8x32xbf16>
    %166 = arith.mulf %136, %165 : vector<8x32xbf16>
    %167 = vector.extract_strided_slice %162 {offsets = [2, 0], sizes = [8, 32], strides = [1, 1]} : vector<12x32xbf16> to vector<8x32xbf16>
    %168 = arith.mulf %136, %167 : vector<8x32xbf16>
    %169 = vector.extract_strided_slice %162 {offsets = [3, 0], sizes = [8, 32], strides = [1, 1]} : vector<12x32xbf16> to vector<8x32xbf16>
    %170 = arith.mulf %136, %169 : vector<8x32xbf16>
    %171 = vector.extract_strided_slice %162 {offsets = [4, 0], sizes = [8, 32], strides = [1, 1]} : vector<12x32xbf16> to vector<8x32xbf16>
    %172 = arith.mulf %136, %171 : vector<8x32xbf16>
    %173 = vector.extract_strided_slice %4 {offsets = [5, 0, 0], sizes = [1, 12, 32], strides = [1, 1, 1]} : vector<12x12x32xbf16> to vector<1x12x32xbf16>
    %174 = vector.shape_cast %173 : vector<1x12x32xbf16> to vector<12x32xbf16>
    %175 = vector.extract_strided_slice %174 {offsets = [0, 0], sizes = [8, 32], strides = [1, 1]} : vector<12x32xbf16> to vector<8x32xbf16>
    %176 = arith.mulf %136, %175 : vector<8x32xbf16>
    %177 = vector.extract_strided_slice %174 {offsets = [1, 0], sizes = [8, 32], strides = [1, 1]} : vector<12x32xbf16> to vector<8x32xbf16>
    %178 = arith.mulf %136, %177 : vector<8x32xbf16>
    %179 = vector.extract_strided_slice %174 {offsets = [2, 0], sizes = [8, 32], strides = [1, 1]} : vector<12x32xbf16> to vector<8x32xbf16>
    %180 = arith.mulf %136, %179 : vector<8x32xbf16>
    %181 = vector.extract_strided_slice %174 {offsets = [3, 0], sizes = [8, 32], strides = [1, 1]} : vector<12x32xbf16> to vector<8x32xbf16>
    %182 = arith.mulf %136, %181 : vector<8x32xbf16>
    %183 = vector.extract_strided_slice %174 {offsets = [4, 0], sizes = [8, 32], strides = [1, 1]} : vector<12x32xbf16> to vector<8x32xbf16>
    %184 = arith.mulf %136, %183 : vector<8x32xbf16>
    %185 = vector.extract_strided_slice %4 {offsets = [6, 0, 0], sizes = [1, 12, 32], strides = [1, 1, 1]} : vector<12x12x32xbf16> to vector<1x12x32xbf16>
    %186 = vector.shape_cast %185 : vector<1x12x32xbf16> to vector<12x32xbf16>
    %187 = vector.extract_strided_slice %186 {offsets = [0, 0], sizes = [8, 32], strides = [1, 1]} : vector<12x32xbf16> to vector<8x32xbf16>
    %188 = arith.mulf %136, %187 : vector<8x32xbf16>
    %189 = vector.extract_strided_slice %186 {offsets = [1, 0], sizes = [8, 32], strides = [1, 1]} : vector<12x32xbf16> to vector<8x32xbf16>
    %190 = arith.mulf %136, %189 : vector<8x32xbf16>
    %191 = vector.extract_strided_slice %186 {offsets = [2, 0], sizes = [8, 32], strides = [1, 1]} : vector<12x32xbf16> to vector<8x32xbf16>
    %192 = arith.mulf %136, %191 : vector<8x32xbf16>
    %193 = vector.extract_strided_slice %186 {offsets = [3, 0], sizes = [8, 32], strides = [1, 1]} : vector<12x32xbf16> to vector<8x32xbf16>
    %194 = arith.mulf %136, %193 : vector<8x32xbf16>
    %195 = vector.extract_strided_slice %186 {offsets = [4, 0], sizes = [8, 32], strides = [1, 1]} : vector<12x32xbf16> to vector<8x32xbf16>
    %196 = arith.mulf %136, %195 : vector<8x32xbf16>
    %197 = tpu.concatenate %140, %142, %144, %146, %148, %152, %154, %156, %158, %160, %164, %166, %168, %170, %172, %176 in 1 : vector<8x32xbf16>, vector<8x32xbf16>, vector<8x32xbf16>, vector<8x32xbf16>, vector<8x32xbf16>, vector<8x32xbf16>, vector<8x32xbf16>, vector<8x32xbf16>, vector<8x32xbf16>, vector<8x32xbf16>, vector<8x32xbf16>, vector<8x32xbf16>, vector<8x32xbf16>, vector<8x32xbf16>, vector<8x32xbf16>, vector<8x32xbf16> -> vector<8x512xbf16>
    %198 = tpu.concatenate %178, %180, %182, %184, %188, %190, %192, %194, %196 in 1 : vector<8x32xbf16>, vector<8x32xbf16>, vector<8x32xbf16>, vector<8x32xbf16>, vector<8x32xbf16>, vector<8x32xbf16>, vector<8x32xbf16>, vector<8x32xbf16>, vector<8x32xbf16> -> vector<8x288xbf16>
    %199 = tpu.concatenate %197, %198 in 1 : vector<8x512xbf16>, vector<8x288xbf16> -> vector<8x800xbf16>
    %200 = vector.extract_strided_slice %2 {offsets = [3, 0, 0], sizes = [1, 8, 32], strides = [1, 1, 1]} : vector<8x8x32xbf16> to vector<1x8x32xbf16>
    %201 = vector.shape_cast %200 : vector<1x8x32xbf16> to vector<8x32xbf16>
    %202 = vector.extract_strided_slice %4 {offsets = [3, 0, 0], sizes = [1, 12, 32], strides = [1, 1, 1]} : vector<12x12x32xbf16> to vector<1x12x32xbf16>
    %203 = vector.shape_cast %202 : vector<1x12x32xbf16> to vector<12x32xbf16>
    %204 = vector.extract_strided_slice %203 {offsets = [0, 0], sizes = [8, 32], strides = [1, 1]} : vector<12x32xbf16> to vector<8x32xbf16>
    %205 = arith.mulf %201, %204 : vector<8x32xbf16>
    %206 = vector.extract_strided_slice %203 {offsets = [1, 0], sizes = [8, 32], strides = [1, 1]} : vector<12x32xbf16> to vector<8x32xbf16>
    %207 = arith.mulf %201, %206 : vector<8x32xbf16>
    %208 = vector.extract_strided_slice %203 {offsets = [2, 0], sizes = [8, 32], strides = [1, 1]} : vector<12x32xbf16> to vector<8x32xbf16>
    %209 = arith.mulf %201, %208 : vector<8x32xbf16>
    %210 = vector.extract_strided_slice %203 {offsets = [3, 0], sizes = [8, 32], strides = [1, 1]} : vector<12x32xbf16> to vector<8x32xbf16>
    %211 = arith.mulf %201, %210 : vector<8x32xbf16>
    %212 = vector.extract_strided_slice %203 {offsets = [4, 0], sizes = [8, 32], strides = [1, 1]} : vector<12x32xbf16> to vector<8x32xbf16>
    %213 = arith.mulf %201, %212 : vector<8x32xbf16>
    %214 = vector.extract_strided_slice %4 {offsets = [4, 0, 0], sizes = [1, 12, 32], strides = [1, 1, 1]} : vector<12x12x32xbf16> to vector<1x12x32xbf16>
    %215 = vector.shape_cast %214 : vector<1x12x32xbf16> to vector<12x32xbf16>
    %216 = vector.extract_strided_slice %215 {offsets = [0, 0], sizes = [8, 32], strides = [1, 1]} : vector<12x32xbf16> to vector<8x32xbf16>
    %217 = arith.mulf %201, %216 : vector<8x32xbf16>
    %218 = vector.extract_strided_slice %215 {offsets = [1, 0], sizes = [8, 32], strides = [1, 1]} : vector<12x32xbf16> to vector<8x32xbf16>
    %219 = arith.mulf %201, %218 : vector<8x32xbf16>
    %220 = vector.extract_strided_slice %215 {offsets = [2, 0], sizes = [8, 32], strides = [1, 1]} : vector<12x32xbf16> to vector<8x32xbf16>
    %221 = arith.mulf %201, %220 : vector<8x32xbf16>
    %222 = vector.extract_strided_slice %215 {offsets = [3, 0], sizes = [8, 32], strides = [1, 1]} : vector<12x32xbf16> to vector<8x32xbf16>
    %223 = arith.mulf %201, %222 : vector<8x32xbf16>
    %224 = vector.extract_strided_slice %215 {offsets = [4, 0], sizes = [8, 32], strides = [1, 1]} : vector<12x32xbf16> to vector<8x32xbf16>
    %225 = arith.mulf %201, %224 : vector<8x32xbf16>
    %226 = vector.extract_strided_slice %4 {offsets = [5, 0, 0], sizes = [1, 12, 32], strides = [1, 1, 1]} : vector<12x12x32xbf16> to vector<1x12x32xbf16>
    %227 = vector.shape_cast %226 : vector<1x12x32xbf16> to vector<12x32xbf16>
    %228 = vector.extract_strided_slice %227 {offsets = [0, 0], sizes = [8, 32], strides = [1, 1]} : vector<12x32xbf16> to vector<8x32xbf16>
    %229 = arith.mulf %201, %228 : vector<8x32xbf16>
    %230 = vector.extract_strided_slice %227 {offsets = [1, 0], sizes = [8, 32], strides = [1, 1]} : vector<12x32xbf16> to vector<8x32xbf16>
    %231 = arith.mulf %201, %230 : vector<8x32xbf16>
    %232 = vector.extract_strided_slice %227 {offsets = [2, 0], sizes = [8, 32], strides = [1, 1]} : vector<12x32xbf16> to vector<8x32xbf16>
    %233 = arith.mulf %201, %232 : vector<8x32xbf16>
    %234 = vector.extract_strided_slice %227 {offsets = [3, 0], sizes = [8, 32], strides = [1, 1]} : vector<12x32xbf16> to vector<8x32xbf16>
    %235 = arith.mulf %201, %234 : vector<8x32xbf16>
    %236 = vector.extract_strided_slice %227 {offsets = [4, 0], sizes = [8, 32], strides = [1, 1]} : vector<12x32xbf16> to vector<8x32xbf16>
    %237 = arith.mulf %201, %236 : vector<8x32xbf16>
    %238 = vector.extract_strided_slice %4 {offsets = [6, 0, 0], sizes = [1, 12, 32], strides = [1, 1, 1]} : vector<12x12x32xbf16> to vector<1x12x32xbf16>
    %239 = vector.shape_cast %238 : vector<1x12x32xbf16> to vector<12x32xbf16>
    %240 = vector.extract_strided_slice %239 {offsets = [0, 0], sizes = [8, 32], strides = [1, 1]} : vector<12x32xbf16> to vector<8x32xbf16>
    %241 = arith.mulf %201, %240 : vector<8x32xbf16>
    %242 = vector.extract_strided_slice %239 {offsets = [1, 0], sizes = [8, 32], strides = [1, 1]} : vector<12x32xbf16> to vector<8x32xbf16>
    %243 = arith.mulf %201, %242 : vector<8x32xbf16>
    %244 = vector.extract_strided_slice %239 {offsets = [2, 0], sizes = [8, 32], strides = [1, 1]} : vector<12x32xbf16> to vector<8x32xbf16>
    %245 = arith.mulf %201, %244 : vector<8x32xbf16>
    %246 = vector.extract_strided_slice %239 {offsets = [3, 0], sizes = [8, 32], strides = [1, 1]} : vector<12x32xbf16> to vector<8x32xbf16>
    %247 = arith.mulf %201, %246 : vector<8x32xbf16>
    %248 = vector.extract_strided_slice %239 {offsets = [4, 0], sizes = [8, 32], strides = [1, 1]} : vector<12x32xbf16> to vector<8x32xbf16>
    %249 = arith.mulf %201, %248 : vector<8x32xbf16>
    %250 = vector.extract_strided_slice %4 {offsets = [7, 0, 0], sizes = [1, 12, 32], strides = [1, 1, 1]} : vector<12x12x32xbf16> to vector<1x12x32xbf16>
    %251 = vector.shape_cast %250 : vector<1x12x32xbf16> to vector<12x32xbf16>
    %252 = vector.extract_strided_slice %251 {offsets = [0, 0], sizes = [8, 32], strides = [1, 1]} : vector<12x32xbf16> to vector<8x32xbf16>
    %253 = arith.mulf %201, %252 : vector<8x32xbf16>
    %254 = vector.extract_strided_slice %251 {offsets = [1, 0], sizes = [8, 32], strides = [1, 1]} : vector<12x32xbf16> to vector<8x32xbf16>
    %255 = arith.mulf %201, %254 : vector<8x32xbf16>
    %256 = vector.extract_strided_slice %251 {offsets = [2, 0], sizes = [8, 32], strides = [1, 1]} : vector<12x32xbf16> to vector<8x32xbf16>
    %257 = arith.mulf %201, %256 : vector<8x32xbf16>
    %258 = vector.extract_strided_slice %251 {offsets = [3, 0], sizes = [8, 32], strides = [1, 1]} : vector<12x32xbf16> to vector<8x32xbf16>
    %259 = arith.mulf %201, %258 : vector<8x32xbf16>
    %260 = vector.extract_strided_slice %251 {offsets = [4, 0], sizes = [8, 32], strides = [1, 1]} : vector<12x32xbf16> to vector<8x32xbf16>
    %261 = arith.mulf %201, %260 : vector<8x32xbf16>
    %262 = tpu.concatenate %205, %207, %209, %211, %213, %217, %219, %221, %223, %225, %229, %231, %233, %235, %237, %241 in 1 : vector<8x32xbf16>, vector<8x32xbf16>, vector<8x32xbf16>, vector<8x32xbf16>, vector<8x32xbf16>, vector<8x32xbf16>, vector<8x32xbf16>, vector<8x32xbf16>, vector<8x32xbf16>, vector<8x32xbf16>, vector<8x32xbf16>, vector<8x32xbf16>, vector<8x32xbf16>, vector<8x32xbf16>, vector<8x32xbf16>, vector<8x32xbf16> -> vector<8x512xbf16>
    %263 = tpu.concatenate %243, %245, %247, %249, %253, %255, %257, %259, %261 in 1 : vector<8x32xbf16>, vector<8x32xbf16>, vector<8x32xbf16>, vector<8x32xbf16>, vector<8x32xbf16>, vector<8x32xbf16>, vector<8x32xbf16>, vector<8x32xbf16>, vector<8x32xbf16> -> vector<8x288xbf16>
    %264 = tpu.concatenate %262, %263 in 1 : vector<8x512xbf16>, vector<8x288xbf16> -> vector<8x800xbf16>
    %265 = vector.extract_strided_slice %2 {offsets = [4, 0, 0], sizes = [1, 8, 32], strides = [1, 1, 1]} : vector<8x8x32xbf16> to vector<1x8x32xbf16>
    %266 = vector.shape_cast %265 : vector<1x8x32xbf16> to vector<8x32xbf16>
    %267 = vector.extract_strided_slice %4 {offsets = [4, 0, 0], sizes = [1, 12, 32], strides = [1, 1, 1]} : vector<12x12x32xbf16> to vector<1x12x32xbf16>
    %268 = vector.shape_cast %267 : vector<1x12x32xbf16> to vector<12x32xbf16>
    %269 = vector.extract_strided_slice %268 {offsets = [0, 0], sizes = [8, 32], strides = [1, 1]} : vector<12x32xbf16> to vector<8x32xbf16>
    %270 = arith.mulf %266, %269 : vector<8x32xbf16>
    %271 = vector.extract_strided_slice %268 {offsets = [1, 0], sizes = [8, 32], strides = [1, 1]} : vector<12x32xbf16> to vector<8x32xbf16>
    %272 = arith.mulf %266, %271 : vector<8x32xbf16>
    %273 = vector.extract_strided_slice %268 {offsets = [2, 0], sizes = [8, 32], strides = [1, 1]} : vector<12x32xbf16> to vector<8x32xbf16>
    %274 = arith.mulf %266, %273 : vector<8x32xbf16>
    %275 = vector.extract_strided_slice %268 {offsets = [3, 0], sizes = [8, 32], strides = [1, 1]} : vector<12x32xbf16> to vector<8x32xbf16>
    %276 = arith.mulf %266, %275 : vector<8x32xbf16>
    %277 = vector.extract_strided_slice %268 {offsets = [4, 0], sizes = [8, 32], strides = [1, 1]} : vector<12x32xbf16> to vector<8x32xbf16>
    %278 = arith.mulf %266, %277 : vector<8x32xbf16>
    %279 = vector.extract_strided_slice %4 {offsets = [5, 0, 0], sizes = [1, 12, 32], strides = [1, 1, 1]} : vector<12x12x32xbf16> to vector<1x12x32xbf16>
    %280 = vector.shape_cast %279 : vector<1x12x32xbf16> to vector<12x32xbf16>
    %281 = vector.extract_strided_slice %280 {offsets = [0, 0], sizes = [8, 32], strides = [1, 1]} : vector<12x32xbf16> to vector<8x32xbf16>
    %282 = arith.mulf %266, %281 : vector<8x32xbf16>
    %283 = vector.extract_strided_slice %280 {offsets = [1, 0], sizes = [8, 32], strides = [1, 1]} : vector<12x32xbf16> to vector<8x32xbf16>
    %284 = arith.mulf %266, %283 : vector<8x32xbf16>
    %285 = vector.extract_strided_slice %280 {offsets = [2, 0], sizes = [8, 32], strides = [1, 1]} : vector<12x32xbf16> to vector<8x32xbf16>
    %286 = arith.mulf %266, %285 : vector<8x32xbf16>
    %287 = vector.extract_strided_slice %280 {offsets = [3, 0], sizes = [8, 32], strides = [1, 1]} : vector<12x32xbf16> to vector<8x32xbf16>
    %288 = arith.mulf %266, %287 : vector<8x32xbf16>
    %289 = vector.extract_strided_slice %280 {offsets = [4, 0], sizes = [8, 32], strides = [1, 1]} : vector<12x32xbf16> to vector<8x32xbf16>
    %290 = arith.mulf %266, %289 : vector<8x32xbf16>
    %291 = vector.extract_strided_slice %4 {offsets = [6, 0, 0], sizes = [1, 12, 32], strides = [1, 1, 1]} : vector<12x12x32xbf16> to vector<1x12x32xbf16>
    %292 = vector.shape_cast %291 : vector<1x12x32xbf16> to vector<12x32xbf16>
    %293 = vector.extract_strided_slice %292 {offsets = [0, 0], sizes = [8, 32], strides = [1, 1]} : vector<12x32xbf16> to vector<8x32xbf16>
    %294 = arith.mulf %266, %293 : vector<8x32xbf16>
    %295 = vector.extract_strided_slice %292 {offsets = [1, 0], sizes = [8, 32], strides = [1, 1]} : vector<12x32xbf16> to vector<8x32xbf16>
    %296 = arith.mulf %266, %295 : vector<8x32xbf16>
    %297 = vector.extract_strided_slice %292 {offsets = [2, 0], sizes = [8, 32], strides = [1, 1]} : vector<12x32xbf16> to vector<8x32xbf16>
    %298 = arith.mulf %266, %297 : vector<8x32xbf16>
    %299 = vector.extract_strided_slice %292 {offsets = [3, 0], sizes = [8, 32], strides = [1, 1]} : vector<12x32xbf16> to vector<8x32xbf16>
    %300 = arith.mulf %266, %299 : vector<8x32xbf16>
    %301 = vector.extract_strided_slice %292 {offsets = [4, 0], sizes = [8, 32], strides = [1, 1]} : vector<12x32xbf16> to vector<8x32xbf16>
    %302 = arith.mulf %266, %301 : vector<8x32xbf16>
    %303 = vector.extract_strided_slice %4 {offsets = [7, 0, 0], sizes = [1, 12, 32], strides = [1, 1, 1]} : vector<12x12x32xbf16> to vector<1x12x32xbf16>
    %304 = vector.shape_cast %303 : vector<1x12x32xbf16> to vector<12x32xbf16>
    %305 = vector.extract_strided_slice %304 {offsets = [0, 0], sizes = [8, 32], strides = [1, 1]} : vector<12x32xbf16> to vector<8x32xbf16>
    %306 = arith.mulf %266, %305 : vector<8x32xbf16>
    %307 = vector.extract_strided_slice %304 {offsets = [1, 0], sizes = [8, 32], strides = [1, 1]} : vector<12x32xbf16> to vector<8x32xbf16>
    %308 = arith.mulf %266, %307 : vector<8x32xbf16>
    %309 = vector.extract_strided_slice %304 {offsets = [2, 0], sizes = [8, 32], strides = [1, 1]} : vector<12x32xbf16> to vector<8x32xbf16>
    %310 = arith.mulf %266, %309 : vector<8x32xbf16>
    %311 = vector.extract_strided_slice %304 {offsets = [3, 0], sizes = [8, 32], strides = [1, 1]} : vector<12x32xbf16> to vector<8x32xbf16>
    %312 = arith.mulf %266, %311 : vector<8x32xbf16>
    %313 = vector.extract_strided_slice %304 {offsets = [4, 0], sizes = [8, 32], strides = [1, 1]} : vector<12x32xbf16> to vector<8x32xbf16>
    %314 = arith.mulf %266, %313 : vector<8x32xbf16>
    %315 = vector.extract_strided_slice %4 {offsets = [8, 0, 0], sizes = [1, 12, 32], strides = [1, 1, 1]} : vector<12x12x32xbf16> to vector<1x12x32xbf16>
    %316 = vector.shape_cast %315 : vector<1x12x32xbf16> to vector<12x32xbf16>
    %317 = vector.extract_strided_slice %316 {offsets = [0, 0], sizes = [8, 32], strides = [1, 1]} : vector<12x32xbf16> to vector<8x32xbf16>
    %318 = arith.mulf %266, %317 : vector<8x32xbf16>
    %319 = vector.extract_strided_slice %316 {offsets = [1, 0], sizes = [8, 32], strides = [1, 1]} : vector<12x32xbf16> to vector<8x32xbf16>
    %320 = arith.mulf %266, %319 : vector<8x32xbf16>
    %321 = vector.extract_strided_slice %316 {offsets = [2, 0], sizes = [8, 32], strides = [1, 1]} : vector<12x32xbf16> to vector<8x32xbf16>
    %322 = arith.mulf %266, %321 : vector<8x32xbf16>
    %323 = vector.extract_strided_slice %316 {offsets = [3, 0], sizes = [8, 32], strides = [1, 1]} : vector<12x32xbf16> to vector<8x32xbf16>
    %324 = arith.mulf %266, %323 : vector<8x32xbf16>
    %325 = vector.extract_strided_slice %316 {offsets = [4, 0], sizes = [8, 32], strides = [1, 1]} : vector<12x32xbf16> to vector<8x32xbf16>
    %326 = arith.mulf %266, %325 : vector<8x32xbf16>
    %327 = tpu.concatenate %270, %272, %274, %276, %278, %282, %284, %286, %288, %290, %294, %296, %298, %300, %302, %306 in 1 : vector<8x32xbf16>, vector<8x32xbf16>, vector<8x32xbf16>, vector<8x32xbf16>, vector<8x32xbf16>, vector<8x32xbf16>, vector<8x32xbf16>, vector<8x32xbf16>, vector<8x32xbf16>, vector<8x32xbf16>, vector<8x32xbf16>, vector<8x32xbf16>, vector<8x32xbf16>, vector<8x32xbf16>, vector<8x32xbf16>, vector<8x32xbf16> -> vector<8x512xbf16>
    %328 = tpu.concatenate %308, %310, %312, %314, %318, %320, %322, %324, %326 in 1 : vector<8x32xbf16>, vector<8x32xbf16>, vector<8x32xbf16>, vector<8x32xbf16>, vector<8x32xbf16>, vector<8x32xbf16>, vector<8x32xbf16>, vector<8x32xbf16>, vector<8x32xbf16> -> vector<8x288xbf16>
    %329 = tpu.concatenate %327, %328 in 1 : vector<8x512xbf16>, vector<8x288xbf16> -> vector<8x800xbf16>
    %330 = vector.extract_strided_slice %2 {offsets = [5, 0, 0], sizes = [1, 8, 32], strides = [1, 1, 1]} : vector<8x8x32xbf16> to vector<1x8x32xbf16>
    %331 = vector.shape_cast %330 : vector<1x8x32xbf16> to vector<8x32xbf16>
    %332 = vector.extract_strided_slice %4 {offsets = [5, 0, 0], sizes = [1, 12, 32], strides = [1, 1, 1]} : vector<12x12x32xbf16> to vector<1x12x32xbf16>
    %333 = vector.shape_cast %332 : vector<1x12x32xbf16> to vector<12x32xbf16>
    %334 = vector.extract_strided_slice %333 {offsets = [0, 0], sizes = [8, 32], strides = [1, 1]} : vector<12x32xbf16> to vector<8x32xbf16>
    %335 = arith.mulf %331, %334 : vector<8x32xbf16>
    %336 = vector.extract_strided_slice %333 {offsets = [1, 0], sizes = [8, 32], strides = [1, 1]} : vector<12x32xbf16> to vector<8x32xbf16>
    %337 = arith.mulf %331, %336 : vector<8x32xbf16>
    %338 = vector.extract_strided_slice %333 {offsets = [2, 0], sizes = [8, 32], strides = [1, 1]} : vector<12x32xbf16> to vector<8x32xbf16>
    %339 = arith.mulf %331, %338 : vector<8x32xbf16>
    %340 = vector.extract_strided_slice %333 {offsets = [3, 0], sizes = [8, 32], strides = [1, 1]} : vector<12x32xbf16> to vector<8x32xbf16>
    %341 = arith.mulf %331, %340 : vector<8x32xbf16>
    %342 = vector.extract_strided_slice %333 {offsets = [4, 0], sizes = [8, 32], strides = [1, 1]} : vector<12x32xbf16> to vector<8x32xbf16>
    %343 = arith.mulf %331, %342 : vector<8x32xbf16>
    %344 = vector.extract_strided_slice %4 {offsets = [6, 0, 0], sizes = [1, 12, 32], strides = [1, 1, 1]} : vector<12x12x32xbf16> to vector<1x12x32xbf16>
    %345 = vector.shape_cast %344 : vector<1x12x32xbf16> to vector<12x32xbf16>
    %346 = vector.extract_strided_slice %345 {offsets = [0, 0], sizes = [8, 32], strides = [1, 1]} : vector<12x32xbf16> to vector<8x32xbf16>
    %347 = arith.mulf %331, %346 : vector<8x32xbf16>
    %348 = vector.extract_strided_slice %345 {offsets = [1, 0], sizes = [8, 32], strides = [1, 1]} : vector<12x32xbf16> to vector<8x32xbf16>
    %349 = arith.mulf %331, %348 : vector<8x32xbf16>
    %350 = vector.extract_strided_slice %345 {offsets = [2, 0], sizes = [8, 32], strides = [1, 1]} : vector<12x32xbf16> to vector<8x32xbf16>
    %351 = arith.mulf %331, %350 : vector<8x32xbf16>
    %352 = vector.extract_strided_slice %345 {offsets = [3, 0], sizes = [8, 32], strides = [1, 1]} : vector<12x32xbf16> to vector<8x32xbf16>
    %353 = arith.mulf %331, %352 : vector<8x32xbf16>
    %354 = vector.extract_strided_slice %345 {offsets = [4, 0], sizes = [8, 32], strides = [1, 1]} : vector<12x32xbf16> to vector<8x32xbf16>
    %355 = arith.mulf %331, %354 : vector<8x32xbf16>
    %356 = vector.extract_strided_slice %4 {offsets = [7, 0, 0], sizes = [1, 12, 32], strides = [1, 1, 1]} : vector<12x12x32xbf16> to vector<1x12x32xbf16>
    %357 = vector.shape_cast %356 : vector<1x12x32xbf16> to vector<12x32xbf16>
    %358 = vector.extract_strided_slice %357 {offsets = [0, 0], sizes = [8, 32], strides = [1, 1]} : vector<12x32xbf16> to vector<8x32xbf16>
    %359 = arith.mulf %331, %358 : vector<8x32xbf16>
    %360 = vector.extract_strided_slice %357 {offsets = [1, 0], sizes = [8, 32], strides = [1, 1]} : vector<12x32xbf16> to vector<8x32xbf16>
    %361 = arith.mulf %331, %360 : vector<8x32xbf16>
    %362 = vector.extract_strided_slice %357 {offsets = [2, 0], sizes = [8, 32], strides = [1, 1]} : vector<12x32xbf16> to vector<8x32xbf16>
    %363 = arith.mulf %331, %362 : vector<8x32xbf16>
    %364 = vector.extract_strided_slice %357 {offsets = [3, 0], sizes = [8, 32], strides = [1, 1]} : vector<12x32xbf16> to vector<8x32xbf16>
    %365 = arith.mulf %331, %364 : vector<8x32xbf16>
    %366 = vector.extract_strided_slice %357 {offsets = [4, 0], sizes = [8, 32], strides = [1, 1]} : vector<12x32xbf16> to vector<8x32xbf16>
    %367 = arith.mulf %331, %366 : vector<8x32xbf16>
    %368 = vector.extract_strided_slice %4 {offsets = [8, 0, 0], sizes = [1, 12, 32], strides = [1, 1, 1]} : vector<12x12x32xbf16> to vector<1x12x32xbf16>
    %369 = vector.shape_cast %368 : vector<1x12x32xbf16> to vector<12x32xbf16>
    %370 = vector.extract_strided_slice %369 {offsets = [0, 0], sizes = [8, 32], strides = [1, 1]} : vector<12x32xbf16> to vector<8x32xbf16>
    %371 = arith.mulf %331, %370 : vector<8x32xbf16>
    %372 = vector.extract_strided_slice %369 {offsets = [1, 0], sizes = [8, 32], strides = [1, 1]} : vector<12x32xbf16> to vector<8x32xbf16>
    %373 = arith.mulf %331, %372 : vector<8x32xbf16>
    %374 = vector.extract_strided_slice %369 {offsets = [2, 0], sizes = [8, 32], strides = [1, 1]} : vector<12x32xbf16> to vector<8x32xbf16>
    %375 = arith.mulf %331, %374 : vector<8x32xbf16>
    %376 = vector.extract_strided_slice %369 {offsets = [3, 0], sizes = [8, 32], strides = [1, 1]} : vector<12x32xbf16> to vector<8x32xbf16>
    %377 = arith.mulf %331, %376 : vector<8x32xbf16>
    %378 = vector.extract_strided_slice %369 {offsets = [4, 0], sizes = [8, 32], strides = [1, 1]} : vector<12x32xbf16> to vector<8x32xbf16>
    %379 = arith.mulf %331, %378 : vector<8x32xbf16>
    %380 = vector.extract_strided_slice %4 {offsets = [9, 0, 0], sizes = [1, 12, 32], strides = [1, 1, 1]} : vector<12x12x32xbf16> to vector<1x12x32xbf16>
    %381 = vector.shape_cast %380 : vector<1x12x32xbf16> to vector<12x32xbf16>
    %382 = vector.extract_strided_slice %381 {offsets = [0, 0], sizes = [8, 32], strides = [1, 1]} : vector<12x32xbf16> to vector<8x32xbf16>
    %383 = arith.mulf %331, %382 : vector<8x32xbf16>
    %384 = vector.extract_strided_slice %381 {offsets = [1, 0], sizes = [8, 32], strides = [1, 1]} : vector<12x32xbf16> to vector<8x32xbf16>
    %385 = arith.mulf %331, %384 : vector<8x32xbf16>
    %386 = vector.extract_strided_slice %381 {offsets = [2, 0], sizes = [8, 32], strides = [1, 1]} : vector<12x32xbf16> to vector<8x32xbf16>
    %387 = arith.mulf %331, %386 : vector<8x32xbf16>
    %388 = vector.extract_strided_slice %381 {offsets = [3, 0], sizes = [8, 32], strides = [1, 1]} : vector<12x32xbf16> to vector<8x32xbf16>
    %389 = arith.mulf %331, %388 : vector<8x32xbf16>
    %390 = vector.extract_strided_slice %381 {offsets = [4, 0], sizes = [8, 32], strides = [1, 1]} : vector<12x32xbf16> to vector<8x32xbf16>
    %391 = arith.mulf %331, %390 : vector<8x32xbf16>
    %392 = tpu.concatenate %335, %337, %339, %341, %343, %347, %349, %351, %353, %355, %359, %361, %363, %365, %367, %371 in 1 : vector<8x32xbf16>, vector<8x32xbf16>, vector<8x32xbf16>, vector<8x32xbf16>, vector<8x32xbf16>, vector<8x32xbf16>, vector<8x32xbf16>, vector<8x32xbf16>, vector<8x32xbf16>, vector<8x32xbf16>, vector<8x32xbf16>, vector<8x32xbf16>, vector<8x32xbf16>, vector<8x32xbf16>, vector<8x32xbf16>, vector<8x32xbf16> -> vector<8x512xbf16>
    %393 = tpu.concatenate %373, %375, %377, %379, %383, %385, %387, %389, %391 in 1 : vector<8x32xbf16>, vector<8x32xbf16>, vector<8x32xbf16>, vector<8x32xbf16>, vector<8x32xbf16>, vector<8x32xbf16>, vector<8x32xbf16>, vector<8x32xbf16>, vector<8x32xbf16> -> vector<8x288xbf16>
    %394 = tpu.concatenate %392, %393 in 1 : vector<8x512xbf16>, vector<8x288xbf16> -> vector<8x800xbf16>
    %395 = vector.extract_strided_slice %2 {offsets = [6, 0, 0], sizes = [1, 8, 32], strides = [1, 1, 1]} : vector<8x8x32xbf16> to vector<1x8x32xbf16>
    %396 = vector.shape_cast %395 : vector<1x8x32xbf16> to vector<8x32xbf16>
    %397 = vector.extract_strided_slice %4 {offsets = [6, 0, 0], sizes = [1, 12, 32], strides = [1, 1, 1]} : vector<12x12x32xbf16> to vector<1x12x32xbf16>
    %398 = vector.shape_cast %397 : vector<1x12x32xbf16> to vector<12x32xbf16>
    %399 = vector.extract_strided_slice %398 {offsets = [0, 0], sizes = [8, 32], strides = [1, 1]} : vector<12x32xbf16> to vector<8x32xbf16>
    %400 = arith.mulf %396, %399 : vector<8x32xbf16>
    %401 = vector.extract_strided_slice %398 {offsets = [1, 0], sizes = [8, 32], strides = [1, 1]} : vector<12x32xbf16> to vector<8x32xbf16>
    %402 = arith.mulf %396, %401 : vector<8x32xbf16>
    %403 = vector.extract_strided_slice %398 {offsets = [2, 0], sizes = [8, 32], strides = [1, 1]} : vector<12x32xbf16> to vector<8x32xbf16>
    %404 = arith.mulf %396, %403 : vector<8x32xbf16>
    %405 = vector.extract_strided_slice %398 {offsets = [3, 0], sizes = [8, 32], strides = [1, 1]} : vector<12x32xbf16> to vector<8x32xbf16>
    %406 = arith.mulf %396, %405 : vector<8x32xbf16>
    %407 = vector.extract_strided_slice %398 {offsets = [4, 0], sizes = [8, 32], strides = [1, 1]} : vector<12x32xbf16> to vector<8x32xbf16>
    %408 = arith.mulf %396, %407 : vector<8x32xbf16>
    %409 = vector.extract_strided_slice %4 {offsets = [7, 0, 0], sizes = [1, 12, 32], strides = [1, 1, 1]} : vector<12x12x32xbf16> to vector<1x12x32xbf16>
    %410 = vector.shape_cast %409 : vector<1x12x32xbf16> to vector<12x32xbf16>
    %411 = vector.extract_strided_slice %410 {offsets = [0, 0], sizes = [8, 32], strides = [1, 1]} : vector<12x32xbf16> to vector<8x32xbf16>
    %412 = arith.mulf %396, %411 : vector<8x32xbf16>
    %413 = vector.extract_strided_slice %410 {offsets = [1, 0], sizes = [8, 32], strides = [1, 1]} : vector<12x32xbf16> to vector<8x32xbf16>
    %414 = arith.mulf %396, %413 : vector<8x32xbf16>
    %415 = vector.extract_strided_slice %410 {offsets = [2, 0], sizes = [8, 32], strides = [1, 1]} : vector<12x32xbf16> to vector<8x32xbf16>
    %416 = arith.mulf %396, %415 : vector<8x32xbf16>
    %417 = vector.extract_strided_slice %410 {offsets = [3, 0], sizes = [8, 32], strides = [1, 1]} : vector<12x32xbf16> to vector<8x32xbf16>
    %418 = arith.mulf %396, %417 : vector<8x32xbf16>
    %419 = vector.extract_strided_slice %410 {offsets = [4, 0], sizes = [8, 32], strides = [1, 1]} : vector<12x32xbf16> to vector<8x32xbf16>
    %420 = arith.mulf %396, %419 : vector<8x32xbf16>
    %421 = vector.extract_strided_slice %4 {offsets = [8, 0, 0], sizes = [1, 12, 32], strides = [1, 1, 1]} : vector<12x12x32xbf16> to vector<1x12x32xbf16>
    %422 = vector.shape_cast %421 : vector<1x12x32xbf16> to vector<12x32xbf16>
    %423 = vector.extract_strided_slice %422 {offsets = [0, 0], sizes = [8, 32], strides = [1, 1]} : vector<12x32xbf16> to vector<8x32xbf16>
    %424 = arith.mulf %396, %423 : vector<8x32xbf16>
    %425 = vector.extract_strided_slice %422 {offsets = [1, 0], sizes = [8, 32], strides = [1, 1]} : vector<12x32xbf16> to vector<8x32xbf16>
    %426 = arith.mulf %396, %425 : vector<8x32xbf16>
    %427 = vector.extract_strided_slice %422 {offsets = [2, 0], sizes = [8, 32], strides = [1, 1]} : vector<12x32xbf16> to vector<8x32xbf16>
    %428 = arith.mulf %396, %427 : vector<8x32xbf16>
    %429 = vector.extract_strided_slice %422 {offsets = [3, 0], sizes = [8, 32], strides = [1, 1]} : vector<12x32xbf16> to vector<8x32xbf16>
    %430 = arith.mulf %396, %429 : vector<8x32xbf16>
    %431 = vector.extract_strided_slice %422 {offsets = [4, 0], sizes = [8, 32], strides = [1, 1]} : vector<12x32xbf16> to vector<8x32xbf16>
    %432 = arith.mulf %396, %431 : vector<8x32xbf16>
    %433 = vector.extract_strided_slice %4 {offsets = [9, 0, 0], sizes = [1, 12, 32], strides = [1, 1, 1]} : vector<12x12x32xbf16> to vector<1x12x32xbf16>
    %434 = vector.shape_cast %433 : vector<1x12x32xbf16> to vector<12x32xbf16>
    %435 = vector.extract_strided_slice %434 {offsets = [0, 0], sizes = [8, 32], strides = [1, 1]} : vector<12x32xbf16> to vector<8x32xbf16>
    %436 = arith.mulf %396, %435 : vector<8x32xbf16>
    %437 = vector.extract_strided_slice %434 {offsets = [1, 0], sizes = [8, 32], strides = [1, 1]} : vector<12x32xbf16> to vector<8x32xbf16>
    %438 = arith.mulf %396, %437 : vector<8x32xbf16>
    %439 = vector.extract_strided_slice %434 {offsets = [2, 0], sizes = [8, 32], strides = [1, 1]} : vector<12x32xbf16> to vector<8x32xbf16>
    %440 = arith.mulf %396, %439 : vector<8x32xbf16>
    %441 = vector.extract_strided_slice %434 {offsets = [3, 0], sizes = [8, 32], strides = [1, 1]} : vector<12x32xbf16> to vector<8x32xbf16>
    %442 = arith.mulf %396, %441 : vector<8x32xbf16>
    %443 = vector.extract_strided_slice %434 {offsets = [4, 0], sizes = [8, 32], strides = [1, 1]} : vector<12x32xbf16> to vector<8x32xbf16>
    %444 = arith.mulf %396, %443 : vector<8x32xbf16>
    %445 = vector.extract_strided_slice %4 {offsets = [10, 0, 0], sizes = [1, 12, 32], strides = [1, 1, 1]} : vector<12x12x32xbf16> to vector<1x12x32xbf16>
    %446 = vector.shape_cast %445 : vector<1x12x32xbf16> to vector<12x32xbf16>
    %447 = vector.extract_strided_slice %446 {offsets = [0, 0], sizes = [8, 32], strides = [1, 1]} : vector<12x32xbf16> to vector<8x32xbf16>
    %448 = arith.mulf %396, %447 : vector<8x32xbf16>
    %449 = vector.extract_strided_slice %446 {offsets = [1, 0], sizes = [8, 32], strides = [1, 1]} : vector<12x32xbf16> to vector<8x32xbf16>
    %450 = arith.mulf %396, %449 : vector<8x32xbf16>
    %451 = vector.extract_strided_slice %446 {offsets = [2, 0], sizes = [8, 32], strides = [1, 1]} : vector<12x32xbf16> to vector<8x32xbf16>
    %452 = arith.mulf %396, %451 : vector<8x32xbf16>
    %453 = vector.extract_strided_slice %446 {offsets = [3, 0], sizes = [8, 32], strides = [1, 1]} : vector<12x32xbf16> to vector<8x32xbf16>
    %454 = arith.mulf %396, %453 : vector<8x32xbf16>
    %455 = vector.extract_strided_slice %446 {offsets = [4, 0], sizes = [8, 32], strides = [1, 1]} : vector<12x32xbf16> to vector<8x32xbf16>
    %456 = arith.mulf %396, %455 : vector<8x32xbf16>
    %457 = tpu.concatenate %400, %402, %404, %406, %408, %412, %414, %416, %418, %420, %424, %426, %428, %430, %432, %436 in 1 : vector<8x32xbf16>, vector<8x32xbf16>, vector<8x32xbf16>, vector<8x32xbf16>, vector<8x32xbf16>, vector<8x32xbf16>, vector<8x32xbf16>, vector<8x32xbf16>, vector<8x32xbf16>, vector<8x32xbf16>, vector<8x32xbf16>, vector<8x32xbf16>, vector<8x32xbf16>, vector<8x32xbf16>, vector<8x32xbf16>, vector<8x32xbf16> -> vector<8x512xbf16>
    %458 = tpu.concatenate %438, %440, %442, %444, %448, %450, %452, %454, %456 in 1 : vector<8x32xbf16>, vector<8x32xbf16>, vector<8x32xbf16>, vector<8x32xbf16>, vector<8x32xbf16>, vector<8x32xbf16>, vector<8x32xbf16>, vector<8x32xbf16>, vector<8x32xbf16> -> vector<8x288xbf16>
    %459 = tpu.concatenate %457, %458 in 1 : vector<8x512xbf16>, vector<8x288xbf16> -> vector<8x800xbf16>
    %460 = vector.extract_strided_slice %2 {offsets = [7, 0, 0], sizes = [1, 8, 32], strides = [1, 1, 1]} : vector<8x8x32xbf16> to vector<1x8x32xbf16>
    %461 = vector.shape_cast %460 : vector<1x8x32xbf16> to vector<8x32xbf16>
    %462 = vector.extract_strided_slice %4 {offsets = [7, 0, 0], sizes = [1, 12, 32], strides = [1, 1, 1]} : vector<12x12x32xbf16> to vector<1x12x32xbf16>
    %463 = vector.shape_cast %462 : vector<1x12x32xbf16> to vector<12x32xbf16>
    %464 = vector.extract_strided_slice %463 {offsets = [0, 0], sizes = [8, 32], strides = [1, 1]} : vector<12x32xbf16> to vector<8x32xbf16>
    %465 = arith.mulf %461, %464 : vector<8x32xbf16>
    %466 = vector.extract_strided_slice %463 {offsets = [1, 0], sizes = [8, 32], strides = [1, 1]} : vector<12x32xbf16> to vector<8x32xbf16>
    %467 = arith.mulf %461, %466 : vector<8x32xbf16>
    %468 = vector.extract_strided_slice %463 {offsets = [2, 0], sizes = [8, 32], strides = [1, 1]} : vector<12x32xbf16> to vector<8x32xbf16>
    %469 = arith.mulf %461, %468 : vector<8x32xbf16>
    %470 = vector.extract_strided_slice %463 {offsets = [3, 0], sizes = [8, 32], strides = [1, 1]} : vector<12x32xbf16> to vector<8x32xbf16>
    %471 = arith.mulf %461, %470 : vector<8x32xbf16>
    %472 = vector.extract_strided_slice %463 {offsets = [4, 0], sizes = [8, 32], strides = [1, 1]} : vector<12x32xbf16> to vector<8x32xbf16>
    %473 = arith.mulf %461, %472 : vector<8x32xbf16>
    %474 = vector.extract_strided_slice %4 {offsets = [8, 0, 0], sizes = [1, 12, 32], strides = [1, 1, 1]} : vector<12x12x32xbf16> to vector<1x12x32xbf16>
    %475 = vector.shape_cast %474 : vector<1x12x32xbf16> to vector<12x32xbf16>
    %476 = vector.extract_strided_slice %475 {offsets = [0, 0], sizes = [8, 32], strides = [1, 1]} : vector<12x32xbf16> to vector<8x32xbf16>
    %477 = arith.mulf %461, %476 : vector<8x32xbf16>
    %478 = vector.extract_strided_slice %475 {offsets = [1, 0], sizes = [8, 32], strides = [1, 1]} : vector<12x32xbf16> to vector<8x32xbf16>
    %479 = arith.mulf %461, %478 : vector<8x32xbf16>
    %480 = vector.extract_strided_slice %475 {offsets = [2, 0], sizes = [8, 32], strides = [1, 1]} : vector<12x32xbf16> to vector<8x32xbf16>
    %481 = arith.mulf %461, %480 : vector<8x32xbf16>
    %482 = vector.extract_strided_slice %475 {offsets = [3, 0], sizes = [8, 32], strides = [1, 1]} : vector<12x32xbf16> to vector<8x32xbf16>
    %483 = arith.mulf %461, %482 : vector<8x32xbf16>
    %484 = vector.extract_strided_slice %475 {offsets = [4, 0], sizes = [8, 32], strides = [1, 1]} : vector<12x32xbf16> to vector<8x32xbf16>
    %485 = arith.mulf %461, %484 : vector<8x32xbf16>
    %486 = vector.extract_strided_slice %4 {offsets = [9, 0, 0], sizes = [1, 12, 32], strides = [1, 1, 1]} : vector<12x12x32xbf16> to vector<1x12x32xbf16>
    %487 = vector.shape_cast %486 : vector<1x12x32xbf16> to vector<12x32xbf16>
    %488 = vector.extract_strided_slice %487 {offsets = [0, 0], sizes = [8, 32], strides = [1, 1]} : vector<12x32xbf16> to vector<8x32xbf16>
    %489 = arith.mulf %461, %488 : vector<8x32xbf16>
    %490 = vector.extract_strided_slice %487 {offsets = [1, 0], sizes = [8, 32], strides = [1, 1]} : vector<12x32xbf16> to vector<8x32xbf16>
    %491 = arith.mulf %461, %490 : vector<8x32xbf16>
    %492 = vector.extract_strided_slice %487 {offsets = [2, 0], sizes = [8, 32], strides = [1, 1]} : vector<12x32xbf16> to vector<8x32xbf16>
    %493 = arith.mulf %461, %492 : vector<8x32xbf16>
    %494 = vector.extract_strided_slice %487 {offsets = [3, 0], sizes = [8, 32], strides = [1, 1]} : vector<12x32xbf16> to vector<8x32xbf16>
    %495 = arith.mulf %461, %494 : vector<8x32xbf16>
    %496 = vector.extract_strided_slice %487 {offsets = [4, 0], sizes = [8, 32], strides = [1, 1]} : vector<12x32xbf16> to vector<8x32xbf16>
    %497 = arith.mulf %461, %496 : vector<8x32xbf16>
    %498 = vector.extract_strided_slice %4 {offsets = [10, 0, 0], sizes = [1, 12, 32], strides = [1, 1, 1]} : vector<12x12x32xbf16> to vector<1x12x32xbf16>
    %499 = vector.shape_cast %498 : vector<1x12x32xbf16> to vector<12x32xbf16>
    %500 = vector.extract_strided_slice %499 {offsets = [0, 0], sizes = [8, 32], strides = [1, 1]} : vector<12x32xbf16> to vector<8x32xbf16>
    %501 = arith.mulf %461, %500 : vector<8x32xbf16>
    %502 = vector.extract_strided_slice %499 {offsets = [1, 0], sizes = [8, 32], strides = [1, 1]} : vector<12x32xbf16> to vector<8x32xbf16>
    %503 = arith.mulf %461, %502 : vector<8x32xbf16>
    %504 = vector.extract_strided_slice %499 {offsets = [2, 0], sizes = [8, 32], strides = [1, 1]} : vector<12x32xbf16> to vector<8x32xbf16>
    %505 = arith.mulf %461, %504 : vector<8x32xbf16>
    %506 = vector.extract_strided_slice %499 {offsets = [3, 0], sizes = [8, 32], strides = [1, 1]} : vector<12x32xbf16> to vector<8x32xbf16>
    %507 = arith.mulf %461, %506 : vector<8x32xbf16>
    %508 = vector.extract_strided_slice %499 {offsets = [4, 0], sizes = [8, 32], strides = [1, 1]} : vector<12x32xbf16> to vector<8x32xbf16>
    %509 = arith.mulf %461, %508 : vector<8x32xbf16>
    %510 = vector.extract_strided_slice %4 {offsets = [11, 0, 0], sizes = [1, 12, 32], strides = [1, 1, 1]} : vector<12x12x32xbf16> to vector<1x12x32xbf16>
    %511 = vector.shape_cast %510 : vector<1x12x32xbf16> to vector<12x32xbf16>
    %512 = vector.extract_strided_slice %511 {offsets = [0, 0], sizes = [8, 32], strides = [1, 1]} : vector<12x32xbf16> to vector<8x32xbf16>
    %513 = arith.mulf %461, %512 : vector<8x32xbf16>
    %514 = vector.extract_strided_slice %511 {offsets = [1, 0], sizes = [8, 32], strides = [1, 1]} : vector<12x32xbf16> to vector<8x32xbf16>
    %515 = arith.mulf %461, %514 : vector<8x32xbf16>
    %516 = vector.extract_strided_slice %511 {offsets = [2, 0], sizes = [8, 32], strides = [1, 1]} : vector<12x32xbf16> to vector<8x32xbf16>
    %517 = arith.mulf %461, %516 : vector<8x32xbf16>
    %518 = vector.extract_strided_slice %511 {offsets = [3, 0], sizes = [8, 32], strides = [1, 1]} : vector<12x32xbf16> to vector<8x32xbf16>
    %519 = arith.mulf %461, %518 : vector<8x32xbf16>
    %520 = vector.extract_strided_slice %511 {offsets = [4, 0], sizes = [8, 32], strides = [1, 1]} : vector<12x32xbf16> to vector<8x32xbf16>
    %521 = arith.mulf %461, %520 : vector<8x32xbf16>
    %522 = tpu.concatenate %465, %467, %469, %471, %473, %477, %479, %481, %483, %485, %489, %491, %493, %495, %497, %501 in 1 : vector<8x32xbf16>, vector<8x32xbf16>, vector<8x32xbf16>, vector<8x32xbf16>, vector<8x32xbf16>, vector<8x32xbf16>, vector<8x32xbf16>, vector<8x32xbf16>, vector<8x32xbf16>, vector<8x32xbf16>, vector<8x32xbf16>, vector<8x32xbf16>, vector<8x32xbf16>, vector<8x32xbf16>, vector<8x32xbf16>, vector<8x32xbf16> -> vector<8x512xbf16>
    %523 = tpu.concatenate %503, %505, %507, %509, %513, %515, %517, %519, %521 in 1 : vector<8x32xbf16>, vector<8x32xbf16>, vector<8x32xbf16>, vector<8x32xbf16>, vector<8x32xbf16>, vector<8x32xbf16>, vector<8x32xbf16>, vector<8x32xbf16>, vector<8x32xbf16> -> vector<8x288xbf16>
    %524 = tpu.concatenate %522, %523 in 1 : vector<8x512xbf16>, vector<8x288xbf16> -> vector<8x800xbf16>
    %525 = tpu.concatenate %69, %134, %199, %264, %329, %394, %459, %524 in 0 : vector<8x800xbf16>, vector<8x800xbf16>, vector<8x800xbf16>, vector<8x800xbf16>, vector<8x800xbf16>, vector<8x800xbf16>, vector<8x800xbf16>, vector<8x800xbf16> -> vector<64x800xbf16>
    %cst = arith.constant dense<0.000000e+00> : vector<64x32xf32>
    %526 = tpu.matmul %525, %0, %cst {dimension_numbers = #tpu.dot_dimension_numbers<[1], [0], [0], [1], [0, 0, 1, 1], [], []>} : vector<64x800xbf16>, vector<800x32xbf16>, vector<64x32xf32> -> vector<64x32xf32>
    %cst_9 = arith.constant 0.000000e+00 : f32
    %527 = vector.broadcast %cst_9 : f32 to vector<64x32xf32>
    %528 = arith.cmpf oge, %526, %527 : vector<64x32xf32>
    %cst_10 = arith.constant 1.000000e-01 : f32
    %529 = vector.broadcast %cst_10 : f32 to vector<64x32xf32>
    %530 = arith.mulf %529, %526 : vector<64x32xf32>
    %531 = arith.select %528, %526, %530 : vector<64x32xi1>, vector<64x32xf32>
    %532 = arith.truncf %531 : vector<64x32xf32> to vector<64x32xbf16>
    %c0_11 = arith.constant 0 : index
    %c0_12 = arith.constant 0 : index
    %c0_13 = arith.constant 0 : index
    %533 = vector.load %arg4[%c0_11, %c0_12, %c0_13] : memref<1x64x32xbf16, #tpu.memory_space<vmem>>, vector<1x64x32xbf16>
    %534 = vector.shape_cast %533 : vector<1x64x32xbf16> to vector<64x32xbf16>
    %535 = vector.shape_cast %532 : vector<64x32xbf16> to vector<1x64x32xbf16>
    tpu.vector_store %arg4[%c0_11, %c0_12, %c0_13], %535 {strides = array<i32>} : memref<1x64x32xbf16, #tpu.memory_space<vmem>>, vector<1x64x32xbf16>,
    return
  }
  func.func @transform_0(%arg0: i32) -> (i32, i32, i32, i32) {
    %c0_i32 = arith.constant 0 : i32
    %c0_i32_0 = arith.constant 0 : i32
    %c0_i32_1 = arith.constant 0 : i32
    %c0_i32_2 = arith.constant 0 : i32
    return %arg0, %c0_i32, %c0_i32_0, %c0_i32_1 : i32, i32, i32, i32
  }
  func.func @transform_1(%arg0: i32) -> (i32, i32, i32, i32) {
    %c0_i32 = arith.constant 0 : i32
    %c0_i32_0 = arith.constant 0 : i32
    %c0_i32_1 = arith.constant 0 : i32
    %c0_i32_2 = arith.constant 0 : i32
    return %arg0, %c0_i32, %c0_i32_0, %c0_i32_1 : i32, i32, i32, i32
  }
  func.func @transform_2(%arg0: i32) -> (i32, i32) {
    %c0_i32 = arith.constant 0 : i32
    %c0_i32_0 = arith.constant 0 : i32
    %c0_i32_1 = arith.constant 0 : i32
    return %c0_i32, %c0_i32_0 : i32, i32
  }
  func.func @transform_3(%arg0: i32) -> (i32, i32, i32) {
    %c0_i32 = arith.constant 0 : i32
    %c0_i32_0 = arith.constant 0 : i32
    %c0_i32_1 = arith.constant 0 : i32
    return %arg0, %c0_i32, %c0_i32_0 : i32, i32, i32
  }
}

module attributes {stable_mosaic.version = 11 : i64} {
  func.func @_conv3x3_kernel(%arg0: i32, %arg1: memref<1x1x10x10x64xbf16, #tpu.memory_space<vmem>>, %arg2: memref<576x32xbf16, #tpu.memory_space<vmem>>, %arg3: memref<1x32xf32, #tpu.memory_space<vmem>>, %arg4: memref<1x64x32xbf16, #tpu.memory_space<vmem>>) attributes {dimension_semantics = [#tpu.dimension_semantics<parallel>], iteration_bounds = array<i64: 2>, scalar_prefetch = 0 : i64, scratch_operands = 0 : i64, tpu.core_type = #tpu.core_type<tc>, window_params = [{transform_indices = @transform_0, window_bounds = array<i64: 1, 1, 10, 10, 64>}, {pipeline_mode = #tpu.pipeline_mode<synchronous>, transform_indices = @transform_1, window_bounds = array<i64: 576, 32>}, {pipeline_mode = #tpu.pipeline_mode<synchronous>, transform_indices = @transform_2, window_bounds = array<i64: 1, 32>}, {transform_indices = @transform_3, window_bounds = array<i64: 1, 64, 32>}]} {
    %c0 = arith.constant 0 : index
    %c0_0 = arith.constant 0 : index
    %0 = vector.load %arg2[%c0, %c0_0] : memref<576x32xbf16, #tpu.memory_space<vmem>>, vector<576x32xbf16>
    %c0_1 = arith.constant 0 : index
    %c0_2 = arith.constant 0 : index
    %1 = vector.load %arg3[%c0_1, %c0_2] : memref<1x32xf32, #tpu.memory_space<vmem>>, vector<1x32xf32>
    %2 = vector.shape_cast %1 : vector<1x32xf32> to vector<1x32xf32>
    %3 = vector.broadcast %2 : vector<1x32xf32> to vector<64x32xf32>
    %c0_3 = arith.constant 0 : index
    %c0_4 = arith.constant 0 : index
    %c0_5 = arith.constant 0 : index
    %c0_6 = arith.constant 0 : index
    %c0_7 = arith.constant 0 : index
    %4 = vector.load %arg1[%c0_3, %c0_4, %c0_5, %c0_6, %c0_7] : memref<1x1x10x10x64xbf16, #tpu.memory_space<vmem>>, vector<1x1x10x10x64xbf16>
    %5 = vector.shape_cast %4 : vector<1x1x10x10x64xbf16> to vector<10x10x64xbf16>
    %6 = vector.extract_strided_slice %5 {offsets = [0, 0, 0], sizes = [1, 8, 64], strides = [1, 1, 1]} : vector<10x10x64xbf16> to vector<1x8x64xbf16>
    %7 = vector.shape_cast %6 : vector<1x8x64xbf16> to vector<8x64xbf16>
    %8 = vector.extract_strided_slice %5 {offsets = [0, 1, 0], sizes = [1, 8, 64], strides = [1, 1, 1]} : vector<10x10x64xbf16> to vector<1x8x64xbf16>
    %9 = vector.shape_cast %8 : vector<1x8x64xbf16> to vector<8x64xbf16>
    %10 = vector.extract_strided_slice %5 {offsets = [0, 2, 0], sizes = [1, 8, 64], strides = [1, 1, 1]} : vector<10x10x64xbf16> to vector<1x8x64xbf16>
    %11 = vector.shape_cast %10 : vector<1x8x64xbf16> to vector<8x64xbf16>
    %12 = vector.extract_strided_slice %5 {offsets = [1, 0, 0], sizes = [1, 8, 64], strides = [1, 1, 1]} : vector<10x10x64xbf16> to vector<1x8x64xbf16>
    %13 = vector.shape_cast %12 : vector<1x8x64xbf16> to vector<8x64xbf16>
    %14 = vector.extract_strided_slice %5 {offsets = [1, 1, 0], sizes = [1, 8, 64], strides = [1, 1, 1]} : vector<10x10x64xbf16> to vector<1x8x64xbf16>
    %15 = vector.shape_cast %14 : vector<1x8x64xbf16> to vector<8x64xbf16>
    %16 = vector.extract_strided_slice %5 {offsets = [1, 2, 0], sizes = [1, 8, 64], strides = [1, 1, 1]} : vector<10x10x64xbf16> to vector<1x8x64xbf16>
    %17 = vector.shape_cast %16 : vector<1x8x64xbf16> to vector<8x64xbf16>
    %18 = vector.extract_strided_slice %5 {offsets = [2, 0, 0], sizes = [1, 8, 64], strides = [1, 1, 1]} : vector<10x10x64xbf16> to vector<1x8x64xbf16>
    %19 = vector.shape_cast %18 : vector<1x8x64xbf16> to vector<8x64xbf16>
    %20 = vector.extract_strided_slice %5 {offsets = [2, 1, 0], sizes = [1, 8, 64], strides = [1, 1, 1]} : vector<10x10x64xbf16> to vector<1x8x64xbf16>
    %21 = vector.shape_cast %20 : vector<1x8x64xbf16> to vector<8x64xbf16>
    %22 = vector.extract_strided_slice %5 {offsets = [2, 2, 0], sizes = [1, 8, 64], strides = [1, 1, 1]} : vector<10x10x64xbf16> to vector<1x8x64xbf16>
    %23 = vector.shape_cast %22 : vector<1x8x64xbf16> to vector<8x64xbf16>
    %24 = tpu.concatenate %7, %9, %11, %13, %15, %17, %19, %21, %23 in 1 : vector<8x64xbf16>, vector<8x64xbf16>, vector<8x64xbf16>, vector<8x64xbf16>, vector<8x64xbf16>, vector<8x64xbf16>, vector<8x64xbf16>, vector<8x64xbf16>, vector<8x64xbf16> -> vector<8x576xbf16>
    %25 = vector.extract_strided_slice %5 {offsets = [1, 0, 0], sizes = [1, 8, 64], strides = [1, 1, 1]} : vector<10x10x64xbf16> to vector<1x8x64xbf16>
    %26 = vector.shape_cast %25 : vector<1x8x64xbf16> to vector<8x64xbf16>
    %27 = vector.extract_strided_slice %5 {offsets = [1, 1, 0], sizes = [1, 8, 64], strides = [1, 1, 1]} : vector<10x10x64xbf16> to vector<1x8x64xbf16>
    %28 = vector.shape_cast %27 : vector<1x8x64xbf16> to vector<8x64xbf16>
    %29 = vector.extract_strided_slice %5 {offsets = [1, 2, 0], sizes = [1, 8, 64], strides = [1, 1, 1]} : vector<10x10x64xbf16> to vector<1x8x64xbf16>
    %30 = vector.shape_cast %29 : vector<1x8x64xbf16> to vector<8x64xbf16>
    %31 = vector.extract_strided_slice %5 {offsets = [2, 0, 0], sizes = [1, 8, 64], strides = [1, 1, 1]} : vector<10x10x64xbf16> to vector<1x8x64xbf16>
    %32 = vector.shape_cast %31 : vector<1x8x64xbf16> to vector<8x64xbf16>
    %33 = vector.extract_strided_slice %5 {offsets = [2, 1, 0], sizes = [1, 8, 64], strides = [1, 1, 1]} : vector<10x10x64xbf16> to vector<1x8x64xbf16>
    %34 = vector.shape_cast %33 : vector<1x8x64xbf16> to vector<8x64xbf16>
    %35 = vector.extract_strided_slice %5 {offsets = [2, 2, 0], sizes = [1, 8, 64], strides = [1, 1, 1]} : vector<10x10x64xbf16> to vector<1x8x64xbf16>
    %36 = vector.shape_cast %35 : vector<1x8x64xbf16> to vector<8x64xbf16>
    %37 = vector.extract_strided_slice %5 {offsets = [3, 0, 0], sizes = [1, 8, 64], strides = [1, 1, 1]} : vector<10x10x64xbf16> to vector<1x8x64xbf16>
    %38 = vector.shape_cast %37 : vector<1x8x64xbf16> to vector<8x64xbf16>
    %39 = vector.extract_strided_slice %5 {offsets = [3, 1, 0], sizes = [1, 8, 64], strides = [1, 1, 1]} : vector<10x10x64xbf16> to vector<1x8x64xbf16>
    %40 = vector.shape_cast %39 : vector<1x8x64xbf16> to vector<8x64xbf16>
    %41 = vector.extract_strided_slice %5 {offsets = [3, 2, 0], sizes = [1, 8, 64], strides = [1, 1, 1]} : vector<10x10x64xbf16> to vector<1x8x64xbf16>
    %42 = vector.shape_cast %41 : vector<1x8x64xbf16> to vector<8x64xbf16>
    %43 = tpu.concatenate %26, %28, %30, %32, %34, %36, %38, %40, %42 in 1 : vector<8x64xbf16>, vector<8x64xbf16>, vector<8x64xbf16>, vector<8x64xbf16>, vector<8x64xbf16>, vector<8x64xbf16>, vector<8x64xbf16>, vector<8x64xbf16>, vector<8x64xbf16> -> vector<8x576xbf16>
    %44 = vector.extract_strided_slice %5 {offsets = [2, 0, 0], sizes = [1, 8, 64], strides = [1, 1, 1]} : vector<10x10x64xbf16> to vector<1x8x64xbf16>
    %45 = vector.shape_cast %44 : vector<1x8x64xbf16> to vector<8x64xbf16>
    %46 = vector.extract_strided_slice %5 {offsets = [2, 1, 0], sizes = [1, 8, 64], strides = [1, 1, 1]} : vector<10x10x64xbf16> to vector<1x8x64xbf16>
    %47 = vector.shape_cast %46 : vector<1x8x64xbf16> to vector<8x64xbf16>
    %48 = vector.extract_strided_slice %5 {offsets = [2, 2, 0], sizes = [1, 8, 64], strides = [1, 1, 1]} : vector<10x10x64xbf16> to vector<1x8x64xbf16>
    %49 = vector.shape_cast %48 : vector<1x8x64xbf16> to vector<8x64xbf16>
    %50 = vector.extract_strided_slice %5 {offsets = [3, 0, 0], sizes = [1, 8, 64], strides = [1, 1, 1]} : vector<10x10x64xbf16> to vector<1x8x64xbf16>
    %51 = vector.shape_cast %50 : vector<1x8x64xbf16> to vector<8x64xbf16>
    %52 = vector.extract_strided_slice %5 {offsets = [3, 1, 0], sizes = [1, 8, 64], strides = [1, 1, 1]} : vector<10x10x64xbf16> to vector<1x8x64xbf16>
    %53 = vector.shape_cast %52 : vector<1x8x64xbf16> to vector<8x64xbf16>
    %54 = vector.extract_strided_slice %5 {offsets = [3, 2, 0], sizes = [1, 8, 64], strides = [1, 1, 1]} : vector<10x10x64xbf16> to vector<1x8x64xbf16>
    %55 = vector.shape_cast %54 : vector<1x8x64xbf16> to vector<8x64xbf16>
    %56 = vector.extract_strided_slice %5 {offsets = [4, 0, 0], sizes = [1, 8, 64], strides = [1, 1, 1]} : vector<10x10x64xbf16> to vector<1x8x64xbf16>
    %57 = vector.shape_cast %56 : vector<1x8x64xbf16> to vector<8x64xbf16>
    %58 = vector.extract_strided_slice %5 {offsets = [4, 1, 0], sizes = [1, 8, 64], strides = [1, 1, 1]} : vector<10x10x64xbf16> to vector<1x8x64xbf16>
    %59 = vector.shape_cast %58 : vector<1x8x64xbf16> to vector<8x64xbf16>
    %60 = vector.extract_strided_slice %5 {offsets = [4, 2, 0], sizes = [1, 8, 64], strides = [1, 1, 1]} : vector<10x10x64xbf16> to vector<1x8x64xbf16>
    %61 = vector.shape_cast %60 : vector<1x8x64xbf16> to vector<8x64xbf16>
    %62 = tpu.concatenate %45, %47, %49, %51, %53, %55, %57, %59, %61 in 1 : vector<8x64xbf16>, vector<8x64xbf16>, vector<8x64xbf16>, vector<8x64xbf16>, vector<8x64xbf16>, vector<8x64xbf16>, vector<8x64xbf16>, vector<8x64xbf16>, vector<8x64xbf16> -> vector<8x576xbf16>
    %63 = vector.extract_strided_slice %5 {offsets = [3, 0, 0], sizes = [1, 8, 64], strides = [1, 1, 1]} : vector<10x10x64xbf16> to vector<1x8x64xbf16>
    %64 = vector.shape_cast %63 : vector<1x8x64xbf16> to vector<8x64xbf16>
    %65 = vector.extract_strided_slice %5 {offsets = [3, 1, 0], sizes = [1, 8, 64], strides = [1, 1, 1]} : vector<10x10x64xbf16> to vector<1x8x64xbf16>
    %66 = vector.shape_cast %65 : vector<1x8x64xbf16> to vector<8x64xbf16>
    %67 = vector.extract_strided_slice %5 {offsets = [3, 2, 0], sizes = [1, 8, 64], strides = [1, 1, 1]} : vector<10x10x64xbf16> to vector<1x8x64xbf16>
    %68 = vector.shape_cast %67 : vector<1x8x64xbf16> to vector<8x64xbf16>
    %69 = vector.extract_strided_slice %5 {offsets = [4, 0, 0], sizes = [1, 8, 64], strides = [1, 1, 1]} : vector<10x10x64xbf16> to vector<1x8x64xbf16>
    %70 = vector.shape_cast %69 : vector<1x8x64xbf16> to vector<8x64xbf16>
    %71 = vector.extract_strided_slice %5 {offsets = [4, 1, 0], sizes = [1, 8, 64], strides = [1, 1, 1]} : vector<10x10x64xbf16> to vector<1x8x64xbf16>
    %72 = vector.shape_cast %71 : vector<1x8x64xbf16> to vector<8x64xbf16>
    %73 = vector.extract_strided_slice %5 {offsets = [4, 2, 0], sizes = [1, 8, 64], strides = [1, 1, 1]} : vector<10x10x64xbf16> to vector<1x8x64xbf16>
    %74 = vector.shape_cast %73 : vector<1x8x64xbf16> to vector<8x64xbf16>
    %75 = vector.extract_strided_slice %5 {offsets = [5, 0, 0], sizes = [1, 8, 64], strides = [1, 1, 1]} : vector<10x10x64xbf16> to vector<1x8x64xbf16>
    %76 = vector.shape_cast %75 : vector<1x8x64xbf16> to vector<8x64xbf16>
    %77 = vector.extract_strided_slice %5 {offsets = [5, 1, 0], sizes = [1, 8, 64], strides = [1, 1, 1]} : vector<10x10x64xbf16> to vector<1x8x64xbf16>
    %78 = vector.shape_cast %77 : vector<1x8x64xbf16> to vector<8x64xbf16>
    %79 = vector.extract_strided_slice %5 {offsets = [5, 2, 0], sizes = [1, 8, 64], strides = [1, 1, 1]} : vector<10x10x64xbf16> to vector<1x8x64xbf16>
    %80 = vector.shape_cast %79 : vector<1x8x64xbf16> to vector<8x64xbf16>
    %81 = tpu.concatenate %64, %66, %68, %70, %72, %74, %76, %78, %80 in 1 : vector<8x64xbf16>, vector<8x64xbf16>, vector<8x64xbf16>, vector<8x64xbf16>, vector<8x64xbf16>, vector<8x64xbf16>, vector<8x64xbf16>, vector<8x64xbf16>, vector<8x64xbf16> -> vector<8x576xbf16>
    %82 = vector.extract_strided_slice %5 {offsets = [4, 0, 0], sizes = [1, 8, 64], strides = [1, 1, 1]} : vector<10x10x64xbf16> to vector<1x8x64xbf16>
    %83 = vector.shape_cast %82 : vector<1x8x64xbf16> to vector<8x64xbf16>
    %84 = vector.extract_strided_slice %5 {offsets = [4, 1, 0], sizes = [1, 8, 64], strides = [1, 1, 1]} : vector<10x10x64xbf16> to vector<1x8x64xbf16>
    %85 = vector.shape_cast %84 : vector<1x8x64xbf16> to vector<8x64xbf16>
    %86 = vector.extract_strided_slice %5 {offsets = [4, 2, 0], sizes = [1, 8, 64], strides = [1, 1, 1]} : vector<10x10x64xbf16> to vector<1x8x64xbf16>
    %87 = vector.shape_cast %86 : vector<1x8x64xbf16> to vector<8x64xbf16>
    %88 = vector.extract_strided_slice %5 {offsets = [5, 0, 0], sizes = [1, 8, 64], strides = [1, 1, 1]} : vector<10x10x64xbf16> to vector<1x8x64xbf16>
    %89 = vector.shape_cast %88 : vector<1x8x64xbf16> to vector<8x64xbf16>
    %90 = vector.extract_strided_slice %5 {offsets = [5, 1, 0], sizes = [1, 8, 64], strides = [1, 1, 1]} : vector<10x10x64xbf16> to vector<1x8x64xbf16>
    %91 = vector.shape_cast %90 : vector<1x8x64xbf16> to vector<8x64xbf16>
    %92 = vector.extract_strided_slice %5 {offsets = [5, 2, 0], sizes = [1, 8, 64], strides = [1, 1, 1]} : vector<10x10x64xbf16> to vector<1x8x64xbf16>
    %93 = vector.shape_cast %92 : vector<1x8x64xbf16> to vector<8x64xbf16>
    %94 = vector.extract_strided_slice %5 {offsets = [6, 0, 0], sizes = [1, 8, 64], strides = [1, 1, 1]} : vector<10x10x64xbf16> to vector<1x8x64xbf16>
    %95 = vector.shape_cast %94 : vector<1x8x64xbf16> to vector<8x64xbf16>
    %96 = vector.extract_strided_slice %5 {offsets = [6, 1, 0], sizes = [1, 8, 64], strides = [1, 1, 1]} : vector<10x10x64xbf16> to vector<1x8x64xbf16>
    %97 = vector.shape_cast %96 : vector<1x8x64xbf16> to vector<8x64xbf16>
    %98 = vector.extract_strided_slice %5 {offsets = [6, 2, 0], sizes = [1, 8, 64], strides = [1, 1, 1]} : vector<10x10x64xbf16> to vector<1x8x64xbf16>
    %99 = vector.shape_cast %98 : vector<1x8x64xbf16> to vector<8x64xbf16>
    %100 = tpu.concatenate %83, %85, %87, %89, %91, %93, %95, %97, %99 in 1 : vector<8x64xbf16>, vector<8x64xbf16>, vector<8x64xbf16>, vector<8x64xbf16>, vector<8x64xbf16>, vector<8x64xbf16>, vector<8x64xbf16>, vector<8x64xbf16>, vector<8x64xbf16> -> vector<8x576xbf16>
    %101 = vector.extract_strided_slice %5 {offsets = [5, 0, 0], sizes = [1, 8, 64], strides = [1, 1, 1]} : vector<10x10x64xbf16> to vector<1x8x64xbf16>
    %102 = vector.shape_cast %101 : vector<1x8x64xbf16> to vector<8x64xbf16>
    %103 = vector.extract_strided_slice %5 {offsets = [5, 1, 0], sizes = [1, 8, 64], strides = [1, 1, 1]} : vector<10x10x64xbf16> to vector<1x8x64xbf16>
    %104 = vector.shape_cast %103 : vector<1x8x64xbf16> to vector<8x64xbf16>
    %105 = vector.extract_strided_slice %5 {offsets = [5, 2, 0], sizes = [1, 8, 64], strides = [1, 1, 1]} : vector<10x10x64xbf16> to vector<1x8x64xbf16>
    %106 = vector.shape_cast %105 : vector<1x8x64xbf16> to vector<8x64xbf16>
    %107 = vector.extract_strided_slice %5 {offsets = [6, 0, 0], sizes = [1, 8, 64], strides = [1, 1, 1]} : vector<10x10x64xbf16> to vector<1x8x64xbf16>
    %108 = vector.shape_cast %107 : vector<1x8x64xbf16> to vector<8x64xbf16>
    %109 = vector.extract_strided_slice %5 {offsets = [6, 1, 0], sizes = [1, 8, 64], strides = [1, 1, 1]} : vector<10x10x64xbf16> to vector<1x8x64xbf16>
    %110 = vector.shape_cast %109 : vector<1x8x64xbf16> to vector<8x64xbf16>
    %111 = vector.extract_strided_slice %5 {offsets = [6, 2, 0], sizes = [1, 8, 64], strides = [1, 1, 1]} : vector<10x10x64xbf16> to vector<1x8x64xbf16>
    %112 = vector.shape_cast %111 : vector<1x8x64xbf16> to vector<8x64xbf16>
    %113 = vector.extract_strided_slice %5 {offsets = [7, 0, 0], sizes = [1, 8, 64], strides = [1, 1, 1]} : vector<10x10x64xbf16> to vector<1x8x64xbf16>
    %114 = vector.shape_cast %113 : vector<1x8x64xbf16> to vector<8x64xbf16>
    %115 = vector.extract_strided_slice %5 {offsets = [7, 1, 0], sizes = [1, 8, 64], strides = [1, 1, 1]} : vector<10x10x64xbf16> to vector<1x8x64xbf16>
    %116 = vector.shape_cast %115 : vector<1x8x64xbf16> to vector<8x64xbf16>
    %117 = vector.extract_strided_slice %5 {offsets = [7, 2, 0], sizes = [1, 8, 64], strides = [1, 1, 1]} : vector<10x10x64xbf16> to vector<1x8x64xbf16>
    %118 = vector.shape_cast %117 : vector<1x8x64xbf16> to vector<8x64xbf16>
    %119 = tpu.concatenate %102, %104, %106, %108, %110, %112, %114, %116, %118 in 1 : vector<8x64xbf16>, vector<8x64xbf16>, vector<8x64xbf16>, vector<8x64xbf16>, vector<8x64xbf16>, vector<8x64xbf16>, vector<8x64xbf16>, vector<8x64xbf16>, vector<8x64xbf16> -> vector<8x576xbf16>
    %120 = vector.extract_strided_slice %5 {offsets = [6, 0, 0], sizes = [1, 8, 64], strides = [1, 1, 1]} : vector<10x10x64xbf16> to vector<1x8x64xbf16>
    %121 = vector.shape_cast %120 : vector<1x8x64xbf16> to vector<8x64xbf16>
    %122 = vector.extract_strided_slice %5 {offsets = [6, 1, 0], sizes = [1, 8, 64], strides = [1, 1, 1]} : vector<10x10x64xbf16> to vector<1x8x64xbf16>
    %123 = vector.shape_cast %122 : vector<1x8x64xbf16> to vector<8x64xbf16>
    %124 = vector.extract_strided_slice %5 {offsets = [6, 2, 0], sizes = [1, 8, 64], strides = [1, 1, 1]} : vector<10x10x64xbf16> to vector<1x8x64xbf16>
    %125 = vector.shape_cast %124 : vector<1x8x64xbf16> to vector<8x64xbf16>
    %126 = vector.extract_strided_slice %5 {offsets = [7, 0, 0], sizes = [1, 8, 64], strides = [1, 1, 1]} : vector<10x10x64xbf16> to vector<1x8x64xbf16>
    %127 = vector.shape_cast %126 : vector<1x8x64xbf16> to vector<8x64xbf16>
    %128 = vector.extract_strided_slice %5 {offsets = [7, 1, 0], sizes = [1, 8, 64], strides = [1, 1, 1]} : vector<10x10x64xbf16> to vector<1x8x64xbf16>
    %129 = vector.shape_cast %128 : vector<1x8x64xbf16> to vector<8x64xbf16>
    %130 = vector.extract_strided_slice %5 {offsets = [7, 2, 0], sizes = [1, 8, 64], strides = [1, 1, 1]} : vector<10x10x64xbf16> to vector<1x8x64xbf16>
    %131 = vector.shape_cast %130 : vector<1x8x64xbf16> to vector<8x64xbf16>
    %132 = vector.extract_strided_slice %5 {offsets = [8, 0, 0], sizes = [1, 8, 64], strides = [1, 1, 1]} : vector<10x10x64xbf16> to vector<1x8x64xbf16>
    %133 = vector.shape_cast %132 : vector<1x8x64xbf16> to vector<8x64xbf16>
    %134 = vector.extract_strided_slice %5 {offsets = [8, 1, 0], sizes = [1, 8, 64], strides = [1, 1, 1]} : vector<10x10x64xbf16> to vector<1x8x64xbf16>
    %135 = vector.shape_cast %134 : vector<1x8x64xbf16> to vector<8x64xbf16>
    %136 = vector.extract_strided_slice %5 {offsets = [8, 2, 0], sizes = [1, 8, 64], strides = [1, 1, 1]} : vector<10x10x64xbf16> to vector<1x8x64xbf16>
    %137 = vector.shape_cast %136 : vector<1x8x64xbf16> to vector<8x64xbf16>
    %138 = tpu.concatenate %121, %123, %125, %127, %129, %131, %133, %135, %137 in 1 : vector<8x64xbf16>, vector<8x64xbf16>, vector<8x64xbf16>, vector<8x64xbf16>, vector<8x64xbf16>, vector<8x64xbf16>, vector<8x64xbf16>, vector<8x64xbf16>, vector<8x64xbf16> -> vector<8x576xbf16>
    %139 = vector.extract_strided_slice %5 {offsets = [7, 0, 0], sizes = [1, 8, 64], strides = [1, 1, 1]} : vector<10x10x64xbf16> to vector<1x8x64xbf16>
    %140 = vector.shape_cast %139 : vector<1x8x64xbf16> to vector<8x64xbf16>
    %141 = vector.extract_strided_slice %5 {offsets = [7, 1, 0], sizes = [1, 8, 64], strides = [1, 1, 1]} : vector<10x10x64xbf16> to vector<1x8x64xbf16>
    %142 = vector.shape_cast %141 : vector<1x8x64xbf16> to vector<8x64xbf16>
    %143 = vector.extract_strided_slice %5 {offsets = [7, 2, 0], sizes = [1, 8, 64], strides = [1, 1, 1]} : vector<10x10x64xbf16> to vector<1x8x64xbf16>
    %144 = vector.shape_cast %143 : vector<1x8x64xbf16> to vector<8x64xbf16>
    %145 = vector.extract_strided_slice %5 {offsets = [8, 0, 0], sizes = [1, 8, 64], strides = [1, 1, 1]} : vector<10x10x64xbf16> to vector<1x8x64xbf16>
    %146 = vector.shape_cast %145 : vector<1x8x64xbf16> to vector<8x64xbf16>
    %147 = vector.extract_strided_slice %5 {offsets = [8, 1, 0], sizes = [1, 8, 64], strides = [1, 1, 1]} : vector<10x10x64xbf16> to vector<1x8x64xbf16>
    %148 = vector.shape_cast %147 : vector<1x8x64xbf16> to vector<8x64xbf16>
    %149 = vector.extract_strided_slice %5 {offsets = [8, 2, 0], sizes = [1, 8, 64], strides = [1, 1, 1]} : vector<10x10x64xbf16> to vector<1x8x64xbf16>
    %150 = vector.shape_cast %149 : vector<1x8x64xbf16> to vector<8x64xbf16>
    %151 = vector.extract_strided_slice %5 {offsets = [9, 0, 0], sizes = [1, 8, 64], strides = [1, 1, 1]} : vector<10x10x64xbf16> to vector<1x8x64xbf16>
    %152 = vector.shape_cast %151 : vector<1x8x64xbf16> to vector<8x64xbf16>
    %153 = vector.extract_strided_slice %5 {offsets = [9, 1, 0], sizes = [1, 8, 64], strides = [1, 1, 1]} : vector<10x10x64xbf16> to vector<1x8x64xbf16>
    %154 = vector.shape_cast %153 : vector<1x8x64xbf16> to vector<8x64xbf16>
    %155 = vector.extract_strided_slice %5 {offsets = [9, 2, 0], sizes = [1, 8, 64], strides = [1, 1, 1]} : vector<10x10x64xbf16> to vector<1x8x64xbf16>
    %156 = vector.shape_cast %155 : vector<1x8x64xbf16> to vector<8x64xbf16>
    %157 = tpu.concatenate %140, %142, %144, %146, %148, %150, %152, %154, %156 in 1 : vector<8x64xbf16>, vector<8x64xbf16>, vector<8x64xbf16>, vector<8x64xbf16>, vector<8x64xbf16>, vector<8x64xbf16>, vector<8x64xbf16>, vector<8x64xbf16>, vector<8x64xbf16> -> vector<8x576xbf16>
    %158 = tpu.concatenate %24, %43, %62, %81, %100, %119, %138, %157 in 0 : vector<8x576xbf16>, vector<8x576xbf16>, vector<8x576xbf16>, vector<8x576xbf16>, vector<8x576xbf16>, vector<8x576xbf16>, vector<8x576xbf16>, vector<8x576xbf16> -> vector<64x576xbf16>
    %cst = arith.constant dense<0.000000e+00> : vector<64x32xf32>
    %159 = tpu.matmul %158, %0, %cst {dimension_numbers = #tpu.dot_dimension_numbers<[1], [0], [0], [1], [0, 0, 1, 1], [], []>} : vector<64x576xbf16>, vector<576x32xbf16>, vector<64x32xf32> -> vector<64x32xf32>
    %160 = arith.addf %159, %3 : vector<64x32xf32>
    %cst_8 = arith.constant 0.000000e+00 : f32
    %161 = vector.broadcast %cst_8 : f32 to vector<64x32xf32>
    %162 = arith.cmpf oge, %160, %161 : vector<64x32xf32>
    %cst_9 = arith.constant 1.000000e-01 : f32
    %163 = vector.broadcast %cst_9 : f32 to vector<64x32xf32>
    %164 = arith.mulf %163, %160 : vector<64x32xf32>
    %165 = arith.select %162, %160, %164 : vector<64x32xi1>, vector<64x32xf32>
    %166 = arith.truncf %165 : vector<64x32xf32> to vector<64x32xbf16>
    %c0_10 = arith.constant 0 : index
    %c0_11 = arith.constant 0 : index
    %c0_12 = arith.constant 0 : index
    %167 = vector.load %arg4[%c0_10, %c0_11, %c0_12] : memref<1x64x32xbf16, #tpu.memory_space<vmem>>, vector<1x64x32xbf16>
    %168 = vector.shape_cast %167 : vector<1x64x32xbf16> to vector<64x32xbf16>
    %169 = vector.shape_cast %166 : vector<64x32xbf16> to vector<1x64x32xbf16>
    tpu.vector_store %arg4[%c0_10, %c0_11, %c0_12], %169 {strides = array<i32>} : memref<1x64x32xbf16, #tpu.memory_space<vmem>>, vector<1x64x32xbf16>,
    return
  }
  func.func @transform_0(%arg0: i32) -> (i32, i32, i32, i32, i32) {
    %c0_i32 = arith.constant 0 : i32
    %c0_i32_0 = arith.constant 0 : i32
    %c0_i32_1 = arith.constant 0 : i32
    %c0_i32_2 = arith.constant 0 : i32
    %c0_i32_3 = arith.constant 0 : i32
    return %arg0, %c0_i32, %c0_i32_0, %c0_i32_1, %c0_i32_2 : i32, i32, i32, i32, i32
  }
  func.func @transform_1(%arg0: i32) -> (i32, i32) {
    %c0_i32 = arith.constant 0 : i32
    %c0_i32_0 = arith.constant 0 : i32
    %c0_i32_1 = arith.constant 0 : i32
    return %c0_i32, %c0_i32_0 : i32, i32
  }
  func.func @transform_2(%arg0: i32) -> (i32, i32) {
    %c0_i32 = arith.constant 0 : i32
    %c0_i32_0 = arith.constant 0 : i32
    %c0_i32_1 = arith.constant 0 : i32
    return %c0_i32, %c0_i32_0 : i32, i32
  }
  func.func @transform_3(%arg0: i32) -> (i32, i32, i32) {
    %c0_i32 = arith.constant 0 : i32
    %c0_i32_0 = arith.constant 0 : i32
    %c0_i32_1 = arith.constant 0 : i32
    return %arg0, %c0_i32, %c0_i32_0 : i32, i32, i32
  }
}

module attributes {stable_mosaic.version = 11 : i64} {
  func.func @_conv3x3_kernel(%arg0: i32, %arg1: memref<1x1x10x10x32xbf16, #tpu.memory_space<vmem>>, %arg2: memref<288x128xbf16, #tpu.memory_space<vmem>>, %arg3: memref<1x128xf32, #tpu.memory_space<vmem>>, %arg4: memref<1x64x128xbf16, #tpu.memory_space<vmem>>) attributes {dimension_semantics = [#tpu.dimension_semantics<parallel>], iteration_bounds = array<i64: 2>, scalar_prefetch = 0 : i64, scratch_operands = 0 : i64, tpu.core_type = #tpu.core_type<tc>, window_params = [{transform_indices = @transform_0, window_bounds = array<i64: 1, 1, 10, 10, 32>}, {pipeline_mode = #tpu.pipeline_mode<synchronous>, transform_indices = @transform_1, window_bounds = array<i64: 288, 128>}, {pipeline_mode = #tpu.pipeline_mode<synchronous>, transform_indices = @transform_2, window_bounds = array<i64: 1, 128>}, {transform_indices = @transform_3, window_bounds = array<i64: 1, 64, 128>}]} {
    %c0 = arith.constant 0 : index
    %c0_0 = arith.constant 0 : index
    %0 = vector.load %arg2[%c0, %c0_0] : memref<288x128xbf16, #tpu.memory_space<vmem>>, vector<288x128xbf16>
    %c0_1 = arith.constant 0 : index
    %c0_2 = arith.constant 0 : index
    %1 = vector.load %arg3[%c0_1, %c0_2] : memref<1x128xf32, #tpu.memory_space<vmem>>, vector<1x128xf32>
    %2 = vector.shape_cast %1 : vector<1x128xf32> to vector<1x128xf32>
    %3 = vector.broadcast %2 : vector<1x128xf32> to vector<64x128xf32>
    %c0_3 = arith.constant 0 : index
    %c0_4 = arith.constant 0 : index
    %c0_5 = arith.constant 0 : index
    %c0_6 = arith.constant 0 : index
    %c0_7 = arith.constant 0 : index
    %4 = vector.load %arg1[%c0_3, %c0_4, %c0_5, %c0_6, %c0_7] : memref<1x1x10x10x32xbf16, #tpu.memory_space<vmem>>, vector<1x1x10x10x32xbf16>
    %5 = vector.shape_cast %4 : vector<1x1x10x10x32xbf16> to vector<10x10x32xbf16>
    %6 = vector.extract_strided_slice %5 {offsets = [0, 0, 0], sizes = [1, 8, 32], strides = [1, 1, 1]} : vector<10x10x32xbf16> to vector<1x8x32xbf16>
    %7 = vector.shape_cast %6 : vector<1x8x32xbf16> to vector<8x32xbf16>
    %8 = vector.extract_strided_slice %5 {offsets = [0, 1, 0], sizes = [1, 8, 32], strides = [1, 1, 1]} : vector<10x10x32xbf16> to vector<1x8x32xbf16>
    %9 = vector.shape_cast %8 : vector<1x8x32xbf16> to vector<8x32xbf16>
    %10 = vector.extract_strided_slice %5 {offsets = [0, 2, 0], sizes = [1, 8, 32], strides = [1, 1, 1]} : vector<10x10x32xbf16> to vector<1x8x32xbf16>
    %11 = vector.shape_cast %10 : vector<1x8x32xbf16> to vector<8x32xbf16>
    %12 = vector.extract_strided_slice %5 {offsets = [1, 0, 0], sizes = [1, 8, 32], strides = [1, 1, 1]} : vector<10x10x32xbf16> to vector<1x8x32xbf16>
    %13 = vector.shape_cast %12 : vector<1x8x32xbf16> to vector<8x32xbf16>
    %14 = vector.extract_strided_slice %5 {offsets = [1, 1, 0], sizes = [1, 8, 32], strides = [1, 1, 1]} : vector<10x10x32xbf16> to vector<1x8x32xbf16>
    %15 = vector.shape_cast %14 : vector<1x8x32xbf16> to vector<8x32xbf16>
    %16 = vector.extract_strided_slice %5 {offsets = [1, 2, 0], sizes = [1, 8, 32], strides = [1, 1, 1]} : vector<10x10x32xbf16> to vector<1x8x32xbf16>
    %17 = vector.shape_cast %16 : vector<1x8x32xbf16> to vector<8x32xbf16>
    %18 = vector.extract_strided_slice %5 {offsets = [2, 0, 0], sizes = [1, 8, 32], strides = [1, 1, 1]} : vector<10x10x32xbf16> to vector<1x8x32xbf16>
    %19 = vector.shape_cast %18 : vector<1x8x32xbf16> to vector<8x32xbf16>
    %20 = vector.extract_strided_slice %5 {offsets = [2, 1, 0], sizes = [1, 8, 32], strides = [1, 1, 1]} : vector<10x10x32xbf16> to vector<1x8x32xbf16>
    %21 = vector.shape_cast %20 : vector<1x8x32xbf16> to vector<8x32xbf16>
    %22 = vector.extract_strided_slice %5 {offsets = [2, 2, 0], sizes = [1, 8, 32], strides = [1, 1, 1]} : vector<10x10x32xbf16> to vector<1x8x32xbf16>
    %23 = vector.shape_cast %22 : vector<1x8x32xbf16> to vector<8x32xbf16>
    %24 = tpu.concatenate %7, %9, %11, %13, %15, %17, %19, %21, %23 in 1 : vector<8x32xbf16>, vector<8x32xbf16>, vector<8x32xbf16>, vector<8x32xbf16>, vector<8x32xbf16>, vector<8x32xbf16>, vector<8x32xbf16>, vector<8x32xbf16>, vector<8x32xbf16> -> vector<8x288xbf16>
    %25 = vector.extract_strided_slice %5 {offsets = [1, 0, 0], sizes = [1, 8, 32], strides = [1, 1, 1]} : vector<10x10x32xbf16> to vector<1x8x32xbf16>
    %26 = vector.shape_cast %25 : vector<1x8x32xbf16> to vector<8x32xbf16>
    %27 = vector.extract_strided_slice %5 {offsets = [1, 1, 0], sizes = [1, 8, 32], strides = [1, 1, 1]} : vector<10x10x32xbf16> to vector<1x8x32xbf16>
    %28 = vector.shape_cast %27 : vector<1x8x32xbf16> to vector<8x32xbf16>
    %29 = vector.extract_strided_slice %5 {offsets = [1, 2, 0], sizes = [1, 8, 32], strides = [1, 1, 1]} : vector<10x10x32xbf16> to vector<1x8x32xbf16>
    %30 = vector.shape_cast %29 : vector<1x8x32xbf16> to vector<8x32xbf16>
    %31 = vector.extract_strided_slice %5 {offsets = [2, 0, 0], sizes = [1, 8, 32], strides = [1, 1, 1]} : vector<10x10x32xbf16> to vector<1x8x32xbf16>
    %32 = vector.shape_cast %31 : vector<1x8x32xbf16> to vector<8x32xbf16>
    %33 = vector.extract_strided_slice %5 {offsets = [2, 1, 0], sizes = [1, 8, 32], strides = [1, 1, 1]} : vector<10x10x32xbf16> to vector<1x8x32xbf16>
    %34 = vector.shape_cast %33 : vector<1x8x32xbf16> to vector<8x32xbf16>
    %35 = vector.extract_strided_slice %5 {offsets = [2, 2, 0], sizes = [1, 8, 32], strides = [1, 1, 1]} : vector<10x10x32xbf16> to vector<1x8x32xbf16>
    %36 = vector.shape_cast %35 : vector<1x8x32xbf16> to vector<8x32xbf16>
    %37 = vector.extract_strided_slice %5 {offsets = [3, 0, 0], sizes = [1, 8, 32], strides = [1, 1, 1]} : vector<10x10x32xbf16> to vector<1x8x32xbf16>
    %38 = vector.shape_cast %37 : vector<1x8x32xbf16> to vector<8x32xbf16>
    %39 = vector.extract_strided_slice %5 {offsets = [3, 1, 0], sizes = [1, 8, 32], strides = [1, 1, 1]} : vector<10x10x32xbf16> to vector<1x8x32xbf16>
    %40 = vector.shape_cast %39 : vector<1x8x32xbf16> to vector<8x32xbf16>
    %41 = vector.extract_strided_slice %5 {offsets = [3, 2, 0], sizes = [1, 8, 32], strides = [1, 1, 1]} : vector<10x10x32xbf16> to vector<1x8x32xbf16>
    %42 = vector.shape_cast %41 : vector<1x8x32xbf16> to vector<8x32xbf16>
    %43 = tpu.concatenate %26, %28, %30, %32, %34, %36, %38, %40, %42 in 1 : vector<8x32xbf16>, vector<8x32xbf16>, vector<8x32xbf16>, vector<8x32xbf16>, vector<8x32xbf16>, vector<8x32xbf16>, vector<8x32xbf16>, vector<8x32xbf16>, vector<8x32xbf16> -> vector<8x288xbf16>
    %44 = vector.extract_strided_slice %5 {offsets = [2, 0, 0], sizes = [1, 8, 32], strides = [1, 1, 1]} : vector<10x10x32xbf16> to vector<1x8x32xbf16>
    %45 = vector.shape_cast %44 : vector<1x8x32xbf16> to vector<8x32xbf16>
    %46 = vector.extract_strided_slice %5 {offsets = [2, 1, 0], sizes = [1, 8, 32], strides = [1, 1, 1]} : vector<10x10x32xbf16> to vector<1x8x32xbf16>
    %47 = vector.shape_cast %46 : vector<1x8x32xbf16> to vector<8x32xbf16>
    %48 = vector.extract_strided_slice %5 {offsets = [2, 2, 0], sizes = [1, 8, 32], strides = [1, 1, 1]} : vector<10x10x32xbf16> to vector<1x8x32xbf16>
    %49 = vector.shape_cast %48 : vector<1x8x32xbf16> to vector<8x32xbf16>
    %50 = vector.extract_strided_slice %5 {offsets = [3, 0, 0], sizes = [1, 8, 32], strides = [1, 1, 1]} : vector<10x10x32xbf16> to vector<1x8x32xbf16>
    %51 = vector.shape_cast %50 : vector<1x8x32xbf16> to vector<8x32xbf16>
    %52 = vector.extract_strided_slice %5 {offsets = [3, 1, 0], sizes = [1, 8, 32], strides = [1, 1, 1]} : vector<10x10x32xbf16> to vector<1x8x32xbf16>
    %53 = vector.shape_cast %52 : vector<1x8x32xbf16> to vector<8x32xbf16>
    %54 = vector.extract_strided_slice %5 {offsets = [3, 2, 0], sizes = [1, 8, 32], strides = [1, 1, 1]} : vector<10x10x32xbf16> to vector<1x8x32xbf16>
    %55 = vector.shape_cast %54 : vector<1x8x32xbf16> to vector<8x32xbf16>
    %56 = vector.extract_strided_slice %5 {offsets = [4, 0, 0], sizes = [1, 8, 32], strides = [1, 1, 1]} : vector<10x10x32xbf16> to vector<1x8x32xbf16>
    %57 = vector.shape_cast %56 : vector<1x8x32xbf16> to vector<8x32xbf16>
    %58 = vector.extract_strided_slice %5 {offsets = [4, 1, 0], sizes = [1, 8, 32], strides = [1, 1, 1]} : vector<10x10x32xbf16> to vector<1x8x32xbf16>
    %59 = vector.shape_cast %58 : vector<1x8x32xbf16> to vector<8x32xbf16>
    %60 = vector.extract_strided_slice %5 {offsets = [4, 2, 0], sizes = [1, 8, 32], strides = [1, 1, 1]} : vector<10x10x32xbf16> to vector<1x8x32xbf16>
    %61 = vector.shape_cast %60 : vector<1x8x32xbf16> to vector<8x32xbf16>
    %62 = tpu.concatenate %45, %47, %49, %51, %53, %55, %57, %59, %61 in 1 : vector<8x32xbf16>, vector<8x32xbf16>, vector<8x32xbf16>, vector<8x32xbf16>, vector<8x32xbf16>, vector<8x32xbf16>, vector<8x32xbf16>, vector<8x32xbf16>, vector<8x32xbf16> -> vector<8x288xbf16>
    %63 = vector.extract_strided_slice %5 {offsets = [3, 0, 0], sizes = [1, 8, 32], strides = [1, 1, 1]} : vector<10x10x32xbf16> to vector<1x8x32xbf16>
    %64 = vector.shape_cast %63 : vector<1x8x32xbf16> to vector<8x32xbf16>
    %65 = vector.extract_strided_slice %5 {offsets = [3, 1, 0], sizes = [1, 8, 32], strides = [1, 1, 1]} : vector<10x10x32xbf16> to vector<1x8x32xbf16>
    %66 = vector.shape_cast %65 : vector<1x8x32xbf16> to vector<8x32xbf16>
    %67 = vector.extract_strided_slice %5 {offsets = [3, 2, 0], sizes = [1, 8, 32], strides = [1, 1, 1]} : vector<10x10x32xbf16> to vector<1x8x32xbf16>
    %68 = vector.shape_cast %67 : vector<1x8x32xbf16> to vector<8x32xbf16>
    %69 = vector.extract_strided_slice %5 {offsets = [4, 0, 0], sizes = [1, 8, 32], strides = [1, 1, 1]} : vector<10x10x32xbf16> to vector<1x8x32xbf16>
    %70 = vector.shape_cast %69 : vector<1x8x32xbf16> to vector<8x32xbf16>
    %71 = vector.extract_strided_slice %5 {offsets = [4, 1, 0], sizes = [1, 8, 32], strides = [1, 1, 1]} : vector<10x10x32xbf16> to vector<1x8x32xbf16>
    %72 = vector.shape_cast %71 : vector<1x8x32xbf16> to vector<8x32xbf16>
    %73 = vector.extract_strided_slice %5 {offsets = [4, 2, 0], sizes = [1, 8, 32], strides = [1, 1, 1]} : vector<10x10x32xbf16> to vector<1x8x32xbf16>
    %74 = vector.shape_cast %73 : vector<1x8x32xbf16> to vector<8x32xbf16>
    %75 = vector.extract_strided_slice %5 {offsets = [5, 0, 0], sizes = [1, 8, 32], strides = [1, 1, 1]} : vector<10x10x32xbf16> to vector<1x8x32xbf16>
    %76 = vector.shape_cast %75 : vector<1x8x32xbf16> to vector<8x32xbf16>
    %77 = vector.extract_strided_slice %5 {offsets = [5, 1, 0], sizes = [1, 8, 32], strides = [1, 1, 1]} : vector<10x10x32xbf16> to vector<1x8x32xbf16>
    %78 = vector.shape_cast %77 : vector<1x8x32xbf16> to vector<8x32xbf16>
    %79 = vector.extract_strided_slice %5 {offsets = [5, 2, 0], sizes = [1, 8, 32], strides = [1, 1, 1]} : vector<10x10x32xbf16> to vector<1x8x32xbf16>
    %80 = vector.shape_cast %79 : vector<1x8x32xbf16> to vector<8x32xbf16>
    %81 = tpu.concatenate %64, %66, %68, %70, %72, %74, %76, %78, %80 in 1 : vector<8x32xbf16>, vector<8x32xbf16>, vector<8x32xbf16>, vector<8x32xbf16>, vector<8x32xbf16>, vector<8x32xbf16>, vector<8x32xbf16>, vector<8x32xbf16>, vector<8x32xbf16> -> vector<8x288xbf16>
    %82 = vector.extract_strided_slice %5 {offsets = [4, 0, 0], sizes = [1, 8, 32], strides = [1, 1, 1]} : vector<10x10x32xbf16> to vector<1x8x32xbf16>
    %83 = vector.shape_cast %82 : vector<1x8x32xbf16> to vector<8x32xbf16>
    %84 = vector.extract_strided_slice %5 {offsets = [4, 1, 0], sizes = [1, 8, 32], strides = [1, 1, 1]} : vector<10x10x32xbf16> to vector<1x8x32xbf16>
    %85 = vector.shape_cast %84 : vector<1x8x32xbf16> to vector<8x32xbf16>
    %86 = vector.extract_strided_slice %5 {offsets = [4, 2, 0], sizes = [1, 8, 32], strides = [1, 1, 1]} : vector<10x10x32xbf16> to vector<1x8x32xbf16>
    %87 = vector.shape_cast %86 : vector<1x8x32xbf16> to vector<8x32xbf16>
    %88 = vector.extract_strided_slice %5 {offsets = [5, 0, 0], sizes = [1, 8, 32], strides = [1, 1, 1]} : vector<10x10x32xbf16> to vector<1x8x32xbf16>
    %89 = vector.shape_cast %88 : vector<1x8x32xbf16> to vector<8x32xbf16>
    %90 = vector.extract_strided_slice %5 {offsets = [5, 1, 0], sizes = [1, 8, 32], strides = [1, 1, 1]} : vector<10x10x32xbf16> to vector<1x8x32xbf16>
    %91 = vector.shape_cast %90 : vector<1x8x32xbf16> to vector<8x32xbf16>
    %92 = vector.extract_strided_slice %5 {offsets = [5, 2, 0], sizes = [1, 8, 32], strides = [1, 1, 1]} : vector<10x10x32xbf16> to vector<1x8x32xbf16>
    %93 = vector.shape_cast %92 : vector<1x8x32xbf16> to vector<8x32xbf16>
    %94 = vector.extract_strided_slice %5 {offsets = [6, 0, 0], sizes = [1, 8, 32], strides = [1, 1, 1]} : vector<10x10x32xbf16> to vector<1x8x32xbf16>
    %95 = vector.shape_cast %94 : vector<1x8x32xbf16> to vector<8x32xbf16>
    %96 = vector.extract_strided_slice %5 {offsets = [6, 1, 0], sizes = [1, 8, 32], strides = [1, 1, 1]} : vector<10x10x32xbf16> to vector<1x8x32xbf16>
    %97 = vector.shape_cast %96 : vector<1x8x32xbf16> to vector<8x32xbf16>
    %98 = vector.extract_strided_slice %5 {offsets = [6, 2, 0], sizes = [1, 8, 32], strides = [1, 1, 1]} : vector<10x10x32xbf16> to vector<1x8x32xbf16>
    %99 = vector.shape_cast %98 : vector<1x8x32xbf16> to vector<8x32xbf16>
    %100 = tpu.concatenate %83, %85, %87, %89, %91, %93, %95, %97, %99 in 1 : vector<8x32xbf16>, vector<8x32xbf16>, vector<8x32xbf16>, vector<8x32xbf16>, vector<8x32xbf16>, vector<8x32xbf16>, vector<8x32xbf16>, vector<8x32xbf16>, vector<8x32xbf16> -> vector<8x288xbf16>
    %101 = vector.extract_strided_slice %5 {offsets = [5, 0, 0], sizes = [1, 8, 32], strides = [1, 1, 1]} : vector<10x10x32xbf16> to vector<1x8x32xbf16>
    %102 = vector.shape_cast %101 : vector<1x8x32xbf16> to vector<8x32xbf16>
    %103 = vector.extract_strided_slice %5 {offsets = [5, 1, 0], sizes = [1, 8, 32], strides = [1, 1, 1]} : vector<10x10x32xbf16> to vector<1x8x32xbf16>
    %104 = vector.shape_cast %103 : vector<1x8x32xbf16> to vector<8x32xbf16>
    %105 = vector.extract_strided_slice %5 {offsets = [5, 2, 0], sizes = [1, 8, 32], strides = [1, 1, 1]} : vector<10x10x32xbf16> to vector<1x8x32xbf16>
    %106 = vector.shape_cast %105 : vector<1x8x32xbf16> to vector<8x32xbf16>
    %107 = vector.extract_strided_slice %5 {offsets = [6, 0, 0], sizes = [1, 8, 32], strides = [1, 1, 1]} : vector<10x10x32xbf16> to vector<1x8x32xbf16>
    %108 = vector.shape_cast %107 : vector<1x8x32xbf16> to vector<8x32xbf16>
    %109 = vector.extract_strided_slice %5 {offsets = [6, 1, 0], sizes = [1, 8, 32], strides = [1, 1, 1]} : vector<10x10x32xbf16> to vector<1x8x32xbf16>
    %110 = vector.shape_cast %109 : vector<1x8x32xbf16> to vector<8x32xbf16>
    %111 = vector.extract_strided_slice %5 {offsets = [6, 2, 0], sizes = [1, 8, 32], strides = [1, 1, 1]} : vector<10x10x32xbf16> to vector<1x8x32xbf16>
    %112 = vector.shape_cast %111 : vector<1x8x32xbf16> to vector<8x32xbf16>
    %113 = vector.extract_strided_slice %5 {offsets = [7, 0, 0], sizes = [1, 8, 32], strides = [1, 1, 1]} : vector<10x10x32xbf16> to vector<1x8x32xbf16>
    %114 = vector.shape_cast %113 : vector<1x8x32xbf16> to vector<8x32xbf16>
    %115 = vector.extract_strided_slice %5 {offsets = [7, 1, 0], sizes = [1, 8, 32], strides = [1, 1, 1]} : vector<10x10x32xbf16> to vector<1x8x32xbf16>
    %116 = vector.shape_cast %115 : vector<1x8x32xbf16> to vector<8x32xbf16>
    %117 = vector.extract_strided_slice %5 {offsets = [7, 2, 0], sizes = [1, 8, 32], strides = [1, 1, 1]} : vector<10x10x32xbf16> to vector<1x8x32xbf16>
    %118 = vector.shape_cast %117 : vector<1x8x32xbf16> to vector<8x32xbf16>
    %119 = tpu.concatenate %102, %104, %106, %108, %110, %112, %114, %116, %118 in 1 : vector<8x32xbf16>, vector<8x32xbf16>, vector<8x32xbf16>, vector<8x32xbf16>, vector<8x32xbf16>, vector<8x32xbf16>, vector<8x32xbf16>, vector<8x32xbf16>, vector<8x32xbf16> -> vector<8x288xbf16>
    %120 = vector.extract_strided_slice %5 {offsets = [6, 0, 0], sizes = [1, 8, 32], strides = [1, 1, 1]} : vector<10x10x32xbf16> to vector<1x8x32xbf16>
    %121 = vector.shape_cast %120 : vector<1x8x32xbf16> to vector<8x32xbf16>
    %122 = vector.extract_strided_slice %5 {offsets = [6, 1, 0], sizes = [1, 8, 32], strides = [1, 1, 1]} : vector<10x10x32xbf16> to vector<1x8x32xbf16>
    %123 = vector.shape_cast %122 : vector<1x8x32xbf16> to vector<8x32xbf16>
    %124 = vector.extract_strided_slice %5 {offsets = [6, 2, 0], sizes = [1, 8, 32], strides = [1, 1, 1]} : vector<10x10x32xbf16> to vector<1x8x32xbf16>
    %125 = vector.shape_cast %124 : vector<1x8x32xbf16> to vector<8x32xbf16>
    %126 = vector.extract_strided_slice %5 {offsets = [7, 0, 0], sizes = [1, 8, 32], strides = [1, 1, 1]} : vector<10x10x32xbf16> to vector<1x8x32xbf16>
    %127 = vector.shape_cast %126 : vector<1x8x32xbf16> to vector<8x32xbf16>
    %128 = vector.extract_strided_slice %5 {offsets = [7, 1, 0], sizes = [1, 8, 32], strides = [1, 1, 1]} : vector<10x10x32xbf16> to vector<1x8x32xbf16>
    %129 = vector.shape_cast %128 : vector<1x8x32xbf16> to vector<8x32xbf16>
    %130 = vector.extract_strided_slice %5 {offsets = [7, 2, 0], sizes = [1, 8, 32], strides = [1, 1, 1]} : vector<10x10x32xbf16> to vector<1x8x32xbf16>
    %131 = vector.shape_cast %130 : vector<1x8x32xbf16> to vector<8x32xbf16>
    %132 = vector.extract_strided_slice %5 {offsets = [8, 0, 0], sizes = [1, 8, 32], strides = [1, 1, 1]} : vector<10x10x32xbf16> to vector<1x8x32xbf16>
    %133 = vector.shape_cast %132 : vector<1x8x32xbf16> to vector<8x32xbf16>
    %134 = vector.extract_strided_slice %5 {offsets = [8, 1, 0], sizes = [1, 8, 32], strides = [1, 1, 1]} : vector<10x10x32xbf16> to vector<1x8x32xbf16>
    %135 = vector.shape_cast %134 : vector<1x8x32xbf16> to vector<8x32xbf16>
    %136 = vector.extract_strided_slice %5 {offsets = [8, 2, 0], sizes = [1, 8, 32], strides = [1, 1, 1]} : vector<10x10x32xbf16> to vector<1x8x32xbf16>
    %137 = vector.shape_cast %136 : vector<1x8x32xbf16> to vector<8x32xbf16>
    %138 = tpu.concatenate %121, %123, %125, %127, %129, %131, %133, %135, %137 in 1 : vector<8x32xbf16>, vector<8x32xbf16>, vector<8x32xbf16>, vector<8x32xbf16>, vector<8x32xbf16>, vector<8x32xbf16>, vector<8x32xbf16>, vector<8x32xbf16>, vector<8x32xbf16> -> vector<8x288xbf16>
    %139 = vector.extract_strided_slice %5 {offsets = [7, 0, 0], sizes = [1, 8, 32], strides = [1, 1, 1]} : vector<10x10x32xbf16> to vector<1x8x32xbf16>
    %140 = vector.shape_cast %139 : vector<1x8x32xbf16> to vector<8x32xbf16>
    %141 = vector.extract_strided_slice %5 {offsets = [7, 1, 0], sizes = [1, 8, 32], strides = [1, 1, 1]} : vector<10x10x32xbf16> to vector<1x8x32xbf16>
    %142 = vector.shape_cast %141 : vector<1x8x32xbf16> to vector<8x32xbf16>
    %143 = vector.extract_strided_slice %5 {offsets = [7, 2, 0], sizes = [1, 8, 32], strides = [1, 1, 1]} : vector<10x10x32xbf16> to vector<1x8x32xbf16>
    %144 = vector.shape_cast %143 : vector<1x8x32xbf16> to vector<8x32xbf16>
    %145 = vector.extract_strided_slice %5 {offsets = [8, 0, 0], sizes = [1, 8, 32], strides = [1, 1, 1]} : vector<10x10x32xbf16> to vector<1x8x32xbf16>
    %146 = vector.shape_cast %145 : vector<1x8x32xbf16> to vector<8x32xbf16>
    %147 = vector.extract_strided_slice %5 {offsets = [8, 1, 0], sizes = [1, 8, 32], strides = [1, 1, 1]} : vector<10x10x32xbf16> to vector<1x8x32xbf16>
    %148 = vector.shape_cast %147 : vector<1x8x32xbf16> to vector<8x32xbf16>
    %149 = vector.extract_strided_slice %5 {offsets = [8, 2, 0], sizes = [1, 8, 32], strides = [1, 1, 1]} : vector<10x10x32xbf16> to vector<1x8x32xbf16>
    %150 = vector.shape_cast %149 : vector<1x8x32xbf16> to vector<8x32xbf16>
    %151 = vector.extract_strided_slice %5 {offsets = [9, 0, 0], sizes = [1, 8, 32], strides = [1, 1, 1]} : vector<10x10x32xbf16> to vector<1x8x32xbf16>
    %152 = vector.shape_cast %151 : vector<1x8x32xbf16> to vector<8x32xbf16>
    %153 = vector.extract_strided_slice %5 {offsets = [9, 1, 0], sizes = [1, 8, 32], strides = [1, 1, 1]} : vector<10x10x32xbf16> to vector<1x8x32xbf16>
    %154 = vector.shape_cast %153 : vector<1x8x32xbf16> to vector<8x32xbf16>
    %155 = vector.extract_strided_slice %5 {offsets = [9, 2, 0], sizes = [1, 8, 32], strides = [1, 1, 1]} : vector<10x10x32xbf16> to vector<1x8x32xbf16>
    %156 = vector.shape_cast %155 : vector<1x8x32xbf16> to vector<8x32xbf16>
    %157 = tpu.concatenate %140, %142, %144, %146, %148, %150, %152, %154, %156 in 1 : vector<8x32xbf16>, vector<8x32xbf16>, vector<8x32xbf16>, vector<8x32xbf16>, vector<8x32xbf16>, vector<8x32xbf16>, vector<8x32xbf16>, vector<8x32xbf16>, vector<8x32xbf16> -> vector<8x288xbf16>
    %158 = tpu.concatenate %24, %43, %62, %81, %100, %119, %138, %157 in 0 : vector<8x288xbf16>, vector<8x288xbf16>, vector<8x288xbf16>, vector<8x288xbf16>, vector<8x288xbf16>, vector<8x288xbf16>, vector<8x288xbf16>, vector<8x288xbf16> -> vector<64x288xbf16>
    %cst = arith.constant dense<0.000000e+00> : vector<64x128xf32>
    %159 = tpu.matmul %158, %0, %cst {dimension_numbers = #tpu.dot_dimension_numbers<[1], [0], [0], [1], [0, 0, 1, 1], [], []>} : vector<64x288xbf16>, vector<288x128xbf16>, vector<64x128xf32> -> vector<64x128xf32>
    %160 = arith.addf %159, %3 : vector<64x128xf32>
    %161 = arith.truncf %160 : vector<64x128xf32> to vector<64x128xbf16>
    %c0_8 = arith.constant 0 : index
    %c0_9 = arith.constant 0 : index
    %c0_10 = arith.constant 0 : index
    %162 = vector.load %arg4[%c0_8, %c0_9, %c0_10] : memref<1x64x128xbf16, #tpu.memory_space<vmem>>, vector<1x64x128xbf16>
    %163 = vector.shape_cast %162 : vector<1x64x128xbf16> to vector<64x128xbf16>
    %164 = vector.shape_cast %161 : vector<64x128xbf16> to vector<1x64x128xbf16>
    tpu.vector_store %arg4[%c0_8, %c0_9, %c0_10], %164 {strides = array<i32>} : memref<1x64x128xbf16, #tpu.memory_space<vmem>>, vector<1x64x128xbf16>,
    return
  }
  func.func @transform_0(%arg0: i32) -> (i32, i32, i32, i32, i32) {
    %c0_i32 = arith.constant 0 : i32
    %c0_i32_0 = arith.constant 0 : i32
    %c0_i32_1 = arith.constant 0 : i32
    %c0_i32_2 = arith.constant 0 : i32
    %c0_i32_3 = arith.constant 0 : i32
    return %arg0, %c0_i32, %c0_i32_0, %c0_i32_1, %c0_i32_2 : i32, i32, i32, i32, i32
  }
  func.func @transform_1(%arg0: i32) -> (i32, i32) {
    %c0_i32 = arith.constant 0 : i32
    %c0_i32_0 = arith.constant 0 : i32
    %c0_i32_1 = arith.constant 0 : i32
    return %c0_i32, %c0_i32_0 : i32, i32
  }
  func.func @transform_2(%arg0: i32) -> (i32, i32) {
    %c0_i32 = arith.constant 0 : i32
    %c0_i32_0 = arith.constant 0 : i32
    %c0_i32_1 = arith.constant 0 : i32
    return %c0_i32, %c0_i32_0 : i32, i32
  }
  func.func @transform_3(%arg0: i32) -> (i32, i32, i32) {
    %c0_i32 = arith.constant 0 : i32
    %c0_i32_0 = arith.constant 0 : i32
    %c0_i32_1 = arith.constant 0 : i32
    return %arg0, %c0_i32, %c0_i32_0 : i32, i32, i32
  }
}

module attributes {stable_mosaic.version = 11 : i64} {
  func.func @_upsample_kernel(%arg0: i32, %arg1: memref<32x8xbf16, #tpu.memory_space<vmem>>, %arg2: memref<1x2x8x8xbf16, #tpu.memory_space<vmem>>, %arg3: memref<8x32xbf16, #tpu.memory_space<vmem>>, %arg4: memref<1x2x32x32xf32, #tpu.memory_space<vmem>>) attributes {dimension_semantics = [#tpu.dimension_semantics<parallel>], iteration_bounds = array<i64: 2>, scalar_prefetch = 0 : i64, scratch_operands = 0 : i64, tpu.core_type = #tpu.core_type<tc>, window_params = [{pipeline_mode = #tpu.pipeline_mode<synchronous>, transform_indices = @transform_0, window_bounds = array<i64: 32, 8>}, {transform_indices = @transform_1, window_bounds = array<i64: 1, 2, 8, 8>}, {pipeline_mode = #tpu.pipeline_mode<synchronous>, transform_indices = @transform_2, window_bounds = array<i64: 8, 32>}, {transform_indices = @transform_3, window_bounds = array<i64: 1, 2, 32, 32>}]} {
    %c0 = arith.constant 0 : index
    %c0_0 = arith.constant 0 : index
    %0 = vector.load %arg1[%c0, %c0_0] : memref<32x8xbf16, #tpu.memory_space<vmem>>, vector<32x8xbf16>
    %c0_1 = arith.constant 0 : index
    %c0_2 = arith.constant 0 : index
    %1 = vector.load %arg3[%c0_1, %c0_2] : memref<8x32xbf16, #tpu.memory_space<vmem>>, vector<8x32xbf16>
    %c0_3 = arith.constant 0 : index
    %c0_4 = arith.constant 0 : index
    %c0_5 = arith.constant 0 : index
    %c0_6 = arith.constant 0 : index
    %2 = vector.load %arg2[%c0_3, %c0_4, %c0_5, %c0_6] : memref<1x2x8x8xbf16, #tpu.memory_space<vmem>>, vector<1x1x8x8xbf16>
    %3 = vector.shape_cast %2 : vector<1x1x8x8xbf16> to vector<8x8xbf16>
    %cst = arith.constant dense<0.000000e+00> : vector<32x8xf32>
    %4 = tpu.matmul %0, %3, %cst {dimension_numbers = #tpu.dot_dimension_numbers<[1], [0], [0], [1], [0, 0, 1, 1], [], []>} : vector<32x8xbf16>, vector<8x8xbf16>, vector<32x8xf32> -> vector<32x8xf32>
    %5 = arith.truncf %4 : vector<32x8xf32> to vector<32x8xbf16>
    %cst_7 = arith.constant dense<0.000000e+00> : vector<32x32xf32>
    %6 = tpu.matmul %5, %1, %cst_7 {dimension_numbers = #tpu.dot_dimension_numbers<[1], [0], [0], [1], [0, 0, 1, 1], [], []>} : vector<32x8xbf16>, vector<8x32xbf16>, vector<32x32xf32> -> vector<32x32xf32>
    %cst_8 = arith.constant 2.000000e+01 : f32
    %7 = vector.broadcast %cst_8 : f32 to vector<32x32xf32>
    %8 = arith.mulf %6, %7 : vector<32x32xf32>
    %c0_9 = arith.constant 0 : index
    %c0_10 = arith.constant 0 : index
    %c0_11 = arith.constant 0 : index
    %c0_12 = arith.constant 0 : index
    %9 = vector.load %arg4[%c0_9, %c0_10, %c0_11, %c0_12] : memref<1x2x32x32xf32, #tpu.memory_space<vmem>>, vector<1x1x32x32xf32>
    %10 = vector.shape_cast %9 : vector<1x1x32x32xf32> to vector<32x32xf32>
    %11 = vector.shape_cast %8 : vector<32x32xf32> to vector<1x1x32x32xf32>
    tpu.vector_store %arg4[%c0_9, %c0_10, %c0_11, %c0_12], %11 {strides = array<i32>} : memref<1x2x32x32xf32, #tpu.memory_space<vmem>>, vector<1x1x32x32xf32>,
    %c0_13 = arith.constant 0 : index
    %c1 = arith.constant 1 : index
    %c0_14 = arith.constant 0 : index
    %c0_15 = arith.constant 0 : index
    %12 = vector.load %arg2[%c0_13, %c1, %c0_14, %c0_15] : memref<1x2x8x8xbf16, #tpu.memory_space<vmem>>, vector<1x1x8x8xbf16>
    %13 = vector.shape_cast %12 : vector<1x1x8x8xbf16> to vector<8x8xbf16>
    %cst_16 = arith.constant dense<0.000000e+00> : vector<32x8xf32>
    %14 = tpu.matmul %0, %13, %cst_16 {dimension_numbers = #tpu.dot_dimension_numbers<[1], [0], [0], [1], [0, 0, 1, 1], [], []>} : vector<32x8xbf16>, vector<8x8xbf16>, vector<32x8xf32> -> vector<32x8xf32>
    %15 = arith.truncf %14 : vector<32x8xf32> to vector<32x8xbf16>
    %cst_17 = arith.constant dense<0.000000e+00> : vector<32x32xf32>
    %16 = tpu.matmul %15, %1, %cst_17 {dimension_numbers = #tpu.dot_dimension_numbers<[1], [0], [0], [1], [0, 0, 1, 1], [], []>} : vector<32x8xbf16>, vector<8x32xbf16>, vector<32x32xf32> -> vector<32x32xf32>
    %cst_18 = arith.constant 2.000000e+01 : f32
    %17 = vector.broadcast %cst_18 : f32 to vector<32x32xf32>
    %18 = arith.mulf %16, %17 : vector<32x32xf32>
    %c0_19 = arith.constant 0 : index
    %c1_20 = arith.constant 1 : index
    %c0_21 = arith.constant 0 : index
    %c0_22 = arith.constant 0 : index
    %19 = vector.load %arg4[%c0_19, %c1_20, %c0_21, %c0_22] : memref<1x2x32x32xf32, #tpu.memory_space<vmem>>, vector<1x1x32x32xf32>
    %20 = vector.shape_cast %19 : vector<1x1x32x32xf32> to vector<32x32xf32>
    %21 = vector.shape_cast %18 : vector<32x32xf32> to vector<1x1x32x32xf32>
    tpu.vector_store %arg4[%c0_19, %c1_20, %c0_21, %c0_22], %21 {strides = array<i32>} : memref<1x2x32x32xf32, #tpu.memory_space<vmem>>, vector<1x1x32x32xf32>,
    return
  }
  func.func @transform_0(%arg0: i32) -> (i32, i32) {
    %c0_i32 = arith.constant 0 : i32
    %c0_i32_0 = arith.constant 0 : i32
    %c0_i32_1 = arith.constant 0 : i32
    return %c0_i32, %c0_i32_0 : i32, i32
  }
  func.func @transform_1(%arg0: i32) -> (i32, i32, i32, i32) {
    %c0_i32 = arith.constant 0 : i32
    %c0_i32_0 = arith.constant 0 : i32
    %c0_i32_1 = arith.constant 0 : i32
    %c0_i32_2 = arith.constant 0 : i32
    return %arg0, %c0_i32, %c0_i32_0, %c0_i32_1 : i32, i32, i32, i32
  }
  func.func @transform_2(%arg0: i32) -> (i32, i32) {
    %c0_i32 = arith.constant 0 : i32
    %c0_i32_0 = arith.constant 0 : i32
    %c0_i32_1 = arith.constant 0 : i32
    return %c0_i32, %c0_i32_0 : i32, i32
  }
  func.func @transform_3(%arg0: i32) -> (i32, i32, i32, i32) {
    %c0_i32 = arith.constant 0 : i32
    %c0_i32_0 = arith.constant 0 : i32
    %c0_i32_1 = arith.constant 0 : i32
    %c0_i32_2 = arith.constant 0 : i32
    return %arg0, %c0_i32, %c0_i32_0, %c0_i32_1 : i32, i32, i32, i32
  }
}

</mosaic_0001>

<bundles_post_ra>
// kernel: run_pwcnet_forward.15
= control target key start
LH: loop header
LB: loop body
LE: loop exit
PB: predicated region body
PF: predicated region fallthrough
CT: control target
= control target key end

     0   :  { %s1299_s12 = smov 0   ;;  %s1680_s0 = inlined_call_operand.vmem [shape: bf16[2,4,9,9,16], index: 0, kind: input, shape index: {}]   ;;  %s1681_s1 = inlined_call_operand.vmem [shape: bf16[144,32], index: 1, kind: input, shape index: {}]   ;;  %s1682_s2 = inlined_call_operand.vmem [shape: f32[1,32], index: 2, kind: input, shape index: {}]   ;;  %s1683_s3 = inlined_call_operand.vmem [shape: bf16[2,64,32], index: 3, kind: output, shape index: {}]  }
   0x1 LB: > { %s1045_s13 = sadd.s32 4294967295, %s1269_s12   ;;  %p1049_p0 = scmp.ge.s32.totalorder %s1269_s12, 1  ;;  %s1269_s12 = sphi %s1299_s12, %s13_s12  }
   0x2   : > { %p137_p1 = scmp.lt.s32.totalorder %s1269_s12, 3 }
   0x4   : > { %p138_p2 = pnand %p1049_p0, %p137_p1 }
   0x5   : > { %p161_p3 = scmp.lt.s32.totalorder (!%p138_p2), %s1045_s13, 1  ;;  %s1271_s18 = smov (!%p138_p2), 48  }
   0x6   : > { %141 = sbr.rel (%p138_p2) target bundleno = 448 (0x1c0), region = 32  ;;  %s1272_s19 = smov (!%p138_p2), 16  }
   0x7   : > { %s1273_s20 = smov (!%p138_p2), 64   ;;  %s1274_s21 = smov (!%p138_p2), 32  }
   0x8   : > { %s1276_s26 = smov (!%p138_p2), 80   ;;  %s1277_s6 = smov (!%p138_p2), 96  }
   0x9   : > { %s1278_s11 = smov (!%p138_p2), 112  }
   0xb   : > { %s1685_s13 = smov (!%p161_p3, %s1045_s13), 1  ;;  %v1254_v41 = vld [vmem:[%s1681_s1 + $0x38] sm:$0xff]   ;;  %v1275_v48 = vmov 0   ;;  %v1255_v49 = vld [vmem:[%s1681_s1 + $0x30] sm:$0xff]   ;;  %v1256_v63 = vld [vmem:[%s1681_s1 + $0x28] sm:$0xff]   ;;  %vm773_vm0 = vcmask 1043456  }
   0xc   : > { %s1187_s14 = smul.u32 288, %s1685_s13  ;;  %860 = vmatprep.subr.bf16.mxu0 %v1275_v48  ;;  %1169 = vmatprep.subr.bf16.mxu1 %v1275_v48  ;;  %vm312_vm1 = vcmask 130048   ;;  %vm316_vm2 = vcmask 261120   ;;  %vm319_vm3 = vcmask 392192   ;;  %vm322_vm4 = vcmask 523264  }
   0xd   : > { %861 = vmatpush1.bf16.msra.mxu0 %v1254_v41  ;;  %1178 = vmatpush1.bf16.msra.mxu1 %v1254_v41  ;;  %vm325_vm5 = vcmask 654336   ;;  %vm328_vm6 = vcmask 785408   ;;  %vm331_vm7 = vcmask 916480   ;;  %vm981_vm9 = vcmask 257024  }
   0xe   : > { %s1313_s17 = scalar_lea.vmem %s1680_s0, %s1187_s14  ;;  %862 = vmatprep.subr.bf16.mxu0 %v1275_v48  ;;  %1170 = vmatprep.subr.bf16.mxu1 %v1275_v48 }
   0xf   : > { %v1065_v0 = vld [vmem:[%s1313_s17 + $0x98] sm:$0xf]  ;;  %v1317_v2 = vld [vmem:[%s1313_s17 + $0x50] ss:$0 sps:$4 sm:$0xff]   ;;  %v1066_v6 = vld [vmem:[%s1313_s17 + $0x9c] sm:$0x1] }
  0x10   : > { %v1095_v1 = vcombine.low %v1065_v0, %v1065_v0  ;;  %v1073_v3 = vld [vmem:[%s1313_s17 + $0xb8] sm:$0xf]  ;;  %334 = vrot.lane.b32.xlu0 %v1317_v2, %s1272_s19  ;;  %v1324_v5 = vld [vmem:[%s1313_s17 + $0x70] ss:$0 sps:$4 sm:$0xff]   ;;  %v1210_v7 = vld [vmem:[%s1313_s17 + $0xe0] ss:$0 sps:$4 sm:$0xff]   ;;  %v1097_v24 = vcombine.low %v1065_v0, %v1066_v6 }
  0x11   : > { %v1119_v4 = vcombine.low %v1073_v3, %v1073_v3  ;;  %v1329_v8 = vld [vmem:[%s1313_s17 + $0x8] sm:$0xf]  ;;  %v200_v9 = vld [vmem:[%s1313_s17 + $0xc] sm:$0x1]  ;;  %v1338_v13 = vld [vmem:[%s1313_s17] sm:$0xf]  ;;  %863 = vmatpush1.bf16.msra.mxu0 %v1255_v49  ;;  %1179 = vmatpush1.bf16.msra.mxu1 %v1255_v49 }
  0x12   : > { %341 = vrot.lane.b32.xlu1 %v1095_v1, %s1271_s18  ;;  %v1333_v10 = vld [vmem:[%s1313_s17 + $0x28] sm:$0xf]  ;;  %v1094_v11 = vcombine.low %v1329_v8, %v200_v9  ;;  %v208_v12 = vld [vmem:[%s1313_s17 + $0x2c] sm:$0x1]  ;;  %v198_v14 = vld [vmem:[%s1313_s17 + $0x4] sm:$0x1]  ;;  %864 = vmatprep.subr.bf16.mxu0 %v1275_v48 }
  0x13   : > { %v1211_v15 = vld [vmem:[%s1313_s17 + $0x48] ss:$0 sps:$4 sm:$0xff]   ;;  %v1118_v16 = vcombine.low %v1333_v10, %v208_v12  ;;  %v1088_v17 = vcombine.low %v1338_v13, %v198_v14  ;;  %v1348_v20 = vld [vmem:[%s1313_s17 + $0x20] sm:$0xf]  ;;  %v206_v21 = vld [vmem:[%s1313_s17 + $0x24] sm:$0x1]  ;;  %1171 = vmatprep.subr.bf16.mxu1 %v1275_v48 }
  0x14   : > { %578 = vrot.lane.b32.xlu0 %v1324_v5, %s1272_s19  ;;  %v306_v18 = vshrl.u32 %v1094_v11, 16  ;;  %v308_v19 = vshll.u32 %v1094_v11, 16  ;;  %v1074_v25 = vld [vmem:[%s1313_s17 + $0xbc] sm:$0x1]  ;;  %v1112_v27 = vcombine.low %v1348_v20, %v206_v21  ;;  %v1356_v28 = vld [vmem:[%s1313_s17 + $0x68] ss:$0 sps:$4 sm:$0xff]  }
  0x15   : > { %v559_v22 = vshll.u32 %v1118_v16, 16  ;;  %v264_v23 = vshll.u32 %v1088_v17, 16  ;;  %v557_v29 = vshrl.u32 %v1118_v16, 16  ;;  %v262_v31 = vshrl.u32 %v1088_v17, 16  ;;  %v1216_v43 = vld [vmem:[%s1313_s17 + $0x100] ss:$0 sps:$4 sm:$0xff]   ;;  %865 = vmatpush1.bf16.msra.mxu0 %v1256_v63  ;;  %1180 = vmatpush1.bf16.msra.mxu1 %v1256_v63 }
  0x16   : > { %585 = vrot.lane.b32.xlu1 %v1119_v4, %s1271_s18  ;;  %v310_v26 = vrot.slane %v308_v19, 1  ;;  %v498_v34 = vshll.u32 %v1112_v27, 16  ;;  %v354_v35 = vshll.u32 %v1097_v24, 16  ;;  %v1121_v36 = vcombine.low %v1073_v3, %v1074_v25  ;;  %v1063_v47 = vld [vmem:[%s1313_s17 + $0x90] sm:$0xf]  ;;  %v1257_v6 = vld [vmem:[%s1681_s1 + $0x20] sm:$0xff]   ;;  %866 = vmatprep.subr.bf16.mxu0 %v1275_v48 }
  0x17   : > { %v561_v30 = vrot.slane %v559_v22, 1  ;;  %v266_v32 = vrot.slane %v264_v23, 1  ;;  %v496_v39 = vshrl.u32 %v1112_v27, 16  ;;  %v352_v42 = vshrl.u32 %v1097_v24, 16  ;;  %v202_v54 = vld [vmem:[%s1313_s17 + $0x14] sm:$0x1]  ;;  %1172 = vmatprep.subr.bf16.mxu1 %v1275_v48 }
  0x18   : > { %254 = vrot.lane.b32.xlu0 %v1211_v15, %s1272_s19  ;;  %v1358_v33 = vor.u32 %v310_v26, %v306_v18  ;;  %v500_v40 = vrot.slane %v498_v34, 1  ;;  %v356_v45 = vrot.slane %v354_v35, 1  ;;  %v598_v46 = vshll.u32 %v1121_v36, 16  ;;  %v1064_v55 = vld [vmem:[%s1313_s17 + $0x94] sm:$0x1]  ;;  %v1258_v18 = vld [vmem:[%s1681_s1 + $0x18] sm:$0xff]  }
  0x19   : > { %v1364_v37 = vor.u32 %v561_v30, %v557_v29  ;;  %v267_v38 = vor.u32 %v266_v32, %v262_v31  ;;  %v1089_v51 = vcombine.low %v1063_v47, %v1063_v47  ;;  %v596_v52 = vshrl.u32 %v1121_v36, 16  ;;  %v1071_v56 = vld [vmem:[%s1313_s17 + $0xb0] sm:$0xf]  ;;  %v210_v59 = vld [vmem:[%s1313_s17 + $0x34] sm:$0x1]  ;;  %867 = vmatpush1.bf16.msra.mxu0 %v1257_v6  ;;  %1181 = vmatpush1.bf16.msra.mxu1 %v1257_v6 }
  0x1a   : > { %346 = vrot.lane.b32.xlu1 %v1210_v7, %s1273_s20  ;;  %v1373_v44 = vor.u32 %v500_v40, %v496_v39  ;;  %v357_v50 = vor.u32 %v356_v45, %v352_v42  ;;  %v600_v53 = vrot.slane %v598_v46, 1  ;;  %v1390_v57 = vld [vmem:[%s1313_s17 + $0x10] sm:$0xf]  ;;  %v1091_v60 = vcombine.low %v1063_v47, %v1064_v55  ;;  %v1072_v0 = vld [vmem:[%s1313_s17 + $0xb4] sm:$0x1]  ;;  %868 = vmatprep.subr.bf16.mxu0 %v1275_v48  ;;  %v1260_v39 = vld [vmem:[%s1681_s1 + $0x8] sm:$0xff]  }
  0x1b   : > { %v1100_v58 = vcombine.low %v1390_v57, %v202_v54  ;;  %v1113_v62 = vcombine.low %v1071_v56, %v1071_v56  ;;  %v1403_v1 = vld [vmem:[%s1313_s17 + $0x30] sm:$0xf]  ;;  %v1406_v3 = vld [vmem:[%s1313_s17 + $0x40] sm:$0xf]  ;;  %v214_v4 = vld [vmem:[%s1313_s17 + $0x44] sm:$0x1]  ;;  %v1115_v12 = vcombine.low %v1071_v56, %v1072_v0  ;;  %v1098_v14 = vcombine.low %v1390_v57, %v1390_v57  ;;  %1173 = vmatprep.subr.bf16.mxu1 %v1275_v48 }
  0x1c   : > { %517 = vrot.lane.b32.xlu0 %v1356_v28, %s1272_s19  ;;  %v601_v61 = vor.u32 %v600_v53, %v596_v52  ;;  %v1124_v9 = vcombine.low %v1403_v1, %v210_v59  ;;  %v1414_v11 = vcombine.low %v1406_v3, %v214_v4  ;;  %v1223_v15 = vld [vmem:[%s1313_s17 + $0xd8] ss:$0 sps:$4 sm:$0xff]   ;;  %v286_v16 = vshll.u32 %v1091_v60, 16  ;;  %v1259_v27 = vld [vmem:[%s1681_s1 + $0x10] sm:$0xff]   ;;  %v212_v46 = vld [vmem:[%s1313_s17 + $0x3c] sm:$0x1] }
  0x1d   : > { %v376_v7 = vshll.u32 %v1100_v58, 16  ;;  %v374_v17 = vshrl.u32 %v1100_v58, 16  ;;  %v1122_v22 = vcombine.low %v1403_v1, %v1403_v1  ;;  %v1225_v23 = vld [vmem:[%s1313_s17 + $0xf8] ss:$0 sps:$4 sm:$0xff]   ;;  %v284_v24 = vshrl.u32 %v1091_v60, 16  ;;  %869 = vmatpush1.bf16.msra.mxu0 %v1258_v18  ;;  %1182 = vmatpush1.bf16.msra.mxu1 %v1258_v18 }
  0x1e   : > { %336 = vrot.lane.b32.xlu1 %v1358_v33, %s1274_s21  ;;  %v620_v21 = vshll.u32 %v1124_v9, 16  ;;  %v288_v25 = vrot.slane %v286_v16, 1  ;;  %v537_v26 = vshll.u32 %v1115_v12, 16  ;;  %v618_v30 = vshrl.u32 %v1124_v9, 16  ;;  %870 = vmatprep.subr.bf16.mxu0 %v1275_v48  ;;  %v1443_v32 = vld [vmem:[%s1313_s17 + $0x58] ss:$0 sps:$4 sm:$0xff]  }
  0x1f   : > { %v378_v19 = vrot.slane %v376_v7, 1  ;;  %1174 = vmatprep.subr.bf16.mxu1 %v1275_v48  ;;  %v535_v35 = vshrl.u32 %v1115_v12, 16  ;;  %v1450_v40 = vld [vmem:[%s1313_s17 + $0x78] ss:$0 sps:$4 sm:$0xff]   ;;  %v204_v49 = vld [vmem:[%s1313_s17 + $0x1c] sm:$0x1]  ;;  %v1092_v53 = vcombine.low %v1329_v8, %v1329_v8 }
  0x20   : > { %268 = vrot.lane.b32.xlu0 %v267_v38, %s1274_s21  ;;  %v622_v31 = vrot.slane %v620_v21, 1  ;;  %v289_v34 = vor.u32 %v288_v25, %v284_v24  ;;  %v539_v36 = vrot.slane %v537_v26, 1  ;;  %v1462_v45 = vld [vmem:[%s1313_s17 + $0x38] sm:$0xf]  ;;  %v1496_v56 = vld [vmem:[%s1313_s17 + $0x60] ss:$0 sps:$4 sm:$0xff]  }
  0x21   : > { %v1436_v29 = vor.u32 %v378_v19, %v374_v17  ;;  %871 = vmatpush1.bf16.msra.mxu0 %v1259_v27  ;;  %1183 = vmatpush1.bf16.msra.mxu1 %v1259_v27  ;;  %v1466_v47 = vld [vmem:[%s1313_s17 + $0x18] sm:$0xf]  ;;  %v1130_v54 = vcombine.low %v1462_v45, %v212_v46  ;;  %v1069_v6 = vld [vmem:[%s1313_s17 + $0xa8] sm:$0xf]  ;;  %v1070_v7 = vld [vmem:[%s1313_s17 + $0xac] sm:$0x1] }
  0x22   : > { %580 = vrot.lane.b32.xlu1 %v1364_v37, %s1274_s21  ;;  %v1452_v41 = vor.u32 %v622_v31, %v618_v30  ;;  %872 = vmatprep.subr.bf16.mxu0 %v1275_v48  ;;  %v1106_v55 = vcombine.low %v1466_v47, %v204_v49  ;;  %v1077_v9 = vld [vmem:[%s1313_s17 + $0xc8] sm:$0xf]  ;;  %v1109_v12 = vcombine.low %v1069_v6, %v1070_v7  ;;  %v1238_v16 = vld [vmem:[%s1313_s17 + $0xf0] ss:$0 sps:$4 sm:$0xff]   ;;  %v1068_v30 = vld [vmem:[%s1313_s17 + $0xa4] sm:$0x1] }
  0x23   : > { %v763_v38 = vrot.slane %v1436_v29, 4  ;;  %1175 = vmatprep.subr.bf16.mxu1 %v1275_v48  ;;  %v681_v58 = vshll.u32 %v1130_v54, 16  ;;  %v679_v60 = vshrl.u32 %v1130_v54, 16  ;;  %v1240_v18 = vld [vmem:[%s1313_s17 + $0x110] ss:$0 sps:$4 sm:$0xff]   ;;  %v740_v46 = vshrl.u32 %v1414_v11, 16 }
  0x24   : > { %519 = vrot.lane.b32.xlu0 %v1373_v44, %s1274_s21  ;;  %v437_v59 = vshll.u32 %v1106_v55, 16  ;;  %v476_v17 = vshll.u32 %v1109_v12, 16  ;;  %v474_v19 = vshrl.u32 %v1109_v12, 16  ;;  %v1075_v31 = vld [vmem:[%s1313_s17 + $0xc0] sm:$0xf] }
  0x25   : > { %v779_v42 = vsel %vm773_vm0, %v1358_v33, %v763_v38  ;;  %873 = vmatpush1.bf16.msra.mxu0 %v1260_v39  ;;  %1184 = vmatpush1.bf16.msra.mxu1 %v1260_v39  ;;  %v1261_v33 = vld [vmem:[%s1681_s1] sm:$0xff]   ;;  %v1110_v38 = vcombine.low %v1348_v20, %v1348_v20  ;;  %v1247_v39 = vld [vmem:[%s1313_s17 + $0xe8] ss:$0 sps:$4 sm:$0xff]  }
  0x26   : > { %590 = vrot.lane.b32.xlu1 %v1216_v43, %s1273_s20  ;;  %v540_v43 = vor.u32 %v539_v36, %v535_v35  ;;  %1146 = vmatprep.mubr.msk.bf16.mxu0 %vm312_vm1, %v779_v42  ;;  %v439_v63 = vrot.slane %v437_v59, 1  ;;  %v478_v21 = vrot.slane %v476_v17, 1  ;;  %v1076_v35 = vld [vmem:[%s1313_s17 + $0xc4] sm:$0x1]  ;;  %v1134_v42 = vcombine.low %v1406_v3, %v1406_v3 }
  0x27   : > { %874 = vmatprep.subr.bf16.mxu0 %v1275_v48  ;;  %1176 = vmatprep.subr.bf16.mxu1 %v1275_v48  ;;  %v1127_v36 = vcombine.low %v1075_v31, %v1076_v35 }
  0x28   : > { %273 = vrot.lane.b32.xlu0 %v1089_v51, %s1271_s18  ;;  %v1116_v51 = vcombine.low %v1333_v10, %v1333_v10  ;;  %v479_v24 = vor.u32 %v478_v21, %v474_v19 }
  0x29   : > { %875 = vmatpush1.bf16.msra.mxu0 %v1261_v33  ;;  %1185 = vmatpush1.bf16.msra.mxu1 %v1261_v33  ;;  %v657_v3 = vshrl.u32 %v1127_v36, 16 }
  0x2a   : > { %358 = vrot.lane.b32.xlu1 %v357_v50, %s1276_s26  ;;  %v769_v50 = vrot.slane %v1452_v41, 4  ;;  %890 = vmatprep.subr.bf16.mxu0 %v1275_v48 }
  0x2b   : > { %1177 = vmatprep.subr.bf16.mxu1 %v1275_v48  ;;  %v1503_v48 = vld [vmem:[%s1313_s17 + $0x80] ss:$0 sps:$4 sm:$0xff]  }
  0x2c   : > { %524 = vrot.lane.b32.xlu0 %v1113_v62, %s1271_s18  ;;  %v791_v52 = vsel %vm773_vm0, %v1364_v37, %v769_v50  ;;  %v1262_v37 = vld [vmem:[%s1681_s1 + $0x40] sm:$0xff]   ;;  %v435_v62 = vshrl.u32 %v1106_v55, 16  ;;  %v1250_v50 = vld [vmem:[%s1313_s17 + $0x108] ss:$0 sps:$4 sm:$0xff]  }
  0x2d   : > { %1148 = vmatprep.mubr.msk.bf16.mxu1 %vm312_vm1, %v791_v52  ;;  %891 = vmatpush2.bf16.msra.mxu0 %v1262_v37  ;;  %v766_v52 = vrot.slane %v1373_v44, 4 }
  0x2e   : > { %602 = vrot.lane.b32.xlu1 %v601_v61, %s1276_s26  ;;  %1186 = vmatpush2.bf16.msra.mxu1 %v1262_v37  ;;  %v683_v61 = vrot.slane %v681_v58, 1  ;;  %v1511_v4 = vor.u32 %v439_v63, %v435_v62 }
  0x30   : > { %278 = vrot.lane.b32.xlu0 %v1223_v15, %s1273_s20  ;;  %v1509_v0 = vor.u32 %v683_v61, %v679_v60  ;;  %v1558_v58 = vsel %vm773_vm0, %v1511_v4, %v766_v52  ;;  %v1128_v60 = vcombine.low %v1462_v45, %v1462_v45  ;;  %v1104_v61 = vcombine.low %v1466_v47, %v1466_v47 }
  0x32   : > { %363 = vrot.lane.b32.xlu1 %v1098_v14, %s1277_s6  ;;  %v1078_v14 = vld [vmem:[%s1313_s17 + $0xcc] sm:$0x1] }
  0x33   : > { %v1133_v15 = vcombine.low %v1077_v9, %v1078_v14 }
  0x34   : > { %529 = vrot.lane.b32.xlu0 %v1225_v23, %s1273_s20  ;;  %v1067_v23 = vld [vmem:[%s1313_s17 + $0xa0] sm:$0xf] }
  0x35   : > { %v1101_v25 = vcombine.low %v1067_v23, %v1067_v23  ;;  %v718_v26 = vshrl.u32 %v1133_v15, 16 }
  0x36   : > { %607 = vrot.lane.b32.xlu1 %v1122_v22, %s1277_s6  ;;  %v720_v22 = vshll.u32 %v1133_v15, 16 }
  0x38   : > { %290 = vrot.lane.b32.xlu0 %v289_v34, %s1276_s26  ;;  %v722_v27 = vrot.slane %v720_v22, 1  ;;  %v1125_v34 = vcombine.low %v1075_v31, %v1075_v31 }
  0x3a   : > { %368 = vrot.lane.b32.xlu1 %v1443_v32, %s1278_s11 }
  0x3c   : > { %541 = vrot.lane.b32.xlu0 %v540_v43, %s1276_s26 }
  0x3e   : > { %612 = vrot.lane.b32.xlu1 %v1450_v40, %s1278_s11 }
  0x40   : > { %295 = vrot.lane.b32.xlu0 %v1092_v53, %s1277_s6 }
  0x42   : > { %546 = vrot.lane.b32.xlu1 %v1116_v51, %s1277_s6  ;;  %v659_v51 = vshll.u32 %v1127_v36, 16 }
  0x44   : > { %300 = vrot.lane.b32.xlu0 %v1317_v2, %s1278_s11  ;;  %v1107_v2 = vcombine.low %v1069_v6, %v1069_v6  ;;  %v661_v54 = vrot.slane %v659_v51, 1 }
  0x46   : > { %456 = vrot.lane.b32.xlu1 %v1496_v56, %s1272_s19  ;;  %v662_v44 = vor.u32 %v661_v54, %v657_v3 }
  0x48   : > { %551 = vrot.lane.b32.xlu0 %v1324_v5, %s1278_s11  ;;  %v1131_v5 = vcombine.low %v1077_v9, %v1077_v9 }
  0x4a   : > { %700 = vrot.lane.b32.xlu1 %v1503_v48, %s1272_s19 }
  0x4c   : > { %458 = vrot.lane.b32.xlu0 %v1511_v4, %s1274_s21 }
  0x4e   : > { %702 = vrot.lane.b32.xlu1 %v1509_v0, %s1274_s21 }
  0x50   : > { %395 = vrot.lane.b32.xlu0 %v1443_v32, %s1272_s19  ;;  %v723_v32 = vor.u32 %v722_v27, %v718_v26 }
  0x52   : > { %463 = vrot.lane.b32.xlu1 %v1107_v2, %s1271_s18 }
  0x54   : > { %639 = vrot.lane.b32.xlu0 %v1450_v40, %s1272_s19  ;;  %v742_v40 = vshll.u32 %v1414_v11, 16  ;;  %v1251_v11 = vld [vmem:[%s1313_s17 + $0x88] ss:$0 sps:$4 sm:$0xff]   ;;  %s1160_s19 = sshll.u32 %s1685_s13, 5 }
  0x55   : > { %s1659_s23 = scalar_lea.vmem %s1683_s3, %s1160_s19 }
  0x56   : > { %707 = vrot.lane.b32.xlu1 %v1131_v5, %s1271_s18  ;;  %v744_v49 = vrot.slane %v742_v40, 1 }
  0x58   : > { %397 = vrot.lane.b32.xlu0 %v1436_v29, %s1274_s21  ;;  %v1103_v29 = vcombine.low %v1067_v23, %v1068_v30  ;;  %v745_v55 = vor.u32 %v744_v49, %v740_v46 }
  0x5a   : > { %468 = vrot.lane.b32.xlu1 %v1238_v16, %s1273_s20  ;;  %v413_v43 = vshrl.u32 %v1103_v29, 16  ;;  %v772_v37 = vrot.slane %v745_v55, 4 }
  0x5c   : > { %641 = vrot.lane.b32.xlu0 %v1452_v41, %s1274_s21  ;;  %v415_v41 = vshll.u32 %v1103_v29, 16  ;;  %v1566_v59 = vsel %vm773_vm0, %v1509_v0, %v772_v37 }
  0x5e   : > { %712 = vrot.lane.b32.xlu1 %v1240_v18, %s1273_s20  ;;  %v417_v33 = vrot.slane %v415_v41, 1 }
  0x60   : > { %402 = vrot.lane.b32.xlu0 %v1101_v25, %s1271_s18  ;;  %v418_v53 = vor.u32 %v417_v33, %v413_v43 }
  0x62   : > { %480 = vrot.lane.b32.xlu1 %v479_v24, %s1276_s26 }
  0x64   : > { %646 = vrot.lane.b32.xlu0 %v1125_v34, %s1271_s18 }
  0x66   : > { %724 = vrot.lane.b32.xlu1 %v723_v32, %s1276_s26 }
  0x68   : > { %407 = vrot.lane.b32.xlu0 %v1247_v39, %s1273_s20 }
  0x6a   : > { %485 = vrot.lane.b32.xlu1 %v1110_v38, %s1277_s6 }
  0x6c   : > { %651 = vrot.lane.b32.xlu0 %v1250_v50, %s1273_s20 }
  0x6e   : > { %729 = vrot.lane.b32.xlu1 %v1134_v42, %s1277_s6 }
  0x70   : > { %419 = vrot.lane.b32.xlu0 %v418_v53, %s1276_s26 }
  0x72   : > { %490 = vrot.lane.b32.xlu1 %v1356_v28, %s1278_s11 }
  0x74   : > { %663 = vrot.lane.b32.xlu0 %v662_v44, %s1276_s26 }
  0x76   : > { %734 = vrot.lane.b32.xlu1 %v1251_v11, %s1278_s11 }
  0x78   : > { %424 = vrot.lane.b32.xlu0 %v1104_v61, %s1277_s6 }
  0x7a   : > { %668 = vrot.lane.b32.xlu1 %v1128_v60, %s1277_s6 }
  0x7c   : > { %429 = vrot.lane.b32.xlu0 %v1496_v56, %s1278_s11 }
  0x7e   : > { %673 = vrot.lane.b32.xlu1 %v1503_v48, %s1278_s11 }
  0x82   : > { %v335_v62 = vpop.permute.xlu0 %334 }
  0x83   : > { %v382_v22 = vsel %vm312_vm1, %v1329_v8, %v335_v62 }
  0x84   : > { %v342_v28 = vpop.permute.xlu1 %341 }
  0x86   : > { %v579_v0 = vpop.permute.xlu0 %578 }
  0x87   : > { %v626_v31 = vsel %vm312_vm1, %v1333_v10, %v579_v0 }
  0x88   : > { %v586_v63 = vpop.permute.xlu1 %585 }
  0x8a   : > { %v255_v6 = vpop.permute.xlu0 %254 }
  0x8b   : > { %v315_v8 = vsel %vm312_vm1, %v1338_v13, %v255_v6 }
  0x8c   : > { %v347_v4 = vpop.permute.xlu1 %346 }
  0x8e   : > { %v518_v2 = vpop.permute.xlu0 %517 }
  0x8f   : > { %v565_v13 = vsel %vm312_vm1, %v1348_v20, %v518_v2 }
  0x90   : > { %v337_v7 = vpop.permute.xlu1 %336 }
  0x91   : > { %v384_v23 = vsel %vm316_vm2, %v382_v22, %v337_v7 }
  0x92   : > { %v269_v12 = vpop.permute.xlu0 %268  ;;  %v386_v26 = vsel %vm319_vm3, %v384_v23, %v342_v28 }
  0x93   : > { %v388_v32 = vsel %vm322_vm4, %v386_v26, %v347_v4  ;;  %v318_v35 = vsel %vm316_vm2, %v315_v8, %v269_v12 }
  0x94   : > { %v581_v9 = vpop.permute.xlu1 %580 }
  0x95   : > { %v628_v29 = vsel %vm316_vm2, %v626_v31, %v581_v9 }
  0x96   : > { %v520_v14 = vpop.permute.xlu0 %519  ;;  %v630_v40 = vsel %vm319_vm3, %v628_v29, %v586_v63 }
  0x97   : > { %v567_v50 = vsel %vm316_vm2, %v565_v13, %v520_v14 }
  0x98   : > { %v591_v5 = vpop.permute.xlu1 %590 }
  0x99   : > { %v632_v42 = vsel %vm322_vm4, %v630_v40, %v591_v5 }
  0x9a   : > { %v274_v16 = vpop.permute.xlu0 %273 }
  0x9b   : > { %v321_v10 = vsel %vm319_vm3, %v318_v35, %v274_v16 }
  0x9c   : > { %v359_v15 = vpop.permute.xlu1 %358 }
  0x9d   : > { %v390_v34 = vsel %vm325_vm5, %v388_v32, %v359_v15 }
  0x9e   : > { %v525_v18 = vpop.permute.xlu0 %524 }
  0x9f   : > { %v569_v54 = vsel %vm319_vm3, %v567_v50, %v525_v18 }
  0xa0   : > { %v603_v17 = vpop.permute.xlu1 %602 }
  0xa1   : > { %v634_v46 = vsel %vm325_vm5, %v632_v42, %v603_v17 }
  0xa2   : > { %v279_v19 = vpop.permute.xlu0 %278 }
  0xa3   : > { %v324_v43 = vsel %vm322_vm4, %v321_v10, %v279_v19 }
  0xa4   : > { %v364_v48 = vpop.permute.xlu1 %363 }
  0xa5   : > { %v392_v36 = vsel %vm328_vm6, %v390_v34, %v364_v48 }
  0xa6   : > { %v530_v56 = vpop.permute.xlu0 %529 }
  0xa7   : > { %v571_v20 = vsel %vm322_vm4, %v569_v54, %v530_v56 }
  0xa8   : > { %v608_v21 = vpop.permute.xlu1 %607 }
  0xa9   : > { %v636_v33 = vsel %vm328_vm6, %v634_v46, %v608_v21 }
  0xaa   : > { %v291_v25 = vpop.permute.xlu0 %290 }
  0xab   : > { %v327_v49 = vsel %vm325_vm5, %v324_v43, %v291_v25 }
  0xac   : > { %v369_v24 = vpop.permute.xlu1 %368 }
  0xad   : > { %v394_v41 = vsel %vm331_vm7, %v392_v36, %v369_v24 }
  0xae   : > { %v542_v30 = vpop.permute.xlu0 %541  ;;  %v762_v51 = vrot.slane %v394_v41, 4 }
  0xaf   : > { %v573_v44 = vsel %vm325_vm5, %v571_v20, %v542_v30 }
  0xb0   : > { %v613_v27 = vpop.permute.xlu1 %612 }
  0xb1   : > { %v638_v55 = vsel %vm331_vm7, %v636_v33, %v613_v27 }
  0xb2   : > { %v296_v39 = vpop.permute.xlu0 %295  ;;  %v768_v60 = vrot.slane %v638_v55, 4 }
  0xb3   : > { %v330_v52 = vsel %vm328_vm6, %v327_v49, %v296_v39 }
  0xb4   : > { %v547_v38 = vpop.permute.xlu1 %546 }
  0xb5   : > { %v575_v61 = vsel %vm328_vm6, %v573_v44, %v547_v38 }
  0xb6   : > { %v301_v3 = vpop.permute.xlu0 %300 }
  0xb7   : > { %v333_v37 = vsel %vm331_vm7, %v330_v52, %v301_v3 }
  0xb8   : > { %v457_v53 = vpop.permute.xlu1 %456  ;;  %v775_v11 = vsel %vm773_vm0, %v333_v37, %v762_v51 }
  0xb9   : > { %893 = vmatmul.mubr.bf16.vlgmr.msra.gmra.mxu0 %v775_v11 }
  0xba   : > { %v552_v62 = vpop.permute.xlu0 %551  ;;  %1147 = vmatprep.mubr.msk.bf16.mxu0 %vm312_vm1, %v1558_v58 }
  0xbb   : > { %v577_v63 = vsel %vm331_vm7, %v575_v61, %v552_v62 }
  0xbc   : > { %v701_v28 = vpop.permute.xlu1 %700  ;;  %v787_v0 = vsel %vm773_vm0, %v577_v63, %v768_v60  ;;  %v1053_v60 = vld [vmem:[%s1682_s2] ss:$0 sm:$0xff] }
  0xbd   : > { %909 = vmatmul.mubr.bf16.vlgmr.msra.gmra.mxu1 %v787_v0  ;;  %v748_v25 = vsel %vm312_vm1, %v1462_v45, %v701_v28 }
  0xbe   : > { %v459_v6 = vpop.permute.xlu0 %458  ;;  %1149 = vmatprep.mubr.msk.bf16.mxu1 %vm312_vm1, %v1566_v59  ;;  %v504_v59 = vsel %vm312_vm1, %v1466_v47, %v457_v53 }
  0xbf   : > { %v506_v27 = vsel %vm316_vm2, %v504_v59, %v459_v6 }
  0xc0   : > { %v703_v4 = vpop.permute.xlu1 %702 }
  0xc1   : > { %v750_v26 = vsel %vm316_vm2, %v748_v25, %v703_v4 }
  0xc2   : > { %v396_v7 = vpop.permute.xlu0 %395 }
  0xc3   : > { %v443_v47 = vsel %vm312_vm1, %v1390_v57, %v396_v7 }
  0xc4   : > { %v464_v2 = vpop.permute.xlu1 %463 }
  0xc5   : > { %v508_v29 = vsel %vm319_vm3, %v506_v27, %v464_v2 }
  0xc6   : > { %v640_v12 = vpop.permute.xlu0 %639 }
  0xc7   : > { %v687_v45 = vsel %vm312_vm1, %v1403_v1, %v640_v12 }
  0xc8   : > { %v708_v9 = vpop.permute.xlu1 %707 }
  0xc9   : > { %v752_v32 = vsel %vm319_vm3, %v750_v26, %v708_v9 }
  0xca   : > { %v398_v14 = vpop.permute.xlu0 %397 }
  0xcb   : > { %v445_v38 = vsel %vm316_vm2, %v443_v47, %v398_v14 }
  0xcc   : > { %v469_v5 = vpop.permute.xlu1 %468 }
  0xcd   : > { %v510_v8 = vsel %vm322_vm4, %v508_v29, %v469_v5 }
  0xce   : > { %v642_v16 = vpop.permute.xlu0 %641 }
  0xcf   : > { %v689_v39 = vsel %vm316_vm2, %v687_v45, %v642_v16 }
  0xd0   : > { %v713_v15 = vpop.permute.xlu1 %712 }
  0xd1   : > { %v754_v34 = vsel %vm322_vm4, %v752_v32, %v713_v15 }
  0xd2   : > { %v403_v58 = vpop.permute.xlu0 %402 }
  0xd3   : > { %v447_v43 = vsel %vm319_vm3, %v445_v38, %v403_v58 }
  0xd4   : > { %v481_v17 = vpop.permute.xlu1 %480 }
  0xd5   : > { %v512_v35 = vsel %vm325_vm5, %v510_v8, %v481_v17 }
  0xd6   : > { %v647_v48 = vpop.permute.xlu0 %646 }
  0xd7   : > { %v691_v57 = vsel %vm319_vm3, %v689_v39, %v647_v48 }
  0xd8   : > { %v725_v18 = vpop.permute.xlu1 %724 }
  0xd9   : > { %v756_v36 = vsel %vm325_vm5, %v754_v34, %v725_v18 }
  0xda   : > { %v408_v21 = vpop.permute.xlu0 %407 }
  0xdb   : > { %v449_v46 = vsel %vm322_vm4, %v447_v43, %v408_v21 }
  0xdc   : > { %v486_v19 = vpop.permute.xlu1 %485 }
  0xdd   : > { %v514_v40 = vsel %vm328_vm6, %v512_v35, %v486_v19 }
  0xde   : > { %v652_v22 = vpop.permute.xlu0 %651 }
  0xdf   : > { %v693_v49 = vsel %vm322_vm4, %v691_v57, %v652_v22 }
  0xe0   : > { %v730_v56 = vpop.permute.xlu1 %729 }
  0xe1   : > { %v758_v10 = vsel %vm328_vm6, %v756_v36, %v730_v56 }
  0xe2   : > { %v420_v24 = vpop.permute.xlu0 %419 }
  0xe3   : > { %v451_v50 = vsel %vm325_vm5, %v449_v46, %v420_v24 }
  0xe4   : > { %v491_v23 = vpop.permute.xlu1 %490 }
  0xe5   : > { %v516_v1 = vsel %vm331_vm7, %v514_v40, %v491_v23 }
  0xe6   : > { %v664_v31 = vpop.permute.xlu0 %663  ;;  %v765_v51 = vrot.slane %v516_v1, 4 }
  0xe7   : > { %v695_v33 = vsel %vm325_vm5, %v693_v49, %v664_v31 }
  0xe8   : > { %v735_v30 = vpop.permute.xlu1 %734 }
  0xe9   : > { %v760_v13 = vsel %vm331_vm7, %v758_v10, %v735_v30 }
  0xea   : > { %v425_v42 = vpop.permute.xlu0 %424  ;;  %v771_v52 = vrot.slane %v760_v13, 4 }
  0xeb   : > { %v453_v3 = vsel %vm328_vm6, %v451_v50, %v425_v42 }
  0xec   : > { %v669_v41 = vpop.permute.xlu1 %668 }
  0xed   : > { %v697_v53 = vsel %vm328_vm6, %v695_v33, %v669_v41 }
  0xee   : > { %v430_v55 = vpop.permute.xlu0 %429 }
  0xef   : > { %v455_v20 = vsel %vm331_vm7, %v453_v3, %v430_v55 }
  0xf0   : > { %v674_v54 = vpop.permute.xlu1 %673  ;;  %v781_v11 = vsel %vm773_vm0, %v455_v20, %v765_v51 }
  0xf1   : > { %v699_v37 = vsel %vm331_vm7, %v697_v53, %v674_v54  ;;  %901 = vmatmul.mubr.bf16.gmra.mxu0 %v781_v11 }
  0xf2   : > { %v793_v44 = vsel %vm773_vm0, %v699_v37, %v771_v52 }
  0xf3   : > { %917 = vmatmul.mubr.bf16.gmra.mxu1 %v793_v44 }
 0x179   : > { %v894_v61 = vpop.f32.mrf.mxu0 }
 0x17a   : > { %v895_v28 = vadd.f32 %v1053_v60, %v894_v61 }
 0x17b   : > { %v896_v62 = vpop.f32.mrf.mxu0 }
 0x17c   : > { %vm925_vm8 = vcmp.ge.f32.partialorder %v895_v28, 0.0  ;;  %v933_v63 = vmul.f32 0.1, %v895_v28 }
 0x17d   : > { %v897_v0 = vpop.f32.mrf.mxu0  ;;  %v910_v4 = vpop.f32.mrf.mxu1 }
 0x17e   : > { %v941_v6 = vsel %vm925_vm8, %v895_v28, %v933_v63  ;;  %v898_v2 = vadd.f32 %v1053_v60, %v897_v0  ;;  %v911_v7 = vadd.f32 %v1053_v60, %v910_v4 }
 0x17f   : > { %v1161_v9 = vpack.c.bf16 %v941_v6, %v941_v6  ;;  %v899_v12 = vpop.f32.mrf.mxu0  ;;  %v912_v5 = vpop.f32.mrf.mxu1 }
 0x180   : > { %vm926_vm10 = vcmp.ge.f32.partialorder %v898_v2, 0.0  ;;  %v934_v14 = vmul.f32 0.1, %v898_v2  ;;  %vm929_vm11 = vcmp.ge.f32.partialorder %v911_v7, 0.0  ;;  %v937_v15 = vmul.f32 0.1, %v911_v7 }
 0x181   : > { %982 = vst.msk [vmem:[%s1659_s23] sm:$0xf] %vm981_vm9, %v1161_v9  ;;  %v913_v16 = vpop.f32.mrf.mxu1 }
 0x182   : > { %v942_v17 = vsel %vm926_vm10, %v898_v2, %v934_v14  ;;  %v945_v58 = vsel %vm929_vm11, %v911_v7, %v937_v15  ;;  %v914_v18 = vadd.f32 %v1053_v60, %v913_v16 }
 0x183   : > { %v1162_v48 = vpack.c.bf16 %v942_v17, %v942_v17  ;;  %v1165_v19 = vpack.c.bf16 %v945_v58, %v945_v58  ;;  %v915_v21 = vpop.f32.mrf.mxu1 }
 0x184   : > { %vm930_vm12 = vcmp.ge.f32.partialorder %v914_v18, 0.0  ;;  %v938_v56 = vmul.f32 0.1, %v914_v18 }
 0x185   : > { %983 = vst.msk [vmem:[%s1659_s23 + $0x4] sm:$0xf] %vm981_vm9, %v1162_v48  ;;  %986 = vst.msk [vmem:[%s1659_s23 + $0x10] sm:$0xf] %vm981_vm9, %v1165_v19 }
 0x186   : > { %v946_v22 = vsel %vm930_vm12, %v914_v18, %v938_v56 }
 0x187   : > { %v1166_v23 = vpack.c.bf16 %v946_v22, %v946_v22 }
 0x189   : > { %987 = vst.msk [vmem:[%s1659_s23 + $0x14] sm:$0xf] %vm981_vm9, %v1166_v23 }
 0x1b1   : > { %v902_v24 = vpop.f32.mrf.mxu0 }
 0x1b2   : > { %v903_v25 = vadd.f32 %v1053_v60, %v902_v24 }
 0x1b3   : > { %v918_v59 = vpop.f32.mrf.mxu1  ;;  %v904_v27 = vpop.f32.mrf.mxu0 }
 0x1b4   : > { %v919_v26 = vadd.f32 %v1053_v60, %v918_v59  ;;  %vm927_vm13 = vcmp.ge.f32.partialorder %v903_v25, 0.0  ;;  %v935_v31 = vmul.f32 0.1, %v903_v25 }
 0x1b5   : > { %v920_v30 = vpop.f32.mrf.mxu1  ;;  %v905_v32 = vpop.f32.mrf.mxu0 }
 0x1b6   : > { %vm931_vm14 = vcmp.ge.f32.partialorder %v919_v26, 0.0  ;;  %v939_v29 = vmul.f32 0.1, %v919_v26  ;;  %v943_v34 = vsel %vm927_vm13, %v903_v25, %v935_v31  ;;  %v906_v45 = vadd.f32 %v1053_v60, %v905_v32 }
 0x1b7   : > { %v921_v8 = vpop.f32.mrf.mxu1  ;;  %v1163_v36 = vpack.c.bf16 %v943_v34, %v943_v34  ;;  %v907_v39 = vpop.f32.mrf.mxu0 }
 0x1b8   : > { %v947_v47 = vsel %vm931_vm14, %v919_v26, %v939_v29  ;;  %v922_v35 = vadd.f32 %v1053_v60, %v921_v8  ;;  %vm928_vm15 = vcmp.ge.f32.partialorder %v906_v45, 0.0  ;;  %v936_v10 = vmul.f32 0.1, %v906_v45 }
 0x1b9   : > { %v1167_v38 = vpack.c.bf16 %v947_v47, %v947_v47  ;;  %v923_v40 = vpop.f32.mrf.mxu1  ;;  %984 = vst.msk [vmem:[%s1659_s23 + $0x8] sm:$0xf] %vm981_vm9, %v1163_v36 }
 0x1ba   : > { %vm932_vm0 = vcmp.ge.f32.partialorder %v922_v35, 0.0  ;;  %v940_v41 = vmul.f32 0.1, %v922_v35  ;;  %v944_v42 = vsel %vm928_vm15, %v906_v45, %v936_v10 }
 0x1bb   : > { %988 = vst.msk [vmem:[%s1659_s23 + $0x18] sm:$0xf] %vm981_vm9, %v1167_v38  ;;  %v1164_v57 = vpack.c.bf16 %v944_v42, %v944_v42 }
 0x1bc   : > { %v948_v43 = vsel %vm932_vm0, %v922_v35, %v940_v41 }
 0x1bd   : > { %v1168_v1 = vpack.c.bf16 %v948_v43, %v948_v43  ;;  %985 = vst.msk [vmem:[%s1659_s23 + $0xc] sm:$0xf] %vm981_vm9, %v1164_v57 }
 0x1bf   : > { %989 = vst.msk [vmem:[%s1659_s23 + $0x1c] sm:$0xf] %vm981_vm9, %v1168_v1 }
 0x1c0 PF: > { %s13_s12 = sadd.s32 1, %s1269_s12  }
 0x1c1   : > { %p10_p4 = scmp.ge.s32.totalorder %s13_s12, 4  }
 0x1c3   :  { %12 = sbr.rel (!%p10_p4) target bundleno = 1 (0x1), region = 65 }

// kernel: run_pwcnet_forward.14
= control target key start
LH: loop header
LB: loop body
LE: loop exit
PB: predicated region body
PF: predicated region fallthrough
CT: control target
= control target key end

     0   :  { %s2851_s12 = smov 0   ;;  %s3664_s0 = inlined_call_operand.vmem [shape: bf16[2,4,17,17,3], index: 0, kind: input, shape index: {}]   ;;  %s3665_s1 = inlined_call_operand.vmem [shape: bf16[27,16], index: 1, kind: input, shape index: {}]   ;;  %s3666_s2 = inlined_call_operand.vmem [shape: f32[1,16], index: 2, kind: input, shape index: {}]   ;;  %s3667_s3 = inlined_call_operand.vmem [shape: bf16[2,256,16], index: 3, kind: output, shape index: {}]  }
   0x1 LB: > { %s2288_s13 = sadd.s32 4294967295, %s2820_s12   ;;  %p2292_p0 = scmp.ge.s32.totalorder %s2820_s12, 1  ;;  %s2820_s12 = sphi %s2851_s12, %s13_s12  }
   0x2   : > { %p137_p1 = scmp.lt.s32.totalorder %s2820_s12, 3 }
   0x4   : > { %p138_p2 = pnand %p2292_p0, %p137_p1 }
   0x5   : > { %p161_p3 = scmp.lt.s32.totalorder (!%p138_p2), %s2288_s13, 1  ;;  %s2822_s18 = smov (!%p138_p2), 3  }
   0x6   : > { %141 = sbr.rel (%p138_p2) target bundleno = 593 (0x251), region = 32  ;;  %s2823_s19 = smov (!%p138_p2), 9  }
   0x7   : > { %s2824_s20 = smov (!%p138_p2), 6   ;;  %s2825_s21 = smov (!%p138_p2), 12  }
   0x8   : > { %s2826_s22 = smov (!%p138_p2), 15   ;;  %s2827_s23 = smov (!%p138_p2), 18  }
   0x9   : > { %s2828_s24 = smov (!%p138_p2), 21   ;;  %s2829_s25 = smov (!%p138_p2), 24  }
   0xb   : > { %s3669_s13 = smov (!%p161_p3, %s2288_s13), 1  ;;  %vm286_vm0 = vsmask.f32 7424  ;;  %vm989_vm1 = vcmask 1044480   ;;  %vm990_vm2 = vcmask 1045504   ;;  %vm363_vm3 = vcmask 23552  }
   0xc   : > { %s2687_s14 = smul.u32 816, %s3669_s13  ;;  %vm366_vm4 = vcmask 48128   ;;  %vm369_vm5 = vcmask 72704   ;;  %vm372_vm6 = vcmask 97280   ;;  %vm375_vm7 = vcmask 121856   ;;  %s2594_s5 = sshll.u32 %s3669_s13, 7 }
   0xd   : > { %vm378_vm8 = vcmask 146432   ;;  %vm381_vm9 = vcmask 171008   ;;  %vm384_vm10 = vcmask 195584   ;;  %vm972_vm11 = vcmask 220160   ;;  %s3565_s8 = scalar_lea.vmem %s3667_s3, %s2594_s5 }
   0xe   : > { %s2865_s17 = scalar_lea.vmem %s3664_s0, %s2687_s14  ;;  %vm1205_vm13 = vcmask 125952  }
   0xf   : > { %v2868_v0 = vld [vmem:[%s2865_s17 + $0xd8] sm:$0xff]   ;;  %v2706_v1 = vld [vmem:[%s2865_s17 + $0xcc] sm:$0xff]   ;;  %v2882_v5 = vld [vmem:[%s2865_s17] sm:$0xff]  }
  0x10   : > { %387 = vrot.lane.b32.xlu1 %v2868_v0, %s2822_s18  ;;  %v2874_v2 = vld [vmem:[%s2865_s17 + $0x138] sm:$0xff]   ;;  %281 = vrot.lane.b32.xlu0 %v2706_v1, %s2822_s18  ;;  %v2708_v3 = vld [vmem:[%s2865_s17 + $0x12c] sm:$0xff]   ;;  %v288_v7 = vshrl.u32 %v2882_v5, 16  ;;  %v290_v8 = vshll.u32 %v2882_v5, 16 }
  0x11   : > { %v2709_v4 = vld [vmem:[%s2865_s17 + $0x198] sm:$0xff]   ;;  %v2711_v6 = vld [vmem:[%s2865_s17 + $0x8] ss:$0 sps:$4 sm:$0x11]   ;;  %v2892_v11 = vld [vmem:[%s2865_s17 + $0xc] sm:$0xff]  }
  0x12   : > { %v295_v9 = vshll.u32 %v2711_v6, 16  ;;  %v2889_v10 = vld [vmem:[%s2865_s17 + $0x1f8] sm:$0xff]   ;;  %v2714_v12 = vld [vmem:[%s2865_s17 + $0x14] ss:$0 sps:$4 sm:$0x11]   ;;  %v292_v13 = vrot.slane %v290_v8, 1 }
  0x13   : > { %v350_v15 = vshrl.u32 %v2892_v11, 16  ;;  %v352_v16 = vshll.u32 %v2892_v11, 16  ;;  %v357_v17 = vshll.u32 %v2714_v12, 16  ;;  %v2899_v18 = vld [vmem:[%s2865_s17 + $0x60] sm:$0xff]   ;;  %v2903_v21 = vld [vmem:[%s2865_s17 + $0x6c] sm:$0xff]   ;;  %v321_v35 = vshll.u32 %v2709_v4, 16 }
  0x14   : > { %1418 = vrot.lane.b32.xlu1 %v2874_v2, %s2822_s18  ;;  %1321 = vrot.lane.b32.xlu0 %v2708_v3, %s2822_s18  ;;  %v297_v14 = vrot.slane %v295_v9, 1  ;;  %v293_v19 = vor.u32 %v292_v13, %v288_v7  ;;  %v2716_v20 = vld [vmem:[%s2865_s17 + $0x68] ss:$0 sps:$4 sm:$0x11]   ;;  %v1327_v24 = vshrl.u32 %v2899_v18, 16  ;;  %v1329_v25 = vshll.u32 %v2899_v18, 16 }
  0x15   : > { %v354_v22 = vrot.slane %v352_v16, 1  ;;  %v359_v23 = vrot.slane %v357_v17, 1  ;;  %v1334_v27 = vshll.u32 %v2716_v20, 16  ;;  %v2718_v28 = vld [vmem:[%s2865_s17 + $0x74] ss:$0 sps:$4 sm:$0x11]  }
  0x16   : > { %v298_v26 = vsel %vm286_vm0, %v293_v19, %v297_v14  ;;  %v1331_v30 = vrot.slane %v1329_v25, 1  ;;  %v1389_v31 = vshrl.u32 %v2903_v21, 16  ;;  %v1391_v32 = vshll.u32 %v2903_v21, 16  ;;  %v2719_v43 = vld [vmem:[%s2865_s17 + $0x264] sm:$0xff]   ;;  %v2724_v1 = vld [vmem:[%s2865_s17 + $0x270] sm:$0xff]  }
  0x17   : > { %v355_v29 = vor.u32 %v354_v22, %v350_v15  ;;  %v1336_v33 = vrot.slane %v1334_v27, 1  ;;  %v1396_v34 = vshll.u32 %v2718_v28, 16  ;;  %v1360_v42 = vshll.u32 %v2889_v10, 16  ;;  %v2723_v44 = vld [vmem:[%s2865_s17 + $0x1a0] ss:$0 sps:$4 sm:$0x11]  }
  0x18   : > { %306 = vrot.lane.b32.xlu0 %v2709_v4, %s2823_s19  ;;  %299 = vrot.lane.b32.xlu1 %v298_v26, %s2824_s20  ;;  %v1332_v37 = vor.u32 %v1331_v30, %v1327_v24  ;;  %v1393_v38 = vrot.slane %v1391_v32, 1  ;;  %v319_v46 = vshrl.u32 %v2709_v4, 16  ;;  %v323_v47 = vrot.slane %v321_v35, 1  ;;  %v2725_v49 = vld [vmem:[%s2865_s17 + $0x200] ss:$0 sps:$4 sm:$0x11]  }
  0x19   : > { %v2915_v36 = vsel %vm286_vm0, %v355_v29, %v359_v23  ;;  %v1398_v39 = vrot.slane %v1396_v34, 1  ;;  %v326_v48 = vshll.u32 %v2723_v44, 16  ;;  %v2720_v50 = vld [vmem:[%s2865_s17 + $0x1a4] sm:$0xff]   ;;  %v1358_v52 = vshrl.u32 %v2889_v10, 16  ;;  %v2726_v9 = vld [vmem:[%s2865_s17 + $0x2d0] sm:$0xff]   ;;  %v2729_v22 = vld [vmem:[%s2865_s17 + $0x18] sm:$0xff]  }
  0x1a   : > { %v1337_v40 = vsel %vm286_vm0, %v1332_v37, %v1336_v33  ;;  %v1394_v41 = vor.u32 %v1393_v38, %v1389_v31  ;;  %v2721_v51 = vld [vmem:[%s2865_s17 + $0x2c4] sm:$0xff]   ;;  %v324_v53 = vor.u32 %v323_v47, %v319_v46  ;;  %v1362_v55 = vrot.slane %v1360_v42, 1  ;;  %v2727_v57 = vld [vmem:[%s2865_s17 + $0x1ac] ss:$0 sps:$4 sm:$0x11]   ;;  %v2730_v24 = vld [vmem:[%s2865_s17 + $0x78] sm:$0xff]  }
  0x1b   : > { %v328_v54 = vrot.slane %v326_v48, 1  ;;  %v1365_v56 = vshll.u32 %v2725_v49, 16  ;;  %v411_v58 = vshll.u32 %v2720_v50, 16  ;;  %v2722_v59 = vld [vmem:[%s2865_s17 + $0x204] sm:$0xff]   ;;  %v409_v3 = vshrl.u32 %v2720_v50, 16  ;;  %v2988_v42 = vld [vmem:[%s2865_s17 + $0xf0] sm:$0xff]  }
  0x1c   : > { %1345 = vrot.lane.b32.xlu0 %v2889_v10, %s2823_s19  ;;  %389 = vrot.lane.b32.xlu1 %v2915_v36, %s2824_s20  ;;  %v2925_v45 = vsel %vm286_vm0, %v1394_v41, %v1398_v39  ;;  %v1363_v61 = vor.u32 %v1362_v55, %v1358_v52  ;;  %v1442_v63 = vshll.u32 %v2722_v59, 16  ;;  %v416_v6 = vshll.u32 %v2727_v57, 16  ;;  %v2728_v7 = vld [vmem:[%s2865_s17 + $0x20c] ss:$0 sps:$4 sm:$0x11]   ;;  %v2731_v29 = vld [vmem:[%s2865_s17 + $0xe4] sm:$0xff]  }
  0x1d   : > { %v329_v60 = vsel %vm286_vm0, %v324_v53, %v328_v54  ;;  %v1367_v62 = vrot.slane %v1365_v56, 1  ;;  %v413_v4 = vrot.slane %v411_v58, 1  ;;  %v1440_v10 = vshrl.u32 %v2722_v59, 16  ;;  %v2732_v33 = vld [vmem:[%s2865_s17 + $0x144] sm:$0xff]   ;;  %v2998_v48 = vld [vmem:[%s2865_s17 + $0x150] sm:$0xff]  }
  0x1e   : > { %v1444_v12 = vrot.slane %v1442_v63, 1  ;;  %v418_v14 = vrot.slane %v416_v6, 1  ;;  %v1447_v15 = vshll.u32 %v2728_v7, 16  ;;  %v442_v23 = vshll.u32 %v2729_v22, 16  ;;  %v2985_v41 = vld [vmem:[%s2865_s17 + $0x84] sm:$0xff]   ;;  %v2740_v55 = vld [vmem:[%s2865_s17 + $0x210] sm:$0xff]  }
  0x1f   : > { %v1368_v8 = vsel %vm286_vm0, %v1363_v61, %v1367_v62  ;;  %v414_v13 = vor.u32 %v413_v4, %v409_v3  ;;  %v440_v25 = vshrl.u32 %v2729_v22, 16  ;;  %v1473_v28 = vshll.u32 %v2730_v24, 16  ;;  %v2739_v39 = vld [vmem:[%s2865_s17 + $0x2c] ss:$0 sps:$4 sm:$0x11]   ;;  %v2743_v62 = vld [vmem:[%s2865_s17 + $0x27c] sm:$0xff]  }
  0x20   : > { %1338 = vrot.lane.b32.xlu0 %v1337_v40, %s2824_s20  ;;  %1420 = vrot.lane.b32.xlu1 %v2925_v45, %s2824_s20  ;;  %v1445_v17 = vor.u32 %v1444_v12, %v1440_v10  ;;  %v1449_v19 = vrot.slane %v1447_v15, 1  ;;  %v444_v26 = vrot.slane %v442_v23, 1  ;;  %v1555_v47 = vshll.u32 %v2985_v41, 16  ;;  %v2747_v61 = vld [vmem:[%s2865_s17 + $0x1b8] ss:$0 sps:$4 sm:$0x11]  }
  0x21   : > { %v419_v16 = vsel %vm286_vm0, %v414_v13, %v418_v14  ;;  %v1553_v49 = vshrl.u32 %v2985_v41, 16  ;;  %v2830_v63 = vmov 65535   ;;  %v1524_v3 = vshll.u32 %v2740_v55, 16  ;;  %v2749_v6 = vld [vmem:[%s2865_s17 + $0x218] ss:$0 sps:$4 sm:$0x11]  }
  0x22   : > { %v1450_v20 = vsel %vm286_vm0, %v1445_v17, %v1449_v19  ;;  %v445_v31 = vor.u32 %v444_v26, %v440_v25  ;;  %v1557_v53 = vrot.slane %v1555_v47, 1  ;;  %v498_v13 = vshll.u32 %v2747_v61, 16  ;;  %v2744_v14 = vld [vmem:[%s2865_s17 + $0x1bc] sm:$0xff]   ;;  %v2748_v26 = vld [vmem:[%s2865_s17 + $0x288] sm:$0xff]  }
  0x23   : > { %v2745_v15 = vld [vmem:[%s2865_s17 + $0x2dc] sm:$0xff]   ;;  %v1526_v17 = vrot.slane %v1524_v3, 1  ;;  %v575_v23 = vshll.u32 %v2744_v14, 16 }
  0x24   : > { %313 = vrot.lane.b32.xlu0 %v2719_v43, %s2825_s21  ;;  %396 = vrot.lane.b32.xlu1 %v2720_v50, %s2823_s19  ;;  %v2742_v43 = vld [vmem:[%s2865_s17 + $0x8c] ss:$0 sps:$4 sm:$0x11]   ;;  %v2737_v50 = vld [vmem:[%s2865_s17 + $0x1b0] sm:$0xff]   ;;  %v1558_v57 = vor.u32 %v1557_v53, %v1553_v49 }
  0x25   : > { %v1560_v54 = vshll.u32 %v2742_v43, 16  ;;  %v491_v4 = vshrl.u32 %v2737_v50, 16  ;;  %v3062_v49 = vld [vmem:[%s2865_s17 + $0x90] sm:$0xff]  }
  0x27   : > { %v1562_v58 = vrot.slane %v1560_v54, 1  ;;  %v1637_v54 = vshll.u32 %v3062_v49, 16 }
  0x28   : > { %1352 = vrot.lane.b32.xlu0 %v2721_v51, %s2825_s21  ;;  %1427 = vrot.lane.b32.xlu1 %v2722_v59, %s2823_s19  ;;  %v2776_v59 = vld [vmem:[%s3665_s1 + $0x8] sm:$0x3f]  }
  0x2c   : > { %330 = vrot.lane.b32.xlu0 %v329_v60, %s2826_s22  ;;  %403 = vrot.lane.b32.xlu1 %v2724_v1, %s2825_s21  ;;  %v493_v60 = vshll.u32 %v2737_v50, 16  ;;  %v991_v1 = vsel %vm989_vm1, 4294967295, %v2830_v63  ;;  %v2756_v63 = vld [vmem:[%s2865_s17 + $0x15c] sm:$0xff]  }
  0x2d   : > { %v992_v7 = vsel %vm990_vm2, %v991_v1, 0 }
  0x2e   : > { %v994_v10 = vand.u32 %v2776_v59, %v992_v7  ;;  %v495_v12 = vrot.slane %v493_v60, 1  ;;  %v1639_v60 = vrot.slane %v1637_v54, 1  ;;  %v2768_v54 = vld [vmem:[%s2865_s17 + $0x1d4] sm:$0xff]  }
  0x30   : > { %1369 = vrot.lane.b32.xlu0 %v1368_v8, %s2826_s22  ;;  %1434 = vrot.lane.b32.xlu1 %v2726_v9, %s2825_s21  ;;  %v2778_v8 = vld [vmem:[%s3665_s1] sm:$0xff]   ;;  %v3023_v9 = vsel %vm286_vm0, %v1558_v57, %v1562_v58  ;;  %v496_v19 = vor.u32 %v495_v12, %v491_v4 }
  0x31   : > { %2647 = vmatprep.subr.bf16.mxu0 %v994_v10  ;;  %2667 = vmatprep.subr.bf16.mxu1 %v994_v10  ;;  %v2763_v12 = vld [vmem:[%s2865_s17 + $0x44] ss:$0 sps:$4 sm:$0x11]  }
  0x32   : > { %2648 = vmatpush3.bf16.msra.mxu0 %v994_v10  ;;  %2668 = vmatpush3.bf16.msra.mxu1 %v994_v10 }
  0x33   : > { %2649 = vmatprep.subr.bf16.mxu0 %v2778_v8  ;;  %2669 = vmatprep.subr.bf16.mxu1 %v2778_v8 }
  0x34   : > { %337 = vrot.lane.b32.xlu0 %v2892_v11, %s2827_s23  ;;  %420 = vrot.lane.b32.xlu1 %v419_v16, %s2826_s22  ;;  %v2733_v11 = vld [vmem:[%s2865_s17 + $0x20] ss:$0 sps:$4 sm:$0x11]   ;;  %v1522_v16 = vshrl.u32 %v2740_v55, 16 }
  0x35   : > { %v447_v27 = vshll.u32 %v2733_v11, 16  ;;  %v2751_v11 = vld [vmem:[%s2865_s17 + $0x1c4] ss:$0 sps:$4 sm:$0x11]  }
  0x36   : > { %2650 = vmatpush3.bf16.msra.mxu0 %v2778_v8  ;;  %2670 = vmatpush3.bf16.msra.mxu1 %v2778_v8 }
  0x37   : > { %v449_v32 = vrot.slane %v447_v27, 1  ;;  %v1527_v27 = vor.u32 %v1526_v17, %v1522_v16  ;;  %v3113_v16 = vld [vmem:[%s2865_s17 + $0x108] sm:$0xff]  }
  0x38   : > { %1376 = vrot.lane.b32.xlu0 %v2903_v21, %s2827_s23  ;;  %1451 = vrot.lane.b32.xlu1 %v1450_v20, %s2826_s22  ;;  %v2734_v21 = vld [vmem:[%s2865_s17 + $0x80] ss:$0 sps:$4 sm:$0x11]   ;;  %v500_v20 = vrot.slane %v498_v13, 1 }
  0x39   : > { %v1478_v30 = vshll.u32 %v2734_v21, 16  ;;  %v450_v34 = vsel %vm286_vm0, %v445_v31, %v449_v32  ;;  %v2752_v31 = vld [vmem:[%s2865_s17 + $0x224] ss:$0 sps:$4 sm:$0x11]   ;;  %v3105_v13 = vld [vmem:[%s2865_s17 + $0x9c] sm:$0xff]  }
  0x3a   : > { %v501_v25 = vsel %vm286_vm0, %v496_v19, %v500_v20  ;;  %v693_v20 = vshll.u32 %v2763_v12, 16 }
  0x3b   : > { %v1480_v37 = vrot.slane %v1478_v30, 1  ;;  %v580_v30 = vshll.u32 %v2751_v11, 16  ;;  %v1719_v11 = vshll.u32 %v3105_v13, 16 }
  0x3c   : > { %344 = vrot.lane.b32.xlu0 %v2868_v0, %s2828_s24  ;;  %427 = vrot.lane.b32.xlu1 %v2729_v22, %s2827_s23  ;;  %v1471_v0 = vshrl.u32 %v2730_v24, 16  ;;  %v1529_v22 = vshll.u32 %v2749_v6, 16  ;;  %v3092_v6 = vld [vmem:[%s2865_s17 + $0x3c] sm:$0xff]  }
  0x3d   : > { %v688_v10 = vshll.u32 %v3092_v6, 16  ;;  %v686_v17 = vshrl.u32 %v3092_v6, 16 }
  0x3f   : > { %v690_v19 = vrot.slane %v688_v10, 1 }
  0x40   : > { %1383 = vrot.lane.b32.xlu0 %v2874_v2, %s2828_s24  ;;  %1458 = vrot.lane.b32.xlu1 %v2730_v24, %s2827_s23  ;;  %v1475_v2 = vrot.slane %v1473_v28, 1  ;;  %v2746_v24 = vld [vmem:[%s2865_s17 + $0x21c] sm:$0xff]   ;;  %v1531_v28 = vrot.slane %v1529_v22, 1  ;;  %v2766_v22 = vld [vmem:[%s2865_s17 + $0xa4] ss:$0 sps:$4 sm:$0x11]  }
  0x41   : > { %v1606_v21 = vshll.u32 %v2746_v24, 16 }
  0x42   : > { %v1476_v35 = vor.u32 %v1475_v2, %v1471_v0  ;;  %v577_v0 = vrot.slane %v575_v23, 1  ;;  %v1532_v32 = vsel %vm286_vm0, %v1527_v27, %v1531_v28  ;;  %v2750_v2 = vld [vmem:[%s2865_s17 + $0x2e8] sm:$0xff]   ;;  %v695_v27 = vrot.slane %v693_v20, 1 }
  0x43   : > { %v1717_v28 = vshrl.u32 %v3105_v13, 16 }
  0x44   : > { %361 = vrot.lane.b32.xlu0 %v2915_v36, %s2829_s25  ;;  %434 = vrot.lane.b32.xlu1 %v2731_v29, %s2828_s24  ;;  %v2977_v36 = vld [vmem:[%s2865_s17 + $0x24] sm:$0xff]   ;;  %v1481_v38 = vsel %vm286_vm0, %v1476_v35, %v1480_v37  ;;  %v582_v37 = vrot.slane %v580_v30, 1 }
  0x45   : > { %v524_v40 = vshll.u32 %v2977_v36, 16  ;;  %v522_v44 = vshrl.u32 %v2977_v36, 16 }
  0x47   : > { %v526_v46 = vrot.slane %v524_v40, 1 }
  0x48   : > { %1400 = vrot.lane.b32.xlu0 %v2925_v45, %s2829_s25  ;;  %1465 = vrot.lane.b32.xlu1 %v2732_v33, %s2828_s24  ;;  %v529_v45 = vshll.u32 %v2739_v39, 16 }
  0x49   : > { %v527_v51 = vor.u32 %v526_v46, %v522_v44  ;;  %v2757_v46 = vld [vmem:[%s2865_s17 + $0x38] ss:$0 sps:$4 sm:$0x11]  }
  0x4a   : > { %v531_v52 = vrot.slane %v529_v45, 1  ;;  %v3053_v45 = vld [vmem:[%s2865_s17 + $0x30] sm:$0xff]   ;;  %v611_v53 = vshll.u32 %v2757_v46, 16 }
  0x4b   : > { %v606_v47 = vshll.u32 %v3053_v45, 16 }
  0x4c   : > { %451 = vrot.lane.b32.xlu0 %v450_v34, %s2829_s25  ;;  %469 = vrot.lane.b32.xlu1 %v2731_v29, %s2822_s18  ;;  %v3008_v56 = vsel %vm286_vm0, %v527_v51, %v531_v52  ;;  %v573_v29 = vshrl.u32 %v2744_v14, 16  ;;  %v613_v59 = vrot.slane %v611_v53, 1  ;;  %v2773_v53 = vld [vmem:[%s2865_s17 + $0x230] ss:$0 sps:$4 sm:$0x11]  }
  0x4d   : > { %v608_v52 = vrot.slane %v606_v47, 1 }
  0x4e   : > { %v578_v35 = vor.u32 %v577_v0, %v573_v29  ;;  %v1721_v29 = vrot.slane %v1719_v11, 1  ;;  %v1724_v0 = vshll.u32 %v2766_v22, 16  ;;  %v2772_v22 = vld [vmem:[%s2865_s17 + $0x2a0] sm:$0xff]   ;;  %v737_v11 = vshrl.u32 %v2768_v54, 16 }
  0x50   : > { %1482 = vrot.lane.b32.xlu0 %v1481_v38, %s2829_s25  ;;  %1500 = vrot.lane.b32.xlu1 %v2732_v33, %s2822_s18  ;;  %v1604_v33 = vshrl.u32 %v2746_v24, 16  ;;  %v583_v39 = vsel %vm286_vm0, %v578_v35, %v582_v37 }
  0x54   : > { %471 = vrot.lane.b32.xlu0 %v450_v34, %s2824_s20  ;;  %551 = vrot.lane.b32.xlu1 %v2988_v42, %s2822_s18  ;;  %v1608_v34 = vrot.slane %v1606_v21, 1  ;;  %v3126_v21 = vld [vmem:[%s2865_s17 + $0x168] sm:$0xff]  }
  0x56   : > { %v1609_v40 = vor.u32 %v1608_v34, %v1604_v33  ;;  %v1722_v33 = vor.u32 %v1721_v29, %v1717_v28  ;;  %v1726_v34 = vrot.slane %v1724_v0, 1  ;;  %v2777_v28 = vld [vmem:[%s2865_s17 + $0x23c] ss:$0 sps:$4 sm:$0x11]  }
  0x58   : > { %1502 = vrot.lane.b32.xlu0 %v1481_v38, %s2824_s20  ;;  %1582 = vrot.lane.b32.xlu1 %v2998_v48, %s2822_s18  ;;  %v1611_v38 = vshll.u32 %v2752_v31, 16 }
  0x5a   : > { %v1613_v43 = vrot.slane %v1611_v38, 1  ;;  %v2771_v38 = vld [vmem:[%s2865_s17 + $0x1d0] ss:$0 sps:$4 sm:$0x11]  }
  0x5c   : > { %478 = vrot.lane.b32.xlu0 %v2737_v50, %s2823_s19  ;;  %553 = vrot.lane.b32.xlu1 %v3008_v56, %s2824_s20  ;;  %v1614_v44 = vsel %vm286_vm0, %v1609_v40, %v1613_v43  ;;  %v3151_v43 = vsel %vm286_vm0, %v1722_v33, %v1726_v34 }
  0x60   : > { %1509 = vrot.lane.b32.xlu0 %v2740_v55, %s2823_s19  ;;  %1584 = vrot.lane.b32.xlu1 %v3023_v9, %s2824_s20  ;;  %v2755_v55 = vld [vmem:[%s2865_s17 + $0xfc] sm:$0xff]  }
  0x64   : > { %485 = vrot.lane.b32.xlu0 %v2743_v62, %s2825_s21  ;;  %560 = vrot.lane.b32.xlu1 %v2744_v14, %s2823_s19 }
  0x68   : > { %1516 = vrot.lane.b32.xlu0 %v2745_v15, %s2825_s21  ;;  %1591 = vrot.lane.b32.xlu1 %v2746_v24, %s2823_s19 }
  0x6c   : > { %502 = vrot.lane.b32.xlu0 %v501_v25, %s2826_s22  ;;  %567 = vrot.lane.b32.xlu1 %v2748_v26, %s2825_s21  ;;  %v691_v25 = vor.u32 %v690_v19, %v686_v17  ;;  %v2761_v26 = vld [vmem:[%s2865_s17 + $0x1c8] sm:$0xff]  }
  0x6d   : > { %v657_v37 = vshll.u32 %v2761_v26, 16  ;;  %v655_v47 = vshrl.u32 %v2761_v26, 16 }
  0x70   : > { %1533 = vrot.lane.b32.xlu0 %v1532_v32, %s2826_s22  ;;  %1598 = vrot.lane.b32.xlu1 %v2750_v2, %s2825_s21  ;;  %v3139_v32 = vsel %vm286_vm0, %v691_v25, %v695_v27  ;;  %v2764_v2 = vld [vmem:[%s2865_s17 + $0x228] sm:$0xff]  }
  0x71   : > { %v1688_v40 = vshll.u32 %v2764_v2, 16 }
  0x74   : > { %509 = vrot.lane.b32.xlu0 %v2977_v36, %s2827_s23  ;;  %584 = vrot.lane.b32.xlu1 %v583_v39, %s2826_s22 }
  0x78   : > { %1540 = vrot.lane.b32.xlu0 %v2985_v41, %s2827_s23  ;;  %1615 = vrot.lane.b32.xlu1 %v1614_v44, %s2826_s22  ;;  %v604_v41 = vshrl.u32 %v3053_v45, 16  ;;  %v2767_v44 = vld [vmem:[%s2865_s17 + $0x294] sm:$0xff]  }
  0x7a   : > { %v609_v58 = vor.u32 %v608_v52, %v604_v41  ;;  %v659_v41 = vrot.slane %v657_v37, 1  ;;  %v662_v52 = vshll.u32 %v2771_v38, 16  ;;  %v2774_v37 = vld [vmem:[%s2865_s17 + $0x300] sm:$0xff]  }
  0x7c   : > { %516 = vrot.lane.b32.xlu0 %v2988_v42, %s2828_s24  ;;  %591 = vrot.lane.b32.xlu1 %v3053_v45, %s2827_s23  ;;  %v2758_v42 = vld [vmem:[%s2865_s17 + $0x98] ss:$0 sps:$4 sm:$0x11]   ;;  %v614_v1 = vsel %vm286_vm0, %v609_v58, %v613_v59  ;;  %v660_v59 = vor.u32 %v659_v41, %v655_v47  ;;  %v1775_v41 = vshll.u32 %v2777_v28, 16 }
  0x7d   : > { %v1642_v61 = vshll.u32 %v2758_v42, 16 }
  0x7f   : > { %v1644_v4 = vrot.slane %v1642_v61, 1  ;;  %v1690_v61 = vrot.slane %v1688_v40, 1 }
  0x80   : > { %1547 = vrot.lane.b32.xlu0 %v2998_v48, %s2828_s24  ;;  %1622 = vrot.lane.b32.xlu1 %v3062_v49, %s2827_s23  ;;  %v1635_v48 = vshrl.u32 %v3062_v49, 16 }
  0x82   : > { %v3067_v50 = vpop.permute.xlu1 %387  ;;  %v3069_v51 = vpop.permute.xlu0 %281  ;;  %v1640_v3 = vor.u32 %v1639_v60, %v1635_v48  ;;  %v1686_v48 = vshrl.u32 %v2764_v2, 16  ;;  %v664_v60 = vrot.slane %v662_v52, 1 }
  0x84   : > { %533 = vrot.lane.b32.xlu0 %v3008_v56, %s2829_s25  ;;  %598 = vrot.lane.b32.xlu1 %v2755_v55, %s2828_s24  ;;  %v665_v12 = vsel %vm286_vm0, %v660_v59, %v664_v60  ;;  %v1691_v17 = vor.u32 %v1690_v61, %v1686_v48 }
  0x86   : > { %v3079_v57 = vpop.permute.xlu0 %1321  ;;  %v3082_v62 = vpop.permute.xlu1 %1418 }
  0x88   : > { %1564 = vrot.lane.b32.xlu0 %v3023_v9, %s2829_s25  ;;  %1629 = vrot.lane.b32.xlu1 %v2756_v63, %s2828_s24  ;;  %v1645_v9 = vsel %vm286_vm0, %v1640_v3, %v1644_v4  ;;  %v739_v3 = vshll.u32 %v2768_v54, 16  ;;  %v2770_v4 = vld [vmem:[%s2865_s17 + $0x234] sm:$0xff]  }
  0x8a   : > { %v3087_v56 = vpop.permute.xlu0 %306  ;;  %v3095_v7 = vpop.permute.xlu1 %299  ;;  %v741_v25 = vrot.slane %v739_v3, 1 }
  0x8c   : > { %615 = vrot.lane.b32.xlu0 %v614_v1, %s2829_s25  ;;  %633 = vrot.lane.b32.xlu1 %v2755_v55, %s2822_s18  ;;  %v2769_v55 = vld [vmem:[%s2865_s17 + $0x2f4] sm:$0xff]   ;;  %v742_v38 = vor.u32 %v741_v25, %v737_v11 }
  0x8e   : > { %v3097_v8 = vpop.permute.xlu0 %1345  ;;  %v3107_v14 = vpop.permute.xlu1 %389 }
  0x90   : > { %1646 = vrot.lane.b32.xlu0 %v1645_v9, %s2829_s25  ;;  %1664 = vrot.lane.b32.xlu1 %v2756_v63, %s2822_s18  ;;  %v1693_v63 = vshll.u32 %v2773_v53, 16 }
  0x92   : > { %v3109_v15 = vpop.permute.xlu0 %1338  ;;  %v3119_v23 = vpop.permute.xlu1 %1420  ;;  %v1695_v19 = vrot.slane %v1693_v63, 1  ;;  %v2809_v63 = vld [vmem:[%s2865_s17 + $0xc] sm:$0xff]  }
  0x94   : > { %635 = vrot.lane.b32.xlu0 %v614_v1, %s2824_s20  ;;  %715 = vrot.lane.b32.xlu1 %v3113_v16, %s2822_s18  ;;  %v1696_v0 = vsel %vm286_vm0, %v1691_v17, %v1695_v19 }
  0x96   : > { %v3121_v24 = vpop.permute.xlu0 %313  ;;  %v3131_v30 = vpop.permute.xlu1 %396 }
  0x98   : > { %1666 = vrot.lane.b32.xlu0 %v1645_v9, %s2824_s20  ;;  %1746 = vrot.lane.b32.xlu1 %v3126_v21, %s2822_s18  ;;  %v2775_v9 = vld [vmem:[%s2865_s17 + $0x1dc] ss:$0 sps:$4 sm:$0x11]  }
  0x99   : > { %v744_v27 = vshll.u32 %v2775_v9, 16 }
  0x9a   : > { %v3133_v31 = vpop.permute.xlu0 %1352  ;;  %v3142_v35 = vpop.permute.xlu1 %1427 }
  0x9b   : > { %v746_v40 = vrot.slane %v744_v27, 1 }
  0x9c   : > { %642 = vrot.lane.b32.xlu0 %v2761_v26, %s2823_s19  ;;  %717 = vrot.lane.b32.xlu1 %v3139_v32, %s2824_s20  ;;  %v1770_v26 = vshll.u32 %v2770_v4, 16 }
  0x9e   : > { %v3145_v39 = vpop.permute.xlu0 %330  ;;  %v3154_v46 = vpop.permute.xlu1 %403  ;;  %v1772_v47 = vrot.slane %v1770_v26, 1  ;;  %v2783_v26 = vld [vmem:[%s2865_s17 + $0x50] ss:$0 sps:$4 sm:$0x11]  }
  0xa0   : > { %1673 = vrot.lane.b32.xlu0 %v2764_v2, %s2823_s19  ;;  %1748 = vrot.lane.b32.xlu1 %v3151_v43, %s2824_s20  ;;  %v365_v2 = vsel %vm363_vm3, %v2882_v5, %v3069_v51  ;;  %v1403_v5 = vsel %vm363_vm3, %v2899_v18, %v3079_v57  ;;  %v747_v18 = vsel %vm286_vm0, %v742_v38, %v746_v40  ;;  %v2784_v38 = vld [vmem:[%s2865_s17 + $0xb0] ss:$0 sps:$4 sm:$0x11]  }
  0xa1   : > { %v368_v34 = vsel %vm366_vm4, %v365_v2, %v3095_v7  ;;  %v1405_v53 = vsel %vm366_vm4, %v1403_v5, %v3109_v15 }
  0xa2   : > { %v3157_v42 = vpop.permute.xlu0 %1369  ;;  %v3164_v58 = vpop.permute.xlu1 %1434  ;;  %v371_v51 = vsel %vm369_vm5, %v368_v34, %v3087_v56  ;;  %v1777_v56 = vrot.slane %v1775_v41, 1 }
  0xa4   : > { %649 = vrot.lane.b32.xlu0 %v2767_v44, %s2825_s21  ;;  %724 = vrot.lane.b32.xlu1 %v2768_v54, %s2823_s19  ;;  %v1768_v44 = vshrl.u32 %v2770_v4, 16  ;;  %v374_v54 = vsel %vm372_vm6, %v371_v51, %v3121_v24  ;;  %v1407_v24 = vsel %vm369_vm5, %v1405_v53, %v3097_v8  ;;  %v1806_v53 = vshll.u32 %v2784_v38, 16 }
  0xa6   : > { %v338_v1 = vpop.permute.xlu0 %337  ;;  %v3170_v10 = vpop.permute.xlu1 %420  ;;  %v1773_v57 = vor.u32 %v1772_v47, %v1768_v44  ;;  %v2781_v47 = vld [vmem:[%s2865_s17 + $0x114] sm:$0xff]  }
  0xa8   : > { %1680 = vrot.lane.b32.xlu0 %v2769_v55, %s2825_s21  ;;  %1755 = vrot.lane.b32.xlu1 %v2770_v4, %s2823_s19  ;;  %v377_v55 = vsel %vm375_vm7, %v374_v54, %v3145_v39  ;;  %v1409_v39 = vsel %vm372_vm6, %v1407_v24, %v3133_v31  ;;  %v1778_v8 = vsel %vm286_vm0, %v1773_v57, %v1777_v56  ;;  %v1808_v56 = vrot.slane %v1806_v53, 1 }
  0xa9   : > { %v380_v15 = vsel %vm378_vm8, %v377_v55, %v338_v1  ;;  %v454_v1 = vsel %vm363_vm3, %v2809_v63, %v3067_v50  ;;  %v1411_v3 = vsel %vm375_vm7, %v1409_v39, %v3157_v42  ;;  %v2782_v55 = vld [vmem:[%s2865_s17 + $0x174] sm:$0xff]  }
  0xaa   : > { %v1377_v20 = vpop.permute.xlu0 %1376  ;;  %v3177_v29 = vpop.permute.xlu1 %1451  ;;  %v456_v31 = vsel %vm366_vm4, %v454_v1, %v3107_v14  ;;  %v2810_v14 = vld [vmem:[%s2865_s17 + $0x6c] sm:$0xff]  }
  0xab   : > { %v1413_v4 = vsel %vm378_vm8, %v1411_v3, %v1377_v20  ;;  %v458_v50 = vsel %vm369_vm5, %v456_v31, %v3131_v30  ;;  %v1485_v20 = vsel %vm363_vm3, %v2810_v14, %v3082_v62  ;;  %v3313_v3 = vld [vmem:[%s2865_s17 + $0x120] sm:$0xff]  }
  0xac   : > { %666 = vrot.lane.b32.xlu0 %v665_v12, %s2826_s22  ;;  %731 = vrot.lane.b32.xlu1 %v2772_v22, %s2825_s21  ;;  %v460_v17 = vsel %vm372_vm6, %v458_v50, %v3154_v46  ;;  %v3231_v22 = vld [vmem:[%s2865_s17 + $0x48] sm:$0xff]   ;;  %v1487_v46 = vsel %vm366_vm4, %v1485_v20, %v3119_v23  ;;  %v2787_v14 = vld [vmem:[%s2865_s17 + $0x1e0] sm:$0xff]  }
  0xad   : > { %v462_v30 = vsel %vm375_vm7, %v460_v17, %v3170_v10  ;;  %v770_v27 = vshll.u32 %v3231_v22, 16  ;;  %v1489_v62 = vsel %vm369_vm5, %v1487_v46, %v3142_v35  ;;  %v768_v35 = vshrl.u32 %v3231_v22, 16  ;;  %v3326_v17 = vld [vmem:[%s2865_s17 + $0x180] sm:$0xff]  }
  0xae   : > { %v345_v33 = vpop.permute.xlu0 %344  ;;  %v428_v52 = vpop.permute.xlu1 %427 }
  0xaf   : > { %v383_v59 = vsel %vm381_vm9, %v380_v15, %v345_v33  ;;  %v464_v11 = vsel %vm378_vm8, %v462_v30, %v428_v52  ;;  %v772_v34 = vrot.slane %v770_v27, 1 }
  0xb0   : > { %1697 = vrot.lane.b32.xlu0 %v1696_v0, %s2826_s22  ;;  %1762 = vrot.lane.b32.xlu1 %v2774_v37, %s2825_s21  ;;  %v3255_v0 = vld [vmem:[%s2865_s17 + $0xa8] sm:$0xff]   ;;  %v775_v37 = vshll.u32 %v2783_v26, 16 }
  0xb1   : > { %v1801_v40 = vshll.u32 %v3255_v0, 16  ;;  %v1799_v41 = vshrl.u32 %v3255_v0, 16  ;;  %v773_v5 = vor.u32 %v772_v34, %v768_v35  ;;  %v2793_v34 = vld [vmem:[%s2865_s17 + $0x2ac] sm:$0xff]  }
  0xb2   : > { %v1384_v7 = vpop.permute.xlu0 %1383  ;;  %v1459_v48 = vpop.permute.xlu1 %1458  ;;  %v777_v51 = vrot.slane %v775_v37, 1  ;;  %v819_v37 = vshrl.u32 %v2787_v14, 16 }
  0xb3   : > { %v1415_v12 = vsel %vm381_vm9, %v1413_v4, %v1384_v7  ;;  %v1803_v7 = vrot.slane %v1801_v40, 1 }
  0xb4   : > { %673 = vrot.lane.b32.xlu0 %v3092_v6, %s2827_s23  ;;  %748 = vrot.lane.b32.xlu1 %v747_v18, %s2826_s22  ;;  %v778_v18 = vsel %vm286_vm0, %v773_v5, %v777_v51  ;;  %v2795_v5 = vld [vmem:[%s2865_s17 + $0x30c] sm:$0xff]  }
  0xb5   : > { %v1804_v57 = vor.u32 %v1803_v7, %v1799_v41  ;;  %v2794_v41 = vld [vmem:[%s2865_s17 + $0x1ec] sm:$0xff]  }
  0xb6   : > { %v362_v60 = vpop.permute.xlu0 %361  ;;  %v435_v9 = vpop.permute.xlu1 %434 }
  0xb7   : > { %v386_v61 = vsel %vm384_vm10, %v383_v59, %v362_v60  ;;  %v466_v10 = vsel %vm381_vm9, %v464_v11, %v435_v9  ;;  %v2789_v60 = vld [vmem:[%s2865_s17 + $0x5c] ss:$0 sps:$4 sm:$0x11]  }
  0xb8   : > { %1704 = vrot.lane.b32.xlu0 %v3105_v13, %s2827_s23  ;;  %2651 = vmatprep.mubr.msk.bf16.mxu0 %vm972_vm11, %v386_v61  ;;  %v3305_v61 = vld [vmem:[%s2865_s17 + $0xb4] sm:$0xff]   ;;  %v2792_v9 = vld [vmem:[%s2865_s17 + $0xbc] ss:$0 sps:$4 sm:$0x11]  }
  0xb9   : > { %1779 = vrot.lane.b32.xlu1 %v1778_v8, %s2826_s22  ;;  %v857_v8 = vshll.u32 %v2789_v60, 16  ;;  %v1883_v50 = vshll.u32 %v3305_v61, 16  ;;  %v1881_v30 = vshrl.u32 %v3305_v61, 16  ;;  %v1888_v11 = vshll.u32 %v2792_v9, 16 }
  0xba   : > { %v1401_v42 = vpop.permute.xlu0 %1400  ;;  %v1466_v25 = vpop.permute.xlu1 %1465  ;;  %v2801_v60 = vld [vmem:[%s2865_s17 + $0x1f4] ss:$0 sps:$4 sm:$0x11]  }
  0xbb   : > { %v1417_v19 = vsel %vm384_vm10, %v1415_v12, %v1401_v42  ;;  %v1885_v46 = vrot.slane %v1883_v50, 1 }
  0xbc   : > { %680 = vrot.lane.b32.xlu0 %v3113_v16, %s2828_s24  ;;  %2671 = vmatprep.mubr.msk.bf16.mxu1 %vm972_vm11, %v1417_v19  ;;  %v1491_v16 = vsel %vm372_vm6, %v1489_v62, %v3164_v58  ;;  %v859_v19 = vrot.slane %v857_v8, 1  ;;  %v2790_v62 = vld [vmem:[%s2865_s17 + $0x240] sm:$0xff]  }
  0xbd   : > { %755 = vrot.lane.b32.xlu1 %v3231_v22, %s2827_s23  ;;  %v1493_v2 = vsel %vm375_vm7, %v1491_v16, %v3177_v29  ;;  %v1850_v51 = vshrl.u32 %v2790_v62, 16 }
  0xbe   : > { %v452_v28 = vpop.permute.xlu0 %451  ;;  %v1495_v58 = vsel %vm378_vm8, %v1493_v2, %v1459_v48  ;;  %v3264_v33 = vpop.permute.xlu1 %469  ;;  %v3293_v48 = vld [vmem:[%s2865_s17 + $0x54] sm:$0xff]   ;;  %v821_v2 = vshll.u32 %v2787_v14, 16 }
  0xbf   : > { %v468_v23 = vsel %vm384_vm10, %v466_v10, %v452_v28  ;;  %v1497_v44 = vsel %vm381_vm9, %v1495_v58, %v1466_v25  ;;  %v852_v39 = vshll.u32 %v3293_v48, 16  ;;  %v850_v31 = vshrl.u32 %v3293_v48, 16 }
  0xc0   : > { %1711 = vrot.lane.b32.xlu0 %v3126_v21, %s2828_s24  ;;  %2652 = vmatmul.mubr.msk.bf16.vlgmr.msra.gmra.mxu0 %vm972_vm11, %v468_v23  ;;  %v1886_v10 = vor.u32 %v1885_v46, %v1881_v30  ;;  %v1890_v28 = vrot.slane %v1888_v11, 1  ;;  %v2797_v23 = vld [vmem:[%s2865_s17 + $0x1e8] ss:$0 sps:$4 sm:$0x11]   ;;  %v823_v40 = vrot.slane %v821_v2, 1  ;;  %v908_v46 = vshll.u32 %v2801_v60, 16 }
  0xc1   : > { %1786 = vrot.lane.b32.xlu1 %v3255_v0, %s2827_s23  ;;  %v854_v4 = vrot.slane %v852_v39, 1  ;;  %v903_v39 = vshll.u32 %v2794_v41, 16 }
  0xc2   : > { %v1483_v29 = vpop.permute.xlu0 %1482  ;;  %v3277_v52 = vpop.permute.xlu1 %1500  ;;  %v3351_v58 = vsel %vm286_vm0, %v1886_v10, %v1890_v28  ;;  %v824_v53 = vor.u32 %v823_v40, %v819_v37  ;;  %v2811_v37 = vld [vmem:[%s2865_s17 + $0x18] sm:$0xff]  }
  0xc3   : > { %v1499_v21 = vsel %vm384_vm10, %v1497_v44, %v1483_v29  ;;  %v855_v20 = vor.u32 %v854_v4, %v850_v31  ;;  %v826_v44 = vshll.u32 %v2797_v23, 16  ;;  %v2799_v29 = vld [vmem:[%s2865_s17 + $0x248] ss:$0 sps:$4 sm:$0x11]   ;;  %v905_v30 = vrot.slane %v903_v39, 1  ;;  %v2800_v23 = vld [vmem:[%s2865_s17 + $0x318] sm:$0xff]  }
  0xc4   : > { %697 = vrot.lane.b32.xlu0 %v3139_v32, %s2829_s25  ;;  %2672 = vmatmul.mubr.msk.bf16.vlgmr.msra.gmra.mxu1 %vm972_vm11, %v1499_v21  ;;  %v1852_v21 = vshll.u32 %v2790_v62, 16  ;;  %v536_v40 = vsel %vm363_vm3, %v2811_v37, %v3264_v33  ;;  %v2812_v33 = vld [vmem:[%s2865_s17 + $0x78] sm:$0xff]  }
  0xc5   : > { %762 = vrot.lane.b32.xlu1 %v2781_v47, %s2828_s24  ;;  %v3339_v27 = vsel %vm286_vm0, %v855_v20, %v859_v19  ;;  %v2798_v19 = vld [vmem:[%s2865_s17 + $0x2b8] sm:$0xff]   ;;  %v901_v20 = vshrl.u32 %v2794_v41, 16 }
  0xc6   : > { %v3279_v54 = vpop.permute.xlu0 %471  ;;  %v3285_v32 = vpop.permute.xlu1 %551 }
  0xc8   : > { %1728 = vrot.lane.b32.xlu0 %v3151_v43, %s2829_s25  ;;  %v1809_v43 = vsel %vm286_vm0, %v1804_v57, %v1808_v56  ;;  %v1857_v57 = vshll.u32 %v2799_v29, 16  ;;  %v910_v29 = vrot.slane %v908_v46, 1  ;;  %v2803_v46 = vld [vmem:[%s2865_s17 + $0x60] sm:$0xff]  }
  0xc9   : > { %1793 = vrot.lane.b32.xlu1 %v2782_v55, %s2828_s24 }
  0xca   : > { %v3288_v15 = vpop.permute.xlu0 %1502  ;;  %v3295_v24 = vpop.permute.xlu1 %1582  ;;  %v1859_v9 = vrot.slane %v1857_v57, 1  ;;  %v1567_v57 = vsel %vm363_vm3, %v2812_v33, %v3277_v52 }
  0xcb   : > { %v1569_v60 = vsel %vm366_vm4, %v1567_v57, %v3288_v15  ;;  %v618_v15 = vsel %vm363_vm3, %v2977_v36, %v3285_v32 }
  0xcc   : > { %779 = vrot.lane.b32.xlu0 %v778_v18, %s2829_s25 }
  0xcd   : > { %797 = vrot.lane.b32.xlu1 %v2781_v47, %s2822_s18 }
  0xce   : > { %v3298_v59 = vpop.permute.xlu0 %478  ;;  %v3307_v63 = vpop.permute.xlu1 %553 }
  0xd0   : > { %1810 = vrot.lane.b32.xlu0 %v1809_v43, %s2829_s25 }
  0xd1   : > { %1828 = vrot.lane.b32.xlu1 %v2782_v55, %s2822_s18  ;;  %v828_v55 = vrot.slane %v826_v44, 1  ;;  %v906_v44 = vor.u32 %v905_v30, %v901_v20 }
  0xd2   : > { %v3309_v1 = vpop.permute.xlu0 %1509  ;;  %v3319_v12 = vpop.permute.xlu1 %1584 }
  0xd3   : > { %v829_v31 = vsel %vm286_vm0, %v824_v53, %v828_v55 }
  0xd4   : > { %799 = vrot.lane.b32.xlu0 %v778_v18, %s2824_s20  ;;  %v1854_v18 = vrot.slane %v1852_v21, 1 }
  0xd5   : > { %879 = vrot.lane.b32.xlu1 %v3313_v3, %s2822_s18 }
  0xd6   : > { %v3321_v42 = vpop.permute.xlu0 %485  ;;  %v3331_v25 = vpop.permute.xlu1 %560  ;;  %v1855_v4 = vor.u32 %v1854_v18, %v1850_v51 }
  0xd8   : > { %1830 = vrot.lane.b32.xlu0 %v1809_v43, %s2824_s20  ;;  %v2796_v43 = vld [vmem:[%s2865_s17 + $0x24c] sm:$0xff]   ;;  %v1860_v10 = vsel %vm286_vm0, %v1855_v4, %v1859_v9 }
  0xd9   : > { %1910 = vrot.lane.b32.xlu1 %v3326_v17, %s2822_s18  ;;  %v1934_v11 = vshll.u32 %v2796_v43, 16  ;;  %v1932_v2 = vshrl.u32 %v2796_v43, 16 }
  0xda   : > { %v3333_v26 = vpop.permute.xlu0 %1516  ;;  %v3342_v16 = vpop.permute.xlu1 %1591 }
  0xdb   : > { %v1936_v21 = vrot.slane %v1934_v11, 1 }
  0xdc   : > { %806 = vrot.lane.b32.xlu0 %v2787_v14, %s2823_s19  ;;  %v2802_v14 = vld [vmem:[%s2865_s17 + $0x254] ss:$0 sps:$4 sm:$0x11]  }
  0xdd   : > { %881 = vrot.lane.b32.xlu1 %v3339_v27, %s2824_s20 }
  0xde   : > { %v3345_v35 = vpop.permute.xlu0 %502  ;;  %v3354_v38 = vpop.permute.xlu1 %567 }
  0xe0   : > { %1837 = vrot.lane.b32.xlu0 %v2790_v62, %s2823_s19 }
  0xe1   : > { %1912 = vrot.lane.b32.xlu1 %v3351_v58, %s2824_s20 }
  0xe2   : > { %v3357_v47 = vpop.permute.xlu0 %1533  ;;  %v3364_v7 = vpop.permute.xlu1 %1598 }
  0xe4   : > { %813 = vrot.lane.b32.xlu0 %v2793_v34, %s2825_s21  ;;  %v1939_v34 = vshll.u32 %v2802_v14, 16 }
  0xe5   : > { %888 = vrot.lane.b32.xlu1 %v2794_v41, %s2823_s19  ;;  %v538_v41 = vsel %vm366_vm4, %v536_v40, %v3279_v54  ;;  %v911_v54 = vsel %vm286_vm0, %v906_v44, %v910_v29 }
  0xe6   : > { %v510_v56 = vpop.permute.xlu0 %509  ;;  %v3370_v8 = vpop.permute.xlu1 %584  ;;  %v540_v51 = vsel %vm369_vm5, %v538_v41, %v3298_v59  ;;  %v1941_v18 = vrot.slane %v1939_v34, 1  ;;  %v1937_v59 = vor.u32 %v1936_v21, %v1932_v2  ;;  %v2804_v34 = vld [vmem:[%s2865_s17 + $0xc0] sm:$0xff]   ;;  %v932_v21 = vshrl.u32 %v2803_v46, 16 }
  0xe7   : > { %v542_v55 = vsel %vm372_vm6, %v540_v51, %v3321_v42  ;;  %v1965_v40 = vshll.u32 %v2804_v34, 16 }
  0xe8   : > { %1844 = vrot.lane.b32.xlu0 %v2795_v5, %s2825_s21 }
  0xe9   : > { %1919 = vrot.lane.b32.xlu1 %v2796_v43, %s2823_s19  ;;  %v544_v43 = vsel %vm375_vm7, %v542_v55, %v3345_v35  ;;  %v1967_v55 = vrot.slane %v1965_v40, 1 }
  0xea   : > { %v1541_v50 = vpop.permute.xlu0 %1540  ;;  %v3377_v62 = vpop.permute.xlu1 %1615  ;;  %v546_v42 = vsel %vm378_vm8, %v544_v43, %v510_v56 }
  0xec   : > { %830 = vrot.lane.b32.xlu0 %v829_v31, %s2826_s22  ;;  %v1571_v31 = vsel %vm369_vm5, %v1569_v60, %v3309_v1  ;;  %v1942_v1 = vsel %vm286_vm0, %v1937_v59, %v1941_v18  ;;  %v2806_v59 = vld [vmem:[%s2865_s17 + $0x18c] sm:$0xff]  }
  0xed   : > { %895 = vrot.lane.b32.xlu1 %v2798_v19, %s2825_s21  ;;  %v1573_v35 = vsel %vm372_vm6, %v1571_v31, %v3333_v26  ;;  %v620_v26 = vsel %vm366_vm4, %v618_v15, %v3307_v63  ;;  %v2813_v63 = vld [vmem:[%s2865_s17 + $0x84] sm:$0xff]  }
  0xee   : > { %v517_v28 = vpop.permute.xlu0 %516  ;;  %v592_v5 = vpop.permute.xlu1 %591  ;;  %v1575_v56 = vsel %vm375_vm7, %v1573_v35, %v3357_v47  ;;  %v622_v36 = vsel %vm369_vm5, %v620_v26, %v3331_v25 }
  0xef   : > { %v548_v52 = vsel %vm381_vm9, %v546_v42, %v517_v28  ;;  %v1577_v19 = vsel %vm378_vm8, %v1575_v56, %v1541_v50  ;;  %v624_v20 = vsel %vm372_vm6, %v622_v36, %v3354_v38  ;;  %v1649_v50 = vsel %vm363_vm3, %v2813_v63, %v3295_v24  ;;  %v2807_v28 = vld [vmem:[%s2865_s17 + $0x68] ss:$0 sps:$4 sm:$0x11]  }
  0xf0   : > { %1861 = vrot.lane.b32.xlu0 %v1860_v10, %s2826_s22  ;;  %v626_v11 = vsel %vm375_vm7, %v624_v20, %v3370_v8  ;;  %v1651_v25 = vsel %vm366_vm4, %v1649_v50, %v3319_v12  ;;  %v939_v41 = vshll.u32 %v2807_v28, 16 }
  0xf1   : > { %1926 = vrot.lane.b32.xlu1 %v2800_v23, %s2825_s21  ;;  %v628_v38 = vsel %vm378_vm8, %v626_v11, %v592_v5  ;;  %v934_v23 = vshll.u32 %v2803_v46, 16  ;;  %v1653_v24 = vsel %vm369_vm5, %v1651_v25, %v3342_v16  ;;  %v2808_v16 = vld [vmem:[%s2865_s17 + $0xc8] ss:$0 sps:$4 sm:$0x11]  }
  0xf2   : > { %v1548_v53 = vpop.permute.xlu0 %1547  ;;  %v1623_v39 = vpop.permute.xlu1 %1622  ;;  %v1970_v18 = vshll.u32 %v2808_v16, 16  ;;  %v941_v43 = vrot.slane %v939_v41, 1 }
  0xf3   : > { %v1579_v32 = vsel %vm381_vm9, %v1577_v19, %v1548_v53  ;;  %v2805_v53 = vld [vmem:[%s2865_s17 + $0x12c] sm:$0xff]  }
  0xf4   : > { %837 = vrot.lane.b32.xlu0 %v3293_v48, %s2827_s23  ;;  %v1972_v42 = vrot.slane %v1970_v18, 1 }
  0xf5   : > { %912 = vrot.lane.b32.xlu1 %v911_v54, %s2826_s22 }
  0xf6   : > { %v534_v4 = vpop.permute.xlu0 %533  ;;  %v599_v14 = vpop.permute.xlu1 %598 }
  0xf7   : > { %v550_v9 = vsel %vm384_vm10, %v548_v52, %v534_v4  ;;  %v630_v2 = vsel %vm381_vm9, %v628_v38, %v599_v14 }
  0xf8   : > { %1868 = vrot.lane.b32.xlu0 %v3305_v61, %s2827_s23  ;;  %2655 = vmatprep.mubr.msk.bf16.mxu0 %vm972_vm11, %v550_v9 }
  0xf9   : > { %1943 = vrot.lane.b32.xlu1 %v1942_v1, %s2826_s22 }
  0xfa   : > { %v1565_v47 = vpop.permute.xlu0 %1564  ;;  %v1630_v10 = vpop.permute.xlu1 %1629 }
  0xfb   : > { %v1581_v30 = vsel %vm384_vm10, %v1579_v32, %v1565_v47 }
  0xfc   : > { %844 = vrot.lane.b32.xlu0 %v3313_v3, %s2828_s24  ;;  %2675 = vmatprep.mubr.msk.bf16.mxu1 %vm972_vm11, %v1581_v30  ;;  %v1655_v3 = vsel %vm372_vm6, %v1653_v24, %v3364_v7  ;;  %v936_v7 = vrot.slane %v934_v23, 1 }
  0xfd   : > { %919 = vrot.lane.b32.xlu1 %v2803_v46, %s2827_s23  ;;  %v1657_v37 = vsel %vm375_vm7, %v1655_v3, %v3377_v62 }
  0xfe   : > { %v616_v8 = vpop.permute.xlu0 %615  ;;  %v1659_v44 = vsel %vm378_vm8, %v1657_v37, %v1623_v39  ;;  %v634_v29 = vpop.permute.xlu1 %633  ;;  %v937_v57 = vor.u32 %v936_v7, %v932_v21 }
  0xff   : > { %v632_v12 = vsel %vm384_vm10, %v630_v2, %v616_v8  ;;  %v1661_v5 = vsel %vm381_vm9, %v1659_v44, %v1630_v10  ;;  %v700_v11 = vsel %vm363_vm3, %v3053_v45, %v634_v29 }
 0x100   : > { %1875 = vrot.lane.b32.xlu0 %v3326_v17, %s2828_s24  ;;  %2656 = vmatmul.mubr.msk.bf16.gmra.mxu0 %vm972_vm11, %v632_v12  ;;  %v1963_v17 = vshrl.u32 %v2804_v34, 16 }
 0x101   : > { %1950 = vrot.lane.b32.xlu1 %v2804_v34, %s2827_s23 }
 0x102   : > { %v1647_v51 = vpop.permute.xlu0 %1646  ;;  %v1665_v33 = vpop.permute.xlu1 %1664  ;;  %v1968_v60 = vor.u32 %v1967_v55, %v1963_v17 }
 0x103   : > { %v1663_v62 = vsel %vm384_vm10, %v1661_v5, %v1647_v51  ;;  %v1731_v24 = vsel %vm363_vm3, %v3062_v49, %v1665_v33 }
 0x104   : > { %861 = vrot.lane.b32.xlu0 %v3339_v27, %s2829_s25  ;;  %2676 = vmatmul.mubr.msk.bf16.gmra.mxu1 %vm972_vm11, %v1663_v62  ;;  %v942_v27 = vsel %vm286_vm0, %v937_v57, %v941_v43  ;;  %v1973_v52 = vsel %vm286_vm0, %v1968_v60, %v1972_v42 }
 0x105   : > { %926 = vrot.lane.b32.xlu1 %v2805_v53, %s2828_s24 }
 0x106   : > { %v636_v54 = vpop.permute.xlu0 %635  ;;  %v716_v39 = vpop.permute.xlu1 %715 }
 0x107   : > { %v702_v25 = vsel %vm366_vm4, %v700_v11, %v636_v54  ;;  %v782_v44 = vsel %vm363_vm3, %v3092_v6, %v716_v39 }
 0x108   : > { %1892 = vrot.lane.b32.xlu0 %v3351_v58, %s2829_s25 }
 0x109   : > { %1957 = vrot.lane.b32.xlu1 %v2806_v59, %s2828_s24 }
 0x10a   : > { %v1667_v31 = vpop.permute.xlu0 %1666  ;;  %v1747_v4 = vpop.permute.xlu1 %1746 }
 0x10b   : > { %v1733_v8 = vsel %vm366_vm4, %v1731_v24, %v1667_v31  ;;  %v1813_v6 = vsel %vm363_vm3, %v3105_v13, %v1747_v4 }
 0x10c   : > { %943 = vrot.lane.b32.xlu0 %v942_v27, %s2829_s25 }
 0x10d   : > { %1974 = vrot.lane.b32.xlu1 %v1973_v52, %s2829_s25 }
 0x10e   : > { %v643_v35 = vpop.permute.xlu0 %642  ;;  %v718_v9 = vpop.permute.xlu1 %717 }
 0x10f   : > { %v704_v10 = vsel %vm369_vm5, %v702_v25, %v643_v35  ;;  %v784_v29 = vsel %vm366_vm4, %v782_v44, %v718_v9 }
 0x112   : > { %v1674_v15 = vpop.permute.xlu0 %1673  ;;  %v1749_v56 = vpop.permute.xlu1 %1748 }
 0x113   : > { %v1735_v45 = vsel %vm369_vm5, %v1733_v8, %v1674_v15  ;;  %v1815_v55 = vsel %vm366_vm4, %v1813_v6, %v1749_v56 }
 0x116   : > { %v650_v58 = vpop.permute.xlu0 %649  ;;  %v725_v1 = vpop.permute.xlu1 %724 }
 0x117   : > { %v706_v23 = vsel %vm372_vm6, %v704_v10, %v650_v58  ;;  %v786_v41 = vsel %vm369_vm5, %v784_v29, %v725_v1 }
 0x11a   : > { %v1681_v26 = vpop.permute.xlu0 %1680  ;;  %v1756_v19 = vpop.permute.xlu1 %1755 }
 0x11b   : > { %v1737_v16 = vsel %vm372_vm6, %v1735_v45, %v1681_v26  ;;  %v1817_v57 = vsel %vm369_vm5, %v1815_v55, %v1756_v19 }
 0x11e   : > { %v667_v14 = vpop.permute.xlu0 %666  ;;  %v732_v36 = vpop.permute.xlu1 %731 }
 0x11f   : > { %v708_v2 = vsel %vm375_vm7, %v706_v23, %v667_v14  ;;  %v788_v62 = vsel %vm372_vm6, %v786_v41, %v732_v36 }
 0x122   : > { %v1698_v32 = vpop.permute.xlu0 %1697  ;;  %v1763_v47 = vpop.permute.xlu1 %1762 }
 0x123   : > { %v1739_v49 = vsel %vm375_vm7, %v1737_v16, %v1698_v32  ;;  %v1819_v59 = vsel %vm372_vm6, %v1817_v57, %v1763_v47 }
 0x126   : > { %v674_v20 = vpop.permute.xlu0 %673  ;;  %v749_v30 = vpop.permute.xlu1 %748 }
 0x127   : > { %v710_v34 = vsel %vm378_vm8, %v708_v2, %v674_v20  ;;  %v790_v17 = vsel %vm375_vm7, %v788_v62, %v749_v30 }
 0x12a   : > { %v1705_v46 = vpop.permute.xlu0 %1704 }
 0x12b   : > { %v1780_v63 = vpop.permute.xlu1 %1779  ;;  %v1741_v21 = vsel %vm378_vm8, %v1739_v49, %v1705_v46 }
 0x12c   : > { %v1821_v13 = vsel %vm375_vm7, %v1819_v59, %v1780_v63 }
 0x12e   : > { %v681_v50 = vpop.permute.xlu0 %680 }
 0x12f   : > { %v756_v38 = vpop.permute.xlu1 %755  ;;  %v712_v12 = vsel %vm381_vm9, %v710_v34, %v681_v50 }
 0x130   : > { %v792_v18 = vsel %vm378_vm8, %v790_v17, %v756_v38 }
 0x132   : > { %v1712_v28 = vpop.permute.xlu0 %1711 }
 0x133   : > { %v1787_v3 = vpop.permute.xlu1 %1786  ;;  %v1743_v5 = vsel %vm381_vm9, %v1741_v21, %v1712_v28 }
 0x134   : > { %v1823_v42 = vsel %vm378_vm8, %v1821_v13, %v1787_v3 }
 0x136   : > { %v698_v37 = vpop.permute.xlu0 %697 }
 0x137   : > { %v714_v40 = vsel %vm384_vm10, %v712_v12, %v698_v37  ;;  %v763_v7 = vpop.permute.xlu1 %762 }
 0x138   : > { %2659 = vmatprep.mubr.msk.bf16.mxu0 %vm972_vm11, %v714_v40  ;;  %v794_v43 = vsel %vm381_vm9, %v792_v18, %v763_v7 }
 0x13a   : > { %v1729_v51 = vpop.permute.xlu0 %1728 }
 0x13b   : > { %v1745_v53 = vsel %vm384_vm10, %v1743_v5, %v1729_v51  ;;  %v1794_v33 = vpop.permute.xlu1 %1793 }
 0x13c   : > { %2679 = vmatprep.mubr.msk.bf16.mxu1 %vm972_vm11, %v1745_v53  ;;  %v1825_v27 = vsel %vm381_vm9, %v1823_v42, %v1794_v33 }
 0x13e   : > { %v780_v54 = vpop.permute.xlu0 %779 }
 0x13f   : > { %v796_v60 = vsel %vm384_vm10, %v794_v43, %v780_v54  ;;  %v798_v39 = vpop.permute.xlu1 %797 }
 0x140   : > { %2660 = vmatmul.mubr.msk.bf16.gmra.mxu0 %vm972_vm11, %v796_v60  ;;  %v864_v28 = vsel %vm363_vm3, %v3231_v22, %v798_v39  ;;  %v3550_v60 = vld [vmem:[%s3666_s2] ss:$0 sm:$0xff] }
 0x142   : > { %v1811_v31 = vpop.permute.xlu0 %1810 }
 0x143   : > { %v1827_v52 = vsel %vm384_vm10, %v1825_v27, %v1811_v31  ;;  %v1829_v4 = vpop.permute.xlu1 %1828 }
 0x144   : > { %2680 = vmatmul.mubr.msk.bf16.gmra.mxu1 %vm972_vm11, %v1827_v52  ;;  %v1895_v3 = vsel %vm363_vm3, %v3255_v0, %v1829_v4 }
 0x146   : > { %v800_v35 = vpop.permute.xlu0 %799 }
 0x147   : > { %v880_v9 = vpop.permute.xlu1 %879  ;;  %v866_v23 = vsel %vm366_vm4, %v864_v28, %v800_v35 }
 0x148   : > { %v946_v21 = vsel %vm363_vm3, %v3293_v48, %v880_v9 }
 0x14a   : > { %v1831_v15 = vpop.permute.xlu0 %1830 }
 0x14b   : > { %v1911_v56 = vpop.permute.xlu1 %1910  ;;  %v1897_v12 = vsel %vm366_vm4, %v1895_v3, %v1831_v15 }
 0x14c   : > { %v1977_v6 = vsel %vm363_vm3, %v3305_v61, %v1911_v56 }
 0x14e   : > { %v807_v58 = vpop.permute.xlu0 %806 }
 0x14f   : > { %v882_v1 = vpop.permute.xlu1 %881  ;;  %v868_v2 = vsel %vm369_vm5, %v866_v23, %v807_v58 }
 0x150   : > { %v948_v7 = vsel %vm366_vm4, %v946_v21, %v882_v1 }
 0x152   : > { %v1838_v26 = vpop.permute.xlu0 %1837 }
 0x153   : > { %v1913_v19 = vpop.permute.xlu1 %1912  ;;  %v1899_v22 = vsel %vm369_vm5, %v1897_v12, %v1838_v26 }
 0x154   : > { %v1979_v55 = vsel %vm366_vm4, %v1977_v6, %v1913_v19 }
 0x156   : > { %v814_v14 = vpop.permute.xlu0 %813 }
 0x157   : > { %v889_v36 = vpop.permute.xlu1 %888  ;;  %v870_v34 = vsel %vm372_vm6, %v868_v2, %v814_v14 }
 0x158   : > { %v950_v51 = vsel %vm369_vm5, %v948_v7, %v889_v36 }
 0x15a   : > { %v1845_v32 = vpop.permute.xlu0 %1844 }
 0x15b   : > { %v1920_v47 = vpop.permute.xlu1 %1919  ;;  %v1901_v49 = vsel %vm372_vm6, %v1899_v22, %v1845_v32 }
 0x15c   : > { %v1981_v33 = vsel %vm369_vm5, %v1979_v55, %v1920_v47 }
 0x15e   : > { %v831_v20 = vpop.permute.xlu0 %830 }
 0x15f   : > { %v896_v30 = vpop.permute.xlu1 %895  ;;  %v872_v45 = vsel %vm375_vm7, %v870_v34, %v831_v20 }
 0x160   : > { %v952_v17 = vsel %vm372_vm6, %v950_v51, %v896_v30 }
 0x162   : > { %v1862_v46 = vpop.permute.xlu0 %1861 }
 0x163   : > { %v1927_v63 = vpop.permute.xlu1 %1926  ;;  %v1903_v0 = vsel %vm375_vm7, %v1901_v49, %v1862_v46 }
 0x164   : > { %v1983_v54 = vsel %vm372_vm6, %v1981_v33, %v1927_v63 }
 0x166   : > { %v838_v50 = vpop.permute.xlu0 %837 }
 0x167   : > { %v913_v11 = vpop.permute.xlu1 %912  ;;  %v874_v37 = vsel %vm378_vm8, %v872_v45, %v838_v50 }
 0x168   : > { %v954_v18 = vsel %vm375_vm7, %v952_v17, %v913_v11 }
 0x16a   : > { %v1869_v25 = vpop.permute.xlu0 %1868 }
 0x16b   : > { %v1944_v38 = vpop.permute.xlu1 %1943  ;;  %v1905_v41 = vsel %vm378_vm8, %v1903_v0, %v1869_v25 }
 0x16c   : > { %v1985_v13 = vsel %vm375_vm7, %v1983_v54, %v1944_v38 }
 0x16e   : > { %v845_v10 = vpop.permute.xlu0 %844 }
 0x16f   : > { %v920_v24 = vpop.permute.xlu1 %919  ;;  %v876_v40 = vsel %vm381_vm9, %v874_v37, %v845_v10 }
 0x170   : > { %v956_v57 = vsel %vm378_vm8, %v954_v18, %v920_v24 }
 0x172   : > { %v1876_v8 = vpop.permute.xlu0 %1875 }
 0x173   : > { %v1951_v16 = vpop.permute.xlu1 %1950  ;;  %v1907_v62 = vsel %vm381_vm9, %v1905_v41, %v1876_v8 }
 0x174   : > { %v1987_v39 = vsel %vm378_vm8, %v1985_v13, %v1951_v16 }
 0x176   : > { %v862_v44 = vpop.permute.xlu0 %861 }
 0x177   : > { %v878_v29 = vsel %vm384_vm10, %v876_v40, %v862_v44  ;;  %v927_v5 = vpop.permute.xlu1 %926 }
 0x178   : > { %2663 = vmatprep.mubr.msk.bf16.mxu0 %vm972_vm11, %v878_v29  ;;  %v958_v61 = vsel %vm381_vm9, %v956_v57, %v927_v5 }
 0x17a   : > { %v1893_v53 = vpop.permute.xlu0 %1892 }
 0x17b   : > { %v1909_v48 = vsel %vm384_vm10, %v1907_v62, %v1893_v53  ;;  %v1958_v43 = vpop.permute.xlu1 %1957 }
 0x17c   : > { %2683 = vmatprep.mubr.msk.bf16.mxu1 %vm972_vm11, %v1909_v48  ;;  %v1989_v31 = vsel %vm381_vm9, %v1987_v39, %v1958_v43 }
 0x17e   : > { %v944_v59 = vpop.permute.xlu0 %943 }
 0x17f   : > { %v960_v42 = vsel %vm384_vm10, %v958_v61, %v944_v59  ;;  %v1975_v52 = vpop.permute.xlu1 %1974 }
 0x180   : > { %v2653_v27 = vpop.f32.mrf.mxu0  ;;  %2664 = vmatmul.mubr.msk.bf16.gmra.mxu0 %vm972_vm11, %v960_v42  ;;  %v1991_v35 = vsel %vm384_vm10, %v1989_v31, %v1975_v52 }
 0x181   : > { %v1039_v4 = vadd.f32 %v2653_v27, %v3550_v60  ;;  %2684 = vmatmul.mubr.msk.bf16.gmra.mxu1 %vm972_vm11, %v1991_v35 }
 0x182   : > { %v1030_v9 = vpop.f32.mrf.mxu0 }
 0x183   : > { %vm1095_vm12 = vcmp.ge.f32.partialorder %v1039_v4, 0.0  ;;  %v1111_v15 = vmul.f32 0.1, %v1039_v4  ;;  %v1031_v56 = vadd.f32 %v3550_v60, %v1030_v9 }
 0x184   : > { %v2654_v58 = vpop.f32.mrf.mxu0  ;;  %v2673_v1 = vpop.f32.mrf.mxu1 }
 0x185   : > { %v1127_v26 = vsel %vm1095_vm12, %v1039_v4, %v1111_v15  ;;  %vm1093_vm14 = vcmp.ge.f32.partialorder %v1031_v56, 0.0  ;;  %v1109_v19 = vmul.f32 0.1, %v1031_v56  ;;  %v1042_v14 = vadd.f32 %v2654_v58, %v3550_v60 }
 0x186   : > { %v2597_v36 = vpack.c.bf16 %v1127_v26, %v1127_v26  ;;  %v2051_v32 = vadd.f32 %v2673_v1, %v3550_v60  ;;  %v1033_v47 = vpop.f32.mrf.mxu0  ;;  %v2042_v20 = vpop.f32.mrf.mxu1 }
 0x187   : > { %v1125_v30 = vsel %vm1093_vm14, %v1031_v56, %v1109_v19  ;;  %vm1096_vm15 = vcmp.ge.f32.partialorder %v1042_v14, 0.0  ;;  %v1112_v46 = vmul.f32 0.1, %v1042_v14  ;;  %v1034_v63 = vadd.f32 %v3550_v60, %v1033_v47 }
 0x188   : > { %1208 = vst.msk [vmem:[%s3565_s8 + $0x8] sm:$0xf] %vm1205_vm13, %v2597_v36  ;;  %v2595_v50 = vpack.c.bf16 %v1125_v30, %v1125_v30  ;;  %vm2107_vm0 = vcmp.ge.f32.partialorder %v2051_v32, 0.0  ;;  %v2123_v11 = vmul.f32 0.1, %v2051_v32  ;;  %v2043_v25 = vadd.f32 %v3550_v60, %v2042_v20  ;;  %v2674_v38 = vpop.f32.mrf.mxu1 }
 0x189   : > { %v1128_v10 = vsel %vm1096_vm15, %v1042_v14, %v1112_v46  ;;  %vm1094_vm1 = vcmp.ge.f32.partialorder %v1034_v63, 0.0  ;;  %v1110_v28 = vmul.f32 0.1, %v1034_v63  ;;  %v2054_v23 = vadd.f32 %v2674_v38, %v3550_v60 }
 0x18a   : > { %1206 = vst.msk [vmem:[%s3565_s8] sm:$0xf] %vm1205_vm13, %v2595_v50  ;;  %v2598_v24 = vpack.c.bf16 %v1128_v10, %v1128_v10  ;;  %v2139_v2 = vsel %vm2107_vm0, %v2051_v32, %v2123_v11  ;;  %vm2105_vm2 = vcmp.ge.f32.partialorder %v2043_v25, 0.0  ;;  %v2121_v8 = vmul.f32 0.1, %v2043_v25  ;;  %v2045_v34 = vpop.f32.mrf.mxu1 }
 0x18b   : > { %v2613_v3 = vpack.c.bf16 %v2139_v2, %v2139_v2  ;;  %v1126_v45 = vsel %vm1094_vm1, %v1034_v63, %v1110_v28  ;;  %vm2108_vm3 = vcmp.ge.f32.partialorder %v2054_v23, 0.0  ;;  %v2124_v12 = vmul.f32 0.1, %v2054_v23 }
 0x18c   : > { %1209 = vst.msk [vmem:[%s3565_s8 + $0xc] sm:$0xf] %vm1205_vm13, %v2598_v24  ;;  %v2596_v37 = vpack.c.bf16 %v1126_v45, %v1126_v45  ;;  %v2137_v16 = vsel %vm2105_vm2, %v2043_v25, %v2121_v8  ;;  %v2046_v22 = vadd.f32 %v3550_v60, %v2045_v34 }
 0x18d   : > { %2219 = vst.msk [vmem:[%s3565_s8 + $0x48] sm:$0xf] %vm1205_vm13, %v2613_v3  ;;  %v2611_v40 = vpack.c.bf16 %v2137_v16, %v2137_v16  ;;  %v2140_v44 = vsel %vm2108_vm3, %v2054_v23, %v2124_v12 }
 0x18e   : > { %1207 = vst.msk [vmem:[%s3565_s8 + $0x4] sm:$0xf] %vm1205_vm13, %v2596_v37  ;;  %v2614_v49 = vpack.c.bf16 %v2140_v44, %v2140_v44  ;;  %vm2106_vm4 = vcmp.ge.f32.partialorder %v2046_v22, 0.0  ;;  %v2122_v29 = vmul.f32 0.1, %v2046_v22 }
 0x18f   : > { %2217 = vst.msk [vmem:[%s3565_s8 + $0x40] sm:$0xf] %vm1205_vm13, %v2611_v40 }
 0x190   : > { %2220 = vst.msk [vmem:[%s3565_s8 + $0x4c] sm:$0xf] %vm1205_vm13, %v2614_v49  ;;  %v2138_v21 = vsel %vm2106_vm4, %v2046_v22, %v2122_v29 }
 0x191   : > { %v2612_v0 = vpack.c.bf16 %v2138_v21, %v2138_v21 }
 0x193   : > { %2218 = vst.msk [vmem:[%s3565_s8 + $0x44] sm:$0xf] %vm1205_vm13, %v2612_v0 }
 0x1c0   : > { %v2657_v7 = vpop.f32.mrf.mxu0 }
 0x1c1   : > { %v1055_v41 = vadd.f32 %v2657_v7, %v3550_v60 }
 0x1c2   : > { %v1046_v5 = vpop.f32.mrf.mxu0 }
 0x1c3   : > { %vm1099_vm5 = vcmp.ge.f32.partialorder %v1055_v41, 0.0  ;;  %v1115_v51 = vmul.f32 0.1, %v1055_v41  ;;  %v1047_v62 = vadd.f32 %v3550_v60, %v1046_v5 }
 0x1c4   : > { %v2658_v53 = vpop.f32.mrf.mxu0  ;;  %v2677_v6 = vpop.f32.mrf.mxu1 }
 0x1c5   : > { %v1131_v17 = vsel %vm1099_vm5, %v1055_v41, %v1115_v51  ;;  %vm1097_vm6 = vcmp.ge.f32.partialorder %v1047_v62, 0.0  ;;  %v1113_v48 = vmul.f32 0.1, %v1047_v62  ;;  %v1058_v55 = vadd.f32 %v2658_v53, %v3550_v60 }
 0x1c6   : > { %v2601_v18 = vpack.c.bf16 %v1131_v17, %v1131_v17  ;;  %v2067_v33 = vadd.f32 %v2677_v6, %v3550_v60  ;;  %v1049_v57 = vpop.f32.mrf.mxu0  ;;  %v2058_v43 = vpop.f32.mrf.mxu1 }
 0x1c7   : > { %v1129_v54 = vsel %vm1097_vm6, %v1047_v62, %v1113_v48  ;;  %vm1100_vm7 = vcmp.ge.f32.partialorder %v1058_v55, 0.0  ;;  %v1116_v61 = vmul.f32 0.1, %v1058_v55  ;;  %v1050_v59 = vadd.f32 %v3550_v60, %v1049_v57 }
 0x1c8   : > { %1212 = vst.msk [vmem:[%s3565_s8 + $0x18] sm:$0xf] %vm1205_vm13, %v2601_v18  ;;  %v2599_v13 = vpack.c.bf16 %v1129_v54, %v1129_v54  ;;  %vm2111_vm8 = vcmp.ge.f32.partialorder %v2067_v33, 0.0  ;;  %v2127_v42 = vmul.f32 0.1, %v2067_v33  ;;  %v2059_v39 = vadd.f32 %v3550_v60, %v2058_v43  ;;  %v2678_v27 = vpop.f32.mrf.mxu1 }
 0x1c9   : > { %v1132_v31 = vsel %vm1100_vm7, %v1058_v55, %v1116_v61  ;;  %vm1098_vm9 = vcmp.ge.f32.partialorder %v1050_v59, 0.0  ;;  %v1114_v52 = vmul.f32 0.1, %v1050_v59  ;;  %v2070_v4 = vadd.f32 %v2678_v27, %v3550_v60 }
 0x1ca   : > { %1210 = vst.msk [vmem:[%s3565_s8 + $0x10] sm:$0xf] %vm1205_vm13, %v2599_v13  ;;  %v2602_v35 = vpack.c.bf16 %v1132_v31, %v1132_v31  ;;  %v2143_v9 = vsel %vm2111_vm8, %v2067_v33, %v2127_v42  ;;  %vm2109_vm10 = vcmp.ge.f32.partialorder %v2059_v39, 0.0  ;;  %v2125_v15 = vmul.f32 0.1, %v2059_v39  ;;  %v2061_v56 = vpop.f32.mrf.mxu1 }
 0x1cb   : > { %v2617_v58 = vpack.c.bf16 %v2143_v9, %v2143_v9  ;;  %v1130_v1 = vsel %vm1098_vm9, %v1050_v59, %v1114_v52  ;;  %vm2112_vm11 = vcmp.ge.f32.partialorder %v2070_v4, 0.0  ;;  %v2128_v26 = vmul.f32 0.1, %v2070_v4 }
 0x1cc   : > { %1213 = vst.msk [vmem:[%s3565_s8 + $0x1c] sm:$0xf] %vm1205_vm13, %v2602_v35  ;;  %v2600_v19 = vpack.c.bf16 %v1130_v1, %v1130_v1  ;;  %v2141_v14 = vsel %vm2109_vm10, %v2059_v39, %v2125_v15  ;;  %v2062_v36 = vadd.f32 %v3550_v60, %v2061_v56 }
 0x1cd   : > { %2223 = vst.msk [vmem:[%s3565_s8 + $0x58] sm:$0xf] %vm1205_vm13, %v2617_v58  ;;  %v2615_v32 = vpack.c.bf16 %v2141_v14, %v2141_v14  ;;  %v2144_v47 = vsel %vm2112_vm11, %v2070_v4, %v2128_v26 }
 0x1ce   : > { %1211 = vst.msk [vmem:[%s3565_s8 + $0x14] sm:$0xf] %vm1205_vm13, %v2600_v19  ;;  %v2618_v20 = vpack.c.bf16 %v2144_v47, %v2144_v47  ;;  %vm2110_vm12 = vcmp.ge.f32.partialorder %v2062_v36, 0.0  ;;  %v2126_v30 = vmul.f32 0.1, %v2062_v36 }
 0x1cf   : > { %2221 = vst.msk [vmem:[%s3565_s8 + $0x50] sm:$0xf] %vm1205_vm13, %v2615_v32 }
 0x1d0   : > { %2224 = vst.msk [vmem:[%s3565_s8 + $0x5c] sm:$0xf] %vm1205_vm13, %v2618_v20  ;;  %v2142_v46 = vsel %vm2110_vm12, %v2062_v36, %v2126_v30 }
 0x1d1   : > { %v2616_v63 = vpack.c.bf16 %v2142_v46, %v2142_v46 }
 0x1d3   : > { %2222 = vst.msk [vmem:[%s3565_s8 + $0x54] sm:$0xf] %vm1205_vm13, %v2616_v63 }
 0x200   : > { %v2661_v50 = vpop.f32.mrf.mxu0 }
 0x201   : > { %v1071_v11 = vadd.f32 %v2661_v50, %v3550_v60 }
 0x202   : > { %v1062_v25 = vpop.f32.mrf.mxu0 }
 0x203   : > { %vm1103_vm14 = vcmp.ge.f32.partialorder %v1071_v11, 0.0  ;;  %v1119_v38 = vmul.f32 0.1, %v1071_v11  ;;  %v1063_v10 = vadd.f32 %v3550_v60, %v1062_v25 }
 0x204   : > { %v2662_v28 = vpop.f32.mrf.mxu0  ;;  %v2681_v23 = vpop.f32.mrf.mxu1 }
 0x205   : > { %v1135_v24 = vsel %vm1103_vm14, %v1071_v11, %v1119_v38  ;;  %vm1101_vm15 = vcmp.ge.f32.partialorder %v1063_v10, 0.0  ;;  %v1117_v2 = vmul.f32 0.1, %v1063_v10  ;;  %v1074_v8 = vadd.f32 %v2662_v28, %v3550_v60 }
 0x206   : > { %v2605_v34 = vpack.c.bf16 %v1135_v24, %v1135_v24  ;;  %v2083_v3 = vadd.f32 %v2681_v23, %v3550_v60  ;;  %v1065_v45 = vpop.f32.mrf.mxu0  ;;  %v2074_v12 = vpop.f32.mrf.mxu1 }
 0x207   : > { %v1133_v37 = vsel %vm1101_vm15, %v1063_v10, %v1117_v2  ;;  %vm1104_vm0 = vcmp.ge.f32.partialorder %v1074_v8, 0.0  ;;  %v1120_v16 = vmul.f32 0.1, %v1074_v8  ;;  %v1066_v22 = vadd.f32 %v3550_v60, %v1065_v45 }
 0x208   : > { %1216 = vst.msk [vmem:[%s3565_s8 + $0x28] sm:$0xf] %vm1205_vm13, %v2605_v34  ;;  %v2603_v40 = vpack.c.bf16 %v1133_v37, %v1133_v37  ;;  %vm2115_vm1 = vcmp.ge.f32.partialorder %v2083_v3, 0.0  ;;  %v2131_v44 = vmul.f32 0.1, %v2083_v3  ;;  %v2075_v49 = vadd.f32 %v3550_v60, %v2074_v12  ;;  %v2682_v29 = vpop.f32.mrf.mxu1 }
 0x209   : > { %v1136_v21 = vsel %vm1104_vm0, %v1074_v8, %v1120_v16  ;;  %vm1102_vm2 = vcmp.ge.f32.partialorder %v1066_v22, 0.0  ;;  %v1118_v0 = vmul.f32 0.1, %v1066_v22  ;;  %v2086_v7 = vadd.f32 %v2682_v29, %v3550_v60 }
 0x20a   : > { %1214 = vst.msk [vmem:[%s3565_s8 + $0x20] sm:$0xf] %vm1205_vm13, %v2603_v40  ;;  %v2606_v41 = vpack.c.bf16 %v1136_v21, %v1136_v21  ;;  %v2147_v5 = vsel %vm2115_vm1, %v2083_v3, %v2131_v44  ;;  %vm2113_vm3 = vcmp.ge.f32.partialorder %v2075_v49, 0.0  ;;  %v2129_v51 = vmul.f32 0.1, %v2075_v49  ;;  %v2077_v62 = vpop.f32.mrf.mxu1 }
 0x20b   : > { %v2621_v53 = vpack.c.bf16 %v2147_v5, %v2147_v5  ;;  %v1134_v6 = vsel %vm1102_vm2, %v1066_v22, %v1118_v0  ;;  %vm2116_vm4 = vcmp.ge.f32.partialorder %v2086_v7, 0.0  ;;  %v2132_v17 = vmul.f32 0.1, %v2086_v7 }
 0x20c   : > { %1217 = vst.msk [vmem:[%s3565_s8 + $0x2c] sm:$0xf] %vm1205_vm13, %v2606_v41  ;;  %v2604_v48 = vpack.c.bf16 %v1134_v6, %v1134_v6  ;;  %v2145_v55 = vsel %vm2113_vm3, %v2075_v49, %v2129_v51  ;;  %v2078_v18 = vadd.f32 %v3550_v60, %v2077_v62 }
 0x20d   : > { %2227 = vst.msk [vmem:[%s3565_s8 + $0x68] sm:$0xf] %vm1205_vm13, %v2621_v53  ;;  %v2619_v33 = vpack.c.bf16 %v2145_v55, %v2145_v55  ;;  %v2148_v57 = vsel %vm2116_vm4, %v2086_v7, %v2132_v17 }
 0x20e   : > { %1215 = vst.msk [vmem:[%s3565_s8 + $0x24] sm:$0xf] %vm1205_vm13, %v2604_v48  ;;  %v2622_v43 = vpack.c.bf16 %v2148_v57, %v2148_v57  ;;  %vm2114_vm5 = vcmp.ge.f32.partialorder %v2078_v18, 0.0  ;;  %v2130_v54 = vmul.f32 0.1, %v2078_v18 }
 0x20f   : > { %2225 = vst.msk [vmem:[%s3565_s8 + $0x60] sm:$0xf] %vm1205_vm13, %v2619_v33 }
 0x210   : > { %2228 = vst.msk [vmem:[%s3565_s8 + $0x6c] sm:$0xf] %vm1205_vm13, %v2622_v43  ;;  %v2146_v61 = vsel %vm2114_vm5, %v2078_v18, %v2130_v54 }
 0x211   : > { %v2620_v59 = vpack.c.bf16 %v2146_v61, %v2146_v61 }
 0x213   : > { %2226 = vst.msk [vmem:[%s3565_s8 + $0x64] sm:$0xf] %vm1205_vm13, %v2620_v59 }
 0x240   : > { %v2665_v13 = vpop.f32.mrf.mxu0 }
 0x241   : > { %v1087_v42 = vadd.f32 %v2665_v13, %v3550_v60  ;;  %v2685_v31 = vpop.f32.mrf.mxu1 }
 0x242   : > { %v1078_v39 = vpop.f32.mrf.mxu0  ;;  %v2099_v4 = vadd.f32 %v2685_v31, %v3550_v60 }
 0x243   : > { %vm1107_vm6 = vcmp.ge.f32.partialorder %v1087_v42, 0.0  ;;  %v1123_v27 = vmul.f32 0.1, %v1087_v42  ;;  %v1079_v52 = vadd.f32 %v3550_v60, %v1078_v39  ;;  %v2090_v56 = vpop.f32.mrf.mxu1 }
 0x244   : > { %v2666_v35 = vpop.f32.mrf.mxu0  ;;  %vm2119_vm8 = vcmp.ge.f32.partialorder %v2099_v4, 0.0  ;;  %v2135_v26 = vmul.f32 0.1, %v2099_v4  ;;  %v2091_v19 = vadd.f32 %v3550_v60, %v2090_v56 }
 0x245   : > { %v1139_v9 = vsel %vm1107_vm6, %v1087_v42, %v1123_v27  ;;  %vm1105_vm7 = vcmp.ge.f32.partialorder %v1079_v52, 0.0  ;;  %v1121_v15 = vmul.f32 0.1, %v1079_v52  ;;  %v1090_v58 = vadd.f32 %v2666_v35, %v3550_v60  ;;  %v2686_v47 = vpop.f32.mrf.mxu1 }
 0x246   : > { %v2609_v1 = vpack.c.bf16 %v1139_v9, %v1139_v9  ;;  %v1081_v14 = vpop.f32.mrf.mxu0  ;;  %v2151_v30 = vsel %vm2119_vm8, %v2099_v4, %v2135_v26  ;;  %vm2117_vm10 = vcmp.ge.f32.partialorder %v2091_v19, 0.0  ;;  %v2133_v63 = vmul.f32 0.1, %v2091_v19 }
 0x247   : > { %v1137_v36 = vsel %vm1105_vm7, %v1079_v52, %v1121_v15  ;;  %vm1108_vm9 = vcmp.ge.f32.partialorder %v1090_v58, 0.0  ;;  %v1124_v32 = vmul.f32 0.1, %v1090_v58  ;;  %v1082_v20 = vadd.f32 %v3550_v60, %v1081_v14  ;;  %v2093_v38 = vpop.f32.mrf.mxu1 }
 0x248   : > { %1220 = vst.msk [vmem:[%s3565_s8 + $0x38] sm:$0xf] %vm1205_vm13, %v2609_v1  ;;  %v2607_v46 = vpack.c.bf16 %v1137_v36, %v1137_v36  ;;  %v2625_v50 = vpack.c.bf16 %v2151_v30, %v2151_v30  ;;  %v2102_v25 = vadd.f32 %v2686_v47, %v3550_v60  ;;  %v2149_v10 = vsel %vm2117_vm10, %v2091_v19, %v2133_v63 }
 0x249   : > { %v1140_v11 = vsel %vm1108_vm9, %v1090_v58, %v1124_v32  ;;  %vm1106_vm11 = vcmp.ge.f32.partialorder %v1082_v20, 0.0  ;;  %v1122_v23 = vmul.f32 0.1, %v1082_v20  ;;  %v2094_v24 = vadd.f32 %v3550_v60, %v2093_v38 }
 0x24a   : > { %1218 = vst.msk [vmem:[%s3565_s8 + $0x30] sm:$0xf] %vm1205_vm13, %v2607_v46  ;;  %v2610_v28 = vpack.c.bf16 %v1140_v11, %v1140_v11  ;;  %2231 = vst.msk [vmem:[%s3565_s8 + $0x78] sm:$0xf] %vm1205_vm13, %v2625_v50  ;;  %v2623_v2 = vpack.c.bf16 %v2149_v10, %v2149_v10  ;;  %vm2120_vm12 = vcmp.ge.f32.partialorder %v2102_v25, 0.0 }
 0x24b   : > { %v2136_v8 = vmul.f32 0.1, %v2102_v25  ;;  %v1138_v34 = vsel %vm1106_vm11, %v1082_v20, %v1122_v23  ;;  %vm2118_vm14 = vcmp.ge.f32.partialorder %v2094_v24, 0.0  ;;  %v2134_v3 = vmul.f32 0.1, %v2094_v24 }
 0x24c   : > { %1221 = vst.msk [vmem:[%s3565_s8 + $0x3c] sm:$0xf] %vm1205_vm13, %v2610_v28  ;;  %2229 = vst.msk [vmem:[%s3565_s8 + $0x70] sm:$0xf] %vm1205_vm13, %v2623_v2  ;;  %v2608_v12 = vpack.c.bf16 %v1138_v34, %v1138_v34 }
 0x24d   : > { %v2152_v45 = vsel %vm2120_vm12, %v2102_v25, %v2136_v8  ;;  %v2150_v16 = vsel %vm2118_vm14, %v2094_v24, %v2134_v3 }
 0x24e   : > { %v2626_v37 = vpack.c.bf16 %v2152_v45, %v2152_v45  ;;  %1219 = vst.msk [vmem:[%s3565_s8 + $0x34] sm:$0xf] %vm1205_vm13, %v2608_v12  ;;  %v2624_v60 = vpack.c.bf16 %v2150_v16, %v2150_v16 }
 0x250   : > { %2232 = vst.msk [vmem:[%s3565_s8 + $0x7c] sm:$0xf] %vm1205_vm13, %v2626_v37  ;;  %2230 = vst.msk [vmem:[%s3565_s8 + $0x74] sm:$0xf] %vm1205_vm13, %v2624_v60 }
 0x251 PF: > { %s13_s12 = sadd.s32 1, %s2820_s12  }
 0x252   : > { %p10_p4 = scmp.ge.s32.totalorder %s13_s12, 4  }
 0x254   :  { %12 = sbr.rel (!%p10_p4) target bundleno = 1 (0x1), region = 69 }

// kernel: run_pwcnet_forward.19
= control target key start
LH: loop header
LB: loop body
LE: loop exit
PB: predicated region body
PF: predicated region fallthrough
CT: control target
= control target key end

     0   :  { %s3414_s12 = smov 0   ;;  %s4988_s0 = inlined_call_operand.vmem [shape: bf16[2,8,8,32], index: 0, kind: input, shape index: {}]   ;;  %s4989_s1 = inlined_call_operand.vmem [shape: bf16[2,12,12,32], index: 1, kind: input, shape index: {}]   ;;  %s4990_s2 = inlined_call_operand.vmem [shape: bf16[800,32], index: 2, kind: input, shape index: {}]   ;;  %s4991_s3 = inlined_call_operand.vmem [shape: bf16[2,64,32], index: 3, kind: output, shape index: {}]  }
   0x1 LB: > { %s2892_s13 = sadd.s32 4294967295, %s3389_s12   ;;  %p2896_p0 = scmp.ge.s32.totalorder %s3389_s12, 1  ;;  %s3389_s12 = sphi %s3414_s12, %s13_s12  }
   0x2   : > { %p147_p1 = scmp.lt.s32.totalorder %s3389_s12, 3 }
   0x4   : > { %p148_p2 = pnand %p2896_p0, %p147_p1 }
   0x6   : > { %151 = sbr.rel (%p148_p2) target bundleno = 638 (0x27e), region = 32 }
   0xb   : > { %p176_p3 = scmp.lt.s32.totalorder %s2892_s13, 1  ;;  %v3310_v0 = vld [vmem:[%s4990_s2 + $0x78] sm:$0xff]   ;;  %vm346_vm0 = vcmask 1042432   ;;  %vm347_vm1 = vcmask 1046532   ;;  %vm325_vm3 = vsmask.f32 3328 }
   0xc   : > { %3144 = vmatprep.subr.bf16.mxu0 %v3310_v0  ;;  %v3311_v1 = vld [vmem:[%s4990_s2 + $0x38] sm:$0xff]   ;;  %vm3450_vm2 = vmor %vm346_vm0, %vm347_vm1  ;;  %vm326_vm4 = vsmask.f32 7440  ;;  %v3312_v23 = vld [vmem:[%s4990_s2 + $0x70] sm:$0xff]   ;;  %vm355_vm5 = vsmask.f32 2304 }
   0xd   : > { %s5075_s13 = smov (!%p176_p3, %s2892_s13), 1  ;;  %3145 = vmatpush3.bf16.msra.mxu0 %v3311_v1  ;;  %vm356_vm6 = vsmask.f32 6416  ;;  %v3313_v28 = vld [vmem:[%s4990_s2 + $0x30] sm:$0xff]   ;;  %s3391_s30 = smov 32   ;;  %v3314_v37 = vld [vmem:[%s4990_s2 + $0x68] sm:$0xff]   ;;  %vm3539_vm9 = vmor %vm325_vm3, %vm326_vm4 }
   0xe   : > { %s3134_s16 = sshll.u32 %s5075_s13, 5  ;;  %s3298_s17 = smul.u32 96, %s5075_s13  ;;  %3146 = vmatprep.subr.bf16.mxu0 %v3312_v23  ;;  %vm370_vm7 = vcmask 1041408   ;;  %vm371_vm8 = vcmask 1045508   ;;  %v3315_v43 = vld [vmem:[%s4990_s2 + $0x28] sm:$0xff]   ;;  %v3316_v48 = vld [vmem:[%s4990_s2 + $0x60] sm:$0xff]   ;;  %vm3579_vm10 = vmor %vm355_vm5, %vm356_vm6 }
   0xf   : > { %s3434_s20 = scalar_lea.vmem %s4988_s0, %s3134_s16  ;;  %s3392_s10 = smov 64   ;;  %v3317_v63 = vld [vmem:[%s4990_s2 + $0x20] sm:$0xff]   ;;  %vm3605_vm11 = vmor %vm370_vm7, %vm371_vm8  ;;  %vm611_vm12 = vcmask 261120   ;;  %vm615_vm13 = vcmask 523264   ;;  %vm618_vm14 = vcmask 785408   ;;  %vm2107_vm15 = vcmask 1043456  }
  0x10   : > { %s3442_s25 = scalar_lea.vmem %s4989_s1, %s3298_s17  ;;  %v3445_v2 = vld [vmem:[%s3434_s20 + $0x4] sm:$0xf]  ;;  %v3448_v3 = vld [vmem:[%s3434_s20] sm:$0xf]  ;;  %s3393_s11 = smov 96   ;;  %vm2816_vm1 = vcmask 257024  }
  0x11   : > { %v3455_v5 = vld [vmem:[%s3442_s25 + $0x10] sm:$0xf]  ;;  %v3458_v6 = vld [vmem:[%s3442_s25 + $0x8] sm:$0xf]  ;;  %v3461_v7 = vld [vmem:[%s3442_s25 + $0xc] sm:$0x3]  ;;  %3147 = vmatpush3.bf16.msra.mxu0 %v3313_v28 }
  0x12   : > { %v691_v8 = vmul.bf16 %v3455_v5, %v3445_v2  ;;  %v379_v9 = vmul.bf16 %v3458_v6, %v3448_v3  ;;  %v2904_v10 = vrot.slane %v3458_v6, 9  ;;  %v400_v11 = vrot.slane %v3461_v7, 5  ;;  %v3470_v12 = vld [vmem:[%s3442_s25 + $0x14] sm:$0x3]  ;;  %v3473_v13 = vld [vmem:[%s3442_s25] sm:$0xf]  ;;  %3148 = vmatprep.subr.bf16.mxu0 %v3314_v37 }
  0x13   : > { %v2906_v14 = vrot.slane %v3455_v5, 9  ;;  %v443_v15 = vrot.slane %v3470_v12, 5  ;;  %v3478_v16 = vld [vmem:[%s3442_s25 + $0x4] sm:$0x3]  ;;  %v2902_v17 = vrot.slane %v3473_v13, 9  ;;  %v381_v18 = vshrl.u32 %v3458_v6, 16 }
  0x14   : > { %v2935_v19 = vcombine.low %v691_v8, %v691_v8  ;;  %v2915_v20 = vcombine.low %v379_v9, %v379_v9  ;;  %v401_v21 = vsel %vm3450_vm2, %v2904_v10, %v400_v11  ;;  %v351_v22 = vrot.slane %v3478_v16, 5  ;;  %v3516_v42 = vld [vmem:[%s3442_s25 + $0x18] sm:$0xf]  ;;  %v3535_v53 = vld [vmem:[%s3442_s25 + $0x1c] sm:$0x3] }
  0x15   : > { %v688_v24 = vmul.bf16 %v401_v21, %v3445_v2  ;;  %v3491_v25 = vsel %vm3450_vm2, %v2906_v14, %v443_v15  ;;  %v403_v26 = vmul.bf16 %v401_v21, %v3448_v3  ;;  %v383_v27 = vrot.slane %v381_v18, 4  ;;  %3149 = vmatpush3.bf16.msra.mxu0 %v3315_v43  ;;  %v3318_v10 = vld [vmem:[%s4990_s2 + $0x58] sm:$0xff]  }
  0x16   : > { %767 = vrot.lane.b32.xlu0 %v2935_v19, %s3391_s30  ;;  %569 = vrot.lane.b32.xlu1 %v2915_v20, %s3391_s30  ;;  %v693_v29 = vmul.bf16 %v3491_v25, %v3445_v2  ;;  %v352_v30 = vsel %vm3450_vm2, %v2902_v17, %v351_v22  ;;  %v384_v31 = vshll.u32 %v3458_v6, 16  ;;  %v390_v32 = vshll.u32 %v3461_v7, 16  ;;  %v3319_v28 = vld [vmem:[%s4990_s2 + $0x18] sm:$0xff]  }
  0x17   : > { %v2933_v33 = vcombine.low %v688_v24, %v688_v24  ;;  %v2917_v34 = vcombine.low %v403_v26, %v403_v26  ;;  %v354_v35 = vmul.bf16 %v352_v30, %v3448_v3  ;;  %v424_v36 = vshrl.u32 %v3455_v5, 16  ;;  %3150 = vmatprep.subr.bf16.mxu0 %v3316_v48 }
  0x18   : > { %v2937_v38 = vcombine.low %v693_v29, %v693_v29  ;;  %v386_v39 = vrot.slane %v384_v31, 5  ;;  %v392_v40 = vrot.slane %v390_v32, 5  ;;  %v427_v41 = vshll.u32 %v3455_v5, 16 }
  0x19   : > { %v2913_v44 = vcombine.low %v354_v35, %v354_v35  ;;  %v426_v45 = vrot.slane %v424_v36, 4  ;;  %v433_v46 = vshll.u32 %v3470_v12, 16  ;;  %v329_v47 = vshrl.u32 %v3473_v13, 16  ;;  %3151 = vmatpush3.bf16.msra.mxu0 %v3317_v63  ;;  %v3320_v35 = vld [vmem:[%s4990_s2 + $0x50] sm:$0xff]  }
  0x1a   : > { %757 = vrot.lane.b32.xlu0 %v2933_v33, %s3392_s10  ;;  %777 = vrot.lane.b32.xlu1 %v2937_v38, %s3393_s11  ;;  %v387_v49 = vor.u32 %v386_v39, %v383_v27  ;;  %v429_v50 = vrot.slane %v427_v41, 5  ;;  %v332_v51 = vshll.u32 %v3473_v13, 16  ;;  %v338_v52 = vshll.u32 %v3478_v16, 16 }
  0x1b   : > { %v435_v55 = vrot.slane %v433_v46, 5  ;;  %v331_v56 = vrot.slane %v329_v47, 4  ;;  %v467_v57 = vshrl.u32 %v3516_v42, 16  ;;  %v470_v58 = vshll.u32 %v3516_v42, 16  ;;  %3152 = vmatprep.subr.bf16.mxu0 %v3318_v10 }
  0x1c   : > { %v388_v59 = vrot.slane %v387_v49, 4  ;;  %v430_v60 = vor.u32 %v429_v50, %v426_v45  ;;  %v334_v61 = vrot.slane %v332_v51, 5  ;;  %v340_v62 = vrot.slane %v338_v52, 5 }
  0x1d   : > { %v476_v0 = vshll.u32 %v3535_v53, 16  ;;  %v490_v1 = vrot.slane %v467_v57, 5  ;;  %v491_v8 = vrot.slane %v470_v58, 6  ;;  %v494_v9 = vshrl.u32 %v3535_v53, 16  ;;  %3153 = vmatpush3.bf16.msra.mxu0 %v3319_v28 }
  0x1e   : > { %579 = vrot.lane.b32.xlu0 %v2917_v34, %s3393_s11  ;;  %559 = vrot.lane.b32.xlu1 %v2913_v44, %s3392_s10  ;;  %v393_v11 = vsel %vm3539_vm9, %v388_v59, %v392_v40  ;;  %v431_v14 = vrot.slane %v430_v60, 4  ;;  %v335_v15 = vor.u32 %v334_v61, %v331_v56  ;;  %v404_v17 = vrot.slane %v381_v18, 5  ;;  %v3321_v40 = vld [vmem:[%s4990_s2 + $0x10] sm:$0xff]  }
  0x1f   : > { %v687_v19 = vmul.bf16 %v393_v11, %v3445_v2  ;;  %v395_v20 = vmul.bf16 %v393_v11, %v3448_v3  ;;  %v492_v21 = vor.u32 %v491_v8, %v490_v1  ;;  %v496_v22 = vrot.slane %v494_v9, 5  ;;  %3154 = vmatprep.subr.bf16.mxu0 %v3320_v35  ;;  %v3322_v1 = vld [vmem:[%s4990_s2 + $0x48] sm:$0xff]   ;;  %v3327_v35 = vld [vmem:[%s4990_s2 + $0xf0] sm:$0xff]  }
  0x20   : > { %v3575_v23 = vsel %vm3539_vm9, %v431_v14, %v435_v55  ;;  %v336_v24 = vrot.slane %v335_v15, 4  ;;  %v497_v18 = vrot.slane %v476_v0, 6  ;;  %v405_v27 = vrot.slane %v384_v31, 6  ;;  %v3324_v14 = vld [vmem:[%s4990_s2 + $0x8] sm:$0xff]  }
  0x21   : > { %v2932_v29 = vcombine.low %v687_v19, %v687_v19  ;;  %v692_v30 = vmul.bf16 %v3575_v23, %v3445_v2  ;;  %v2916_v33 = vcombine.low %v395_v20, %v395_v20  ;;  %v493_v34 = vrot.slane %v492_v21, 4  ;;  %3155 = vmatpush3.bf16.msra.mxu0 %v3321_v40 }
  0x22   : > { %v341_v37 = vsel %vm3539_vm9, %v336_v24, %v340_v62  ;;  %v498_v31 = vor.u32 %v497_v18, %v496_v22  ;;  %v406_v38 = vor.u32 %v405_v27, %v404_v17  ;;  %v408_v39 = vshrl.u32 %v3461_v7, 16  ;;  %3156 = vmatprep.subr.bf16.mxu0 %v3322_v1  ;;  %v3330_v1 = vld [vmem:[%s4990_s2 + $0xe8] sm:$0xff]  }
  0x23   : > { %752 = vrot.lane.b32.xlu0 %v2932_v29, %s3391_s30  ;;  %v2936_v43 = vcombine.low %v692_v30, %v692_v30  ;;  %v343_v44 = vmul.bf16 %v341_v37, %v3448_v3  ;;  %v411_v45 = vrot.slane %v390_v32, 6  ;;  %v2907_v49 = vrot.slane %v3455_v5, 10  ;;  %v3323_v32 = vld [vmem:[%s4990_s2 + $0xf8] sm:$0xff]   ;;  %v3661_v30 = vld [vmem:[%s3442_s25 + $0x20] sm:$0xf] }
  0x24   : > { %v3612_v50 = vsel %vm3579_vm10, %v493_v34, %v498_v31  ;;  %v407_v55 = vrot.slane %v406_v38, 4  ;;  %v410_v56 = vrot.slane %v408_v39, 5  ;;  %v461_v59 = vrot.slane %v3470_v12, 6  ;;  %3184 = vmatprep.subr.bf16.mxu1 %v3323_v32  ;;  %v3329_v32 = vld [vmem:[%s4990_s2 + $0xb0] sm:$0xff]  }
  0x25   : > { %772 = vrot.lane.b32.xlu1 %v2936_v43, %s3392_s10  ;;  %v2912_v60 = vcombine.low %v343_v44, %v343_v44  ;;  %v699_v61 = vmul.bf16 %v3612_v50, %v3445_v2  ;;  %v358_v62 = vrot.slane %v329_v47, 5  ;;  %v359_v63 = vrot.slane %v332_v51, 6  ;;  %3157 = vmatpush3.bf16.msra.mxu0 %v3324_v14 }
  0x26   : > { %v412_v8 = vor.u32 %v411_v45, %v410_v56  ;;  %v3630_v9 = vsel %vm3605_vm11, %v2907_v49, %v461_v59  ;;  %v362_v10 = vshrl.u32 %v3478_v16, 16  ;;  %v365_v11 = vrot.slane %v338_v52, 6 }
  0x27   : > { %554 = vrot.lane.b32.xlu0 %v2912_v60, %s3391_s30  ;;  %v2941_v13 = vcombine.low %v699_v61, %v699_v61  ;;  %v360_v47 = vor.u32 %v359_v63, %v358_v62  ;;  %v447_v51 = vrot.slane %v424_v36, 5  ;;  %v448_v16 = vrot.slane %v427_v41, 6  ;;  %v3325_v36 = vld [vmem:[%s4990_s2 + $0xb8] sm:$0xff]  }
  0x28   : > { %v3643_v15 = vsel %vm3579_vm10, %v407_v55, %v412_v8  ;;  %v364_v17 = vrot.slane %v362_v10, 5  ;;  %v451_v52 = vshrl.u32 %v3470_v12, 16  ;;  %v695_v20 = vmul.bf16 %v3630_v9, %v3445_v2  ;;  %3185 = vmatpush3.bf16.msra.mxu1 %v3325_v36  ;;  %v3328_v55 = vld [vmem:[%s4990_s2] sm:$0xff]  }
  0x29   : > { %574 = vrot.lane.b32.xlu1 %v2916_v33, %s3392_s10  ;;  %v689_v19 = vmul.bf16 %v3643_v15, %v3445_v2  ;;  %v361_v21 = vrot.slane %v360_v47, 4  ;;  %v454_v41 = vrot.slane %v433_v46, 6  ;;  %v449_v24 = vor.u32 %v448_v16, %v447_v51  ;;  %v3326_v33 = vld [vmem:[%s4990_s2 + $0x40] sm:$0xff]   ;;  %3186 = vmatprep.subr.bf16.mxu1 %v3327_v35 }
  0x2a   : > { %v366_v22 = vor.u32 %v365_v11, %v364_v17  ;;  %v453_v18 = vrot.slane %v451_v52, 5  ;;  %v2909_v27 = vrot.slane %v3516_v42, 10  ;;  %v504_v29 = vrot.slane %v3535_v53, 6  ;;  %3158 = vmatprep.subr.bf16.mxu0 %v3326_v33  ;;  %v3732_v16 = vld [vmem:[%s3442_s25 + $0x24] sm:$0x3] }
  0x2b   : > { %v2934_v28 = vcombine.low %v689_v19, %v689_v19  ;;  %v450_v46 = vrot.slane %v449_v24, 4  ;;  %v2938_v37 = vcombine.low %v695_v20, %v695_v20  ;;  %v2905_v39 = vrot.slane %v3458_v6, 10  ;;  %3159 = vmatpush3.bf16.msra.mxu0 %v3328_v55  ;;  %v3739_v19 = vld [vmem:[%s3434_s20 + $0xc] sm:$0xf]  ;;  %v3333_v20 = vld [vmem:[%s4990_s2 + $0xa0] sm:$0xff]  }
  0x2c   : > { %v367_v12 = vsel %vm3579_vm10, %v361_v21, %v366_v22  ;;  %v455_v34 = vor.u32 %v454_v41, %v453_v18  ;;  %v3676_v38 = vsel %vm3605_vm11, %v2909_v27, %v504_v29  ;;  %v418_v49 = vrot.slane %v3461_v7, 6  ;;  %3187 = vmatpush3.bf16.msra.mxu1 %v3329_v32  ;;  %v3334_v41 = vld [vmem:[%s4990_s2 + $0xd8] sm:$0xff]   ;;  %v3338_v55 = vld [vmem:[%s4990_s2 + $0xc8] sm:$0xff]  }
  0x2d   : > { %797 = vrot.lane.b32.xlu1 %v2941_v13, %s3391_s30  ;;  %762 = vrot.lane.b32.xlu0 %v2934_v28, %s3393_s11  ;;  %v369_v31 = vmul.bf16 %v367_v12, %v3448_v3  ;;  %v700_v43 = vmul.bf16 %v3676_v38, %v3445_v2  ;;  %v701_v6 = vmul.bf16 %v3661_v30, %v3445_v2  ;;  %v469_v56 = vrot.slane %v467_v57, 4  ;;  %v3332_v13 = vld [vmem:[%s4990_s2 + $0xe0] sm:$0xff]   ;;  %v3335_v29 = vld [vmem:[%s4990_s2 + $0x98] sm:$0xff]  }
  0x2e   : > { %v3681_v40 = vsel %vm3579_vm10, %v450_v46, %v455_v34  ;;  %v472_v59 = vrot.slane %v470_v58, 5  ;;  %v696_v61 = vmul.bf16 %v3516_v42, %v3445_v2  ;;  %v478_v62 = vrot.slane %v476_v0, 5  ;;  %v3331_v0 = vld [vmem:[%s4990_s2 + $0xa8] sm:$0xff]   ;;  %3188 = vmatprep.subr.bf16.mxu1 %v3330_v1 }
  0x2f   : > { %v2914_v44 = vcombine.low %v369_v31, %v369_v31  ;;  %v458_v45 = vmul.bf16 %v3681_v40, %v3448_v3  ;;  %v2942_v60 = vcombine.low %v700_v43, %v700_v43  ;;  %v3708_v57 = vsel %vm3605_vm11, %v2905_v39, %v418_v49  ;;  %v3772_v31 = vld [vmem:[%s3442_s25 + $0x2c] sm:$0x3]  ;;  %v3337_v39 = vld [vmem:[%s4990_s2 + $0x90] sm:$0xff]  }
  0x30   : > { %v473_v58 = vor.u32 %v472_v59, %v469_v56  ;;  %v510_v63 = vshrl.u32 %v3661_v30, 16  ;;  %v513_v8 = vshll.u32 %v3661_v30, 16  ;;  %v464_v10 = vmul.bf16 %v3630_v9, %v3448_v3  ;;  %3189 = vmatpush3.bf16.msra.mxu1 %v3331_v0  ;;  %v3789_v59 = vld [vmem:[%s3434_s20 + $0x8] sm:$0xf] }
  0x31   : > { %782 = vrot.lane.b32.xlu1 %v2938_v37, %s3391_s30  ;;  %564 = vrot.lane.b32.xlu0 %v2914_v44, %s3393_s11  ;;  %v2921_v7 = vcombine.low %v458_v45, %v458_v45  ;;  %v2943_v47 = vcombine.low %v701_v6, %v701_v6  ;;  %v2939_v51 = vcombine.low %v696_v61, %v696_v61  ;;  %v519_v28 = vshll.u32 %v3732_v16, 16  ;;  %v3769_v37 = vld [vmem:[%s3442_s25 + $0x28] sm:$0xf] }
  0x32   : > { %v474_v11 = vrot.slane %v473_v58, 4  ;;  %v421_v14 = vmul.bf16 %v3708_v57, %v3448_v3  ;;  %v512_v52 = vrot.slane %v510_v63, 4  ;;  %v515_v36 = vrot.slane %v513_v8, 5  ;;  %3190 = vmatprep.subr.bf16.mxu1 %v3332_v13  ;;  %v3339_v58 = vld [vmem:[%s4990_s2 + $0x88] sm:$0xff]  }
  0x33   : > { %v2922_v21 = vcombine.low %v464_v10, %v464_v10  ;;  %v422_v24 = vmul.bf16 %v3455_v5, %v3448_v3  ;;  %v1081_v33 = vmul.bf16 %v3661_v30, %v3739_v19  ;;  %v3336_v5 = vld [vmem:[%s4990_s2 + $0xd0] sm:$0xff]   ;;  %v465_v46 = vmul.bf16 %v3516_v42, %v3448_v3 }
  0x34   : > { %v3729_v17 = vsel %vm3539_vm9, %v474_v11, %v478_v62  ;;  %v2918_v22 = vcombine.low %v421_v14, %v421_v14  ;;  %v516_v27 = vor.u32 %v515_v36, %v512_v52  ;;  %3191 = vmatpush3.bf16.msra.mxu1 %v3333_v20  ;;  %v521_v35 = vrot.slane %v519_v28, 5  ;;  %v3341_v14 = vld [vmem:[%s4990_s2 + $0x80] sm:$0xff]  }
  0x35   : > { %599 = vrot.lane.b32.xlu1 %v2921_v7, %s3391_s30  ;;  %802 = vrot.lane.b32.xlu0 %v2942_v60, %s3392_s10  ;;  %5034 = vst [vmem:[#allocation2_spill] sm:$0xff] %v3729_v17  ;;  %v697_v18 = vmul.bf16 %v3729_v17, %v3445_v2  ;;  %v2919_v2 = vcombine.low %v422_v24, %v422_v24  ;;  %v2910_v45 = vrot.slane %v3661_v30, 9  ;;  %v529_v49 = vrot.slane %v3732_v16, 5 }
  0x36   : > { %3192 = vmatprep.subr.bf16.mxu1 %v3334_v41  ;;  %v517_v34 = vrot.slane %v516_v27, 4  ;;  %v2975_v43 = vcombine.low %v1081_v33, %v1081_v33  ;;  %v438_v44 = vmul.bf16 %v3575_v23, %v3448_v3  ;;  %v2923_v6 = vcombine.low %v465_v46, %v465_v46 }
  0x37   : > { %v2940_v12 = vcombine.low %v697_v18, %v697_v18  ;;  %v1077_v56 = vmul.bf16 %v3729_v17, %v3739_v19  ;;  %v708_v3 = vshrl.u32 %v3769_v37, 16  ;;  %v711_v32 = vshll.u32 %v3769_v37, 16 }
  0x38   : > { %3193 = vmatpush3.bf16.msra.mxu1 %v3335_v29  ;;  %v3795_v7 = vsel %vm3539_vm9, %v517_v34, %v521_v35  ;;  %v2908_v60 = vrot.slane %v3516_v42, 9  ;;  %v486_v61 = vrot.slane %v3535_v53, 5  ;;  %v717_v62 = vshll.u32 %v3772_v31, 16  ;;  %v3340_v53 = vld [vmem:[%s4990_s2 + $0xc0] sm:$0xff]  }
  0x39   : > { %807 = vrot.lane.b32.xlu1 %v2943_v47, %s3393_s11  ;;  %787 = vrot.lane.b32.xlu0 %v2939_v51, %s3392_s10  ;;  %5035 = vst [vmem:[#allocation3_spill] sm:$0xff] %v3795_v7  ;;  %v2920_v1 = vcombine.low %v438_v44, %v438_v44  ;;  %v886_v0 = vmul.bf16 %v3516_v42, %v3789_v59  ;;  %v735_v11 = vshrl.u32 %v3772_v31, 16  ;;  %v731_v42 = vrot.slane %v708_v3, 5 }
  0x3a   : > { %3194 = vmatprep.subr.bf16.mxu1 %v3336_v5  ;;  %v3807_v10 = vsel %vm3450_vm2, %v2910_v45, %v529_v49  ;;  %v2972_v13 = vcombine.low %v1077_v56, %v1077_v56  ;;  %v1082_v47 = vmul.bf16 %v3795_v7, %v3739_v19  ;;  %v732_v51 = vrot.slane %v711_v32, 6 }
  0x3b   : > { %v3826_v52 = vsel %vm3450_vm2, %v2908_v60, %v486_v61  ;;  %v2955_v36 = vcombine.low %v886_v0, %v886_v0  ;;  %v1083_v20 = vmul.bf16 %v3807_v10, %v3739_v19  ;;  %v738_v24 = vrot.slane %v717_v62, 6 }
  0x3c   : > { %3195 = vmatpush3.bf16.msra.mxu1 %v3337_v39  ;;  %v1078_v41 = vmul.bf16 %v3826_v52, %v3739_v19  ;;  %v733_v18 = vor.u32 %v732_v51, %v731_v42  ;;  %v887_v27 = vmul.bf16 %v3729_v17, %v3789_v59  ;;  %v882_v5 = vmul.bf16 %v3575_v23, %v3789_v59 }
  0x3d   : > { %604 = vrot.lane.b32.xlu1 %v2922_v21, %s3392_s10  ;;  %584 = vrot.lane.b32.xlu0 %v2918_v22, %s3391_s30  ;;  %v2976_v21 = vcombine.low %v1082_v47, %v1082_v47  ;;  %v737_v22 = vrot.slane %v735_v11, 5  ;;  %v2977_v29 = vcombine.low %v1083_v20, %v1083_v20  ;;  %v534_v34 = vrot.slane %v513_v8, 6 }
  0x3e   : > { %3196 = vmatprep.subr.bf16.mxu1 %v3338_v55  ;;  %v2973_v33 = vcombine.low %v1078_v41, %v1078_v41  ;;  %v537_v35 = vshrl.u32 %v3732_v16, 16  ;;  %v883_v39 = vmul.bf16 %v3491_v25, %v3789_v59  ;;  %v2956_v23 = vcombine.low %v887_v27, %v887_v27 }
  0x3f   : > { %v739_v46 = vor.u32 %v738_v24, %v737_v22  ;;  %v2952_v44 = vcombine.low %v882_v5, %v882_v5  ;;  %v547_v45 = vrot.slane %v3732_v16, 6  ;;  %v2931_v16 = vrot.slane %v3769_v37, 10 }
  0x40   : > { %3197 = vmatpush3.bf16.msra.mxu1 %v3339_v58  ;;  %v539_v55 = vrot.slane %v537_v35, 5  ;;  %v2953_v56 = vcombine.low %v883_v39, %v883_v39  ;;  %v888_v58 = vmul.bf16 %v3826_v52, %v3789_v59  ;;  %v713_v20 = vrot.slane %v711_v32, 5 }
  0x41   : > { %589 = vrot.lane.b32.xlu1 %v2919_v2, %s3392_s10  ;;  %792 = vrot.lane.b32.xlu0 %v2940_v12, %s3393_s11  ;;  %v533_v2 = vrot.slane %v510_v63, 5  ;;  %v734_v12 = vrot.slane %v733_v18, 4  ;;  %v2911_v63 = vrot.slane %v3661_v30, 10  ;;  %v3898_v18 = vld [vmem:[%s3442_s25 + $0x30] sm:$0xf] }
  0x42   : > { %3198 = vmatprep.subr.bf16.mxu1 %v3340_v53  ;;  %v884_v53 = vmul.bf16 %v3681_v40, %v3789_v59  ;;  %v2957_v47 = vcombine.low %v888_v58, %v888_v58 }
  0x43   : > { %v3857_v8 = vsel %vm3579_vm10, %v734_v12, %v739_v46  ;;  %v535_v49 = vor.u32 %v534_v34, %v533_v2  ;;  %v719_v2 = vrot.slane %v717_v62, 5  ;;  %v903_v12 = vshrl.u32 %v3898_v18, 16 }
  0x44   : > { %3199 = vmatpush3.bf16.msra.mxu1 %v3341_v14  ;;  %v1089_v61 = vmul.bf16 %v3857_v8, %v3739_v19  ;;  %v906_v46 = vshll.u32 %v3898_v18, 16 }
  0x45   : > { %1157 = vrot.lane.b32.xlu1 %v2975_v43, %s3391_s30  ;;  %609 = vrot.lane.b32.xlu0 %v2923_v6, %s3393_s11  ;;  %v1079_v43 = vmul.bf16 %v3612_v50, %v3739_v19  ;;  %v540_v6 = vrot.slane %v519_v28, 6  ;;  %v536_v0 = vrot.slane %v535_v49, 4  ;;  %v745_v28 = vrot.slane %v3772_v31, 6 }
  0x47   : > { %v2974_v60 = vcombine.low %v1079_v43, %v1079_v43  ;;  %v541_v11 = vor.u32 %v540_v6, %v539_v55  ;;  %v3885_v14 = vsel %vm3605_vm11, %v2931_v16, %v745_v28  ;;  %v890_v43 = vmul.bf16 %v3676_v38, %v3789_v59  ;;  %v3946_v28 = vld [vmem:[%s3442_s25 + $0x38] sm:$0xf] }
  0x48   : > { %v1090_v24 = vmul.bf16 %v3885_v14, %v3739_v19 }
  0x49   : > { %1142 = vrot.lane.b32.xlu1 %v2972_v13, %s3391_s30  ;;  %594 = vrot.lane.b32.xlu0 %v2920_v1, %s3393_s11  ;;  %v3869_v1 = vsel %vm3605_vm11, %v2911_v63, %v547_v45  ;;  %v2981_v13 = vcombine.low %v1089_v61, %v1089_v61  ;;  %v3881_v51 = vsel %vm3579_vm10, %v536_v0, %v541_v11  ;;  %v3925_v63 = vld [vmem:[%s3442_s25 + $0x34] sm:$0x3] }
  0x4a   : > { %v1085_v42 = vmul.bf16 %v3869_v1, %v3739_v19  ;;  %v894_v22 = vmul.bf16 %v3881_v51, %v3789_v59  ;;  %v895_v39 = vmul.bf16 %v3869_v1, %v3789_v59  ;;  %v891_v45 = vmul.bf16 %v3661_v30, %v3789_v59 }
  0x4b   : > { %v2958_v55 = vcombine.low %v890_v43, %v890_v43  ;;  %v912_v61 = vshll.u32 %v3925_v63, 16  ;;  %v896_v11 = vmul.bf16 %v3769_v37, %v3789_v59 }
  0x4c   : > { %v2978_v41 = vcombine.low %v1085_v42, %v1085_v42  ;;  %v2961_v32 = vcombine.low %v894_v22, %v894_v22  ;;  %v2962_v49 = vcombine.low %v895_v39, %v895_v39  ;;  %v2959_v30 = vcombine.low %v891_v45, %v891_v45 }
  0x4d   : > { %962 = vrot.lane.b32.xlu1 %v2955_v36, %s3391_s30  ;;  %1162 = vrot.lane.b32.xlu0 %v2976_v21, %s3392_s10  ;;  %v710_v36 = vrot.slane %v708_v3, 4  ;;  %v2954_v21 = vcombine.low %v884_v53, %v884_v53  ;;  %v1091_v3 = vmul.bf16 %v3898_v18, %v3739_v19  ;;  %v922_v42 = vrot.slane %v3925_v63, 5 }
  0x4e   : > { %v727_v22 = vrot.slane %v3772_v31, 5 }
  0x4f   : > { %v714_v27 = vor.u32 %v713_v20, %v710_v36  ;;  %v2983_v34 = vcombine.low %v1091_v3, %v1091_v3  ;;  %v2963_v36 = vcombine.low %v896_v11, %v896_v11  ;;  %v1101_v3 = vshll.u32 %v3946_v28, 16 }
  0x51   : > { %1167 = vrot.lane.b32.xlu1 %v2977_v29, %s3393_s11  ;;  %1147 = vrot.lane.b32.xlu0 %v2973_v33, %s3392_s10  ;;  %v2982_v29 = vcombine.low %v1090_v24, %v1090_v24  ;;  %v1086_v33 = vmul.bf16 %v3769_v37, %v3739_v19  ;;  %v715_v5 = vrot.slane %v714_v27, 4  ;;  %v1098_v27 = vshrl.u32 %v3946_v28, 16 }
  0x52   : > { %v1122_v39 = vrot.slane %v1101_v3, 6 }
  0x53   : > { %v2979_v35 = vcombine.low %v1086_v33, %v1086_v33  ;;  %v3918_v62 = vsel %vm3539_vm9, %v715_v5, %v719_v2 }
  0x54   : > { %5036 = vst [vmem:[#allocation4_spill] sm:$0xff] %v3918_v62  ;;  %v1087_v6 = vmul.bf16 %v3918_v62, %v3739_v19  ;;  %v914_v19 = vrot.slane %v912_v61, 5 }
  0x55   : > { %967 = vrot.lane.b32.xlu1 %v2956_v23, %s3392_s10  ;;  %947 = vrot.lane.b32.xlu0 %v2952_v44, %s3391_s30  ;;  %v905_v23 = vrot.slane %v903_v12, 4  ;;  %v908_v44 = vrot.slane %v906_v46, 5 }
  0x56   : > { %v2980_v0 = vcombine.low %v1087_v6, %v1087_v6 }
  0x59   : > { %952 = vrot.lane.b32.xlu1 %v2953_v56, %s3392_s10  ;;  %1152 = vrot.lane.b32.xlu0 %v2974_v60, %s3393_s11  ;;  %v3934_v56 = vld [vmem:[%s3434_s20 + $0x14] sm:$0xf]  ;;  %v909_v60 = vor.u32 %v908_v44, %v905_v23 }
  0x5a   : > { %v1471_v58 = vmul.bf16 %v3898_v18, %v3934_v56  ;;  %v1467_v20 = vmul.bf16 %v3918_v62, %v3934_v56 }
  0x5b   : > { %v910_v16 = vrot.slane %v909_v60, 4 }
  0x5c   : > { %v3015_v53 = vcombine.low %v1471_v58, %v1471_v58  ;;  %v3012_v31 = vcombine.low %v1467_v20, %v1467_v20 }
  0x5d   : > { %1187 = vrot.lane.b32.xlu1 %v2981_v13, %s3391_s30  ;;  %972 = vrot.lane.b32.xlu0 %v2957_v47, %s3393_s11  ;;  %v892_v13 = vmul.bf16 %v3795_v7, %v3789_v59  ;;  %v2950_v47 = vrot.slane %v3898_v18, 9  ;;  %v3963_v24 = vsel %vm3539_vm9, %v910_v16, %v914_v19  ;;  %v926_v16 = vrot.slane %v903_v12, 5 }
  0x5e   : > { %5037 = vst [vmem:[#allocation5_spill] sm:$0xff] %v3963_v24  ;;  %v1472_v2 = vmul.bf16 %v3963_v24, %v3934_v56  ;;  %v2951_v12 = vrot.slane %v3898_v18, 10 }
  0x5f   : > { %v3974_v5 = vsel %vm3450_vm2, %v2950_v47, %v922_v42  ;;  %v930_v47 = vshrl.u32 %v3925_v63, 16 }
  0x60   : > { %5038 = vst [vmem:[#allocation6_spill] sm:$0xff] %v3974_v5  ;;  %v3016_v44 = vcombine.low %v1472_v2, %v1472_v2  ;;  %v1473_v45 = vmul.bf16 %v3974_v5, %v3934_v56 }
  0x61   : > { %1172 = vrot.lane.b32.xlu1 %v2978_v41, %s3391_s30  ;;  %957 = vrot.lane.b32.xlu0 %v2954_v21, %s3393_s11  ;;  %v3957_v21 = vld [vmem:[%s3434_s20 + $0x10] sm:$0xf]  ;;  %v2930_v41 = vrot.slane %v3769_v37, 9 }
  0x62   : > { %v1276_v33 = vmul.bf16 %v3769_v37, %v3957_v21  ;;  %v1121_v37 = vrot.slane %v1098_v27, 5  ;;  %v1272_v58 = vmul.bf16 %v3795_v7, %v3957_v21  ;;  %v1277_v11 = vmul.bf16 %v3918_v62, %v3957_v21 }
  0x63   : > { %v1273_v42 = vmul.bf16 %v3807_v10, %v3957_v21 }
  0x64   : > { %v2995_v23 = vcombine.low %v1276_v33, %v1276_v33  ;;  %v2996_v20 = vcombine.low %v1277_v11, %v1277_v11  ;;  %v932_v33 = vrot.slane %v930_v47, 5 }
  0x65   : > { %992 = vrot.lane.b32.xlu1 %v2961_v32, %s3391_s30  ;;  %1192 = vrot.lane.b32.xlu0 %v2982_v29, %s3392_s10  ;;  %v3968_v32 = vld [vmem:[%s3442_s25 + $0x3c] sm:$0x3]  ;;  %v2960_v29 = vcombine.low %v892_v13, %v892_v13  ;;  %v927_v13 = vrot.slane %v906_v46, 6  ;;  %v2993_v2 = vcombine.low %v1273_v42, %v1273_v42 }
  0x66   : > { %v1125_v43 = vshrl.u32 %v3968_v32, 16 }
  0x68   : > { %v1127_v6 = vrot.slane %v1125_v43, 5 }
  0x69   : > { %1197 = vrot.lane.b32.xlu1 %v2983_v34, %s3393_s11  ;;  %1177 = vrot.lane.b32.xlu0 %v2979_v35, %s3392_s10  ;;  %v3982_v34 = vsel %vm3450_vm2, %v2930_v41, %v727_v22  ;;  %v1107_v35 = vshll.u32 %v3968_v32, 16  ;;  %v2992_v41 = vcombine.low %v1272_v58, %v1272_v58  ;;  %v940_v22 = vrot.slane %v3925_v63, 6 }
  0x6a   : > { %v1278_v43 = vmul.bf16 %v3982_v34, %v3957_v21  ;;  %v2971_v63 = vrot.slane %v3946_v28, 10 }
  0x6b   : > { %v1128_v60 = vrot.slane %v1107_v35, 6 }
  0x6c   : > { %v2997_v58 = vcombine.low %v1278_v43, %v1278_v43  ;;  %v1476_v43 = vmul.bf16 %v3946_v28, %v3934_v56 }
  0x6d   : > { %997 = vrot.lane.b32.xlu1 %v2962_v49, %s3392_s10  ;;  %977 = vrot.lane.b32.xlu0 %v2958_v55, %s3391_s30  ;;  %v1468_v49 = vmul.bf16 %v3982_v34, %v3934_v56  ;;  %v1123_v55 = vor.u32 %v1122_v39, %v1121_v37 }
  0x6f   : > { %v1124_v19 = vrot.slane %v1123_v55, 4 }
  0x71   : > { %982 = vrot.lane.b32.xlu1 %v2959_v30, %s3392_s10  ;;  %1182 = vrot.lane.b32.xlu0 %v2980_v0, %s3393_s11  ;;  %v3017_v30 = vcombine.low %v1473_v45, %v1473_v45  ;;  %v3013_v0 = vcombine.low %v1468_v49, %v1468_v49 }
  0x75   : > { %1547 = vrot.lane.b32.xlu1 %v3015_v53, %s3391_s30  ;;  %1002 = vrot.lane.b32.xlu0 %v2963_v36, %s3393_s11  ;;  %v1129_v53 = vor.u32 %v1128_v60, %v1127_v6  ;;  %v1469_v36 = vmul.bf16 %v3857_v8, %v3934_v56  ;;  %v1274_v6 = vmul.bf16 %v3881_v51, %v3957_v21 }
  0x77   : > { %v4019_v46 = vsel %vm3579_vm10, %v1124_v19, %v1129_v53  ;;  %v3014_v37 = vcombine.low %v1469_v36, %v1469_v36  ;;  %v1103_v19 = vrot.slane %v1101_v3, 5  ;;  %v2994_v47 = vcombine.low %v1274_v6, %v1274_v6  ;;  %v4084_v6 = vld [vmem:[%s3434_s20 + $0x4] sm:$0xf] }
  0x78   : > { %5039 = vst [vmem:[#allocation7_spill] sm:$0xff] %v4019_v46  ;;  %v1479_v39 = vmul.bf16 %v4019_v46, %v3934_v56  ;;  %v694_v17 = vmul.bf16 %v4084_v6, %v3681_v40 }
  0x79   : > { %1532 = vrot.lane.b32.xlu1 %v3012_v31, %s3391_s30  ;;  %987 = vrot.lane.b32.xlu0 %v2960_v29, %s3393_s11  ;;  %v928_v29 = vor.u32 %v927_v13, %v926_v16  ;;  %v933_v31 = vrot.slane %v912_v61, 6  ;;  %v1135_v61 = vrot.slane %v3968_v32, 6  ;;  %v1100_v16 = vrot.slane %v1098_v27, 4 }
  0x7a   : > { %v3021_v60 = vcombine.low %v1479_v39, %v1479_v39 }
  0x7b   : > { %v934_v45 = vor.u32 %v933_v31, %v932_v33  ;;  %v4049_v11 = vsel %vm3605_vm11, %v2971_v63, %v1135_v61  ;;  %v1104_v27 = vor.u32 %v1103_v19, %v1100_v16  ;;  %v3019_v19 = vcombine.low %v1476_v43, %v1476_v43 }
  0x7c   : > { %5041 = vst [vmem:[#allocation9_spill] sm:$0xff] %v4049_v11 }
  0x7d   : > { %1352 = vrot.lane.b32.xlu1 %v2995_v23, %s3391_s30  ;;  %1552 = vrot.lane.b32.xlu0 %v3016_v44, %s3392_s10  ;;  %v4031_v23 = vsel %vm3605_vm11, %v2951_v12, %v940_v22  ;;  %v929_v44 = vrot.slane %v928_v29, 4  ;;  %v4067_v12 = vld [vmem:[%s3442_s25] sm:$0xf]  ;;  %v3361_v22 = vld [vmem:[%s3442_s25 + $0x4] sm:$0x3] }
  0x7e   : > { %5040 = vst [vmem:[#allocation8_spill] sm:$0xff] %v4031_v23  ;;  %v2903_v3 = vrot.slane %v4067_v12, 10  ;;  %v375_v29 = vrot.slane %v3361_v22, 6 }
  0x81   : > { %1557 = vrot.lane.b32.xlu1 %v3017_v30, %s3393_s11  ;;  %1537 = vrot.lane.b32.xlu0 %v3013_v0, %s3392_s10  ;;  %v1475_v30 = vmul.bf16 %v4031_v23, %v3934_v56  ;;  %v4045_v0 = vsel %vm3579_vm10, %v929_v44, %v934_v45  ;;  %v1105_v44 = vrot.slane %v1104_v27, 4  ;;  %v1109_v45 = vrot.slane %v1107_v35, 5  ;;  %v4106_v27 = vld [vmem:[%s3434_s20] sm:$0xf] }
  0x82   : > { %v1284_v36 = vmul.bf16 %v4045_v0, %v3957_v21 }
  0x83   : > { %v3018_v42 = vcombine.low %v1475_v30, %v1475_v30  ;;  %v1285_v30 = vmul.bf16 %v4031_v23, %v3957_v21 }
  0x85   : > { %1357 = vrot.lane.b32.xlu1 %v2996_v20, %s3392_s10  ;;  %1337 = vrot.lane.b32.xlu0 %v2992_v41, %s3391_s30  ;;  %v1480_v20 = vmul.bf16 %v4049_v11, %v3934_v56  ;;  %v4064_v41 = vld [vmem:[%s3442_s25 + $0x40] sm:$0xf] }
  0x86   : > { %v1481_v31 = vmul.bf16 %v4064_v41, %v3934_v56  ;;  %v4993_v63 = vshrl.u32 %v4064_v41, 16  ;;  %v4992_v61 = vshll.u32 %v4064_v41, 16 }
  0x87   : > { %v3022_v39 = vcombine.low %v1480_v20, %v1480_v20 }
  0x88   : > { %v768_v49 = vpop.permute.xlu0 %767  ;;  %v4035_v55 = vpop.permute.xlu1 %569  ;;  %v3023_v16 = vcombine.low %v1481_v31, %v1481_v31  ;;  %v4112_v31 = vld [vmem:[%s3442_s25 + $0x44] sm:$0x3] }
  0x89   : > { %1342 = vrot.lane.b32.xlu1 %v2993_v2, %s3392_s10  ;;  %1542 = vrot.lane.b32.xlu0 %v3014_v37, %s3393_s11  ;;  %v3001_v37 = vcombine.low %v1284_v36, %v1284_v36  ;;  %v1298_v36 = vrot.slane %v4992_v61, 5  ;;  %v1330_v40 = vrot.slane %v4112_v31, 6 }
  0x8c   : > { %v4055_v53 = vpop.permute.xlu0 %757  ;;  %v778_v13 = vpop.permute.xlu1 %777 }
  0x8d   : > { %1577 = vrot.lane.b32.xlu1 %v3021_v60, %s3391_s30  ;;  %1362 = vrot.lane.b32.xlu0 %v2997_v58, %s3393_s11  ;;  %v690_v60 = vmul.bf16 %v4084_v6, %v3708_v57  ;;  %v376_v58 = vsel %vm3605_vm11, %v2903_v3, %v375_v29  ;;  %v1280_v57 = vmul.bf16 %v3885_v14, %v3957_v21 }
  0x8e   : > { %v378_v3 = vmul.bf16 %v4106_v27, %v376_v58  ;;  %v1281_v29 = vmul.bf16 %v3898_v18, %v3957_v21  ;;  %v4123_v18 = vld [vmem:[%s3434_s20 + $0x1c] sm:$0xf] }
  0x8f   : > { %v818_v20 = vsel %vm611_vm12, %v690_v60, %v768_v49  ;;  %v2998_v60 = vcombine.low %v1280_v57, %v1280_v57 }
  0x90   : > { %v580_v33 = vpop.permute.xlu0 %579  ;;  %v4075_v2 = vpop.permute.xlu1 %559 }
  0x91   : > { %1562 = vrot.lane.b32.xlu1 %v3018_v42, %s3391_s30  ;;  %1347 = vrot.lane.b32.xlu0 %v2994_v47, %s3393_s11  ;;  %v4098_v47 = vsel %vm3539_vm9, %v1105_v44, %v1109_v45  ;;  %v1295_v42 = vrot.slane %v4993_v63, 4  ;;  %v3002_v44 = vcombine.low %v1285_v30, %v1285_v30  ;;  %v4997_v63 = vshll.u32 %v4112_v31, 16 }
  0x92   : > { %v1477_v58 = vmul.bf16 %v4098_v47, %v3934_v56  ;;  %v1861_v56 = vmul.bf16 %v4064_v41, %v4123_v18 }
  0x93   : > { %v1299_v61 = vor.u32 %v1298_v36, %v1295_v42 }
  0x94   : > { %v3020_v42 = vcombine.low %v1477_v58, %v1477_v58  ;;  %v4157_v58 = vld [vmem:[%s3434_s20 + $0x18] sm:$0xf] }
  0x95   : > { %1382 = vrot.lane.b32.xlu1 %v3001_v37, %s3391_s30  ;;  %1582 = vrot.lane.b32.xlu0 %v3022_v39, %s3392_s10  ;;  %v753_v35 = vpop.permute.xlu0 %752  ;;  %v3364_v37 = vld [vmem:[%s3442_s25 + $0x8] sm:$0xf]  ;;  %v1300_v36 = vrot.slane %v1299_v61, 4 }
  0x96   : > { %v686_v39 = vmul.bf16 %v3364_v37, %v4084_v6 }
  0x97   : > { %v773_v22 = vpop.permute.xlu1 %772 }
  0x98   : > { %v820_v43 = vsel %vm615_vm13, %v818_v20, %v773_v22  ;;  %v623_v20 = vsel %vm611_vm12, %v378_v3, %v4035_v55  ;;  %v1304_v3 = vrot.slane %v4997_v63, 5  ;;  %v1320_v63 = vshrl.u32 %v4112_v31, 16 }
  0x99   : > { %v822_v45 = vsel %vm618_vm14, %v820_v43, %v778_v13  ;;  %1587 = vrot.lane.b32.xlu1 %v3023_v16, %s3393_s11  ;;  %1567 = vrot.lane.b32.xlu0 %v3019_v19, %s3392_s10  ;;  %v555_v49 = vpop.permute.xlu0 %554  ;;  %v324_v13 = vmul.bf16 %v4106_v27, %v4067_v12  ;;  %v2999_v16 = vcombine.low %v1281_v29, %v1281_v29  ;;  %v2990_v43 = vrot.slane %v4064_v41, 9 }
  0x9a   : > { %v811_v19 = vsel %vm611_vm12, %v686_v39, %v753_v35  ;;  %v2059_v22 = vrot.slane %v822_v45, 4  ;;  %v1286_v12 = vmul.bf16 %v3946_v28, %v3957_v21 }
  0x9b   : > { %v575_v30 = vpop.permute.xlu1 %574  ;;  %v813_v37 = vsel %vm615_vm13, %v811_v19, %v4055_v53  ;;  %v614_v61 = vsel %vm611_vm12, %v324_v13, %v555_v49  ;;  %v1312_v53 = vrot.slane %v4112_v31, 5  ;;  %v4165_v49 = vsel %vm3539_vm9, %v1300_v36, %v1304_v3  ;;  %v4169_v19 = vld [vmem:[%s3442_s25 + $0x4c] sm:$0x3] }
  0x9c   : > { %v625_v57 = vsel %vm615_vm13, %v623_v20, %v575_v30  ;;  %v3003_v20 = vcombine.low %v1286_v12, %v1286_v12  ;;  %v2970_v30 = vrot.slane %v3946_v28, 9  ;;  %5042 = vst [vmem:[#allocation10_spill] sm:$0xff] %v4165_v49  ;;  %v1117_v13 = vrot.slane %v3968_v32, 5 }
  0x9d   : > { %1387 = vrot.lane.b32.xlu1 %v3002_v44, %s3392_s10  ;;  %1367 = vrot.lane.b32.xlu0 %v2998_v60, %s3391_s30  ;;  %v627_v55 = vsel %vm618_vm14, %v625_v57, %v580_v33  ;;  %v1282_v33 = vmul.bf16 %v3963_v24, %v3957_v21  ;;  %v4150_v44 = vld [vmem:[%s3442_s25 + $0x48] sm:$0xf]  ;;  %v1857_v60 = vmul.bf16 %v4098_v47, %v4123_v18 }
  0x9e   : > { %v2112_v35 = vsel %vm2107_vm15, %v627_v55, %v2059_v22  ;;  %v3055_v21 = vcombine.low %v1861_v56, %v1861_v56  ;;  %v4996_v57 = vshrl.u32 %v4150_v44, 16  ;;  %v4995_v22 = vshll.u32 %v4150_v44, 16 }
  0x9f   : > { %2532 = vmatprep.mubr.bf16.mxu0 %v2112_v35  ;;  %v4142_v29 = vpop.permute.xlu1 %797  ;;  %v763_v39 = vpop.permute.xlu0 %762  ;;  %v617_v56 = vsel %vm615_vm13, %v614_v61, %v4075_v2  ;;  %v1666_v12 = vmul.bf16 %v3946_v28, %v4157_v58  ;;  %v3052_v36 = vcombine.low %v1857_v60, %v1857_v60  ;;  %v3000_v32 = vcombine.low %v1282_v33, %v1282_v33 }
  0xa0   : > { %v815_v45 = vsel %vm618_vm14, %v813_v37, %v763_v39  ;;  %v4182_v3 = vsel %vm3450_vm2, %v2990_v43, %v1312_v53  ;;  %v1862_v2 = vmul.bf16 %v4165_v49, %v4123_v18  ;;  %v4994_v39 = vshll.u32 %v4169_v19, 16 }
  0xa1   : > { %1372 = vrot.lane.b32.xlu1 %v2999_v16, %s3392_s10  ;;  %1572 = vrot.lane.b32.xlu0 %v3020_v42, %s3393_s11  ;;  %v2058_v55 = vrot.slane %v815_v45, 4  ;;  %5043 = vst [vmem:[#allocation11_spill] sm:$0xff] %v4182_v3  ;;  %v1515_v28 = vshrl.u32 %v4169_v19, 16  ;;  %v4193_v33 = vsel %vm3450_vm2, %v2970_v30, %v1117_v13  ;;  %v1511_v43 = vrot.slane %v4996_v57, 5 }
  0xa2   : > { %v1512_v61 = vrot.slane %v4995_v22, 6  ;;  %v3035_v53 = vcombine.low %v1666_v12, %v1666_v12  ;;  %v1858_v30 = vmul.bf16 %v4193_v33, %v4123_v18  ;;  %v698_v12 = vmul.bf16 %v4084_v6, %v3826_v52 }
  0xa3   : > { %v4173_v16 = vpop.permute.xlu1 %782  ;;  %v565_v42 = vpop.permute.xlu0 %564  ;;  %v1517_v13 = vrot.slane %v1515_v28, 5  ;;  %v5045_v22 = vshll.u32 %v4064_v41, 16 }
  0xa4   : > { %v620_v35 = vsel %vm618_vm14, %v617_v56, %v565_v42  ;;  %v1513_v42 = vor.u32 %v1512_v61, %v1511_v43  ;;  %v5044_v43 = vshrl.u32 %v4064_v41, 16 }
  0xa5   : > { %1937 = vrot.lane.b32.xlu1 %v3055_v21, %s3391_s30  ;;  %1392 = vrot.lane.b32.xlu0 %v3003_v20, %s3393_s11  ;;  %v2109_v37 = vsel %vm2107_vm15, %v620_v35, %v2058_v55  ;;  %v1863_v21 = vmul.bf16 %v4182_v3, %v4123_v18  ;;  %v3056_v20 = vcombine.low %v1862_v2, %v1862_v2  ;;  %v1518_v55 = vrot.slane %v4994_v39, 6 }
  0xa6   : > { %2533 = vmatmul.mubr.bf16.vlgmr.msra.gmra.mxu0 %v2109_v37  ;;  %v1667_v37 = vmul.bf16 %v4098_v47, %v4157_v58  ;;  %v3053_v2 = vcombine.low %v1858_v30, %v1858_v30  ;;  %v1514_v39 = vrot.slane %v1513_v42, 4  ;;  %v1316_v61 = vrot.slane %v5044_v43, 5 }
  0xa7   : > { %v600_v45 = vpop.permute.xlu1 %599  ;;  %v803_v60 = vpop.permute.xlu0 %802  ;;  %v1519_v28 = vor.u32 %v1518_v55, %v1517_v13  ;;  %v1317_v57 = vrot.slane %v5045_v22, 6  ;;  %v1859_v30 = vmul.bf16 %v4019_v46, %v4123_v18  ;;  %v2991_v13 = vrot.slane %v4064_v41, 10 }
  0xa8   : > { %v5046_v55 = vshll.u32 %v4112_v31, 16  ;;  %v1322_v46 = vrot.slane %v1320_v63, 5  ;;  %v415_v31 = vmul.bf16 %v4106_v27, %v3643_v15  ;;  %v825_v15 = vsel %vm611_vm12, %v694_v17, %v4173_v16 }
  0xa9   : > { %1922 = vrot.lane.b32.xlu1 %v3052_v36, %s3391_s30  ;;  %1377 = vrot.lane.b32.xlu0 %v3000_v32, %s3393_s11  ;;  %v1662_v36 = vmul.bf16 %v3963_v24, %v4157_v58  ;;  %v3057_v32 = vcombine.low %v1863_v21, %v1863_v21  ;;  %v3036_v21 = vcombine.low %v1667_v37, %v1667_v37 }
  0xaa   : > { %v1323_v42 = vrot.slane %v5046_v55, 6  ;;  %v4238_v37 = vsel %vm3579_vm10, %v1514_v39, %v1519_v28  ;;  %v1318_v43 = vor.u32 %v1317_v57, %v1316_v61  ;;  %v1668_v24 = vmul.bf16 %v4193_v33, %v4157_v58 }
  0xab   : > { %v808_v56 = vpop.permute.xlu1 %807  ;;  %v788_v35 = vpop.permute.xlu0 %787  ;;  %v3032_v22 = vcombine.low %v1662_v36, %v1662_v36  ;;  %v1869_v63 = vmul.bf16 %v4238_v37, %v4123_v18  ;;  %v4252_v57 = vsel %vm3605_vm11, %v2991_v13, %v1330_v40  ;;  %v3011_v39 = vrot.slane %v4150_v44, 10 }
  0xac   : > { %5047 = vst [vmem:[#allocation12_spill] sm:$0xff] %v4252_v57  ;;  %v1324_v28 = vor.u32 %v1323_v42, %v1322_v46  ;;  %v3037_v13 = vcombine.low %v1668_v24, %v1668_v24  ;;  %v1865_v17 = vmul.bf16 %v4252_v57, %v4123_v18  ;;  %v1664_v16 = vmul.bf16 %v4045_v0, %v4157_v58 }
  0xad   : > { %1742 = vrot.lane.b32.xlu1 %v3035_v53, %s3391_s30  ;;  %1942 = vrot.lane.b32.xlu0 %v3056_v20, %s3392_s10  ;;  %v446_v53 = vmul.bf16 %v4106_v27, %v3491_v25  ;;  %v1663_v20 = vmul.bf16 %v3974_v5, %v4157_v58  ;;  %v832_v25 = vsel %vm611_vm12, %v698_v12, %v4142_v29  ;;  %v1319_v12 = vrot.slane %v1318_v43, 4 }
  0xae   : > { %v3054_v29 = vcombine.low %v1859_v30, %v1859_v30  ;;  %v3061_v46 = vcombine.low %v1869_v63, %v1869_v63  ;;  %v5050_v42 = vshll.u32 %v4150_v44, 16  ;;  %v3034_v63 = vcombine.low %v1664_v16, %v1664_v16 }
  0xaf   : > { %v605_v3 = vpop.permute.xlu1 %604  ;;  %v585_v23 = vpop.permute.xlu0 %584  ;;  %v3033_v55 = vcombine.low %v1663_v20, %v1663_v20 }
  0xb0   : > { %v1493_v43 = vrot.slane %v5050_v42, 5  ;;  %v3343_v42 = vld [vmem:[%s4990_s2 + $0x138] sm:$0xff]  }
  0xb1   : > { %1947 = vrot.lane.b32.xlu1 %v3057_v32, %s3393_s11  ;;  %1927 = vrot.lane.b32.xlu0 %v3053_v2, %s3392_s10  ;;  %v834_v32 = vsel %vm615_vm13, %v832_v25, %v803_v60  ;;  %v1525_v60 = vrot.slane %v4169_v19, 6 }
  0xb2   : > { %v836_v5 = vsel %vm618_vm14, %v834_v32, %v808_v56  ;;  %v637_v56 = vsel %vm611_vm12, %v446_v53, %v600_v45  ;;  %v4279_v45 = vsel %vm3579_vm10, %v1319_v12, %v1324_v28 }
  0xb3   : > { %v590_v2 = vpop.permute.xlu1 %589  ;;  %v793_v36 = vpop.permute.xlu0 %792  ;;  %v2061_v61 = vrot.slane %v836_v5, 4  ;;  %v639_v20 = vsel %vm615_vm13, %v637_v56, %v605_v3  ;;  %v4274_v24 = vsel %vm3605_vm11, %v3011_v39, %v1525_v60  ;;  %v630_v3 = vsel %vm611_vm12, %v415_v31, %v585_v23  ;;  %5048 = vst [vmem:[#allocation13_spill] sm:$0xff] %v4279_v45 }
  0xb4   : > { %v632_v32 = vsel %vm615_vm13, %v630_v3, %v590_v2  ;;  %v3058_v31 = vcombine.low %v1865_v17, %v1865_v17  ;;  %v1674_v60 = vmul.bf16 %v4279_v45, %v4157_v58  ;;  %v1870_v2 = vmul.bf16 %v4274_v24, %v4123_v18 }
  0xb5   : > { %1747 = vrot.lane.b32.xlu1 %v3036_v21, %s3392_s10  ;;  %1727 = vrot.lane.b32.xlu0 %v3032_v22, %s3391_s30  ;;  %v827_v21 = vsel %vm615_vm13, %v825_v15, %v788_v35  ;;  %v5049_v35 = vshrl.u32 %v4150_v44, 16  ;;  %v4297_v15 = vld [vmem:[%s3442_s25 + $0x50] sm:$0xf] }
  0xb6   : > { %v829_v40 = vsel %vm618_vm14, %v827_v21, %v793_v36  ;;  %v3041_v21 = vcombine.low %v1674_v60, %v1674_v60 }
  0xb7   : > { %v4261_v30 = vpop.permute.xlu1 %1157  ;;  %v610_v22 = vpop.permute.xlu0 %609  ;;  %v1490_v53 = vrot.slane %v5049_v35, 4  ;;  %v2060_v36 = vrot.slane %v829_v40, 4  ;;  %v5051_v40 = vshll.u32 %v4169_v19, 16  ;;  %v1675_v35 = vmul.bf16 %v4252_v57, %v4157_v58 }
  0xb8   : > { %v641_v25 = vsel %vm618_vm14, %v639_v20, %v610_v22  ;;  %v3062_v20 = vcombine.low %v1870_v2, %v1870_v2  ;;  %v1866_v22 = vmul.bf16 %v4150_v44, %v4123_v18 }
  0xb9   : > { %1732 = vrot.lane.b32.xlu1 %v3033_v55, %s3392_s10  ;;  %1932 = vrot.lane.b32.xlu0 %v3054_v29, %s3393_s11  ;;  %v2118_v5 = vsel %vm2107_vm15, %v641_v25, %v2061_v61  ;;  %v1494_v56 = vor.u32 %v1493_v43, %v1490_v53  ;;  %v1871_v61 = vmul.bf16 %v4297_v15, %v4123_v18  ;;  %v1499_v25 = vrot.slane %v5051_v40, 5  ;;  %v4320_v43 = vld [vmem:[%s3434_s20 + $0xc] sm:$0xf] }
  0xba   : > { %2597 = vmatprep.mubr.bf16.mxu1 %v2118_v5  ;;  %v3059_v3 = vcombine.low %v1866_v22, %v1866_v22  ;;  %v1670_v53 = vmul.bf16 %v4049_v11, %v4157_v58  ;;  %v885_v22 = vmul.bf16 %v3630_v9, %v3789_v59 }
  0xbb   : > { %v4286_v55 = vpop.permute.xlu1 %1142  ;;  %v595_v29 = vpop.permute.xlu0 %594  ;;  %v3063_v5 = vcombine.low %v1871_v61, %v1871_v61 }
  0xbc   : > { %v634_v23 = vsel %vm618_vm14, %v632_v32, %v595_v29  ;;  %v1080_v32 = vmul.bf16 %v4320_v43, %v3676_v38  ;;  %v3038_v60 = vcombine.low %v1670_v53, %v1670_v53  ;;  %v1671_v53 = vmul.bf16 %v4064_v41, %v4157_v58 }
  0xbd   : > { %1967 = vrot.lane.b32.xlu1 %v3061_v46, %s3391_s30  ;;  %1752 = vrot.lane.b32.xlu0 %v3037_v13, %s3393_s11  ;;  %v2115_v39 = vsel %vm2107_vm15, %v634_v23, %v2060_v36  ;;  %v1495_v13 = vrot.slane %v1494_v56, 4  ;;  %v3342_v46 = vld [vmem:[%s4990_s2 + $0x178] sm:$0xff]   ;;  %v3345_v56 = vld [vmem:[%s4990_s2 + $0x130] sm:$0xff]  }
  0xbe   : > { %2598 = vmatmul.mubr.bf16.vlgmr.msra.gmra.mxu1 %v2115_v39  ;;  %3224 = vmatprep.subr.bf16.mxu0 %v3342_v46  ;;  %v3042_v39 = vcombine.low %v1675_v35, %v1675_v35  ;;  %v1208_v61 = vsel %vm611_vm12, %v1080_v32, %v4261_v30  ;;  %v3346_v35 = vld [vmem:[%s4990_s2 + $0x168] sm:$0xff]  }
  0xbf   : > { %v963_v12 = vpop.permute.xlu1 %962  ;;  %v1163_v28 = vpop.permute.xlu0 %1162  ;;  %v4326_v36 = vsel %vm3539_vm9, %v1495_v13, %v1499_v25  ;;  %3282 = vmatprep.subr.bf16.mxu1 %v3342_v46  ;;  %3225 = vmatpush3.bf16.msra.mxu0 %v3343_v42  ;;  %v3367_v46 = vld [vmem:[%s3442_s25 + $0x10] sm:$0xf] }
  0xc0   : > { %5052 = vst [vmem:[#allocation14_spill] sm:$0xff] %v4326_v36  ;;  %3290 = vmatpush3.bf16.msra.mxu1 %v3343_v42  ;;  %v1867_v2 = vmul.bf16 %v4326_v36, %v4123_v18  ;;  %v1210_v13 = vsel %vm615_vm13, %v1208_v61, %v1163_v28  ;;  %v881_v30 = vmul.bf16 %v3367_v46, %v3789_v59  ;;  %v3347_v59 = vld [vmem:[%s4990_s2 + $0x128] sm:$0xff]  }
  0xc1   : > { %1952 = vrot.lane.b32.xlu1 %v3058_v31, %s3391_s30  ;;  %1737 = vrot.lane.b32.xlu0 %v3034_v63, %s3393_s11  ;;  %v722_v31 = vmul.bf16 %v4084_v6, %v3918_v62  ;;  %v3344_v63 = vld [vmem:[%s4990_s2 + $0x170] sm:$0xff]   ;;  %v1676_v28 = vmul.bf16 %v4150_v44, %v4157_v58  ;;  %v1013_v32 = vsel %vm611_vm12, %v885_v22, %v963_v12 }
  0xc2   : > { %3226 = vmatprep.subr.bf16.mxu0 %v3344_v63  ;;  %3283 = vmatprep.subr.bf16.mxu1 %v3344_v63  ;;  %v3060_v9 = vcombine.low %v1867_v2, %v1867_v2  ;;  %v3039_v22 = vcombine.low %v1671_v53, %v1671_v53  ;;  %v1672_v53 = vmul.bf16 %v4165_v49, %v4157_v58 }
  0xc3   : > { %v1168_v17 = vpop.permute.xlu1 %1167  ;;  %v1148_v16 = vpop.permute.xlu0 %1147  ;;  %3227 = vmatpush3.bf16.msra.mxu0 %v3345_v56 }
  0xc4   : > { %3291 = vmatpush3.bf16.msra.mxu1 %v3345_v56  ;;  %3228 = vmatprep.subr.bf16.mxu0 %v3346_v35  ;;  %v703_v56 = vmul.bf16 %v4084_v6, %v3807_v10 }
  0xc5   : > { %1772 = vrot.lane.b32.xlu1 %v3041_v21, %s3391_s30  ;;  %1972 = vrot.lane.b32.xlu0 %v3062_v20, %s3392_s10  ;;  %v3366_v21 = vld [vmem:[%s3442_s25 + $0x18] sm:$0xf] }
  0xc6   : > { %v1076_v20 = vmul.bf16 %v3366_v21, %v4320_v43  ;;  %3284 = vmatprep.subr.bf16.mxu1 %v3346_v35 }
  0xc7   : > { %v968_v29 = vpop.permute.xlu1 %967  ;;  %v948_v23 = vpop.permute.xlu0 %947  ;;  %3229 = vmatpush3.bf16.msra.mxu0 %v3347_v59 }
  0xc8   : > { %v1201_v42 = vsel %vm611_vm12, %v1076_v20, %v4286_v55  ;;  %v1015_v41 = vsel %vm615_vm13, %v1013_v32, %v968_v29  ;;  %3292 = vmatpush3.bf16.msra.mxu1 %v3347_v59  ;;  %v3043_v20 = vcombine.low %v1676_v28, %v1676_v28  ;;  %v2944_v32 = vcombine.low %v703_v56, %v703_v56 }
  0xc9   : > { %1977 = vrot.lane.b32.xlu1 %v3063_v5, %s3393_s11  ;;  %1957 = vrot.lane.b32.xlu0 %v3059_v3, %s3392_s10  ;;  %v1212_v5 = vsel %vm618_vm14, %v1210_v13, %v1168_v17  ;;  %v2947_v3 = vcombine.low %v722_v31, %v722_v31  ;;  %v4360_v17 = vld [vmem:[%s3442_s25 + $0x58] sm:$0xf]  ;;  %v730_v31 = vmul.bf16 %v4084_v6, %v3982_v34  ;;  %v3349_v13 = vld [vmem:[%s4990_s2 + $0x120] sm:$0xff]   ;;  %v1686_v56 = vshll.u32 %v4297_v15, 16 }
  0xca   : > { %5053 = vst [vmem:[#allocation15_spill] sm:$0xff] %v4360_v17  ;;  %v2073_v63 = vrot.slane %v1212_v5, 4  ;;  %v5011_v61 = vshrl.u32 %v4360_v17, 16  ;;  %v5009_v21 = vshll.u32 %v4360_v17, 16 }
  0xcb   : > { %v953_v40 = vpop.permute.xlu1 %952  ;;  %v1153_v25 = vpop.permute.xlu0 %1152 }
  0xcd   : > { %1777 = vrot.lane.b32.xlu1 %v3042_v39, %s3392_s10  ;;  %1757 = vrot.lane.b32.xlu0 %v3038_v60, %s3391_s30  ;;  %v1203_v39 = vsel %vm615_vm13, %v1201_v42, %v1148_v16  ;;  %v3348_v16 = vld [vmem:[%s4990_s2 + $0x160] sm:$0xff]   ;;  %v2948_v42 = vcombine.low %v730_v31, %v730_v31  ;;  %v1683_v31 = vshrl.u32 %v4297_v15, 16 }
  0xce   : > { %v1205_v55 = vsel %vm618_vm14, %v1203_v39, %v1153_v25  ;;  %v1006_v25 = vsel %vm611_vm12, %v881_v30, %v948_v23  ;;  %3230 = vmatprep.subr.bf16.mxu0 %v3348_v16  ;;  %3285 = vmatprep.subr.bf16.mxu1 %v3348_v16  ;;  %v1880_v23 = vrot.slane %v5011_v61, 4  ;;  %v3350_v30 = vld [vmem:[%s4990_s2 + $0x158] sm:$0xff]   ;;  %v4473_v61 = vmul.bf16 %v4084_v6, %v3869_v1 }
  0xcf   : > { %v4372_v60 = vpop.permute.xlu1 %1187  ;;  %v973_v2 = vpop.permute.xlu0 %972  ;;  %v1008_v5 = vsel %vm615_vm13, %v1006_v25, %v953_v40  ;;  %v2072_v46 = vrot.slane %v1205_v55, 4  ;;  %3231 = vmatpush3.bf16.msra.mxu0 %v3349_v13  ;;  %v1883_v40 = vrot.slane %v5009_v21, 5  ;;  %3293 = vmatpush3.bf16.msra.mxu1 %v3349_v13  ;;  %v3351_v39 = vld [vmem:[%s4990_s2 + $0x118] sm:$0xff]   ;;  %v704_v13 = vmul.bf16 %v4084_v6, %v3881_v51  ;;  %v3353_v25 = vld [vmem:[%s4990_s2 + $0x110] sm:$0xff]  }
  0xd0   : > { %v1017_v12 = vsel %vm618_vm14, %v1015_v41, %v973_v2  ;;  %3232 = vmatprep.subr.bf16.mxu0 %v3350_v30  ;;  %3286 = vmatprep.subr.bf16.mxu1 %v3350_v30  ;;  %v4452_v30 = vmul.bf16 %v4106_v27, %v3612_v50 }
  0xd1   : > { %855 = vrot.lane.b32.xlu1 %v2947_v3, %s3391_s30  ;;  %1962 = vrot.lane.b32.xlu0 %v3060_v9, %s3393_s11  ;;  %v2133_v29 = vsel %vm2107_vm15, %v1017_v12, %v2073_v63  ;;  %v524_v9 = vmul.bf16 %v4106_v27, %v3795_v7  ;;  %v4409_v63 = vld [vmem:[%s3442_s25 + $0x5c] sm:$0x3]  ;;  %v1884_v12 = vor.u32 %v1883_v40, %v1880_v23 }
  0xd2   : > { %2540 = vmatprep.mubr.bf16.mxu0 %v2133_v29  ;;  %v5010_v16 = vshll.u32 %v4409_v63, 16  ;;  %v3352_v29 = vld [vmem:[%s4990_s2 + $0x150] sm:$0xff]   ;;  %v489_v40 = vmul.bf16 %v4106_v27, %v3826_v52  ;;  %v2945_v21 = vcombine.low %v704_v13, %v704_v13  ;;  %v3030_v52 = vrot.slane %v4297_v15, 9 }
  0xd3   : > { %v4391_v35 = vpop.permute.xlu1 %1172  ;;  %v958_v3 = vpop.permute.xlu0 %957  ;;  %v2927_v55 = vcombine.low %v524_v9, %v524_v9  ;;  %3233 = vmatpush3.bf16.msra.mxu0 %v3351_v39  ;;  %3294 = vmatpush3.bf16.msra.mxu1 %v3351_v39  ;;  %v4442_v9 = vld [vmem:[%s3434_s20 + $0x8] sm:$0xf]  ;;  %v1685_v39 = vrot.slane %v1683_v31, 4 }
  0xd4   : > { %v1010_v28 = vsel %vm618_vm14, %v1008_v5, %v958_v3  ;;  %v1088_v5 = vmul.bf16 %v4320_v43, %v3982_v34  ;;  %3234 = vmatprep.subr.bf16.mxu0 %v3352_v29  ;;  %3287 = vmatprep.subr.bf16.mxu1 %v3352_v29  ;;  %v1688_v29 = vrot.slane %v1686_v56, 5  ;;  %v2924_v13 = vcombine.low %v489_v40, %v489_v40  ;;  %v3356_v40 = vld [vmem:[%s4990_s2 + $0x140] sm:$0xff]  }
  0xd5   : > { %1782 = vrot.lane.b32.xlu1 %v3043_v20, %s3393_s11  ;;  %1762 = vrot.lane.b32.xlu0 %v3039_v22, %s3392_s10  ;;  %v2130_v59 = vsel %vm2107_vm15, %v1010_v28, %v2072_v46  ;;  %v3040_v20 = vcombine.low %v1672_v53, %v1672_v53  ;;  %v742_v22 = vmul.bf16 %v4084_v6, %v3857_v8  ;;  %v3354_v28 = vld [vmem:[%s4990_s2 + $0x148] sm:$0xff]  }
  0xd6   : > { %2541 = vmatmul.mubr.bf16.gmra.mxu0 %v2130_v59  ;;  %v4437_v46 = vmul.bf16 %v4106_v27, %v3807_v10  ;;  %v4455_v59 = vld [vmem:[%s3442_s25 + $0x54] sm:$0x3]  ;;  %v1689_v62 = vor.u32 %v1688_v29, %v1685_v39  ;;  %v1707_v39 = vrot.slane %v1686_v56, 6  ;;  %v3357_v29 = vld [vmem:[%s4990_s2 + $0x100] sm:$0xff]  }
  0xd7   : > { %v4414_v41 = vpop.permute.xlu1 %992  ;;  %v4416_v2 = vpop.permute.xlu0 %1192  ;;  %3235 = vmatpush3.bf16.msra.mxu0 %v3353_v25  ;;  %3295 = vmatpush3.bf16.msra.mxu1 %v3353_v25  ;;  %v2949_v3 = vcombine.low %v742_v22, %v742_v22  ;;  %v2925_v25 = vcombine.low %v4452_v30, %v4452_v30  ;;  %v1692_v7 = vshll.u32 %v4455_v59, 16  ;;  %v5055_v30 = vshll.u32 %v4360_v17, 16 }
  0xd8   : > { %3236 = vmatprep.subr.bf16.mxu0 %v3354_v28  ;;  %3288 = vmatprep.subr.bf16.mxu1 %v3354_v28  ;;  %v5054_v28 = vshrl.u32 %v4360_v17, 16 }
  0xd9   : > { %860 = vrot.lane.b32.xlu1 %v2948_v42, %s3392_s10  ;;  %840 = vrot.lane.b32.xlu0 %v2944_v32, %s3391_s30  ;;  %v1885_v42 = vrot.slane %v1884_v12, 4  ;;  %v1889_v32 = vrot.slane %v5010_v16, 5  ;;  %v3355_v12 = vld [vmem:[%s4990_s2 + $0x108] sm:$0xff]   ;;  %v2928_v16 = vcombine.low %v4437_v46, %v4437_v46  ;;  %v1702_v46 = vrot.slane %v4455_v59, 5 }
  0xda   : > { %v1901_v57 = vrot.slane %v5054_v28, 5  ;;  %v1902_v11 = vrot.slane %v5055_v30, 6  ;;  %v1222_v28 = vsel %vm611_vm12, %v1088_v5, %v4372_v60  ;;  %v3050_v60 = vrot.slane %v4360_v17, 9 }
  0xdb   : > { %v1198_v53 = vpop.permute.xlu1 %1197  ;;  %v4446_v23 = vpop.permute.xlu0 %1177  ;;  %3237 = vmatpush3.bf16.msra.mxu0 %v3355_v12  ;;  %v1890_v6 = vsel %vm3539_vm9, %v1885_v42, %v1889_v32  ;;  %3296 = vmatpush3.bf16.msra.mxu1 %v3355_v12  ;;  %v1905_v42 = vshrl.u32 %v4409_v63, 16  ;;  %v1706_v32 = vrot.slane %v1683_v31, 5  ;;  %v2946_v12 = vcombine.low %v4473_v61, %v4473_v61 }
  0xdc   : > { %3238 = vmatprep.subr.bf16.mxu0 %v3356_v40  ;;  %3289 = vmatprep.subr.bf16.mxu1 %v3356_v40  ;;  %v1224_v31 = vsel %vm615_vm13, %v1222_v28, %v4416_v2  ;;  %v4512_v45 = vsel %vm3450_vm2, %v3030_v52, %v1702_v46  ;;  %v1897_v61 = vrot.slane %v4409_v63, 5  ;;  %v1694_v49 = vrot.slane %v1692_v7, 5 }
  0xdd   : > { %660 = vrot.lane.b32.xlu1 %v2927_v55, %s3391_s30  ;;  %1767 = vrot.lane.b32.xlu0 %v3040_v20, %s3393_s11  ;;  %v4477_v55 = vmul.bf16 %v4106_v27, %v3881_v51  ;;  %v1226_v5 = vsel %vm618_vm14, %v1224_v31, %v1198_v53  ;;  %v5056_v40 = vshll.u32 %v4409_v63, 16  ;;  %v1690_v2 = vrot.slane %v1689_v62, 4 }
  0xde   : > { %v1903_v52 = vor.u32 %v1902_v11, %v1901_v57  ;;  %v1907_v46 = vrot.slane %v1905_v42, 5  ;;  %v1708_v28 = vor.u32 %v1707_v39, %v1706_v32  ;;  %v5057_v17 = vmul.bf16 %v4320_v43, %v3881_v51 }
  0xdf   : > { %v998_v20 = vpop.permute.xlu1 %997  ;;  %v4479_v22 = vpop.permute.xlu0 %977  ;;  %3239 = vmatpush3.bf16.msra.mxu0 %v3357_v29  ;;  %v1908_v36 = vrot.slane %v5056_v40, 6  ;;  %3297 = vmatpush3.bf16.msra.mxu1 %v3357_v29  ;;  %v2075_v40 = vrot.slane %v1226_v5, 4  ;;  %v507_v51 = vmul.bf16 %v4106_v27, %v3676_v38  ;;  %v4550_v38 = vsel %vm3539_vm9, %v1690_v2, %v1694_v49 }
  0xe0   : > { %v1215_v53 = vsel %vm611_vm12, %v5057_v17, %v4391_v35  ;;  %v1873_v35 = vmul.bf16 %v4512_v45, %v4123_v18  ;;  %v1904_v27 = vrot.slane %v1903_v52, 4  ;;  %v1709_v39 = vrot.slane %v1708_v28, 4 }
  0xe1   : > { %865 = vrot.lane.b32.xlu1 %v2949_v3, %s3393_s11  ;;  %845 = vrot.lane.b32.xlu0 %v2945_v21, %s3392_s10  ;;  %v2929_v21 = vcombine.low %v4477_v55, %v4477_v55  ;;  %v1710_v3 = vshrl.u32 %v4455_v59, 16  ;;  %v1892_v55 = vmul.bf16 %v1890_v6, %v4123_v18  ;;  %v5058_v6 = vmul.bf16 %v4442_v9, %v3807_v10 }
  0xe2   : > { %v1217_v62 = vsel %vm615_vm13, %v1215_v53, %v4446_v23  ;;  %v1909_v32 = vor.u32 %v1908_v36, %v1907_v46  ;;  %v2926_v49 = vcombine.low %v507_v51, %v507_v51  ;;  %v1697_v36 = vmul.bf16 %v4550_v38, %v4157_v58 }
  0xe3   : > { %v983_v56 = vpop.permute.xlu1 %982  ;;  %v1183_v30 = vpop.permute.xlu0 %1182  ;;  %v1027_v29 = vsel %vm611_vm12, %v5058_v6, %v4414_v41  ;;  %v1712_v31 = vrot.slane %v1710_v3, 5  ;;  %v3067_v23 = vcombine.low %v1892_v55, %v1892_v55  ;;  %v3010_v55 = vrot.slane %v4150_v44, 9 }
  0xe4   : > { %v1029_v11 = vsel %vm615_vm13, %v1027_v29, %v998_v20  ;;  %v1219_v17 = vsel %vm618_vm14, %v1217_v62, %v1183_v30  ;;  %v5059_v20 = vmul.bf16 %v4442_v9, %v3612_v50  ;;  %v1507_v2 = vrot.slane %v4169_v19, 5 }
  0xe5   : > { %665 = vrot.lane.b32.xlu1 %v2928_v16, %s3392_s10  ;;  %645 = vrot.lane.b32.xlu0 %v2924_v13, %s3391_s30  ;;  %v1713_v16 = vrot.slane %v1692_v7, 6  ;;  %v1898_v7 = vsel %vm3450_vm2, %v3050_v60, %v1897_v61  ;;  %v2074_v3 = vrot.slane %v1219_v17, 4  ;;  %v3047_v28 = vcombine.low %v1697_v36, %v1697_v36 }
  0xe6   : > { %v1020_v42 = vsel %vm611_vm12, %v5059_v20, %v4479_v22  ;;  %v1900_v61 = vmul.bf16 %v1898_v7, %v4123_v18  ;;  %v3064_v22 = vcombine.low %v1873_v35, %v1873_v35  ;;  %v4577_v26 = vsel %vm3450_vm2, %v3010_v55, %v1507_v2 }
  0xe7   : > { %v4535_v57 = vpop.permute.xlu1 %1547  ;;  %v1003_v13 = vpop.permute.xlu0 %1002  ;;  %v3031_v44 = vrot.slane %v4297_v15, 10  ;;  %v1720_v19 = vrot.slane %v4455_v59, 6  ;;  %v1678_v4 = vmul.bf16 %v4577_v26, %v4157_v58 }
  0xe8   : > { %v1031_v10 = vsel %vm618_vm14, %v1029_v11, %v1003_v13  ;;  %v4588_v11 = vld [vmem:[%s3434_s20 + $0x14] sm:$0xf] }
  0xe9   : > { %650 = vrot.lane.b32.xlu1 %v2925_v25, %s3392_s10  ;;  %850 = vrot.lane.b32.xlu0 %v2946_v12, %s3393_s11  ;;  %v2139_v41 = vsel %vm2107_vm15, %v1031_v10, %v2075_v40  ;;  %v1714_v25 = vor.u32 %v1713_v16, %v1712_v31  ;;  %v1022_v12 = vsel %vm615_vm13, %v1020_v42, %v983_v56 }
  0xea   : > { %2605 = vmatprep.mubr.bf16.mxu1 %v2139_v41  ;;  %v1910_v56 = vsel %vm3579_vm10, %v1904_v27, %v1909_v32  ;;  %v1705_v16 = vmul.bf16 %v4512_v45, %v4157_v58  ;;  %v1470_v15 = vmul.bf16 %v4588_v11, %v3885_v14  ;;  %v4594_v59 = vsel %vm3605_vm11, %v3031_v44, %v1720_v19  ;;  %v4605_v41 = vld [vmem:[%s3442_s25 + $0x28] sm:$0xf]  ;;  %v4610_v27 = vld [vmem:[%s3434_s20 + $0x10] sm:$0xf] }
  0xeb   : > { %v1533_v30 = vpop.permute.xlu1 %1532  ;;  %v988_v60 = vpop.permute.xlu0 %987  ;;  %v1715_v5 = vsel %vm3579_vm10, %v1709_v39, %v1714_v25  ;;  %v1912_v53 = vmul.bf16 %v1910_v56, %v4123_v18  ;;  %v3044_v17 = vcombine.low %v1678_v4, %v1678_v4  ;;  %v1112_v10 = vmul.bf16 %v4320_v43, %v4098_v47  ;;  %v5061_v4 = vld [vmem:[#allocation5_spill] sm:$0xff] }
  0xec   : > { %v1024_v54 = vsel %vm618_vm14, %v1022_v12, %v988_v60  ;;  %v1874_v6 = vmul.bf16 %v1715_v5, %v4123_v18  ;;  %v3048_v51 = vcombine.low %v1705_v16, %v1705_v16  ;;  %v1875_v35 = vmul.bf16 %v4594_v59, %v4123_v18 }
  0xed   : > { %2025 = vrot.lane.b32.xlu1 %v3067_v23, %s3391_s30  ;;  %670 = vrot.lane.b32.xlu0 %v2929_v21, %s3393_s11  ;;  %v2136_v50 = vsel %vm2107_vm15, %v1024_v54, %v2074_v3  ;;  %v3068_v21 = vcombine.low %v1900_v61, %v1900_v61  ;;  %v3069_v40 = vcombine.low %v1912_v53, %v1912_v53  ;;  %v5060_v53 = vld [vmem:[#allocation6_spill] sm:$0xff] }
  0xee   : > { %2606 = vmatmul.mubr.bf16.gmra.mxu1 %v2136_v50  ;;  %v3065_v62 = vcombine.low %v1874_v6, %v1874_v6  ;;  %v1598_v7 = vsel %vm611_vm12, %v1470_v15, %v4535_v57  ;;  %v1466_v23 = vmul.bf16 %v4605_v41, %v4588_v11  ;;  %v1275_v20 = vmul.bf16 %v4610_v27, %v3869_v1 }
  0xef   : > { %v1353_v52 = vpop.permute.xlu1 %1352  ;;  %v1553_v46 = vpop.permute.xlu0 %1552  ;;  %v1717_v25 = vmul.bf16 %v1715_v5, %v4157_v58  ;;  %v2987_v57 = vcombine.low %v1112_v10, %v1112_v10  ;;  %v3066_v12 = vcombine.low %v1875_v35, %v1875_v35  ;;  %v1679_v3 = vmul.bf16 %v4238_v37, %v4157_v58 }
  0xf0   : > { %v1600_v42 = vsel %vm615_vm13, %v1598_v7, %v1553_v46  ;;  %v1591_v60 = vsel %vm611_vm12, %v1466_v23, %v1533_v30  ;;  %v1403_v54 = vsel %vm611_vm12, %v1275_v20, %v1353_v52  ;;  %v1120_v30 = vmul.bf16 %v4320_v43, %v4193_v33  ;;  %v4637_v52 = vld [vmem:[%s4990_s2 + $0x188] sm:$0xff]  }
  0xf1   : > { %2010 = vrot.lane.b32.xlu1 %v3064_v22, %s3391_s30  ;;  %655 = vrot.lane.b32.xlu0 %v2926_v49, %s3393_s11  ;;  %v4624_v49 = vld [vmem:[%s3442_s25 + $0x20] sm:$0xf]  ;;  %v3049_v46 = vcombine.low %v1717_v25, %v1717_v25  ;;  %v1093_v6 = vmul.bf16 %v4320_v43, %v5060_v53  ;;  %v917_v15 = vmul.bf16 %v4442_v9, %v5061_v4  ;;  %v5062_v23 = vld [vmem:[#allocation7_spill] sm:$0xff] }
  0xf2   : > { %v1271_v61 = vmul.bf16 %v4624_v49, %v4610_v27  ;;  %3270 = vmatprep.subr.bf16.mxu1 %v4637_v52  ;;  %v1132_v20 = vmul.bf16 %v4320_v43, %v5062_v23 }
  0xf3   : > { %v1558_v29 = vpop.permute.xlu1 %1557  ;;  %v1538_v31 = vpop.permute.xlu0 %1537  ;;  %v2967_v35 = vcombine.low %v917_v15, %v917_v15 }
  0xf4   : > { %v1602_v18 = vsel %vm618_vm14, %v1600_v42, %v1558_v29  ;;  %v1593_v22 = vsel %vm615_vm13, %v1591_v60, %v1538_v31  ;;  %v1094_v42 = vmul.bf16 %v4320_v43, %v4045_v0 }
  0xf5   : > { %1830 = vrot.lane.b32.xlu1 %v3047_v28, %s3391_s30  ;;  %2030 = vrot.lane.b32.xlu0 %v3068_v21, %s3392_s10  ;;  %v2087_v50 = vrot.slane %v1602_v18, 4  ;;  %v3045_v28 = vcombine.low %v1679_v3, %v1679_v3  ;;  %v2989_v18 = vcombine.low %v1132_v20, %v1132_v20 }
  0xf6   : > { %v2985_v25 = vcombine.low %v1094_v42, %v1094_v42 }
  0xf7   : > { %v1358_v45 = vpop.permute.xlu1 %1357  ;;  %v1338_v13 = vpop.permute.xlu0 %1337 }
  0xf8   : > { %v1405_v36 = vsel %vm615_vm13, %v1403_v54, %v1358_v45  ;;  %v1396_v44 = vsel %vm611_vm12, %v1271_v61, %v1338_v13  ;;  %v2984_v13 = vcombine.low %v1093_v6, %v1093_v6  ;;  %v899_v54 = vmul.bf16 %v4442_v9, %v3857_v8 }
  0xf9   : > { %2035 = vrot.lane.b32.xlu1 %v3069_v40, %s3393_s11  ;;  %2015 = vrot.lane.b32.xlu0 %v3065_v62, %s3392_s10  ;;  %v2988_v62 = vcombine.low %v1120_v30, %v1120_v30  ;;  %v937_v6 = vmul.bf16 %v4442_v9, %v4045_v0 }
  0xfb   : > { %v1343_v32 = vpop.permute.xlu1 %1342  ;;  %v1543_v39 = vpop.permute.xlu0 %1542 }
  0xfc   : > { %v1595_v55 = vsel %vm618_vm14, %v1593_v22, %v1543_v39  ;;  %v1398_v19 = vsel %vm615_vm13, %v1396_v44, %v1343_v32  ;;  %v5063_v22 = vld [vmem:[#allocation8_spill] sm:$0xff] }
  0xfd   : > { %1835 = vrot.lane.b32.xlu1 %v3048_v51, %s3392_s10  ;;  %1815 = vrot.lane.b32.xlu0 %v3044_v17, %s3391_s30  ;;  %v2086_v29 = vrot.slane %v1595_v55, 4  ;;  %v1680_v51 = vmul.bf16 %v4274_v24, %v4157_v58  ;;  %v925_v58 = vmul.bf16 %v4442_v9, %v5060_v53  ;;  %v1283_v55 = vmul.bf16 %v4610_v27, %v5060_v53 }
  0xff   : > { %v1578_v56 = vpop.permute.xlu1 %1577  ;;  %v1363_v5 = vpop.permute.xlu0 %1362  ;;  %v3046_v7 = vcombine.low %v1680_v51, %v1680_v51  ;;  %v2968_v61 = vcombine.low %v925_v58, %v925_v58  ;;  %v5064_v51 = vld [vmem:[#allocation11_spill] sm:$0xff] }
 0x100   : > { %v1407_v2 = vsel %vm618_vm14, %v1405_v36, %v1363_v5  ;;  %v1095_v36 = vmul.bf16 %v4320_v43, %v5063_v22 }
 0x101   : > { %1245 = vrot.lane.b32.xlu1 %v2987_v57, %s3391_s30  ;;  %2020 = vrot.lane.b32.xlu0 %v3066_v12, %s3393_s11  ;;  %v2154_v21 = vsel %vm2107_vm15, %v1407_v2, %v2087_v50  ;;  %v898_v57 = vmul.bf16 %v4442_v9, %v3982_v34  ;;  %v1478_v12 = vmul.bf16 %v4588_v11, %v4193_v33 }
 0x102   : > { %2548 = vmatprep.mubr.bf16.mxu0 %v2154_v21  ;;  %v1474_v34 = vmul.bf16 %v4588_v11, %v4045_v0  ;;  %v2986_v43 = vcombine.low %v1095_v36, %v1095_v36  ;;  %v1483_v0 = vmul.bf16 %v4588_v11, %v5064_v51 }
 0x103   : > { %v1563_v31 = vpop.permute.xlu1 %1562  ;;  %v1348_v16 = vpop.permute.xlu0 %1347  ;;  %v2964_v50 = vcombine.low %v898_v57, %v898_v57  ;;  %v1612_v5 = vsel %vm611_vm12, %v1478_v12, %v1578_v56  ;;  %v900_v56 = vmul.bf16 %v4442_v9, %v3885_v14 }
 0x104   : > { %v1400_v40 = vsel %vm618_vm14, %v1398_v19, %v1348_v16  ;;  %v1605_v53 = vsel %vm611_vm12, %v1474_v34, %v1563_v31  ;;  %v1279_v19 = vmul.bf16 %v4610_v27, %v3857_v8  ;;  %v5065_v31 = vld [vmem:[#allocation14_spill] sm:$0xff]  ;;  %v5067_v34 = vld [vmem:[#allocation13_spill] sm:$0xff] }
 0x105   : > { %1840 = vrot.lane.b32.xlu1 %v3049_v46, %s3393_s11  ;;  %1820 = vrot.lane.b32.xlu0 %v3045_v28, %s3392_s10  ;;  %v2151_v45 = vsel %vm2107_vm15, %v1400_v40, %v2086_v29  ;;  %v2965_v28 = vcombine.low %v899_v54, %v899_v54 }
 0x106   : > { %2549 = vmatmul.mubr.bf16.gmra.mxu0 %v2151_v45 }
 0x107   : > { %v1383_v17 = vpop.permute.xlu1 %1382  ;;  %v1583_v10 = vpop.permute.xlu0 %1582 }
 0x108   : > { %v1614_v2 = vsel %vm615_vm13, %v1612_v5, %v1583_v10  ;;  %v1417_v44 = vsel %vm611_vm12, %v1283_v55, %v1383_v17  ;;  %v1502_v17 = vmul.bf16 %v4588_v11, %v5065_v31  ;;  %v2966_v10 = vcombine.low %v900_v56, %v900_v56  ;;  %v5068_v56 = vld [vmem:[#allocation9_spill] sm:$0xff] }
 0x109   : > { %1250 = vrot.lane.b32.xlu1 %v2988_v62, %s3392_s10  ;;  %1230 = vrot.lane.b32.xlu0 %v2984_v13, %s3391_s30  ;;  %v1522_v5 = vmul.bf16 %v4588_v11, %v4238_v37  ;;  %v1484_v55 = vmul.bf16 %v4588_v11, %v5067_v34  ;;  %v4726_v37 = vld [vmem:[%s3434_s20 + $0x1c] sm:$0xf] }
 0x10b   : > { %v1588_v32 = vpop.permute.xlu1 %1587  ;;  %v1568_v39 = vpop.permute.xlu0 %1567 }
 0x10c   : > { %v1616_v21 = vsel %vm618_vm14, %v1614_v2, %v1588_v32  ;;  %v1607_v16 = vsel %vm615_vm13, %v1605_v53, %v1568_v39 }
 0x10d   : > { %1050 = vrot.lane.b32.xlu1 %v2967_v35, %s3391_s30  ;;  %1825 = vrot.lane.b32.xlu0 %v3046_v7, %s3393_s11  ;;  %v2089_v29 = vrot.slane %v1616_v21, 4  ;;  %v2969_v35 = vcombine.low %v937_v6, %v937_v6  ;;  %v3029_v21 = vcombine.low %v1522_v5, %v1522_v5  ;;  %v1860_v6 = vmul.bf16 %v4726_v37, %v5068_v56 }
 0x10f   : > { %v1388_v3 = vpop.permute.xlu1 %1387  ;;  %v1368_v60 = vpop.permute.xlu0 %1367 }
 0x110   : > { %v1419_v40 = vsel %vm615_vm13, %v1417_v44, %v1388_v3  ;;  %v1410_v7 = vsel %vm611_vm12, %v1279_v19, %v1368_v60  ;;  %v3027_v3 = vcombine.low %v1502_v17, %v1502_v17  ;;  %v1510_v60 = vmul.bf16 %v4588_v11, %v4577_v26 }
 0x111   : > { %1255 = vrot.lane.b32.xlu1 %v2989_v18, %s3393_s11  ;;  %1235 = vrot.lane.b32.xlu0 %v2985_v25, %s3392_s10  ;;  %v3024_v18 = vcombine.low %v1483_v0, %v1483_v0  ;;  %v5066_v25 = vld [vmem:[#allocation10_spill] sm:$0xff]  ;;  %v1289_v19 = vmul.bf16 %v4610_v27, %v5062_v23  ;;  %v4743_v0 = vld [vmem:[%s3434_s20 + $0x18] sm:$0xf] }
 0x112   : > { %v1307_v57 = vmul.bf16 %v4610_v27, %v5066_v25  ;;  %v3028_v36 = vcombine.low %v1510_v60, %v1510_v60  ;;  %v1665_v17 = vmul.bf16 %v4743_v0, %v5063_v22 }
 0x113   : > { %v1373_v46 = vpop.permute.xlu1 %1372  ;;  %v1573_v30 = vpop.permute.xlu0 %1572 }
 0x114   : > { %v1609_v45 = vsel %vm618_vm14, %v1607_v16, %v1573_v30  ;;  %v1412_v20 = vsel %vm615_vm13, %v1410_v7, %v1373_v46  ;;  %v1315_v30 = vmul.bf16 %v4610_v27, %v5064_v51 }
 0x115   : > { %1055 = vrot.lane.b32.xlu1 %v2968_v61, %s3392_s10  ;;  %1035 = vrot.lane.b32.xlu0 %v2964_v50, %s3391_s30  ;;  %v2088_v42 = vrot.slane %v1609_v45, 4  ;;  %v3007_v50 = vcombine.low %v1307_v57, %v1307_v57  ;;  %v4738_v45 = vld [vmem:[%s3442_s25 + $0x38] sm:$0xf]  ;;  %v4758_v57 = vld [vmem:[%s3442_s25 + $0x30] sm:$0xf] }
 0x116   : > { %v901_v48 = vmul.bf16 %v4758_v57, %v4442_v9 }
 0x117   : > { %v1938_v62 = vpop.permute.xlu1 %1937  ;;  %v1393_v15 = vpop.permute.xlu0 %1392 }
 0x118   : > { %v1421_v13 = vsel %vm618_vm14, %v1419_v40, %v1393_v15  ;;  %v5069_v40 = vld [vmem:[#allocation12_spill] sm:$0xff] }
 0x119   : > { %1040 = vrot.lane.b32.xlu1 %v2965_v28, %s3392_s10  ;;  %1240 = vrot.lane.b32.xlu0 %v2986_v43, %s3393_s11  ;;  %v2160_v8 = vsel %vm2107_vm15, %v1421_v13, %v2089_v29  ;;  %v3025_v28 = vcombine.low %v1484_v55, %v1484_v55  ;;  %v1288_v43 = vmul.bf16 %v4610_v27, %v4193_v33 }
 0x11a   : > { %2613 = vmatprep.mubr.bf16.mxu1 %v2160_v8  ;;  %v3008_v29 = vcombine.low %v1315_v30, %v1315_v30  ;;  %v1485_v15 = vmul.bf16 %v4588_v11, %v5069_v40  ;;  %v1988_v33 = vsel %vm611_vm12, %v1860_v6, %v1938_v62  ;;  %v1856_v13 = vmul.bf16 %v4738_v45, %v4726_v37 }
 0x11b   : > { %v1923_v32 = vpop.permute.xlu1 %1922  ;;  %v1378_v39 = vpop.permute.xlu0 %1377  ;;  %v3004_v16 = vcombine.low %v1288_v43, %v1288_v43 }
 0x11c   : > { %v1414_v58 = vsel %vm618_vm14, %v1412_v20, %v1378_v39  ;;  %v3005_v20 = vcombine.low %v1289_v19, %v1289_v19  ;;  %v3026_v62 = vcombine.low %v1485_v15, %v1485_v15  ;;  %v1327_v39 = vmul.bf16 %v4610_v27, %v5067_v34 }
 0x11d   : > { %1045 = vrot.lane.b32.xlu1 %v2966_v10, %s3393_s11  ;;  %1060 = vrot.lane.b32.xlu0 %v2969_v35, %s3393_s11  ;;  %v2157_v12 = vsel %vm2107_vm15, %v1414_v58, %v2088_v42  ;;  %v1290_v42 = vmul.bf16 %v4610_v27, %v5068_v56  ;;  %v1981_v58 = vsel %vm611_vm12, %v1856_v13, %v1923_v32 }
 0x11e   : > { %2614 = vmatmul.mubr.bf16.gmra.mxu1 %v2157_v12  ;;  %v1661_v12 = vmul.bf16 %v4758_v57, %v4743_v0 }
 0x11f   : > { %v1743_v54 = vpop.permute.xlu1 %1742  ;;  %v1943_v61 = vpop.permute.xlu0 %1942 }
 0x120   : > { %v1990_v8 = vsel %vm615_vm13, %v1988_v33, %v1943_v61 }
 0x121   : > { %1620 = vrot.lane.b32.xlu1 %v3024_v18, %s3391_s30  ;;  %1635 = vrot.lane.b32.xlu0 %v3027_v3, %s3391_s30  ;;  %v1793_v18 = vsel %vm611_vm12, %v1665_v17, %v1743_v54  ;;  %v3006_v54 = vcombine.low %v1290_v42, %v1290_v42 }
 0x123   : > { %v1948_v2 = vpop.permute.xlu1 %1947  ;;  %v1928_v46 = vpop.permute.xlu0 %1927 }
 0x124   : > { %v1992_v7 = vsel %vm618_vm14, %v1990_v8, %v1948_v2  ;;  %v1983_v60 = vsel %vm615_vm13, %v1981_v58, %v1928_v46  ;;  %v3009_v2 = vcombine.low %v1327_v39, %v1327_v39  ;;  %v1673_v8 = vmul.bf16 %v4743_v0, %v5064_v51 }
 0x125   : > { %1440 = vrot.lane.b32.xlu1 %v3007_v50, %s3391_s30  ;;  %1640 = vrot.lane.b32.xlu0 %v3028_v36, %s3392_s10  ;;  %v2101_v3 = vrot.slane %v1992_v7, 4 }
 0x127   : > { %v1748_v53 = vpop.permute.xlu1 %1747  ;;  %v1728_v44 = vpop.permute.xlu0 %1727 }
 0x128   : > { %v1795_v61 = vsel %vm615_vm13, %v1793_v18, %v1748_v53  ;;  %v1786_v30 = vsel %vm611_vm12, %v1661_v12, %v1728_v44  ;;  %v1868_v44 = vmul.bf16 %v4726_v37, %v4577_v26 }
 0x129   : > { %1645 = vrot.lane.b32.xlu1 %v3029_v21, %s3393_s11  ;;  %1625 = vrot.lane.b32.xlu0 %v3025_v28, %s3392_s10 }
 0x12b   : > { %v1733_v10 = vpop.permute.xlu1 %1732  ;;  %v1933_v35 = vpop.permute.xlu0 %1932 }
 0x12c   : > { %v1985_v5 = vsel %vm618_vm14, %v1983_v60, %v1933_v35  ;;  %v1788_v46 = vsel %vm615_vm13, %v1786_v30, %v1733_v10  ;;  %v1669_v60 = vmul.bf16 %v4743_v0, %v5062_v23 }
 0x12d   : > { %1445 = vrot.lane.b32.xlu1 %v3008_v29, %s3392_s10  ;;  %1425 = vrot.lane.b32.xlu0 %v3004_v16, %s3391_s30  ;;  %v2100_v21 = vrot.slane %v1985_v5, 4 }
 0x12f   : > { %v1968_v50 = vpop.permute.xlu1 %1967  ;;  %v1753_v36 = vpop.permute.xlu0 %1752 }
 0x130   : > { %v1797_v55 = vsel %vm618_vm14, %v1795_v61, %v1753_v36  ;;  %v2002_v17 = vsel %vm611_vm12, %v1868_v44, %v1968_v50 }
 0x131   : > { %1430 = vrot.lane.b32.xlu1 %v3005_v20, %s3392_s10  ;;  %1630 = vrot.lane.b32.xlu0 %v3026_v62, %s3393_s11  ;;  %v2175_v32 = vsel %vm2107_vm15, %v1797_v55, %v2101_v3  ;;  %v1864_v62 = vmul.bf16 %v4726_v37, %v5067_v34 }
 0x132   : > { %2556 = vmatprep.mubr.bf16.mxu0 %v2175_v32 }
 0x133   : > { %v1953_v28 = vpop.permute.xlu1 %1952  ;;  %v1738_v43 = vpop.permute.xlu0 %1737 }
 0x134   : > { %v1790_v6 = vsel %vm618_vm14, %v1788_v46, %v1738_v43  ;;  %v1995_v3 = vsel %vm611_vm12, %v1864_v62, %v1953_v28  ;;  %v4798_v28 = vld [vmem:[%s3434_s20 + $0x4] sm:$0xf] }
 0x135   : > { %1435 = vrot.lane.b32.xlu1 %v3006_v54, %s3393_s11  ;;  %1450 = vrot.lane.b32.xlu0 %v3009_v2, %s3393_s11  ;;  %v2172_v53 = vsel %vm2107_vm15, %v1790_v6, %v2100_v21  ;;  %v706_v43 = vmul.bf16 %v4798_v28, %v4605_v41  ;;  %s4953_s11 = scalar_lea.vmem %s4991_s3, %s3134_s16 }
 0x136   : > { %2557 = vmatmul.mubr.bf16.gmra.mxu0 %v2172_v53 }
 0x137   : > { %v1773_v19 = vpop.permute.xlu1 %1772  ;;  %v1973_v29 = vpop.permute.xlu0 %1972 }
 0x138   : > { %v2004_v10 = vsel %vm615_vm13, %v2002_v17, %v1973_v29  ;;  %v1807_v42 = vsel %vm611_vm12, %v1673_v8, %v1773_v19  ;;  %v5070_v29 = vld [vmem:[#allocation3_spill] sm:$0xff] }
 0x13b   : > { %v1978_v16 = vpop.permute.xlu1 %1977  ;;  %v1958_v15 = vpop.permute.xlu0 %1957 }
 0x13c   : > { %v2006_v20 = vsel %vm618_vm14, %v2004_v10, %v1978_v16  ;;  %v1997_v34 = vsel %vm615_vm13, %v1995_v3, %v1958_v15  ;;  %v702_v16 = vmul.bf16 %v4798_v28, %v5070_v29  ;;  %v4806_v15 = vld [vmem:[%s3434_s20] sm:$0xf] }
 0x13d   : > { %v2103_v39 = vrot.slane %v2006_v20, 4  ;;  %v508_v44 = vmul.bf16 %v4806_v15, %v4624_v49 }
 0x13f   : > { %v1778_v33 = vpop.permute.xlu1 %1777  ;;  %v1758_v13 = vpop.permute.xlu0 %1757 }
 0x140   : > { %v1809_v26 = vsel %vm615_vm13, %v1807_v42, %v1778_v33  ;;  %v1800_v5 = vsel %vm611_vm12, %v1669_v60, %v1758_v13 }
 0x143   : > { %v856_v35 = vpop.permute.xlu1 %855  ;;  %v1963_v7 = vpop.permute.xlu0 %1962 }
 0x144   : > { %v1999_v36 = vsel %vm618_vm14, %v1997_v34, %v1963_v7  ;;  %v876_v19 = vsel %vm611_vm12, %v706_v43, %v856_v35  ;;  %v5071_v7 = vld [vmem:[#allocation2_spill] sm:$0xff] }
 0x145   : > { %v2102_v55 = vrot.slane %v1999_v36, 4  ;;  %v481_v35 = vmul.bf16 %v4806_v15, %v5071_v7 }
 0x147   : > { %v1783_v58 = vpop.permute.xlu1 %1782  ;;  %v1763_v18 = vpop.permute.xlu0 %1762 }
 0x148   : > { %v1811_v12 = vsel %vm618_vm14, %v1809_v26, %v1783_v58  ;;  %v1802_v32 = vsel %vm615_vm13, %v1800_v5, %v1763_v18 }
 0x149   : > { %v2181_v51 = vsel %vm2107_vm15, %v1811_v12, %v2103_v39 }
 0x14a   : > { %2621 = vmatprep.mubr.bf16.mxu1 %v2181_v51 }
 0x14b   : > { %v861_v61 = vpop.permute.xlu1 %860  ;;  %v841_v50 = vpop.permute.xlu0 %840 }
 0x14c   : > { %v878_v33 = vsel %vm615_vm13, %v876_v19, %v861_v61  ;;  %v869_v41 = vsel %vm611_vm12, %v702_v16, %v841_v50  ;;  %v1872_v16 = vmul.bf16 %v4726_v37, %v4550_v38  ;;  %v1677_v38 = vmul.bf16 %v4743_v0, %v5065_v31 }
 0x14f   : > { %v661_v54 = vpop.permute.xlu1 %660  ;;  %v1768_v2 = vpop.permute.xlu0 %1767 }
 0x150   : > { %v1804_v30 = vsel %vm618_vm14, %v1802_v32, %v1768_v2  ;;  %v681_v10 = vsel %vm611_vm12, %v508_v44, %v661_v54  ;;  %v5072_v54 = vld [vmem:[#allocation15_spill] sm:$0xff] }
 0x151   : > { %v2178_v23 = vsel %vm2107_vm15, %v1804_v30, %v2102_v55  ;;  %v1876_v2 = vmul.bf16 %v4726_v37, %v5072_v54 }
 0x152   : > { %2622 = vmatmul.mubr.bf16.gmra.mxu1 %v2178_v23 }
 0x153   : > { %v866_v46 = vpop.permute.xlu1 %865  ;;  %v846_v21 = vpop.permute.xlu0 %845 }
 0x154   : > { %v880_v8 = vsel %vm618_vm14, %v878_v33, %v866_v46  ;;  %v871_v62 = vsel %vm615_vm13, %v869_v41, %v846_v21  ;;  %v3379_v21 = vld [vmem:[%s3442_s25 + $0x50] sm:$0xf] }
 0x155   : > { %v2063_v20 = vrot.slane %v880_v8, 4  ;;  %v1681_v43 = vmul.bf16 %v3379_v21, %v4743_v0  ;;  %v5073_v21 = vld [vmem:[#allocation4_spill] sm:$0xff] }
 0x157   : > { %v666_v6 = vpop.permute.xlu1 %665  ;;  %v646_v53 = vpop.permute.xlu0 %645 }
 0x158   : > { %v683_v42 = vsel %vm615_vm13, %v681_v10, %v666_v6  ;;  %v674_v12 = vsel %vm611_vm12, %v481_v35, %v646_v53  ;;  %v748_v10 = vmul.bf16 %v4798_v28, %v3885_v14  ;;  %v3380_v28 = vld [vmem:[%s3434_s20 + $0xc] sm:$0xf] }
 0x15b   : > { %v651_v13 = vpop.permute.xlu1 %650  ;;  %v851_v17 = vpop.permute.xlu0 %850 }
 0x15c   : > { %v873_v26 = vsel %vm618_vm14, %v871_v62, %v851_v17  ;;  %v676_v51 = vsel %vm615_vm13, %v674_v12, %v651_v13 }
 0x15d   : > { %v2062_v3 = vrot.slane %v873_v26, 4  ;;  %v2064_v26 = vrot.slane %v748_v10, 4 }
 0x15f   : > { %v2026_v39 = vpop.permute.xlu1 %2025  ;;  %v671_v49 = vpop.permute.xlu0 %670 }
 0x160   : > { %v685_v58 = vsel %vm618_vm14, %v683_v42, %v671_v49  ;;  %v2046_v46 = vsel %vm611_vm12, %v1876_v2, %v2026_v39  ;;  %v550_v49 = vmul.bf16 %v4806_v15, %v3869_v1  ;;  %v3359_v1 = vld [vmem:[%s4990_s2 + $0x180] sm:$0xff]   ;;  %v1092_v2 = vmul.bf16 %v3380_v28, %v5061_v4 }
 0x161   : > { %v2124_v18 = vsel %vm2107_vm15, %v685_v58, %v2063_v20  ;;  %v1138_v58 = vmul.bf16 %v3380_v28, %v5068_v56  ;;  %v1528_v56 = vmul.bf16 %v4588_v11, %v4274_v24  ;;  %v1333_v24 = vmul.bf16 %v4610_v27, %v5069_v40 }
 0x162   : > { %2662 = vmatprep.mubr.bf16.mxu0 %v2124_v18  ;;  %v2128_v15 = vsel %vm2107_vm15, %v550_v49, %v2064_v26  ;;  %v897_v40 = vmul.bf16 %v4442_v9, %v5073_v21  ;;  %v1723_v4 = vmul.bf16 %v4743_v0, %v4594_v59 }
 0x163   : > { %v2011_v60 = vpop.permute.xlu1 %2010  ;;  %v656_v34 = vpop.permute.xlu0 %655 }
 0x164   : > { %v678_v61 = vsel %vm618_vm14, %v676_v51, %v656_v34  ;;  %v2039_v35 = vsel %vm611_vm12, %v1872_v16, %v2011_v60  ;;  %v1915_v60 = vrot.slane %v4409_v63, 6  ;;  %v943_v63 = vmul.bf16 %v4442_v9, %v5063_v22 }
 0x165   : > { %v2121_v50 = vsel %vm2107_vm15, %v678_v61, %v2062_v3  ;;  %v3051_v3 = vrot.slane %v5072_v54, 10  ;;  %v1096_v54 = vmul.bf16 %v3380_v28, %v4738_v45  ;;  %v3381_v28 = vld [vmem:[%s3442_s25 + $0x48] sm:$0xf] }
 0x166   : > { %2663 = vmatmul.mubr.bf16.vlgmr.msra.gmra.mxu0 %v2121_v50 }
 0x167   : > { %v1831_v36 = vpop.permute.xlu1 %1830  ;;  %v2031_v5 = vpop.permute.xlu0 %2030 }
 0x168   : > { %v2048_v6 = vsel %vm615_vm13, %v2046_v46, %v2031_v5  ;;  %v1851_v44 = vsel %vm611_vm12, %v1681_v43, %v1831_v36  ;;  %v2078_v5 = vrot.slane %v1138_v58, 4  ;;  %v1486_v58 = vmul.bf16 %v3381_v28, %v4588_v11 }
 0x16a   : > { %v2149_v22 = vsel %vm2107_vm15, %v943_v63, %v2078_v5 }
 0x16b   : > { %v2036_v55 = vpop.permute.xlu1 %2035  ;;  %v2016_v32 = vpop.permute.xlu0 %2015 }
 0x16c   : > { %v2050_v29 = vsel %vm618_vm14, %v2048_v6, %v2036_v55  ;;  %v2041_v20 = vsel %vm615_vm13, %v2039_v35, %v2016_v32  ;;  %v1916_v55 = vsel %vm3605_vm11, %v3051_v3, %v1915_v60  ;;  %v2092_v32 = vrot.slane %v1528_v56, 4  ;;  %v3382_v3 = vld [vmem:[%s3442_s25 + $0x40] sm:$0xf] }
 0x16d   : > { %v2105_v33 = vrot.slane %v2050_v29, 4  ;;  %v1291_v60 = vmul.bf16 %v3382_v3, %v4610_v27 }
 0x16e   : > { %v2170_v46 = vsel %vm2107_vm15, %v1333_v24, %v2092_v32 }
 0x16f   : > { %v1836_v30 = vpop.permute.xlu1 %1835  ;;  %v1816_v23 = vpop.permute.xlu0 %1815 }
 0x170   : > { %v1853_v13 = vsel %vm615_vm13, %v1851_v44, %v1836_v30  ;;  %v1844_v14 = vsel %vm611_vm12, %v1677_v38, %v1816_v23 }
 0x173   : > { %v1246_v53 = vpop.permute.xlu1 %1245  ;;  %v2021_v19 = vpop.permute.xlu0 %2020 }
 0x174   : > { %v2043_v39 = vsel %vm618_vm14, %v2041_v20, %v2021_v19  ;;  %v1266_v43 = vsel %vm611_vm12, %v1096_v54, %v1246_v53 }
 0x175   : > { %v2104_v18 = vrot.slane %v2043_v39, 4 }
 0x177   : > { %v1841_v17 = vpop.permute.xlu1 %1840  ;;  %v1821_v8 = vpop.permute.xlu0 %1820 }
 0x178   : > { %v1855_v41 = vsel %vm618_vm14, %v1853_v13, %v1841_v17  ;;  %v1846_v12 = vsel %vm615_vm13, %v1844_v14, %v1821_v8  ;;  %v1482_v14 = vmul.bf16 %v4588_v11, %v5066_v25 }
 0x179   : > { %v2187_v7 = vsel %vm2107_vm15, %v1855_v41, %v2105_v33 }
 0x17a   : > { %2686 = vmatprep.mubr.bf16.mxu1 %v2187_v7 }
 0x17b   : > { %v1251_v62 = vpop.permute.xlu1 %1250  ;;  %v1231_v42 = vpop.permute.xlu0 %1230 }
 0x17c   : > { %v1259_v45 = vsel %vm611_vm12, %v1092_v2, %v1231_v42  ;;  %v1268_v6 = vsel %vm615_vm13, %v1266_v43, %v1251_v62 }
 0x17f   : > { %v1051_v31 = vpop.permute.xlu1 %1050  ;;  %v1826_v51 = vpop.permute.xlu0 %1825 }
 0x180   : > { %v1848_v34 = vsel %vm618_vm14, %v1846_v12, %v1826_v51  ;;  %v1071_v53 = vsel %vm611_vm12, %v901_v48, %v1051_v31 }
 0x181   : > { %v2184_v61 = vsel %vm2107_vm15, %v1848_v34, %v2104_v18  ;;  %v1287_v34 = vmul.bf16 %v4610_v27, %v4098_v47 }
 0x182   : > { %2687 = vmatmul.mubr.bf16.vlgmr.msra.gmra.mxu1 %v2184_v61 }
 0x183   : > { %v1256_v50 = vpop.permute.xlu1 %1255  ;;  %3271 = vmatpush3.bf16.msra.mxu1 %v4637_v52  ;;  %v1236_v36 = vpop.permute.xlu0 %1235  ;;  %3274 = vmatprep.mubr.msk.bf16.mxu1 %vm611_vm12, %v2128_v15  ;;  %v1918_v52 = vmul.bf16 %v4726_v37, %v1916_v55 }
 0x184   : > { %3272 = vmatprep.subr.bf16.mxu1 %v3359_v1  ;;  %v1261_v19 = vsel %vm615_vm13, %v1259_v45, %v1236_v36  ;;  %v1270_v9 = vsel %vm618_vm14, %v1268_v6, %v1256_v50 }
 0x185   : > { %v2106_v37 = vrot.slane %v1918_v52, 4  ;;  %v2077_v59 = vrot.slane %v1270_v9, 4 }
 0x187   : > { %v1056_v30 = vpop.permute.xlu1 %1055  ;;  %3273 = vmatpush3.bf16.msra.mxu1 %v3359_v1  ;;  %v1036_v23 = vpop.permute.xlu0 %1035  ;;  %v2191_v33 = vsel %vm2107_vm15, %v1723_v4, %v2106_v37 }
 0x188   : > { %v1064_v44 = vsel %vm611_vm12, %v897_v40, %v1036_v23  ;;  %v1073_v0 = vsel %vm615_vm13, %v1071_v53, %v1056_v30  ;;  %v3160_v30 = vpop.f32.mrf.mxu0 }
 0x18a   : > { %3275 = vmatmul.mubr.msk.bf16.vlgmr.msra.gmra.mxu1 %vm611_vm12, %v2149_v22  ;;  %v3161_v23 = vpop.f32.mrf.mxu0  ;;  %v3200_v22 = vpop.f32.mrf.mxu1 }
 0x18b   : > { %v1041_v29 = vpop.permute.xlu1 %1040  ;;  %v1241_v16 = vpop.permute.xlu0 %1240  ;;  %3278 = vmatprep.mubr.msk.bf16.mxu1 %vm611_vm12, %v2170_v46 }
 0x18c   : > { %v1263_v57 = vsel %vm618_vm14, %v1261_v19, %v1241_v16  ;;  %v1066_v13 = vsel %vm615_vm13, %v1064_v44, %v1041_v29  ;;  %v3163_v46 = vpop.f32.mrf.mxu0  ;;  %v3201_v48 = vpop.f32.mrf.mxu1 }
 0x18d   : > { %v2076_v17 = vrot.slane %v1263_v57, 4  ;;  %v3202_v28 = vadd.f32 %v3201_v48, %v3200_v22 }
 0x18e   : > { %v3164_v21 = vpop.f32.mrf.mxu0  ;;  %v3203_v40 = vpop.f32.mrf.mxu1 }
 0x18f   : > { %v1046_v8 = vpop.permute.xlu1 %1045  ;;  %v1061_v41 = vpop.permute.xlu0 %1060 }
 0x190   : > { %v1068_v10 = vsel %vm618_vm14, %v1066_v13, %v1046_v8  ;;  %v1075_v7 = vsel %vm618_vm14, %v1073_v0, %v1061_v41  ;;  %v3204_v45 = vpop.f32.mrf.mxu1 }
 0x191   : > { %v2145_v35 = vsel %vm2107_vm15, %v1075_v7, %v2077_v59  ;;  %v2142_v38 = vsel %vm2107_vm15, %v1068_v10, %v2076_v17 }
 0x192   : > { %2670 = vmatprep.mubr.bf16.mxu0 %v2145_v35  ;;  %3279 = vmatmul.mubr.msk.bf16.gmra.mxu1 %vm611_vm12, %v2191_v33 }
 0x193   : > { %v1621_v20 = vpop.permute.xlu1 %1620  ;;  %v1636_v62 = vpop.permute.xlu0 %1635  ;;  %2671 = vmatmul.mubr.bf16.gmra.mxu0 %v2142_v38 }
 0x194   : > { %v1649_v31 = vsel %vm611_vm12, %v1482_v14, %v1621_v20  ;;  %v1656_v51 = vsel %vm611_vm12, %v1486_v58, %v1636_v62 }
 0x196   : > { %v4920_v43 = vpop.f32.mrf.mxu0 }
 0x197   : > { %v1441_v42 = vpop.permute.xlu1 %1440  ;;  %v1641_v39 = vpop.permute.xlu0 %1640 }
 0x198   : > { %v1658_v1 = vsel %vm615_vm13, %v1656_v51, %v1641_v39  ;;  %v1461_v50 = vsel %vm611_vm12, %v1291_v60, %v1441_v42  ;;  %v4922_v4 = vpop.f32.mrf.mxu0  ;;  %v3205_v60 = vadd.f32 %v3204_v45, %v3203_v40 }
 0x19a   : > { %v4924_v6 = vpop.f32.mrf.mxu0 }
 0x19b   : > { %v1646_v49 = vpop.permute.xlu1 %1645  ;;  %v1626_v26 = vpop.permute.xlu0 %1625 }
 0x19c   : > { %v1651_v15 = vsel %vm615_vm13, %v1649_v31, %v1626_v26  ;;  %v1660_v11 = vsel %vm618_vm14, %v1658_v1, %v1646_v49  ;;  %v4926_v29 = vpop.f32.mrf.mxu0 }
 0x19d   : > { %v2091_v63 = vrot.slane %v1660_v11, 4 }
 0x19f   : > { %v1446_v18 = vpop.permute.xlu1 %1445  ;;  %v1426_v12 = vpop.permute.xlu0 %1425 }
 0x1a0   : > { %v1454_v36 = vsel %vm611_vm12, %v1287_v34, %v1426_v12  ;;  %v1463_v5 = vsel %vm615_vm13, %v1461_v50, %v1446_v18  ;;  %v3162_v18 = vadd.f32 %v3161_v23, %v3160_v30 }
 0x1a2   : > { %v2600_v3 = vadd.f32 %v3202_v28, %v3162_v18 }
 0x1a3   : > { %v1431_v25 = vpop.permute.xlu1 %1430  ;;  %v1631_v56 = vpop.permute.xlu0 %1630 }
 0x1a4   : > { %v1653_v61 = vsel %vm618_vm14, %v1651_v15, %v1631_v56  ;;  %v1456_v55 = vsel %vm615_vm13, %v1454_v36, %v1431_v25  ;;  %v3165_v15 = vadd.f32 %v3164_v21, %v3163_v46 }
 0x1a5   : > { %v2090_v47 = vrot.slane %v1653_v61, 4 }
 0x1a6   : > { %v2603_v50 = vadd.f32 %v3205_v60, %v3165_v15 }
 0x1a7   : > { %v1436_v27 = vpop.permute.xlu1 %1435  ;;  %v1451_v24 = vpop.permute.xlu0 %1450 }
 0x1a8   : > { %v1458_v32 = vsel %vm618_vm14, %v1456_v55, %v1436_v27  ;;  %v1465_v54 = vsel %vm618_vm14, %v1463_v5, %v1451_v24 }
 0x1a9   : > { %v2166_v2 = vsel %vm2107_vm15, %v1465_v54, %v2091_v63  ;;  %v2163_v52 = vsel %vm2107_vm15, %v1458_v32, %v2090_v47 }
 0x1aa   : > { %2678 = vmatprep.mubr.bf16.mxu0 %v2166_v2 }
 0x1ab   : > { %2679 = vmatmul.mubr.bf16.gmra.mxu0 %v2163_v52 }
 0x1ae   : > { %v3206_v37 = vpop.f32.mrf.mxu1 }
 0x1b0   : > { %v3207_v19 = vpop.f32.mrf.mxu1 }
 0x1b1   : > { %v3208_v22 = vadd.f32 %v3207_v19, %v3206_v37 }
 0x1b2   : > { %v4928_v16 = vpop.f32.mrf.mxu1 }
 0x1b4   : > { %v4932_v57 = vpop.f32.mrf.mxu1 }
 0x1b5   : > { %v3211_v19 = vadd.f32 %v4932_v57, %v4928_v16 }
 0x1c6   : > { %v4930_v9 = vpop.f32.mrf.mxu0 }
 0x1c8   : > { %v4934_v53 = vpop.f32.mrf.mxu0 }
 0x1ca   : > { %v4938_v33 = vpop.f32.mrf.mxu0 }
 0x1cc   : > { %v4942_v0 = vpop.f32.mrf.mxu0 }
 0x1de   : > { %v4936_v44 = vpop.f32.mrf.mxu1 }
 0x1e0   : > { %v4940_v59 = vpop.f32.mrf.mxu1 }
 0x1e2   : > { %v4944_v13 = vpop.f32.mrf.mxu1 }
 0x1e4   : > { %v4946_v8 = vpop.f32.mrf.mxu1 }
 0x1f6   : > { %v3178_v17 = vpop.f32.mrf.mxu0 }
 0x1f8   : > { %v3179_v41 = vpop.f32.mrf.mxu0 }
 0x1f9   : > { %v3180_v11 = vadd.f32 %v3179_v41, %v3178_v17  ;;  %v3168_v41 = vadd.f32 %v4922_v4, %v4920_v43  ;;  %v3171_v4 = vadd.f32 %v4926_v29, %v4924_v6 }
 0x1fa   : > { %v3181_v7 = vpop.f32.mrf.mxu0 }
 0x1fb   : > { %v2608_v37 = vadd.f32 %v3208_v22, %v3168_v41 }
 0x1fc   : > { %v3182_v38 = vpop.f32.mrf.mxu0 }
 0x1fd   : > { %v3183_v32 = vadd.f32 %v3182_v38, %v3181_v7 }
 0x212   : > { %v3218_v10 = vpop.f32.mrf.mxu1 }
 0x214   : > { %v3219_v35 = vpop.f32.mrf.mxu1 }
 0x215   : > { %v3220_v34 = vadd.f32 %v3219_v35, %v3218_v10 }
 0x216   : > { %v3221_v20 = vpop.f32.mrf.mxu1 }
 0x217   : > { %v2624_v5 = vadd.f32 %v3220_v34, %v3180_v11 }
 0x218   : > { %v3222_v42 = vpop.f32.mrf.mxu1 }
 0x219   : > { %v3223_v47 = vadd.f32 %v3222_v42, %v3221_v20 }
 0x21b   : > { %v2627_v21 = vadd.f32 %v3223_v47, %v3183_v32  ;;  %v3177_v47 = vadd.f32 %v4942_v0, %v4938_v33 }
 0x226   : > { %v3240_v62 = vpop.f32.mrf.mxu0 }
 0x228   : > { %v3241_v39 = vpop.f32.mrf.mxu0 }
 0x229   : > { %v3242_v12 = vadd.f32 %v3241_v39, %v3240_v62 }
 0x22a   : > { %v3243_v26 = vpop.f32.mrf.mxu0 }
 0x22b   : > { %v2665_v56 = vadd.f32 %v3242_v12, %v2600_v3  ;;  %v2611_v12 = vadd.f32 %v3211_v19, %v3171_v4 }
 0x22c   : > { %v3244_v31 = vpop.f32.mrf.mxu0 }
 0x22d   : > { %v3245_v25 = vadd.f32 %v3244_v31, %v3243_v26 }
 0x22f   : > { %v2668_v24 = vadd.f32 %v3245_v25, %v2603_v50 }
 0x242   : > { %v3258_v49 = vpop.f32.mrf.mxu1 }
 0x244   : > { %v3259_v14 = vpop.f32.mrf.mxu1 }
 0x245   : > { %v3260_v36 = vadd.f32 %v3259_v14, %v3258_v49 }
 0x246   : > { %v3261_v58 = vpop.f32.mrf.mxu1 }
 0x247   : > { %v2689_v23 = vadd.f32 %v3260_v36, %v2624_v5 }
 0x248   : > { %v3262_v51 = vpop.f32.mrf.mxu1 }
 0x249   : > { %v3263_v2 = vadd.f32 %v3262_v51, %v3261_v58 }
 0x24a   : > { %v3276_v1 = vpop.f32.mrf.mxu1 }
 0x24b   : > { %v2692_v20 = vadd.f32 %v3263_v2, %v2627_v21 }
 0x24c   : > { %v2729_v61 = vpop.f32.mrf.mxu1 }
 0x24d   : > { %v2730_v63 = vadd.f32 %v2729_v61, %v2665_v56  ;;  %v3174_v61 = vadd.f32 %v4934_v53, %v4930_v9 }
 0x24e   : > { %v3277_v55 = vpop.f32.mrf.mxu1 }
 0x24f   : > { %vm2760_vm0 = vcmp.ge.f32.partialorder %v2730_v63, 0.0  ;;  %v2768_v27 = vmul.f32 0.1, %v2730_v63 }
 0x250   : > { %v2732_v54 = vpop.f32.mrf.mxu1 }
 0x251   : > { %v2776_v52 = vsel %vm2760_vm0, %v2730_v63, %v2768_v27  ;;  %v2733_v30 = vadd.f32 %v2732_v54, %v2668_v24  ;;  %v3217_v63 = vadd.f32 %v4946_v8, %v4944_v13 }
 0x252   : > { %v3136_v46 = vpack.c.bf16 %v2776_v52, %v2776_v52  ;;  %v3280_v48 = vpop.f32.mrf.mxu1 }
 0x253   : > { %vm2761_vm2 = vcmp.ge.f32.partialorder %v2733_v30, 0.0  ;;  %v2769_v40 = vmul.f32 0.1, %v2733_v30  ;;  %v2754_v45 = vadd.f32 %v3280_v48, %v2689_v23  ;;  %v3246_v17 = vpop.f32.mrf.mxu0  ;;  %v2619_v32 = vadd.f32 %v3217_v63, %v3177_v47 }
 0x254   : > { %2817 = vst.msk [vmem:[%s4953_s11] sm:$0xf] %vm2816_vm1, %v3136_v46  ;;  %v2745_v10 = vpop.f32.mrf.mxu1 }
 0x255   : > { %v2777_v7 = vsel %vm2761_vm2, %v2733_v30, %v2769_v40  ;;  %vm2766_vm3 = vcmp.ge.f32.partialorder %v2754_v45, 0.0  ;;  %v2774_v35 = vmul.f32 0.1, %v2754_v45  ;;  %v3247_v38 = vpop.f32.mrf.mxu0 }
 0x256   : > { %v3137_v62 = vpack.c.bf16 %v2777_v7, %v2777_v7  ;;  %v3248_v42 = vadd.f32 %v3247_v38, %v3246_v17  ;;  %v3281_v39 = vpop.f32.mrf.mxu1 }
 0x257   : > { %v2782_v49 = vsel %vm2766_vm3, %v2754_v45, %v2774_v35  ;;  %v2757_v26 = vadd.f32 %v3281_v39, %v2692_v20  ;;  %v3249_v43 = vpop.f32.mrf.mxu0 }
 0x258   : > { %2818 = vst.msk [vmem:[%s4953_s11 + $0x4] sm:$0xf] %vm2816_vm1, %v3137_v62  ;;  %v3142_v14 = vpack.c.bf16 %v2782_v49, %v2782_v49  ;;  %v2673_v28 = vadd.f32 %v3248_v42, %v2608_v37  ;;  %v2748_v53 = vpop.f32.mrf.mxu1 }
 0x259   : > { %vm2767_vm4 = vcmp.ge.f32.partialorder %v2757_v26, 0.0  ;;  %v2775_v58 = vmul.f32 0.1, %v2757_v26  ;;  %v3250_v18 = vpop.f32.mrf.mxu0 }
 0x25a   : > { %2823 = vst.msk [vmem:[%s4953_s11 + $0x18] sm:$0xf] %vm2816_vm1, %v3142_v14  ;;  %v2738_v16 = vadd.f32 %v3276_v1, %v2673_v28  ;;  %v3251_v57 = vadd.f32 %v3250_v18, %v3249_v43  ;;  %v3214_v1 = vadd.f32 %v4940_v59, %v4936_v44 }
 0x25b   : > { %v2783_v31 = vsel %vm2767_vm4, %v2757_v26, %v2775_v58 }
 0x25c   : > { %vm2762_vm5 = vcmp.ge.f32.partialorder %v2738_v16, 0.0  ;;  %v2770_v51 = vmul.f32 0.1, %v2738_v16  ;;  %v3143_v3 = vpack.c.bf16 %v2783_v31, %v2783_v31  ;;  %v2676_v6 = vadd.f32 %v3251_v57, %v2611_v12 }
 0x25d   : > { %v2616_v36 = vadd.f32 %v3214_v1, %v3174_v61 }
 0x25e   : > { %v2778_v29 = vsel %vm2762_vm5, %v2738_v16, %v2770_v51  ;;  %2824 = vst.msk [vmem:[%s4953_s11 + $0x1c] sm:$0xf] %vm2816_vm1, %v3143_v3  ;;  %v2741_v60 = vadd.f32 %v3277_v55, %v2676_v6 }
 0x25f   : > { %v3138_v34 = vpack.c.bf16 %v2778_v29, %v2778_v29 }
 0x260   : > { %vm2763_vm6 = vcmp.ge.f32.partialorder %v2741_v60, 0.0  ;;  %v2771_v15 = vmul.f32 0.1, %v2741_v60 }
 0x261   : > { %2819 = vst.msk [vmem:[%s4953_s11 + $0x8] sm:$0xf] %vm2816_vm1, %v3138_v34 }
 0x262   : > { %v2779_v25 = vsel %vm2763_vm6, %v2741_v60, %v2771_v15 }
 0x263   : > { %v3139_v56 = vpack.c.bf16 %v2779_v25, %v2779_v25 }
 0x265   : > { %2820 = vst.msk [vmem:[%s4953_s11 + $0xc] sm:$0xf] %vm2816_vm1, %v3139_v56 }
 0x26b   : > { %v3252_v11 = vpop.f32.mrf.mxu0 }
 0x26d   : > { %v3253_v50 = vpop.f32.mrf.mxu0 }
 0x26e   : > { %v3254_v5 = vadd.f32 %v3253_v50, %v3252_v11 }
 0x26f   : > { %v3255_v55 = vpop.f32.mrf.mxu0 }
 0x270   : > { %v2681_v27 = vadd.f32 %v3254_v5, %v2616_v36 }
 0x271   : > { %v3256_v24 = vpop.f32.mrf.mxu0 }
 0x272   : > { %v2746_v44 = vadd.f32 %v2745_v10, %v2681_v27  ;;  %v3257_v59 = vadd.f32 %v3256_v24, %v3255_v55 }
 0x274   : > { %vm2764_vm7 = vcmp.ge.f32.partialorder %v2746_v44, 0.0  ;;  %v2772_v54 = vmul.f32 0.1, %v2746_v44  ;;  %v2684_v9 = vadd.f32 %v3257_v59, %v2619_v32 }
 0x276   : > { %v2780_v2 = vsel %vm2764_vm7, %v2746_v44, %v2772_v54  ;;  %v2749_v52 = vadd.f32 %v2748_v53, %v2684_v9 }
 0x277   : > { %v3140_v30 = vpack.c.bf16 %v2780_v2, %v2780_v2 }
 0x278   : > { %vm2765_vm8 = vcmp.ge.f32.partialorder %v2749_v52, 0.0  ;;  %v2773_v13 = vmul.f32 0.1, %v2749_v52 }
 0x279   : > { %2821 = vst.msk [vmem:[%s4953_s11 + $0x10] sm:$0xf] %vm2816_vm1, %v3140_v30 }
 0x27a   : > { %v2781_v8 = vsel %vm2765_vm8, %v2749_v52, %v2773_v13 }
 0x27b   : > { %v3141_v23 = vpack.c.bf16 %v2781_v8, %v2781_v8 }
 0x27d   : > { %2822 = vst.msk [vmem:[%s4953_s11 + $0x14] sm:$0xf] %vm2816_vm1, %v3141_v23 }
 0x27e PF: > { %s13_s12 = sadd.s32 1, %s3389_s12  }
 0x27f   : > { %p10_p4 = scmp.ge.s32.totalorder %s13_s12, 4  }
 0x281   :  { %12 = sbr.rel (!%p10_p4) target bundleno = 1 (0x1), region = 65 }

// kernel: run_pwcnet_forward.20
= control target key start
LH: loop header
LB: loop body
LE: loop exit
PB: predicated region body
PF: predicated region fallthrough
CT: control target
= control target key end

     0   :  { %s1450_s12 = smov 0   ;;  %s1845_s0 = inlined_call_operand.vmem [shape: bf16[2,1,10,10,64], index: 0, kind: input, shape index: {}]   ;;  %s1846_s1 = inlined_call_operand.vmem [shape: bf16[576,32], index: 1, kind: input, shape index: {}]   ;;  %s1847_s2 = inlined_call_operand.vmem [shape: f32[1,32], index: 2, kind: input, shape index: {}]   ;;  %s1848_s3 = inlined_call_operand.vmem [shape: bf16[2,64,32], index: 3, kind: output, shape index: {}]  }
   0x1 LB: > { %s1158_s13 = sadd.s32 4294967295, %s1427_s12   ;;  %p1162_p0 = scmp.ge.s32.totalorder %s1427_s12, 1  ;;  %s1427_s12 = sphi %s1450_s12, %s13_s12  }
   0x2   : > { %p137_p1 = scmp.lt.s32.totalorder %s1427_s12, 3 }
   0x4   : > { %p138_p2 = pnand %p1162_p0, %p137_p1 }
   0x5   : > { %p161_p3 = scmp.lt.s32.totalorder (!%p138_p2), %s1158_s13, 1  ;;  %s1429_s30 = smov (!%p138_p2), 64  }
   0x6   : > { %141 = sbr.rel (%p138_p2) target bundleno = 401 (0x191), region = 32 }
   0xb   : > { %v1385_v0 = vld [vmem:[%s1846_s1 + $0xf8] sm:$0xff]   ;;  %s1850_s13 = smov (!%p161_p3, %s1158_s13), 1  ;;  %v1389_v4 = vld [vmem:[%s1846_s1 + $0xf0] sm:$0xff]   ;;  %v1393_v32 = vld [vmem:[%s1846_s1 + $0xe8] sm:$0xff]   ;;  %vm570_vm0 = vcmask 1043456   ;;  %vm319_vm1 = vcmask 523264  }
   0xc   : > { %v1386_v1 = vld [vmem:[%s1846_s1 + $0x78] sm:$0xff]   ;;  %1285 = vmatprep.subr.bf16.mxu1 %v1385_v0  ;;  %s1357_s20 = smul.u32 80, %s1850_s13  ;;  %v1390_v5 = vld [vmem:[%s1846_s1 + $0x70] sm:$0xff]   ;;  %v1394_v34 = vld [vmem:[%s1846_s1 + $0x68] sm:$0xff]   ;;  %vm1094_vm2 = vcmask 257024  }
   0xd   : > { %v1387_v2 = vld [vmem:[%s1846_s1 + $0xb8] sm:$0xff]   ;;  %1245 = vmatprep.subr.bf16.mxu0 %v1386_v1  ;;  %v1391_v22 = vld [vmem:[%s1846_s1 + $0xb0] sm:$0xff]   ;;  %v1395_v40 = vld [vmem:[%s1846_s1 + $0xa8] sm:$0xff]  }
   0xe   : > { %v1388_v3 = vld [vmem:[%s1846_s1 + $0x38] sm:$0xff]   ;;  %1286 = vmatpush3.bf16.msra.mxu1 %v1387_v2  ;;  %s1479_s27 = scalar_lea.vmem %s1845_s0, %s1357_s20  ;;  %v1392_v27 = vld [vmem:[%s1846_s1 + $0x30] sm:$0xff]   ;;  %v1396_v41 = vld [vmem:[%s1846_s1 + $0x28] sm:$0xff]   ;;  %s1236_s20 = sshll.u32 %s1850_s13, 5 }
   0xf   : > { %1246 = vmatpush3.bf16.msra.mxu0 %v1388_v3  ;;  %v1485_v6 = vld [vmem:[%s1479_s27 + $0x10] sm:$0xf]  ;;  %v256_v7 = vld [vmem:[%s1479_s27 + $0x14] sm:$0x1]  ;;  %v1489_v8 = vld [vmem:[%s1479_s27 + $0x8] sm:$0xf]  ;;  %1287 = vmatprep.subr.bf16.mxu1 %v1389_v4  ;;  %s1824_s23 = scalar_lea.vmem %s1848_s3, %s1236_s20 }
  0x10   : > { %v1171_v9 = vcombine.low %v1485_v6, %v1485_v6  ;;  %v1170_v10 = vcombine.low %v1485_v6, %v256_v7  ;;  %v254_v11 = vld [vmem:[%s1479_s27 + $0xc] sm:$0x1]  ;;  %v1496_v12 = vld [vmem:[%s1479_s27 + $0x18] sm:$0xf]  ;;  %1247 = vmatprep.subr.bf16.mxu0 %v1390_v5  ;;  %v258_v14 = vld [vmem:[%s1479_s27 + $0x1c] sm:$0x1]  ;;  %v1168_v18 = vcombine.low %v1489_v8, %v1489_v8 }
  0x11   : > { %v1499_v13 = vcombine.low %v1489_v8, %v254_v11  ;;  %v1503_v15 = vld [vmem:[%s1479_s27] sm:$0xf]  ;;  %v252_v16 = vld [vmem:[%s1479_s27 + $0x4] sm:$0x1]  ;;  %v1515_v20 = vcombine.low %v1496_v12, %v258_v14  ;;  %v1518_v21 = vld [vmem:[%s1479_s27 + $0x28] sm:$0xf]  ;;  %v1173_v7 = vcombine.low %v1496_v12, %v1496_v12 }
  0x12   : > { %335 = vrot.lane.b32.xlu0 %v1171_v9, %s1429_s30  ;;  %v1507_v17 = vrot.slane %v1170_v10, 1  ;;  %v1512_v19 = vld [vmem:[%s1479_s27 + $0x20] sm:$0xf]  ;;  %v312_v24 = vshll.u32 %v1170_v10, 16  ;;  %v1525_v25 = vcombine.low %v1503_v15, %v252_v16  ;;  %v262_v26 = vld [vmem:[%s1479_s27 + $0x2c] sm:$0x1]  ;;  %1288 = vmatpush3.bf16.msra.mxu1 %v1391_v22 }
  0x13   : > { %v297_v23 = vshll.u32 %v1499_v13, 16  ;;  %v301_v28 = vrot.slane %v1499_v13, 1  ;;  %v295_v29 = vshrl.u32 %v1499_v13, 16  ;;  %v347_v30 = vshll.u32 %v1515_v20, 16  ;;  %1248 = vmatpush3.bf16.msra.mxu0 %v1392_v27  ;;  %v260_v39 = vld [vmem:[%s1479_s27 + $0x24] sm:$0x1]  ;;  %1289 = vmatprep.subr.bf16.mxu1 %v1393_v32 }
  0x14   : > { %337 = vrot.lane.b32.xlu1 %v1507_v17, %s1429_s30  ;;  %v1537_v31 = vcombine.low %v1518_v21, %v262_v26  ;;  %v1175_v35 = vcombine.low %v1512_v19, %v1512_v19  ;;  %v345_v36 = vshrl.u32 %v1515_v20, 16  ;;  %v279_v38 = vshll.u32 %v1525_v25, 16  ;;  %1249 = vmatprep.subr.bf16.mxu0 %v1394_v34  ;;  %v1397_v46 = vld [vmem:[%s1846_s1 + $0xe0] sm:$0xff]   ;;  %v1572_v51 = vld [vmem:[%s1479_s27 + $0x38] sm:$0xf]  ;;  %v1405_v26 = vld [vmem:[%s1846_s1 + $0xd0] sm:$0xff]  }
  0x15   : > { %v299_v33 = vrot.slane %v297_v23, 1  ;;  %v349_v37 = vrot.slane %v347_v30, 1  ;;  %v310_v43 = vshrl.u32 %v1170_v10, 16  ;;  %v314_v44 = vrot.slane %v312_v24, 1  ;;  %v266_v52 = vld [vmem:[%s1479_s27 + $0x3c] sm:$0x1] }
  0x16   : > { %289 = vrot.lane.b32.xlu0 %v1168_v18, %s1429_s30  ;;  %v408_v45 = vshll.u32 %v1537_v31, 16  ;;  %1290 = vmatpush3.bf16.msra.mxu1 %v1395_v40  ;;  %v1174_v47 = vcombine.low %v1512_v19, %v260_v39  ;;  %v277_v49 = vshrl.u32 %v1525_v25, 16  ;;  %v281_v50 = vrot.slane %v279_v38, 1  ;;  %v1398_v57 = vld [vmem:[%s1846_s1 + $0x60] sm:$0xff]   ;;  %v264_v1 = vld [vmem:[%s1479_s27 + $0x34] sm:$0x1] }
  0x17   : > { %v1560_v42 = vor.u32 %v299_v33, %v295_v29  ;;  %1250 = vmatpush3.bf16.msra.mxu0 %v1396_v41  ;;  %v1568_v48 = vor.u32 %v349_v37, %v345_v36  ;;  %1291 = vmatprep.subr.bf16.mxu1 %v1397_v46  ;;  %v1577_v53 = vor.u32 %v314_v44, %v310_v43  ;;  %v406_v54 = vshrl.u32 %v1537_v31, 16  ;;  %v1399_v60 = vld [vmem:[%s1846_s1 + $0xa0] sm:$0xff]   ;;  %v1401_v4 = vld [vmem:[%s1846_s1 + $0xd8] sm:$0xff]   ;;  %v1607_v5 = vld [vmem:[%s1479_s27 + $0x30] sm:$0xf] }
  0x18   : > { %302 = vrot.lane.b32.xlu1 %v301_v28, %s1429_s30  ;;  %v410_v55 = vrot.slane %v408_v45, 1  ;;  %v379_v56 = vshll.u32 %v1174_v47, 16  ;;  %v282_v58 = vor.u32 %v281_v50, %v277_v49  ;;  %v1586_v59 = vcombine.low %v1572_v51, %v266_v52  ;;  %1251 = vmatprep.subr.bf16.mxu0 %v1398_v57  ;;  %v1400_v2 = vld [vmem:[%s1846_s1 + $0x20] sm:$0xff]   ;;  %v1402_v9 = vld [vmem:[%s1846_s1 + $0x58] sm:$0xff]   ;;  %v1629_v22 = vld [vmem:[%s1479_s27 + $0x48] sm:$0xf] }
  0x19   : > { %v1595_v62 = vrot.slane %v1174_v47, 1  ;;  %v377_v63 = vshrl.u32 %v1174_v47, 16  ;;  %v1621_v11 = vrot.slane %v1515_v20, 1  ;;  %v1178_v14 = vcombine.low %v1607_v5, %v264_v1  ;;  %v1403_v16 = vld [vmem:[%s1846_s1 + $0x98] sm:$0xff]   ;;  %v270_v23 = vld [vmem:[%s1479_s27 + $0x4c] sm:$0x1] }
  0x1a   : > { %396 = vrot.lane.b32.xlu0 %v1175_v35, %s1429_s30  ;;  %v1593_v61 = vor.u32 %v410_v55, %v406_v54  ;;  %v381_v0 = vrot.slane %v379_v56, 1  ;;  %1292 = vmatpush3.bf16.msra.mxu1 %v1399_v60  ;;  %v466_v3 = vshll.u32 %v1586_v59, 16  ;;  %v464_v18 = vshrl.u32 %v1586_v59, 16  ;;  %v1404_v24 = vld [vmem:[%s1846_s1 + $0x18] sm:$0xff]   ;;  %v1406_v27 = vld [vmem:[%s1846_s1 + $0x50] sm:$0xff]   ;;  %v1409_v37 = vld [vmem:[%s1846_s1 + $0xc8] sm:$0xff]  }
  0x1b   : > { %1252 = vmatpush3.bf16.msra.mxu0 %v1400_v2  ;;  %1293 = vmatprep.subr.bf16.mxu1 %v1401_v4  ;;  %v1179_v29 = vcombine.low %v1607_v5, %v1607_v5  ;;  %v437_v30 = vshll.u32 %v1178_v14, 16  ;;  %v1407_v32 = vld [vmem:[%s1846_s1 + $0x90] sm:$0xff]   ;;  %v1656_v35 = vrot.slane %v1178_v14, 1  ;;  %v1184_v36 = vcombine.low %v1629_v22, %v270_v23  ;;  %v268_v39 = vld [vmem:[%s1479_s27 + $0x44] sm:$0x1]  ;;  %v1410_v40 = vld [vmem:[%s1846_s1 + $0x48] sm:$0xff]  }
  0x1c   : > { %332 = vrot.lane.b32.xlu1 %v1560_v42, %s1429_s30  ;;  %v1618_v10 = vor.u32 %v381_v0, %v377_v63  ;;  %1253 = vmatprep.subr.bf16.mxu0 %v1402_v9  ;;  %v468_v20 = vrot.slane %v466_v3, 1  ;;  %v1408_v33 = vld [vmem:[%s1846_s1 + $0x10] sm:$0xff]   ;;  %v435_v38 = vshrl.u32 %v1178_v14, 16  ;;  %v1411_v43 = vld [vmem:[%s1846_s1 + $0x88] sm:$0xff]   ;;  %v1671_v44 = vld [vmem:[%s1479_s27 + $0x40] sm:$0xf]  ;;  %v1177_v46 = vcombine.low %v1518_v21, %v1518_v21 }
  0x1d   : > { %v439_v41 = vrot.slane %v437_v30, 1  ;;  %v1412_v45 = vld [vmem:[%s1846_s1 + $0x8] sm:$0xff]   ;;  %v524_v47 = vshll.u32 %v1184_v36, 16  ;;  %v1413_v49 = vld [vmem:[%s1846_s1 + $0xc0] sm:$0xff]   ;;  %v1691_v54 = vrot.slane %v1537_v31, 1  ;;  %v1182_v55 = vcombine.low %v1671_v44, %v268_v39  ;;  %v1417_v31 = vld [vmem:[%s1846_s1 + $0x118] sm:$0xff]  }
  0x1e   : > { %351 = vrot.lane.b32.xlu0 %v1568_v48, %s1429_s30  ;;  %1294 = vmatpush3.bf16.msra.mxu1 %v1403_v16  ;;  %v1654_v34 = vor.u32 %v468_v20, %v464_v18  ;;  %v1414_v50 = vld [vmem:[%s1846_s1 + $0x40] sm:$0xff]   ;;  %v522_v57 = vshrl.u32 %v1184_v36, 16  ;;  %v1183_v63 = vcombine.low %v1671_v44, %v1671_v44  ;;  %v1185_v14 = vrot.slane %v1184_v36, 5 }
  0x1f   : > { %1254 = vmatpush3.bf16.msra.mxu0 %v1404_v24  ;;  %1295 = vmatprep.subr.bf16.mxu1 %v1405_v26  ;;  %v1688_v52 = vor.u32 %v439_v41, %v435_v38  ;;  %v1415_v56 = vld [vmem:[%s1846_s1 + $0x80] sm:$0xff]   ;;  %v526_v60 = vrot.slane %v524_v47, 1  ;;  %v495_v0 = vshll.u32 %v1182_v55, 16  ;;  %v501_v2 = vrot.slane %v1182_v55, 1 }
  0x20   : > { %316 = vrot.lane.b32.xlu1 %v1577_v53, %s1429_s30  ;;  %1255 = vmatprep.subr.bf16.mxu0 %v1406_v27  ;;  %v493_v3 = vshrl.u32 %v1182_v55, 16  ;;  %v1719_v16 = vrot.slane %v1586_v59, 1  ;;  %v285_v20 = vrot.slane %v1525_v25, 1  ;;  %v1419_v55 = vld [vmem:[%s1846_s1 + $0x108] sm:$0xff]  }
  0x21   : > { %v527_v1 = vor.u32 %v526_v60, %v522_v57  ;;  %v497_v4 = vrot.slane %v495_v0, 1  ;;  %v1722_v18 = vsel %vm570_vm0, %v501_v2, %v1185_v14 }
  0x22   : > { %283 = vrot.lane.b32.xlu0 %v282_v58, %s1429_s30  ;;  %1296 = vmatpush3.bf16.msra.mxu1 %v1407_v32  ;;  %v1416_v58 = vld [vmem:[%s1846_s1] sm:$0xff]  }
  0x23   : > { %1256 = vmatpush3.bf16.msra.mxu0 %v1408_v33  ;;  %1297 = vmatprep.subr.bf16.mxu1 %v1409_v37  ;;  %v1715_v9 = vor.u32 %v497_v4, %v493_v3 }
  0x24   : > { %412 = vrot.lane.b32.xlu1 %v1593_v61, %s1429_s30  ;;  %1257 = vmatprep.subr.bf16.mxu0 %v1410_v40 }
  0x26   : > { %398 = vrot.lane.b32.xlu0 %v1595_v62, %s1429_s30  ;;  %1298 = vmatpush3.bf16.msra.mxu1 %v1411_v43 }
  0x27   : > { %1258 = vmatpush3.bf16.msra.mxu0 %v1412_v45  ;;  %1299 = vmatprep.subr.bf16.mxu1 %v1413_v49 }
  0x28   : > { %367 = vrot.lane.b32.xlu1 %v1173_v7, %s1429_s30  ;;  %1259 = vmatprep.subr.bf16.mxu0 %v1414_v50  ;;  %v1181_v7 = vcombine.low %v1572_v51, %v1572_v51 }
  0x2a   : > { %383 = vrot.lane.b32.xlu0 %v1618_v10, %s1429_s30  ;;  %1300 = vmatpush3.bf16.msra.mxu1 %v1415_v56 }
  0x2b   : > { %1260 = vmatpush3.bf16.msra.mxu0 %v1416_v58  ;;  %1349 = vmatprep.subr.bf16.mxu1 %v1417_v31 }
  0x2c   : > { %369 = vrot.lane.b32.xlu1 %v1621_v11, %s1429_s30  ;;  %1333 = vmatprep.subr.bf16.mxu0 %v1417_v31 }
  0x2e   : > { %454 = vrot.lane.b32.xlu0 %v1179_v29, %s1429_s30 }
  0x30   : > { %470 = vrot.lane.b32.xlu1 %v1654_v34, %s1429_s30 }
  0x32   : > { %456 = vrot.lane.b32.xlu0 %v1656_v35, %s1429_s30 }
  0x34   : > { %425 = vrot.lane.b32.xlu1 %v1177_v46, %s1429_s30 }
  0x36   : > { %441 = vrot.lane.b32.xlu0 %v1688_v52, %s1429_s30 }
  0x38   : > { %427 = vrot.lane.b32.xlu1 %v1691_v54, %s1429_s30 }
  0x3a   : > { %512 = vrot.lane.b32.xlu0 %v1183_v63, %s1429_s30 }
  0x3c   : > { %528 = vrot.lane.b32.xlu1 %v527_v1, %s1429_s30  ;;  %v1420_v1 = vld [vmem:[%s1846_s1 + $0x100] sm:$0xff]  }
  0x3e   : > { %514 = vrot.lane.b32.xlu0 %v501_v2, %s1429_s30 }
  0x40   : > { %483 = vrot.lane.b32.xlu1 %v1181_v7, %s1429_s30 }
  0x42   : > { %499 = vrot.lane.b32.xlu0 %v1715_v9, %s1429_s30 }
  0x44   : > { %485 = vrot.lane.b32.xlu1 %v1719_v16, %s1429_s30 }
  0x84   : > { %v336_v23 = vpop.permute.xlu0 %335 }
  0x85   : > { %v359_v24 = vsel %vm319_vm1, %v301_v28, %v336_v23 }
  0x86   : > { %v545_v26 = vrot.slane %v359_v24, 4  ;;  %v338_v59 = vpop.permute.xlu1 %337 }
  0x87   : > { %v362_v37 = vsel %vm319_vm1, %v1577_v53, %v338_v59 }
  0x88   : > { %v290_v27 = vpop.permute.xlu0 %289  ;;  %v546_v41 = vrot.slane %v362_v37, 4 }
  0x89   : > { %v325_v29 = vsel %vm319_vm1, %v285_v20, %v290_v27 }
  0x8a   : > { %v303_v30 = vpop.permute.xlu1 %302  ;;  %v575_v32 = vsel %vm570_vm0, %v325_v29, %v545_v26 }
  0x8b   : > { %875 = vmatprep.mubr.bf16.mxu0 %v575_v32  ;;  %v328_v28 = vsel %vm319_vm1, %v1560_v42, %v303_v30 }
  0x8c   : > { %v397_v33 = vpop.permute.xlu0 %396 }
  0x8e   : > { %v333_v36 = vpop.permute.xlu1 %332 }
  0x8f   : > { %v356_v13 = vsel %vm319_vm1, %v1489_v8, %v333_v36  ;;  %v578_v8 = vsel %vm570_vm0, %v328_v28, %v546_v41 }
  0x90   : > { %v352_v38 = vpop.permute.xlu0 %351  ;;  %v544_v45 = vrot.slane %v356_v13, 4 }
  0x91   : > { %v365_v25 = vsel %vm319_vm1, %v1496_v12, %v352_v38  ;;  %v1418_v12 = vld [vmem:[%s1846_s1 + $0x110] sm:$0xff]  }
  0x92   : > { %v547_v39 = vrot.slane %v365_v25, 4  ;;  %v317_v40 = vpop.permute.xlu1 %316 }
  0x93   : > { %v331_v43 = vsel %vm319_vm1, %v1485_v6, %v317_v40  ;;  %v417_v6 = vsel %vm319_vm1, %v1621_v11, %v397_v33 }
  0x94   : > { %v284_v46 = vpop.permute.xlu0 %283  ;;  %v581_v53 = vsel %vm570_vm0, %v331_v43, %v547_v39  ;;  %v552_v56 = vrot.slane %v417_v6, 4 }
  0x95   : > { %v322_v47 = vsel %vm319_vm1, %v1503_v15, %v284_v46  ;;  %940 = vmatprep.mubr.bf16.mxu1 %v581_v53  ;;  %v562_v46 = vrot.slane %v1719_v16, 4 }
  0x96   : > { %v413_v42 = vpop.permute.xlu1 %412  ;;  %941 = vmatmul.mubr.bf16.vlgmr.msra.gmra.mxu1 %v578_v8  ;;  %v572_v49 = vsel %vm570_vm0, %v322_v47, %v544_v45 }
  0x97   : > { %876 = vmatmul.mubr.bf16.vlgmr.msra.gmra.mxu0 %v572_v49  ;;  %1353 = vmatpush3.bf16.msra.mxu1 %v1417_v31  ;;  %v423_v15 = vsel %vm319_vm1, %v1518_v21, %v413_v42  ;;  %v555_v49 = vrot.slane %v1691_v54, 4 }
  0x98   : > { %v399_v50 = vpop.permute.xlu0 %398  ;;  %1334 = vmatpush3.bf16.msra.mxu0 %v1417_v31  ;;  %1350 = vmatprep.subr.bf16.mxu1 %v1418_v12  ;;  %v554_v63 = vrot.slane %v423_v15, 4 }
  0x99   : > { %1335 = vmatprep.subr.bf16.mxu0 %v1418_v12  ;;  %v420_v58 = vsel %vm319_vm1, %v1618_v10, %v399_v50 }
  0x9a   : > { %v368_v57 = vpop.permute.xlu1 %367  ;;  %v553_v10 = vrot.slane %v420_v58, 4 }
  0x9b   : > { %v388_v60 = vsel %vm319_vm1, %v1507_v17, %v368_v57  ;;  %1354 = vmatpush3.bf16.msra.mxu1 %v1418_v12 }
  0x9c   : > { %v384_v31 = vpop.permute.xlu0 %383  ;;  %v586_v0 = vsel %vm570_vm0, %v388_v60, %v552_v56  ;;  %1336 = vmatpush3.bf16.msra.mxu0 %v1418_v12  ;;  %1351 = vmatprep.subr.bf16.mxu1 %v1419_v55 }
  0x9d   : > { %v394_v21 = vsel %vm319_vm1, %v1512_v19, %v384_v31  ;;  %883 = vmatprep.mubr.bf16.mxu0 %v586_v0  ;;  %1337 = vmatprep.subr.bf16.mxu0 %v1419_v55 }
  0x9e   : > { %v370_v2 = vpop.permute.xlu1 %369  ;;  %v592_v3 = vsel %vm570_vm0, %v394_v21, %v554_v63 }
  0x9f   : > { %v391_v4 = vsel %vm319_vm1, %v1568_v48, %v370_v2  ;;  %884 = vmatmul.mubr.bf16.gmra.mxu0 %v581_v53  ;;  %948 = vmatprep.mubr.bf16.mxu1 %v592_v3 }
  0xa0   : > { %v455_v7 = vpop.permute.xlu0 %454  ;;  %v589_v14 = vsel %vm570_vm0, %v391_v4, %v553_v10  ;;  %1338 = vmatpush3.bf16.msra.mxu0 %v1419_v55  ;;  %1355 = vmatpush3.bf16.msra.mxu1 %v1419_v55 }
  0xa1   : > { %949 = vmatmul.mubr.bf16.gmra.mxu1 %v589_v14  ;;  %1339 = vmatprep.subr.bf16.mxu0 %v1420_v1  ;;  %v475_v23 = vsel %vm319_vm1, %v1691_v54, %v455_v7 }
  0xa2   : > { %v471_v19 = vpop.permute.xlu1 %470  ;;  %1352 = vmatprep.subr.bf16.mxu1 %v1420_v1  ;;  %v559_v20 = vrot.slane %v475_v23, 4 }
  0xa3   : > { %v481_v48 = vsel %vm319_vm1, %v1572_v51, %v471_v19 }
  0xa4   : > { %v457_v24 = vpop.permute.xlu0 %456  ;;  %1340 = vmatpush3.bf16.msra.mxu0 %v1420_v1  ;;  %1356 = vmatpush3.bf16.msra.mxu1 %v1420_v1  ;;  %v561_v29 = vrot.slane %v481_v48, 4 }
  0xa5   : > { %v478_v59 = vsel %vm319_vm1, %v1688_v52, %v457_v24 }
  0xa6   : > { %v426_v26 = vpop.permute.xlu1 %425  ;;  %v560_v36 = vrot.slane %v478_v59, 4 }
  0xa7   : > { %v446_v27 = vsel %vm319_vm1, %v1595_v62, %v426_v26 }
  0xa8   : > { %v442_v30 = vpop.permute.xlu0 %441  ;;  %v597_v32 = vsel %vm570_vm0, %v446_v27, %v559_v20  ;;  %v1166_v20 = vld [vmem:[%s1847_s2] ss:$0 sm:$0xff] }
  0xa9   : > { %v452_v33 = vsel %vm319_vm1, %v1607_v5, %v442_v30  ;;  %891 = vmatprep.mubr.bf16.mxu0 %v597_v32  ;;  %v548_v5 = vrot.slane %v1621_v11, 4 }
  0xaa   : > { %v428_v37 = vpop.permute.xlu1 %427  ;;  %892 = vmatmul.mubr.bf16.gmra.mxu0 %v592_v3  ;;  %v603_v51 = vsel %vm570_vm0, %v452_v33, %v561_v29 }
  0xab   : > { %v449_v38 = vsel %vm319_vm1, %v1593_v61, %v428_v37  ;;  %956 = vmatprep.mubr.bf16.mxu1 %v603_v51  ;;  %v584_v11 = vsel %vm570_vm0, %v1507_v17, %v548_v5  ;;  %v606_v17 = vsel %vm570_vm0, %v1656_v35, %v562_v46 }
  0xac   : > { %v513_v52 = vpop.permute.xlu0 %512  ;;  %v600_v13 = vsel %vm570_vm0, %v449_v38, %v560_v36 }
  0xad   : > { %957 = vmatmul.mubr.bf16.gmra.mxu1 %v600_v13  ;;  %v533_v28 = vsel %vm319_vm1, %v1719_v16, %v513_v52 }
  0xae   : > { %v529_v25 = vpop.permute.xlu1 %528  ;;  %v566_v41 = vrot.slane %v533_v28, 4 }
  0xaf   : > { %v539_v40 = vsel %vm319_vm1, %v1629_v22, %v529_v25 }
  0xb0   : > { %v515_v39 = vpop.permute.xlu0 %514  ;;  %v568_v53 = vrot.slane %v539_v40, 4 }
  0xb1   : > { %v536_v61 = vsel %vm319_vm1, %v1715_v9, %v515_v39 }
  0xb2   : > { %v484_v43 = vpop.permute.xlu1 %483  ;;  %v567_v12 = vrot.slane %v536_v61, 4 }
  0xb3   : > { %v504_v45 = vsel %vm319_vm1, %v1656_v35, %v484_v43 }
  0xb4   : > { %v500_v47 = vpop.permute.xlu0 %499  ;;  %v608_v8 = vsel %vm570_vm0, %v504_v45, %v566_v41 }
  0xb5   : > { %v510_v22 = vsel %vm319_vm1, %v1671_v44, %v500_v47  ;;  %899 = vmatprep.mubr.bf16.mxu0 %v608_v8  ;;  %v595_v44 = vsel %vm570_vm0, %v1595_v62, %v555_v49 }
  0xb6   : > { %v486_v42 = vpop.permute.xlu1 %485  ;;  %900 = vmatmul.mubr.bf16.gmra.mxu0 %v603_v51  ;;  %v614_v9 = vsel %vm570_vm0, %v510_v22, %v568_v53 }
  0xb7   : > { %v507_v16 = vsel %vm319_vm1, %v1654_v34, %v486_v42  ;;  %964 = vmatprep.mubr.bf16.mxu1 %v614_v9  ;;  %1341 = vmatprep.mubr.msk.bf16.mxu0 %vm319_vm1, %v584_v11 }
  0xb8   : > { %v611_v6 = vsel %vm570_vm0, %v507_v16, %v567_v12 }
  0xb9   : > { %965 = vmatmul.mubr.bf16.gmra.mxu1 %v611_v6 }
  0xba   : > { %1345 = vmatprep.mubr.msk.bf16.mxu1 %vm319_vm1, %v606_v17 }
  0xbe   : > { %1342 = vmatmul.mubr.msk.bf16.vlgmr.msra.gmra.mxu0 %vm319_vm1, %v595_v44 }
  0xc1   : > { %1346 = vmatmul.mubr.msk.bf16.vlgmr.msra.gmra.mxu1 %vm319_vm1, %v1722_v18 }
 0x156   : > { %v1301_v34 = vpop.f32.mrf.mxu1 }
 0x157   : > { %v1261_v54 = vpop.f32.mrf.mxu0 }
 0x158   : > { %v1302_v50 = vpop.f32.mrf.mxu1 }
 0x159   : > { %v1262_v15 = vpop.f32.mrf.mxu0  ;;  %v1303_v38 = vadd.f32 %v1302_v50, %v1301_v34 }
 0x15a   : > { %v1304_v55 = vpop.f32.mrf.mxu1  ;;  %v1263_v24 = vadd.f32 %v1262_v15, %v1261_v54 }
 0x15b   : > { %v1264_v56 = vpop.f32.mrf.mxu0 }
 0x15c   : > { %v1305_v57 = vpop.f32.mrf.mxu1  ;;  %v878_v52 = vadd.f32 %v1263_v24, %v1166_v20 }
 0x15d   : > { %v1265_v35 = vpop.f32.mrf.mxu0  ;;  %v1306_v25 = vadd.f32 %v1305_v57, %v1304_v55 }
 0x15e   : > { %v1266_v26 = vadd.f32 %v1265_v35, %v1264_v56  ;;  %v943_v49 = vadd.f32 %v1303_v38, %v878_v52 }
 0x15f   : > { %v1267_v58 = vpop.f32.mrf.mxu0 }
 0x160   : > { %v881_v28 = vadd.f32 %v1266_v26, %v1166_v20 }
 0x161   : > { %v1268_v60 = vpop.f32.mrf.mxu0  ;;  %v1307_v63 = vpop.f32.mrf.mxu1 }
 0x162   : > { %v1269_v19 = vadd.f32 %v1268_v60, %v1267_v58  ;;  %v946_v44 = vadd.f32 %v1306_v25, %v881_v28 }
 0x163   : > { %v1308_v31 = vpop.f32.mrf.mxu1  ;;  %v1270_v0 = vpop.f32.mrf.mxu0 }
 0x164   : > { %v886_v27 = vadd.f32 %v1269_v19, %v1166_v20  ;;  %v1309_v29 = vadd.f32 %v1308_v31, %v1307_v63 }
 0x165   : > { %v1310_v21 = vpop.f32.mrf.mxu1  ;;  %v1271_v62 = vpop.f32.mrf.mxu0 }
 0x166   : > { %v1272_v30 = vadd.f32 %v1271_v62, %v1270_v0  ;;  %v951_v46 = vadd.f32 %v1309_v29, %v886_v27 }
 0x167   : > { %v1311_v10 = vpop.f32.mrf.mxu1 }
 0x168   : > { %v889_v41 = vadd.f32 %v1272_v30, %v1166_v20  ;;  %v1312_v43 = vadd.f32 %v1311_v10, %v1310_v21 }
 0x16a   : > { %v1273_v1 = vpop.f32.mrf.mxu0  ;;  %v954_v15 = vadd.f32 %v1312_v43, %v889_v41 }
 0x16c   : > { %v1274_v2 = vpop.f32.mrf.mxu0 }
 0x16d   : > { %v1313_v3 = vpop.f32.mrf.mxu1  ;;  %v1275_v36 = vadd.f32 %v1274_v2, %v1273_v1 }
 0x16e   : > { %v1276_v4 = vpop.f32.mrf.mxu0 }
 0x16f   : > { %v1314_v18 = vpop.f32.mrf.mxu1  ;;  %v894_v53 = vadd.f32 %v1275_v36, %v1166_v20 }
 0x170   : > { %v1277_v14 = vpop.f32.mrf.mxu0  ;;  %v1315_v47 = vadd.f32 %v1314_v18, %v1313_v3 }
 0x171   : > { %v1316_v7 = vpop.f32.mrf.mxu1  ;;  %v1278_v37 = vadd.f32 %v1277_v14, %v1276_v4 }
 0x172   : > { %v959_v35 = vadd.f32 %v1315_v47, %v894_v53 }
 0x173   : > { %v1317_v48 = vpop.f32.mrf.mxu1  ;;  %v897_v8 = vadd.f32 %v1278_v37, %v1166_v20 }
 0x174   : > { %v1318_v11 = vadd.f32 %v1317_v48, %v1316_v7 }
 0x176   : > { %v1279_v23 = vpop.f32.mrf.mxu0  ;;  %v962_v58 = vadd.f32 %v1318_v11, %v897_v8 }
 0x178   : > { %v1280_v59 = vpop.f32.mrf.mxu0 }
 0x179   : > { %v1281_v32 = vadd.f32 %v1280_v59, %v1279_v23  ;;  %v1319_v33 = vpop.f32.mrf.mxu1 }
 0x17a   : > { %v1282_v51 = vpop.f32.mrf.mxu0 }
 0x17b   : > { %v1320_v13 = vpop.f32.mrf.mxu1  ;;  %v902_v39 = vadd.f32 %v1281_v32, %v1166_v20 }
 0x17c   : > { %v1321_v5 = vadd.f32 %v1320_v13, %v1319_v33  ;;  %v1283_v40 = vpop.f32.mrf.mxu0 }
 0x17d   : > { %v1284_v61 = vadd.f32 %v1283_v40, %v1282_v51  ;;  %v1322_v45 = vpop.f32.mrf.mxu1 }
 0x17e   : > { %v1343_v22 = vpop.f32.mrf.mxu0  ;;  %v967_v6 = vadd.f32 %v1321_v5, %v902_v39 }
 0x17f   : > { %v905_v12 = vadd.f32 %v1284_v61, %v1166_v20  ;;  %v1016_v42 = vadd.f32 %v1343_v22, %v951_v46  ;;  %v1323_v9 = vpop.f32.mrf.mxu1 }
 0x180   : > { %v1324_v16 = vadd.f32 %v1323_v9, %v1322_v45  ;;  %v1007_v17 = vpop.f32.mrf.mxu0 }
 0x181   : > { %vm1040_vm3 = vcmp.ge.f32.partialorder %v1016_v42, 0.0  ;;  %v1048_v34 = vmul.f32 0.1, %v1016_v42  ;;  %v1008_v54 = vadd.f32 %v1007_v17, %v943_v49  ;;  %v1347_v50 = vpop.f32.mrf.mxu1 }
 0x182   : > { %v1032_v55 = vadd.f32 %v1347_v50, %v967_v6  ;;  %v1344_v56 = vpop.f32.mrf.mxu0  ;;  %v970_v57 = vadd.f32 %v1324_v16, %v905_v12 }
 0x183   : > { %v1056_v60 = vsel %vm1040_vm3, %v1016_v42, %v1048_v34  ;;  %vm1038_vm4 = vcmp.ge.f32.partialorder %v1008_v54, 0.0  ;;  %v1046_v63 = vmul.f32 0.1, %v1008_v54  ;;  %v1019_v31 = vadd.f32 %v1344_v56, %v954_v15  ;;  %v1023_v0 = vpop.f32.mrf.mxu1 }
 0x184   : > { %v1239_v21 = vpack.c.bf16 %v1056_v60, %v1056_v60  ;;  %vm1044_vm5 = vcmp.ge.f32.partialorder %v1032_v55, 0.0  ;;  %v1052_v62 = vmul.f32 0.1, %v1032_v55  ;;  %v1024_v1 = vadd.f32 %v1023_v0, %v959_v35  ;;  %v1010_v10 = vpop.f32.mrf.mxu0 }
 0x185   : > { %v1054_v2 = vsel %vm1038_vm4, %v1008_v54, %v1046_v63  ;;  %vm1041_vm6 = vcmp.ge.f32.partialorder %v1019_v31, 0.0  ;;  %v1049_v3 = vmul.f32 0.1, %v1019_v31  ;;  %v1011_v18 = vadd.f32 %v1010_v10, %v946_v44  ;;  %v1348_v4 = vpop.f32.mrf.mxu1 }
 0x186   : > { %1097 = vst.msk [vmem:[%s1824_s23 + $0x8] sm:$0xf] %vm1094_vm2, %v1239_v21  ;;  %v1237_v7 = vpack.c.bf16 %v1054_v2, %v1054_v2  ;;  %v1060_v14 = vsel %vm1044_vm5, %v1032_v55, %v1052_v62  ;;  %vm1042_vm7 = vcmp.ge.f32.partialorder %v1024_v1, 0.0  ;;  %v1050_v19 = vmul.f32 0.1, %v1024_v1 }
 0x187   : > { %v1243_v23 = vpack.c.bf16 %v1060_v14, %v1060_v14  ;;  %v1057_v24 = vsel %vm1041_vm6, %v1019_v31, %v1049_v3  ;;  %vm1039_vm8 = vcmp.ge.f32.partialorder %v1011_v18, 0.0  ;;  %v1047_v48 = vmul.f32 0.1, %v1011_v18  ;;  %v1026_v20 = vpop.f32.mrf.mxu1 }
 0x188   : > { %1095 = vst.msk [vmem:[%s1824_s23] sm:$0xf] %vm1094_vm2, %v1237_v7  ;;  %v1240_v26 = vpack.c.bf16 %v1057_v24, %v1057_v24  ;;  %v1058_v59 = vsel %vm1042_vm7, %v1024_v1, %v1050_v19  ;;  %v1035_v27 = vadd.f32 %v1348_v4, %v970_v57  ;;  %v1027_v29 = vadd.f32 %v1026_v20, %v962_v58 }
 0x189   : > { %1101 = vst.msk [vmem:[%s1824_s23 + $0x18] sm:$0xf] %vm1094_vm2, %v1243_v23  ;;  %v1241_v30 = vpack.c.bf16 %v1058_v59, %v1058_v59  ;;  %v1055_v32 = vsel %vm1039_vm8, %v1011_v18, %v1047_v48 }
 0x18a   : > { %1098 = vst.msk [vmem:[%s1824_s23 + $0xc] sm:$0xf] %vm1094_vm2, %v1240_v26  ;;  %v1238_v33 = vpack.c.bf16 %v1055_v32, %v1055_v32  ;;  %vm1045_vm9 = vcmp.ge.f32.partialorder %v1035_v27, 0.0  ;;  %v1053_v36 = vmul.f32 0.1, %v1035_v27  ;;  %vm1043_vm10 = vcmp.ge.f32.partialorder %v1027_v29, 0.0 }
 0x18b   : > { %1099 = vst.msk [vmem:[%s1824_s23 + $0x10] sm:$0xf] %vm1094_vm2, %v1241_v30  ;;  %v1051_v37 = vmul.f32 0.1, %v1027_v29 }
 0x18c   : > { %1096 = vst.msk [vmem:[%s1824_s23 + $0x4] sm:$0xf] %vm1094_vm2, %v1238_v33  ;;  %v1061_v51 = vsel %vm1045_vm9, %v1035_v27, %v1053_v36 }
 0x18d   : > { %v1244_v38 = vpack.c.bf16 %v1061_v51, %v1061_v51  ;;  %v1059_v52 = vsel %vm1043_vm10, %v1027_v29, %v1051_v37 }
 0x18e   : > { %v1242_v13 = vpack.c.bf16 %v1059_v52, %v1059_v52 }
 0x18f   : > { %1102 = vst.msk [vmem:[%s1824_s23 + $0x1c] sm:$0xf] %vm1094_vm2, %v1244_v38 }
 0x190   : > { %1100 = vst.msk [vmem:[%s1824_s23 + $0x14] sm:$0xf] %vm1094_vm2, %v1242_v13 }
 0x191 PF: > { %s13_s12 = sadd.s32 1, %s1427_s12  }
 0x192   : > { %p10_p4 = scmp.ge.s32.totalorder %s13_s12, 4  }
 0x194   :  { %12 = sbr.rel (!%p10_p4) target bundleno = 1 (0x1), region = 62 }

// kernel: run_pwcnet_forward.23
= control target key start
LH: loop header
LB: loop body
LE: loop exit
PB: predicated region body
PF: predicated region fallthrough
CT: control target
= control target key end

     0   :  { %s598_s12 = smov 0   ;;  %s651_s0 = inlined_call_operand.vmem [shape: bf16[32,8], index: 0, kind: input, shape index: {}]   ;;  %s652_s1 = inlined_call_operand.vmem [shape: bf16[2,2,8,8], index: 1, kind: input, shape index: {}]   ;;  %s653_s2 = inlined_call_operand.vmem [shape: bf16[8,32], index: 2, kind: input, shape index: {}]   ;;  %s654_s3 = inlined_call_operand.vmem [shape: f32[2,2,32,32], index: 3, kind: output, shape index: {}]  }
   0x1 LB: > { %s492_s13 = sadd.s32 4294967295, %s576_s12   ;;  %p496_p0 = scmp.ge.s32.totalorder %s576_s12, 1  ;;  %s576_s12 = sphi %s598_s12, %s13_s12  }
   0x2   : > { %p137_p1 = scmp.lt.s32.totalorder %s576_s12, 3 }
   0x4   : > { %p138_p2 = pnand %p496_p0, %p137_p1 }
   0x5   : > { %p161_p3 = scmp.lt.s32.totalorder (!%p138_p2), %s492_s13, 1 }
   0x6   : > { %141 = sbr.rel (%p138_p2) target bundleno = 431 (0x1af), region = 32 }
   0xb   : > { %v568_v0 = vld [vmem:[%s651_s0] sm:$0xff]   ;;  %vm188_vm0 = vcmask 64512   ;;  %s656_s13 = smov (!%p161_p3, %s492_s13), 1  ;;  %vm195_vm1 = vcmask 1043456   ;;  %v569_v4 = vld [vmem:[%s651_s0 + $0x8] sm:$0xff]   ;;  %vm312_vm2 = vcmask 261120  }
   0xc   : > { %534 = vmatprep.mubr.msk.bf16.mxu0 %vm188_vm0, %v568_v0  ;;  %s518_s16 = sshll.u32 %s656_s13, 3  ;;  %v176_v6 = vld [vmem:[%s653_s2] sm:$0xf]  ;;  %s519_s24 = sshll.u32 %s656_s13, 6 }
   0xd   : > { %s165_s19 = scalar_lea.vmem %s652_s1, %s518_s16  ;;  %557 = vmatprep.subr.msk.bf16.mxu1 %vm195_vm1, %v176_v6  ;;  %v257_v7 = vsel %vm195_vm1, %v176_v6, 0  ;;  %s170_s27 = scalar_lea.vmem %s654_s3, %s519_s24 }
   0xe   : > { %v177_v1 = vld [vmem:[%s165_s19] sm:$0xf]  ;;  %v507_v2 = vld [vmem:[%s165_s19 + $0x4] sm:$0xf]  ;;  %539 = vmatpush3.bf16.msra.mxu1 %v257_v7 }
   0xf   : > { %556 = vmatprep.subr.msk.bf16.mxu0 %vm195_vm1, %v177_v1  ;;  %v197_v3 = vsel %vm195_vm1, %v177_v1, 0  ;;  %v320_v5 = vsel %vm195_vm1, %v507_v2, 0  ;;  %559 = vmatprep.subr.msk.bf16.mxu1 %vm195_vm1, %v176_v6 }
  0x10   : > { %533 = vmatpush3.bf16.msra.mxu0 %v197_v3 }
  0x11   : > { %558 = vmatprep.subr.msk.bf16.mxu0 %vm195_vm1, %v507_v2 }
  0x13   : > { %535 = vmatmul.mubr.msk.bf16.vlgmr.msra.gmra.mxu0 %vm188_vm0, %v569_v4 }
  0x14   : > { %545 = vmatpush3.bf16.msra.mxu0 %v320_v5  ;;  %546 = vmatprep.mubr.msk.bf16.mxu0 %vm188_vm0, %v568_v0 }
  0x1b   : > { %547 = vmatmul.mubr.msk.bf16.vlgmr.msra.gmra.mxu0 %vm188_vm0, %v569_v4 }
  0xd3   : > { %v536_v8 = vpop.f32.mrf.mxu0 }
  0xd5   : > { %v233_v9 = vpop.f32.mrf.mxu0 }
  0xd7   : > { %v537_v10 = vpop.f32.mrf.mxu0 }
  0xd8   : > { %v249_v13 = vpack.c.bf16 %v537_v10, %v536_v8 }
  0xd9   : > { %v236_v11 = vpop.f32.mrf.mxu0 }
  0xda   : > { %v248_v12 = vpack.c.bf16 %v236_v11, %v233_v9 }
  0xdb   : > { %v548_v14 = vpop.f32.mrf.mxu0 }
  0xdc   : > { %540 = vmatprep.mubr.msk.bf16.mxu1 %vm188_vm0, %v248_v12 }
  0xdd   : > { %541 = vmatmul.mubr.msk.bf16.vlgmr.msra.gmra.mxu1 %vm188_vm0, %v249_v13  ;;  %v356_v15 = vpop.f32.mrf.mxu0 }
  0xde   : > { %551 = vmatpush3.bf16.msra.mxu1 %v257_v7 }
  0xdf   : > { %v549_v16 = vpop.f32.mrf.mxu0 }
  0xe0   : > { %v372_v19 = vpack.c.bf16 %v549_v16, %v548_v14 }
  0xe1   : > { %v359_v17 = vpop.f32.mrf.mxu0 }
  0xe2   : > { %v371_v18 = vpack.c.bf16 %v359_v17, %v356_v15 }
  0xe4   : > { %552 = vmatprep.mubr.msk.bf16.mxu1 %vm188_vm0, %v371_v18 }
  0xe5   : > { %553 = vmatmul.mubr.msk.bf16.vlgmr.msra.gmra.mxu1 %vm188_vm0, %v372_v19 }
 0x19d   : > { %v542_v20 = vpop.f32.mrf.mxu1 }
 0x19e   : > { %v310_v21 = vmul.f32 20.0, %v542_v20 }
 0x19f   : > { %v293_v22 = vpop.f32.mrf.mxu1 }
 0x1a0   : > { %315 = vst.msk [vmem:[%s170_s27 + $0x10] sm:$0xff] %vm312_vm2, %v310_v21  ;;  %v308_v23 = vmul.f32 20.0, %v293_v22 }
 0x1a1   : > { %v543_v24 = vpop.f32.mrf.mxu1 }
 0x1a2   : > { %313 = vst.msk [vmem:[%s170_s27] sm:$0xff] %vm312_vm2, %v308_v23  ;;  %v311_v25 = vmul.f32 20.0, %v543_v24 }
 0x1a3   : > { %v296_v26 = vpop.f32.mrf.mxu1 }
 0x1a4   : > { %316 = vst.msk [vmem:[%s170_s27 + $0x18] sm:$0xff] %vm312_vm2, %v311_v25  ;;  %v309_v27 = vmul.f32 20.0, %v296_v26 }
 0x1a5   : > { %v554_v28 = vpop.f32.mrf.mxu1 }
 0x1a6   : > { %314 = vst.msk [vmem:[%s170_s27 + $0x8] sm:$0xff] %vm312_vm2, %v309_v27  ;;  %v430_v29 = vmul.f32 20.0, %v554_v28 }
 0x1a7   : > { %v413_v30 = vpop.f32.mrf.mxu1 }
 0x1a8   : > { %514 = vst.msk [vmem:[%s170_s27 + $0x30] sm:$0xff] %vm312_vm2, %v430_v29  ;;  %v428_v31 = vmul.f32 20.0, %v413_v30 }
 0x1a9   : > { %v555_v32 = vpop.f32.mrf.mxu1 }
 0x1aa   : > { %512 = vst.msk [vmem:[%s170_s27 + $0x20] sm:$0xff] %vm312_vm2, %v428_v31  ;;  %v431_v33 = vmul.f32 20.0, %v555_v32 }
 0x1ab   : > { %v416_v34 = vpop.f32.mrf.mxu1 }
 0x1ac   : > { %515 = vst.msk [vmem:[%s170_s27 + $0x38] sm:$0xff] %vm312_vm2, %v431_v33  ;;  %v429_v35 = vmul.f32 20.0, %v416_v34 }
 0x1ae   : > { %513 = vst.msk [vmem:[%s170_s27 + $0x28] sm:$0xff] %vm312_vm2, %v429_v35 }
 0x1af PF: > { %s13_s12 = sadd.s32 1, %s576_s12  }
 0x1b0   : > { %p10_p4 = scmp.ge.s32.totalorder %s13_s12, 4  }
 0x1b2   :  { %12 = sbr.rel (!%p10_p4) target bundleno = 1 (0x1), region = 64 }

// kernel: run_pwcnet_forward.21
= control target key start
LH: loop header
LB: loop body
LE: loop exit
PB: predicated region body
PF: predicated region fallthrough
CT: control target
= control target key end

     0   :  { %s1230_s12 = smov 0   ;;  %s1586_s0 = inlined_call_operand.vmem [shape: bf16[2,1,10,10,32], index: 0, kind: input, shape index: {}]   ;;  %s1587_s1 = inlined_call_operand.vmem [shape: bf16[288,128], index: 1, kind: input, shape index: {}]   ;;  %s1588_s2 = inlined_call_operand.vmem [shape: f32[1,128], index: 2, kind: input, shape index: {}]   ;;  %s1589_s3 = inlined_call_operand.vmem [shape: bf16[2,64,128], index: 3, kind: output, shape index: {}]  }
   0x1 LB: > { %s983_s13 = sadd.s32 4294967295, %s1205_s12   ;;  %p987_p0 = scmp.ge.s32.totalorder %s1205_s12, 1  ;;  %s1205_s12 = sphi %s1230_s12, %s13_s12  }
   0x2   : > { %p137_p1 = scmp.lt.s32.totalorder %s1205_s12, 3 }
   0x4   : > { %p138_p2 = pnand %p987_p0, %p137_p1 }
   0x5   : > { %p161_p3 = scmp.lt.s32.totalorder (!%p138_p2), %s983_s13, 1  ;;  %s1207_s30 = smov (!%p138_p2), 64  }
   0x6   : > { %141 = sbr.rel (%p138_p2) target bundleno = 437 (0x1b5), region = 32  ;;  %s1208_s4 = smov (!%p138_p2), 96  }
   0x7   : > { %s1209_s7 = smov (!%p138_p2), 32  }
   0xb   : > { %v1181_v0 = vld [vmem:[%s1587_s1 + $0x78] sm:$0xff]   ;;  %s1591_s13 = smov (!%p161_p3, %s983_s13), 1  ;;  %v1183_v2 = vld [vmem:[%s1587_s1 + $0x70] sm:$0xff]   ;;  %v1185_v4 = vld [vmem:[%s1587_s1 + $0x68] sm:$0xff]   ;;  %vm605_vm0 = vcmask 1043456   ;;  %vm288_vm1 = vcmask 261120  }
   0xc   : > { %v1182_v1 = vld [vmem:[%s1587_s1 + $0x38] sm:$0xff]   ;;  %1076 = vmatprep.subr.bf16.mxu0 %v1181_v0  ;;  %1134 = vmatprep.subr.bf16.mxu1 %v1181_v0  ;;  %s1150_s20 = smul.u32 80, %s1591_s13  ;;  %v1184_v3 = vld [vmem:[%s1587_s1 + $0x30] sm:$0xff]   ;;  %v1186_v5 = vld [vmem:[%s1587_s1 + $0x28] sm:$0xff]   ;;  %vm292_vm2 = vcmask 523264   ;;  %vm295_vm3 = vcmask 785408  }
   0xd   : > { %1077 = vmatpush3.bf16.msra.mxu0 %v1182_v1  ;;  %1142 = vmatpush3.bf16.msra.mxu1 %v1182_v1  ;;  %v1187_v23 = vld [vmem:[%s1587_s1 + $0x60] sm:$0xff]   ;;  %v1189_v41 = vld [vmem:[%s1587_s1 + $0x58] sm:$0xff]   ;;  %v1191_v46 = vld [vmem:[%s1587_s1 + $0x50] sm:$0xff]  }
   0xe   : > { %1078 = vmatprep.subr.bf16.mxu0 %v1183_v2  ;;  %1135 = vmatprep.subr.bf16.mxu1 %v1183_v2  ;;  %s1259_s27 = scalar_lea.vmem %s1586_s0, %s1150_s20  ;;  %v1188_v32 = vld [vmem:[%s1587_s1 + $0x20] sm:$0xff]   ;;  %v1190_v45 = vld [vmem:[%s1587_s1 + $0x18] sm:$0xff]   ;;  %v1192_v52 = vld [vmem:[%s1587_s1 + $0x10] sm:$0xff]  }
   0xf   : > { %v1265_v6 = vld [vmem:[%s1259_s27 + $0x18] sm:$0xf]  ;;  %v222_v7 = vld [vmem:[%s1259_s27 + $0x1c] sm:$0x1]  ;;  %v1269_v8 = vld [vmem:[%s1259_s27 + $0x10] sm:$0xf] }
  0x10   : > { %v1273_v9 = vcombine.low %v1265_v6, %v1265_v6  ;;  %v220_v10 = vld [vmem:[%s1259_s27 + $0x14] sm:$0x1]  ;;  %v995_v11 = vcombine.low %v1269_v8, %v1269_v8  ;;  %v1279_v12 = vld [vmem:[%s1259_s27 + $0x8] sm:$0xf]  ;;  %v218_v13 = vld [vmem:[%s1259_s27 + $0xc] sm:$0x1]  ;;  %v1283_v14 = vcombine.low %v1265_v6, %v222_v7 }
  0x11   : > { %1079 = vmatpush3.bf16.msra.mxu0 %v1184_v3  ;;  %1143 = vmatpush3.bf16.msra.mxu1 %v1184_v3  ;;  %v1286_v15 = vcombine.low %v1269_v8, %v220_v10  ;;  %v994_v16 = vcombine.low %v1279_v12, %v218_v13  ;;  %v1290_v17 = vld [vmem:[%s1259_s27] sm:$0xf]  ;;  %v216_v18 = vld [vmem:[%s1259_s27 + $0x4] sm:$0x1]  ;;  %v1308_v28 = vld [vmem:[%s1259_s27 + $0x38] sm:$0xf]  ;;  %v993_v0 = vcombine.low %v1279_v12, %v1279_v12 }
  0x12   : > { %1080 = vmatprep.subr.bf16.mxu0 %v1185_v4  ;;  %1136 = vmatprep.subr.bf16.mxu1 %v1185_v4  ;;  %v992_v19 = vcombine.low %v1290_v17, %v216_v18  ;;  %v324_v22 = vshll.u32 %v1283_v14, 16  ;;  %v230_v29 = vld [vmem:[%s1259_s27 + $0x3c] sm:$0x1]  ;;  %v1312_v30 = vld [vmem:[%s1259_s27 + $0x40] sm:$0xf]  ;;  %v322_v34 = vshrl.u32 %v1283_v14, 16 }
  0x13   : > { %316 = vrot.lane.b32.xlu1 %v1273_v9, %s1207_s30  ;;  %309 = vrot.lane.b32.xlu0 %v995_v11, %s1208_s4  ;;  %v1298_v20 = vrot.slane %v1286_v15, 1  ;;  %v263_v21 = vshll.u32 %v994_v16, 16  ;;  %v267_v24 = vrot.slane %v994_v16, 1  ;;  %v261_v25 = vshrl.u32 %v994_v16, 16  ;;  %v232_v31 = vld [vmem:[%s1259_s27 + $0x44] sm:$0x1] }
  0x14   : > { %v243_v27 = vshll.u32 %v992_v19, 16  ;;  %v249_v33 = vrot.slane %v992_v19, 1  ;;  %v326_v35 = vrot.slane %v324_v22, 1  ;;  %v241_v36 = vshrl.u32 %v992_v19, 16  ;;  %v233_v44 = vld [vmem:[%s1259_s27 + $0x48] sm:$0xf] }
  0x15   : > { %1081 = vmatpush3.bf16.msra.mxu0 %v1186_v5  ;;  %1144 = vmatpush3.bf16.msra.mxu1 %v1186_v5  ;;  %v265_v26 = vrot.slane %v263_v21, 1  ;;  %v281_v39 = vshll.u32 %v1286_v15, 16  ;;  %v1006_v40 = vcombine.low %v1308_v28, %v230_v29  ;;  %v1329_v42 = vcombine.low %v1312_v30, %v232_v31  ;;  %v234_v51 = vld [vmem:[%s1259_s27 + $0x4c] sm:$0x1]  ;;  %v1350_v54 = vld [vmem:[%s1259_s27 + $0x30] sm:$0xf] }
  0x16   : > { %1082 = vmatprep.subr.bf16.mxu0 %v1187_v23  ;;  %1137 = vmatprep.subr.bf16.mxu1 %v1187_v23  ;;  %v245_v38 = vrot.slane %v243_v27, 1  ;;  %v279_v43 = vshrl.u32 %v1286_v15, 16  ;;  %v1342_v47 = vor.u32 %v326_v35, %v322_v34  ;;  %v228_v55 = vld [vmem:[%s1259_s27 + $0x34] sm:$0x1]  ;;  %v1193_v56 = vld [vmem:[%s1587_s1 + $0x48] sm:$0xff]   ;;  %v1361_v60 = vcombine.low %v233_v44, %v234_v51  ;;  %v1195_v62 = vld [vmem:[%s1587_s1 + $0x40] sm:$0xff]  }
  0x17   : > { %311 = vrot.lane.b32.xlu0 %v1298_v20, %s1209_s7  ;;  %273 = vrot.lane.b32.xlu1 %v995_v11, %s1207_s30  ;;  %v1321_v37 = vor.u32 %v265_v26, %v261_v25  ;;  %v283_v49 = vrot.slane %v281_v39, 1  ;;  %v484_v50 = vshll.u32 %v1006_v40, 16  ;;  %v530_v53 = vrot.slane %v1329_v42, 1  ;;  %v1194_v61 = vld [vmem:[%s1587_s1 + $0x8] sm:$0xff]   ;;  %v1196_v3 = vld [vmem:[%s1587_s1] sm:$0xff]  }
  0x18   : > { %v246_v48 = vor.u32 %v245_v38, %v241_v36  ;;  %v482_v58 = vshrl.u32 %v1006_v40, 16  ;;  %v564_v1 = vshll.u32 %v1361_v60, 16  ;;  %v1004_v2 = vcombine.low %v1350_v54, %v228_v55  ;;  %v1390_v18 = vld [vmem:[%s1259_s27 + $0x20] sm:$0xf]  ;;  %v224_v19 = vld [vmem:[%s1259_s27 + $0x24] sm:$0x1] }
  0x19   : > { %1083 = vmatpush3.bf16.msra.mxu0 %v1188_v32  ;;  %1145 = vmatpush3.bf16.msra.mxu1 %v1188_v32  ;;  %v1359_v57 = vor.u32 %v283_v49, %v279_v43  ;;  %v486_v59 = vrot.slane %v484_v50, 1  ;;  %v1009_v4 = vcombine.low %v233_v44, %v233_v44  ;;  %v490_v5 = vrot.slane %v1006_v40, 1  ;;  %v226_v29 = vld [vmem:[%s1259_s27 + $0x2c] sm:$0x1]  ;;  %v1407_v31 = vld [vmem:[%s1259_s27 + $0x28] sm:$0xf] }
  0x1a   : > { %1084 = vmatprep.subr.bf16.mxu0 %v1189_v41  ;;  %1138 = vmatprep.subr.bf16.mxu1 %v1189_v41  ;;  %v562_v7 = vshrl.u32 %v1361_v60, 16  ;;  %v566_v10 = vrot.slane %v564_v1, 1  ;;  %v444_v11 = vshll.u32 %v1004_v2, 16  ;;  %v442_v15 = vshrl.u32 %v1004_v2, 16  ;;  %v1413_v32 = vld [vmem:[%s1587_s1 + $0x88] sm:$0xff]  }
  0x1b   : > { %307 = vrot.lane.b32.xlu0 %v267_v24, %s1207_s30  ;;  %268 = vrot.lane.b32.xlu1 %v267_v24, %s1209_s7  ;;  %v1374_v63 = vor.u32 %v486_v59, %v482_v58  ;;  %v1007_v21 = vcombine.low %v1312_v30, %v1312_v30  ;;  %v1000_v23 = vcombine.low %v1390_v18, %v224_v19  ;;  %v524_v24 = vshll.u32 %v1329_v42, 16 }
  0x1c   : > { %v567_v13 = vor.u32 %v566_v10, %v562_v7  ;;  %v446_v16 = vrot.slane %v444_v11, 1  ;;  %v522_v26 = vshrl.u32 %v1329_v42, 16  ;;  %v1002_v30 = vcombine.low %v1407_v31, %v226_v29 }
  0x1d   : > { %1085 = vmatpush3.bf16.msra.mxu0 %v1190_v45  ;;  %1146 = vmatpush3.bf16.msra.mxu1 %v1190_v45  ;;  %v370_v25 = vrot.slane %v1000_v23, 1  ;;  %v526_v27 = vrot.slane %v524_v24, 1  ;;  %v450_v34 = vrot.slane %v1004_v2, 1  ;;  %v330_v36 = vrot.slane %v1283_v14, 1 }
  0x1e   : > { %1086 = vmatprep.subr.bf16.mxu0 %v1191_v46  ;;  %1139 = vmatprep.subr.bf16.mxu1 %v1191_v46  ;;  %v1397_v22 = vor.u32 %v446_v16, %v442_v15  ;;  %v410_v35 = vrot.slane %v1002_v30, 1  ;;  %v1001_v39 = vcombine.low %v1407_v31, %v1407_v31  ;;  %v404_v40 = vshll.u32 %v1002_v30, 16 }
  0x1f   : > { %305 = vrot.lane.b32.xlu0 %v1321_v37, %s1209_s7  ;;  %250 = vrot.lane.b32.xlu1 %v249_v33, %s1207_s30  ;;  %v1417_v33 = vor.u32 %v526_v27, %v522_v26  ;;  %v589_v41 = vrot.slane %v330_v36, 4  ;;  %v1005_v14 = vcombine.low %v1308_v28, %v1308_v28  ;;  %v402_v45 = vshrl.u32 %v1002_v30, 16 }
  0x20   : > { %v594_v38 = vrot.slane %v410_v35, 4  ;;  %v406_v46 = vrot.slane %v404_v40, 1  ;;  %v599_v49 = vrot.slane %v490_v5, 4  ;;  %v1011_v50 = vrot.slane %v1361_v60, 5 }
  0x21   : > { %1087 = vmatpush3.bf16.msra.mxu0 %v1192_v52  ;;  %1147 = vmatpush3.bf16.msra.mxu1 %v1192_v52  ;;  %v1428_v43 = vsel %vm605_vm0, %v1298_v20, %v589_v41  ;;  %v999_v52 = vcombine.low %v1390_v18, %v1390_v18  ;;  %v364_v55 = vshll.u32 %v1000_v23, 16  ;;  %v362_v58 = vshrl.u32 %v1000_v23, 16 }
  0x22   : > { %1088 = vmatprep.subr.bf16.mxu0 %v1193_v56  ;;  %1140 = vmatprep.subr.bf16.mxu1 %v1193_v56  ;;  %v1431_v44 = vsel %vm605_vm0, %v370_v25, %v594_v38  ;;  %v1444_v51 = vsel %vm605_vm0, %v450_v34, %v599_v49  ;;  %v1454_v56 = vsel %vm605_vm0, %v530_v53, %v1011_v50 }
  0x23   : > { %328 = vrot.lane.b32.xlu1 %v1342_v47, %s1208_s4  ;;  %247 = vrot.lane.b32.xlu0 %v246_v48, %s1209_s7  ;;  %v1440_v48 = vor.u32 %v406_v46, %v402_v45  ;;  %v366_v59 = vrot.slane %v364_v55, 1 }
  0x25   : > { %1089 = vmatpush3.bf16.msra.mxu0 %v1194_v61  ;;  %1148 = vmatpush3.bf16.msra.mxu1 %v1194_v61  ;;  %v1462_v60 = vor.u32 %v366_v59, %v362_v58 }
  0x26   : > { %1090 = vmatprep.subr.bf16.mxu0 %v1195_v62  ;;  %1141 = vmatprep.subr.bf16.mxu1 %v1195_v62 }
  0x27   : > { %551 = vrot.lane.b32.xlu1 %v530_v53, %s1209_s7  ;;  %285 = vrot.lane.b32.xlu0 %v1359_v57, %s1208_s4 }
  0x29   : > { %1091 = vmatpush3.bf16.msra.mxu0 %v1196_v3  ;;  %1149 = vmatpush3.bf16.msra.mxu1 %v1196_v3 }
  0x2a   : > { %1122 = vmatprep.subr.bf16.mxu1 %v1413_v32 }
  0x2b   : > { %545 = vrot.lane.b32.xlu1 %v1374_v63, %s1209_s7  ;;  %255 = vrot.lane.b32.xlu0 %v993_v0, %s1208_s4 }
  0x2f   : > { %511 = vrot.lane.b32.xlu1 %v490_v5, %s1209_s7  ;;  %556 = vrot.lane.b32.xlu0 %v1009_v4, %s1207_s30 }
  0x33   : > { %568 = vrot.lane.b32.xlu1 %v567_v13, %s1208_s4  ;;  %547 = vrot.lane.b32.xlu0 %v490_v5, %s1207_s30 }
  0x37   : > { %516 = vrot.lane.b32.xlu1 %v1007_v21, %s1207_s30  ;;  %505 = vrot.lane.b32.xlu0 %v1397_v22, %s1209_s7 }
  0x3b   : > { %391 = vrot.lane.b32.xlu1 %v370_v25, %s1209_s7  ;;  %549 = vrot.lane.b32.xlu0 %v1007_v21, %s1208_s4 }
  0x3f   : > { %528 = vrot.lane.b32.xlu1 %v1417_v33, %s1208_s4  ;;  %507 = vrot.lane.b32.xlu0 %v450_v34, %s1207_s30 }
  0x43   : > { %396 = vrot.lane.b32.xlu1 %v1001_v39, %s1207_s30  ;;  %385 = vrot.lane.b32.xlu0 %v1342_v47, %s1209_s7 }
  0x47   : > { %351 = vrot.lane.b32.xlu1 %v330_v36, %s1209_s7  ;;  %509 = vrot.lane.b32.xlu0 %v1005_v14, %s1208_s4 }
  0x4b   : > { %408 = vrot.lane.b32.xlu1 %v1440_v48, %s1208_s4  ;;  %387 = vrot.lane.b32.xlu0 %v330_v36, %s1207_s30 }
  0x4f   : > { %356 = vrot.lane.b32.xlu1 %v999_v52, %s1207_s30  ;;  %345 = vrot.lane.b32.xlu0 %v1359_v57, %s1209_s7 }
  0x53   : > { %347 = vrot.lane.b32.xlu1 %v1298_v20, %s1207_s30  ;;  %389 = vrot.lane.b32.xlu0 %v999_v52, %s1208_s4 }
  0x57   : > { %349 = vrot.lane.b32.xlu1 %v1273_v9, %s1208_s4  ;;  %368 = vrot.lane.b32.xlu0 %v1462_v60, %s1208_s4  ;;  %v1003_v9 = vcombine.low %v1350_v54, %v1350_v54 }
  0x5b   : > { %465 = vrot.lane.b32.xlu1 %v1440_v48, %s1209_s7  ;;  %471 = vrot.lane.b32.xlu0 %v450_v34, %s1209_s7 }
  0x5f   : > { %431 = vrot.lane.b32.xlu1 %v410_v35, %s1209_s7  ;;  %476 = vrot.lane.b32.xlu0 %v1005_v14, %s1207_s30 }
  0x63   : > { %488 = vrot.lane.b32.xlu1 %v1374_v63, %s1208_s4  ;;  %467 = vrot.lane.b32.xlu0 %v410_v35, %s1207_s30 }
  0x67   : > { %436 = vrot.lane.b32.xlu1 %v1003_v9, %s1207_s30  ;;  %425 = vrot.lane.b32.xlu0 %v1462_v60, %s1209_s7  ;;  %s1044_s7 = sshll.u32 %s1591_s13, 5 }
  0x68   : > { %s1577_s10 = scalar_lea.vmem %s1589_s3, %s1044_s7 }
  0x6b   : > { %427 = vrot.lane.b32.xlu1 %v370_v25, %s1207_s30  ;;  %469 = vrot.lane.b32.xlu0 %v1003_v9, %s1208_s4 }
  0x6f   : > { %429 = vrot.lane.b32.xlu1 %v1001_v39, %s1208_s4  ;;  %448 = vrot.lane.b32.xlu0 %v1397_v22, %s1208_s4 }
  0x85   : > { %v317_v20 = vpop.permute.xlu1 %316  ;;  %v310_v42 = vpop.permute.xlu0 %309 }
  0x89   : > { %v312_v53 = vpop.permute.xlu0 %311  ;;  %v274_v61 = vpop.permute.xlu1 %273 }
  0x8a   : > { %v340_v3 = vsel %vm288_vm1, %v1359_v57, %v312_v53 }
  0x8b   : > { %v342_v5 = vsel %vm292_vm2, %v340_v3, %v317_v20 }
  0x8d   : > { %v308_v62 = vpop.permute.xlu0 %307  ;;  %v269_v0 = vpop.permute.xlu1 %268 }
  0x8e   : > { %v300_v11 = vsel %vm288_vm1, %v1321_v37, %v269_v0 }
  0x8f   : > { %v302_v57 = vsel %vm292_vm2, %v300_v11, %v274_v61 }
  0x91   : > { %v306_v1 = vpop.permute.xlu0 %305  ;;  %v251_v2 = vpop.permute.xlu1 %250 }
  0x92   : > { %v333_v4 = vsel %vm288_vm1, %v1279_v12, %v306_v1 }
  0x93   : > { %v335_v15 = vsel %vm292_vm2, %v333_v4, %v308_v62 }
  0x94   : > { %v337_v23 = vsel %vm295_vm3, %v335_v15, %v310_v42 }
  0x95   : > { %v329_v7 = vpop.permute.xlu1 %328  ;;  %v248_v10 = vpop.permute.xlu0 %247  ;;  %v587_v29 = vrot.slane %v337_v23, 4 }
  0x96   : > { %v344_v13 = vsel %vm295_vm3, %v342_v5, %v329_v7  ;;  %v291_v12 = vsel %vm288_vm1, %v1290_v17, %v248_v10 }
  0x97   : > { %v588_v16 = vrot.slane %v344_v13, 4  ;;  %v294_v26 = vsel %vm292_vm2, %v291_v12, %v251_v2 }
  0x99   : > { %v552_v19 = vpop.permute.xlu1 %551  ;;  %v286_v21 = vpop.permute.xlu0 %285 }
  0x9a   : > { %v304_v24 = vsel %vm295_vm3, %v302_v57, %v286_v21  ;;  %v580_v41 = vsel %vm288_vm1, %v1417_v33, %v552_v19 }
  0x9b   : > { %v610_v25 = vsel %vm605_vm0, %v304_v24, %v588_v16 }
  0x9c   : > { %790 = vmatprep.mubr.bf16.mxu0 %v610_v25 }
  0x9d   : > { %v546_v37 = vpop.permute.xlu1 %545  ;;  %v256_v27 = vpop.permute.xlu0 %255 }
  0x9e   : > { %v297_v30 = vsel %vm295_vm3, %v294_v26, %v256_v27  ;;  %v573_v33 = vsel %vm288_vm1, %v1308_v28, %v546_v37  ;;  %v1198_v28 = vld [vmem:[%s1587_s1 + $0x80] sm:$0xff]  }
  0x9f   : > { %v607_v34 = vsel %vm605_vm0, %v297_v30, %v587_v29 }
  0xa0   : > { %791 = vmatmul.mubr.bf16.vlgmr.msra.gmra.mxu0 %v607_v34 }
  0xa1   : > { %v512_v35 = vpop.permute.xlu1 %511  ;;  %v557_v36 = vpop.permute.xlu0 %556 }
  0xa2   : > { %v582_v14 = vsel %vm292_vm2, %v580_v41, %v557_v36  ;;  %v540_v50 = vsel %vm288_vm1, %v1374_v63, %v512_v35 }
  0xa5   : > { %v569_v38 = vpop.permute.xlu1 %568  ;;  %v548_v39 = vpop.permute.xlu0 %547 }
  0xa6   : > { %v584_v49 = vsel %vm295_vm3, %v582_v14, %v569_v38  ;;  %v575_v42 = vsel %vm292_vm2, %v573_v33, %v548_v39 }
  0xa7   : > { %v603_v52 = vrot.slane %v584_v49, 4 }
  0xa9   : > { %v517_v17 = vpop.permute.xlu1 %516  ;;  %v506_v40 = vpop.permute.xlu0 %505 }
  0xaa   : > { %v542_v55 = vsel %vm292_vm2, %v540_v50, %v517_v17  ;;  %v533_v63 = vsel %vm288_vm1, %v1350_v54, %v506_v40 }
  0xad   : > { %v392_v45 = vpop.permute.xlu1 %391  ;;  %v550_v46 = vpop.permute.xlu0 %549 }
  0xae   : > { %v577_v62 = vsel %vm295_vm3, %v575_v42, %v550_v46  ;;  %v420_v13 = vsel %vm288_vm1, %v1462_v60, %v392_v45 }
  0xaf   : > { %v602_v0 = vrot.slane %v577_v62, 4 }
  0xb1   : > { %v529_v58 = vpop.permute.xlu1 %528  ;;  %v508_v59 = vpop.permute.xlu0 %507 }
  0xb2   : > { %v544_v9 = vsel %vm295_vm3, %v542_v55, %v529_v58  ;;  %v535_v1 = vsel %vm292_vm2, %v533_v63, %v508_v59 }
  0xb3   : > { %v637_v20 = vsel %vm605_vm0, %v544_v9, %v603_v52 }
  0xb4   : > { %814 = vmatprep.mubr.bf16.mxu1 %v637_v20 }
  0xb5   : > { %v397_v53 = vpop.permute.xlu1 %396  ;;  %v386_v61 = vpop.permute.xlu0 %385 }
  0xb6   : > { %v413_v15 = vsel %vm288_vm1, %v1265_v6, %v386_v61  ;;  %v422_v16 = vsel %vm292_vm2, %v420_v13, %v397_v53 }
  0xb9   : > { %v352_v2 = vpop.permute.xlu1 %351  ;;  %v510_v3 = vpop.permute.xlu0 %509 }
  0xba   : > { %v537_v4 = vsel %vm295_vm3, %v535_v1, %v510_v3  ;;  %v380_v60 = vsel %vm288_vm1, %v1342_v47, %v352_v2 }
  0xbb   : > { %v634_v5 = vsel %vm605_vm0, %v537_v4, %v602_v0 }
  0xbc   : > { %815 = vmatmul.mubr.bf16.vlgmr.msra.gmra.mxu1 %v634_v5  ;;  %v991_v5 = vld [vmem:[%s1588_s2] ss:$0 sm:$0xff] }
  0xbd   : > { %v409_v7 = vpop.permute.xlu1 %408  ;;  %1123 = vmatpush3.bf16.msra.mxu1 %v1413_v32  ;;  %v388_v10 = vpop.permute.xlu0 %387  ;;  %1126 = vmatprep.mubr.msk.bf16.mxu1 %vm288_vm1, %v1428_v43 }
  0xbe   : > { %1124 = vmatprep.subr.bf16.mxu1 %v1198_v28  ;;  %v415_v32 = vsel %vm292_vm2, %v413_v15, %v388_v10  ;;  %v424_v43 = vsel %vm295_vm3, %v422_v16, %v409_v7 }
  0xc1   : > { %v357_v54 = vpop.permute.xlu1 %356  ;;  %1125 = vmatpush3.bf16.msra.mxu1 %v1198_v28  ;;  %v346_v11 = vpop.permute.xlu0 %345 }
  0xc2   : > { %v373_v6 = vsel %vm288_vm1, %v1269_v8, %v346_v11  ;;  %v382_v23 = vsel %vm292_vm2, %v380_v60, %v357_v54 }
  0xc4   : > { %1127 = vmatmul.mubr.msk.bf16.vlgmr.msra.gmra.mxu1 %vm288_vm1, %v1431_v44  ;;  %v593_v44 = vrot.slane %v424_v43, 4 }
  0xc5   : > { %v348_v19 = vpop.permute.xlu1 %347  ;;  %v390_v57 = vpop.permute.xlu0 %389  ;;  %1130 = vmatprep.mubr.msk.bf16.mxu1 %vm288_vm1, %v1444_v51 }
  0xc6   : > { %v417_v21 = vsel %vm295_vm3, %v415_v32, %v390_v57  ;;  %v375_v12 = vsel %vm292_vm2, %v373_v6, %v348_v19 }
  0xc7   : > { %v592_v24 = vrot.slane %v417_v21, 4 }
  0xc9   : > { %v350_v25 = vpop.permute.xlu1 %349  ;;  %v369_v37 = vpop.permute.xlu0 %368 }
  0xca   : > { %v377_v51 = vsel %vm295_vm3, %v375_v12, %v350_v25  ;;  %v384_v26 = vsel %vm295_vm3, %v382_v23, %v369_v37 }
  0xcb   : > { %v619_v27 = vsel %vm605_vm0, %v384_v26, %v593_v44  ;;  %v616_v29 = vsel %vm605_vm0, %v377_v51, %v592_v24 }
  0xcc   : > { %798 = vmatprep.mubr.bf16.mxu0 %v619_v27  ;;  %1131 = vmatmul.mubr.msk.bf16.gmra.mxu1 %vm288_vm1, %v1454_v56 }
  0xcd   : > { %v466_v8 = vpop.permute.xlu1 %465  ;;  %799 = vmatmul.mubr.bf16.gmra.mxu0 %v616_v29  ;;  %v472_v47 = vpop.permute.xlu0 %471 }
  0xce   : > { %v493_v17 = vsel %vm288_vm1, %v1407_v31, %v466_v8  ;;  %v500_v40 = vsel %vm288_vm1, %v1397_v22, %v472_v47 }
  0xd1   : > { %v432_v30 = vpop.permute.xlu1 %431  ;;  %v477_v34 = vpop.permute.xlu0 %476 }
  0xd2   : > { %v502_v41 = vsel %vm292_vm2, %v500_v40, %v477_v34  ;;  %v460_v50 = vsel %vm288_vm1, %v1440_v48, %v432_v30 }
  0xd5   : > { %v489_v35 = vpop.permute.xlu1 %488  ;;  %v468_v36 = vpop.permute.xlu0 %467 }
  0xd6   : > { %v495_v14 = vsel %vm292_vm2, %v493_v17, %v468_v36  ;;  %v504_v46 = vsel %vm295_vm3, %v502_v41, %v489_v35 }
  0xd7   : > { %v598_v31 = vrot.slane %v504_v46, 4 }
  0xd9   : > { %v437_v38 = vpop.permute.xlu1 %436  ;;  %v426_v39 = vpop.permute.xlu0 %425 }
  0xda   : > { %v453_v52 = vsel %vm288_vm1, %v1390_v18, %v426_v39  ;;  %v462_v55 = vsel %vm292_vm2, %v460_v50, %v437_v38 }
  0xdd   : > { %v428_v56 = vpop.permute.xlu1 %427  ;;  %v470_v45 = vpop.permute.xlu0 %469 }
  0xde   : > { %v497_v49 = vsel %vm295_vm3, %v495_v14, %v470_v45  ;;  %v455_v22 = vsel %vm292_vm2, %v453_v52, %v428_v56 }
  0xdf   : > { %v597_v58 = vrot.slane %v497_v49, 4 }
  0xe1   : > { %v430_v59 = vpop.permute.xlu1 %429  ;;  %v449_v9 = vpop.permute.xlu0 %448 }
  0xe2   : > { %v457_v20 = vsel %vm295_vm3, %v455_v22, %v430_v59  ;;  %v464_v33 = vsel %vm295_vm3, %v462_v55, %v449_v9 }
  0xe3   : > { %v628_v42 = vsel %vm605_vm0, %v464_v33, %v598_v31  ;;  %v625_v53 = vsel %vm605_vm0, %v457_v20, %v597_v58 }
  0xe4   : > { %806 = vmatprep.mubr.bf16.mxu0 %v628_v42 }
  0xe5   : > { %807 = vmatmul.mubr.bf16.gmra.mxu0 %v625_v53 }
 0x160   : > { %v1092_v18 = vpop.f32.mrf.mxu0 }
 0x162   : > { %v1093_v48 = vpop.f32.mrf.mxu0 }
 0x163   : > { %v1094_v4 = vadd.f32 %v1093_v48, %v1092_v18 }
 0x164   : > { %v1095_v62 = vpop.f32.mrf.mxu0 }
 0x165   : > { %v793_v54 = vadd.f32 %v1094_v4, %v991_v5 }
 0x166   : > { %v1096_v1 = vpop.f32.mrf.mxu0 }
 0x167   : > { %v1097_v28 = vadd.f32 %v1096_v1, %v1095_v62 }
 0x169   : > { %v796_v11 = vadd.f32 %v1097_v28, %v991_v5 }
 0x17c   : > { %v1110_v61 = vpop.f32.mrf.mxu1 }
 0x17e   : > { %v1111_v63 = vpop.f32.mrf.mxu1 }
 0x17f   : > { %v1112_v15 = vadd.f32 %v1111_v63, %v1110_v61 }
 0x180   : > { %v1113_v0 = vpop.f32.mrf.mxu1 }
 0x181   : > { %v817_v6 = vadd.f32 %v1112_v15, %v991_v5 }
 0x182   : > { %v1114_v2 = vpop.f32.mrf.mxu1 }
 0x183   : > { %v1115_v16 = vadd.f32 %v1114_v2, %v1113_v0 }
 0x184   : > { %v1128_v3 = vpop.f32.mrf.mxu1 }
 0x185   : > { %v820_v23 = vadd.f32 %v1115_v16, %v991_v5 }
 0x186   : > { %v857_v7 = vpop.f32.mrf.mxu1 }
 0x187   : > { %v858_v32 = vadd.f32 %v857_v7, %v793_v54 }
 0x188   : > { %v1129_v10 = vpop.f32.mrf.mxu1 }
 0x18a   : > { %v860_v13 = vpop.f32.mrf.mxu1 }
 0x18b   : > { %v861_v19 = vadd.f32 %v860_v13, %v796_v11 }
 0x18c   : > { %v1132_v57 = vpop.f32.mrf.mxu1 }
 0x18d   : > { %v1056_v43 = vpack.c.bf16 %v861_v19, %v858_v32  ;;  %v1098_v21 = vpop.f32.mrf.mxu0  ;;  %v882_v25 = vadd.f32 %v1132_v57, %v817_v6 }
 0x18e   : > { %v873_v60 = vpop.f32.mrf.mxu1 }
 0x18f   : > { %1057 = vst [vmem:[%s1577_s10] sm:$0xff] %v1056_v43   ;;  %v1099_v44 = vpop.f32.mrf.mxu0 }
 0x190   : > { %v1100_v12 = vadd.f32 %v1099_v44, %v1098_v21  ;;  %v1133_v24 = vpop.f32.mrf.mxu1 }
 0x191   : > { %v885_v37 = vadd.f32 %v1133_v24, %v820_v23  ;;  %v1101_v51 = vpop.f32.mrf.mxu0 }
 0x192   : > { %v801_v29 = vadd.f32 %v1100_v12, %v991_v5  ;;  %v876_v45 = vpop.f32.mrf.mxu1 }
 0x193   : > { %v1071_v26 = vpack.c.bf16 %v885_v37, %v882_v25  ;;  %v1102_v27 = vpop.f32.mrf.mxu0 }
 0x194   : > { %v1103_v8 = vadd.f32 %v1102_v27, %v1101_v51  ;;  %v866_v30 = vadd.f32 %v1128_v3, %v801_v29 }
 0x195   : > { %1075 = vst [vmem:[%s1577_s10 + $0x18] sm:$0xff] %v1071_v26  }
 0x196   : > { %v804_v47 = vadd.f32 %v1103_v8, %v991_v5 }
 0x198   : > { %v869_v34 = vadd.f32 %v1129_v10, %v804_v47 }
 0x19a   : > { %v1061_v35 = vpack.c.bf16 %v869_v34, %v866_v30 }
 0x19c   : > { %1073 = vst [vmem:[%s1577_s10 + $0x8] sm:$0xff] %v1061_v35  }
 0x1a5   : > { %v1104_v36 = vpop.f32.mrf.mxu0 }
 0x1a7   : > { %v1105_v38 = vpop.f32.mrf.mxu0 }
 0x1a8   : > { %v1106_v39 = vadd.f32 %v1105_v38, %v1104_v36 }
 0x1a9   : > { %v1107_v17 = vpop.f32.mrf.mxu0 }
 0x1aa   : > { %v809_v41 = vadd.f32 %v1106_v39, %v991_v5 }
 0x1ab   : > { %v1108_v40 = vpop.f32.mrf.mxu0 }
 0x1ac   : > { %v1109_v14 = vadd.f32 %v1108_v40, %v1107_v17  ;;  %v874_v46 = vadd.f32 %v873_v60, %v809_v41 }
 0x1ae   : > { %v812_v56 = vadd.f32 %v1109_v14, %v991_v5 }
 0x1b0   : > { %v877_v49 = vadd.f32 %v876_v45, %v812_v56 }
 0x1b2   : > { %v1066_v50 = vpack.c.bf16 %v877_v49, %v874_v46 }
 0x1b4   : > { %1074 = vst [vmem:[%s1577_s10 + $0x10] sm:$0xff] %v1066_v50  }
 0x1b5 PF: > { %s13_s12 = sadd.s32 1, %s1205_s12  }
 0x1b6   : > { %p10_p4 = scmp.ge.s32.totalorder %s13_s12, 4  }
 0x1b8   :  { %12 = sbr.rel (!%p10_p4) target bundleno = 1 (0x1), region = 62 }

</bundles_post_ra>
